<compile_context>
chip_gen: v7x
topology: tpu7x:2x2x1
jax: 0.10.0
libtpu: 0.0.40
codegen_flags: <defaults>
</compile_context>

<pallas_src>
import jax
import jax.numpy as jnp
from jax import lax
from jax.experimental import pallas as pl
from jax.experimental.pallas import tpu as pltpu

HIDDEN = 256       # matches the module's hidden_size = 256
VOCAB = 256        # output_size (small, but a lane-dense multiple of 128)
SEQ_LEN = 12       # decode steps fused into one pallas_call
BATCH = 16         # independent decoder streams (fills MXU sublanes)


def decoder_kernel(tok_ref, h0_ref, emb_ref,
                   w_x_ref, w_h_ref, b_x_ref, b_h_ref,
                   w_out_ref, b_out_ref,
                   logp_ref, h_out_ref,
                   gx_ref, h_all_ref):
    BB, H = h0_ref.shape           # rows per batch block, hidden size
    V = emb_ref.shape[0]           # vocab size
    TBB = gx_ref.shape[0]          # T * BB rows
    T = TBB // BB

    # ---- prologue: embedding + ReLU + input-gate projection, all T*BB rows ---
    # One-hot matmul gather on the MXU (OOB-safe: bad ids give a zero row).
    tok = tok_ref[...].reshape(TBB, 1)                          # (TBB, 1) int32
    one_hot = jnp.where(
        lax.broadcasted_iota(jnp.int32, (TBB, V), 1) == tok, 1.0, 0.0
    ).astype(emb_ref.dtype)                                     # (TBB, V) bf16
    x = jnp.dot(one_hot, emb_ref[...], preferred_element_type=jnp.float32)
    x = jnp.maximum(x, 0.0)                                     # (TBB, H) f32
    gx_ref[...] = jnp.dot(x.astype(w_x_ref.dtype), w_x_ref[...],
                          preferred_element_type=jnp.float32) + b_x_ref[...]

    # Hoisted loop-invariant bias broadcast (JAX does not CSE broadcast_in_dim).
    b_h = jnp.broadcast_to(b_h_ref[...], (BB, 3 * H))           # (BB, 3H) f32

    # ---- serial recurrence: only h @ W_h + gate math on the critical path ----
    # PyTorch GRU gate order (r, z, n); T is small and static -> fully unrolled
    # with constant slice offsets (same effect as fori_loop(unroll=True)).
    h = h0_ref[...]                                             # (BB, H) f32
    for t in range(T):
        gx = gx_ref[pl.ds(t * BB, BB), :]                       # (BB, 3H) f32
        gh = jnp.dot(h.astype(w_h_ref.dtype), w_h_ref[...],
                     preferred_element_type=jnp.float32) + b_h  # (BB, 3H) f32
        r = jax.nn.sigmoid(gx[:, 0:H] + gh[:, 0:H])
        z = jax.nn.sigmoid(gx[:, H:2 * H] + gh[:, H:2 * H])
        n = jnp.tanh(gx[:, 2 * H:3 * H] + r * gh[:, 2 * H:3 * H])
        h = (1.0 - z) * n + z * h                               # (BB, H) f32
        h_all_ref[pl.ds(t * BB, BB), :] = h

    # Final hidden state: one write per batch block.
    h_out_ref[...] = h

    # ---- epilogue: Linear + LogSoftmax for all T*BB rows at once -------------
    logits = jnp.dot(h_all_ref[...].astype(w_out_ref.dtype), w_out_ref[...],
                     preferred_element_type=jnp.float32) + b_out_ref[...]
    m = jnp.max(logits, axis=-1, keepdims=True)
    shifted = logits - m
    lse = jnp.log(jnp.sum(jnp.exp(shifted), axis=-1, keepdims=True))
    logp_ref[...] = (shifted - lse).reshape(1, TBB, V)


def decoder_rnn_decode(tokens, h0, params, *, batch_block=None):
    """Run T teacher-forced DecoderRNN steps in one kernel launch.

    tokens: (T, B) int32 token ids in [0, V)
    h0:     (1, B, H) f32 initial hidden (nn.GRU layout)
    batch_block: rows per grid step; default = B (G=1, best on v5e/v6e).
                 Use B//2 on v7x to put one block on each TensorCore.
    returns (log_probs (T, B, V) f32, hidden (1, B, H) f32)
    """
    T, B = tokens.shape
    H = params["w_h"].shape[0]
    V = params["w_out"].shape[1]
    BB = B if batch_block is None else batch_block
    assert B % BB == 0
    G = B // BB
    TBB = T * BB

    # Row ordering inside a block: row = t*BB + b_local, b_global = g*BB + b_local.
    tok3 = (tokens.astype(jnp.int32)
            .reshape(T, G, BB).transpose(1, 0, 2).reshape(G, TBB, 1))
    h2d = h0.reshape(B, H).astype(jnp.float32)

    def resident(shape):  # full-array block, constant index -> VMEM-resident
        return pl.BlockSpec(shape, lambda g: (0,) * len(shape))

    grid_spec = pltpu.PrefetchScalarGridSpec(
        num_scalar_prefetch=0,
        grid=(G,),
        in_specs=[
            pl.BlockSpec((1, TBB, 1), lambda g: (g, 0, 0)),    # tokens (block g)
            pl.BlockSpec((BB, H), lambda g: (g, 0)),           # h0     (block g)
            resident((V, H)),                                  # embedding
            resident((H, 3 * H)), resident((H, 3 * H)),        # w_x, w_h
            resident((1, 3 * H)), resident((1, 3 * H)),        # b_x, b_h
            resident((H, V)), resident((1, V)),                # w_out, b_out
        ],
        out_specs=[
            pl.BlockSpec((1, TBB, V), lambda g: (g, 0, 0)),    # log-probs
            pl.BlockSpec((BB, H), lambda g: (g, 0)),           # final hidden
        ],
        scratch_shapes=[
            pltpu.VMEM((TBB, 3 * H), jnp.float32),             # GX for all steps
            pltpu.VMEM((TBB, H), jnp.float32),                 # h_t for all steps
        ],
    )

    logp_blk, h_final = pl.pallas_call(
        decoder_kernel,
        out_shape=(jax.ShapeDtypeStruct((G, TBB, V), jnp.float32),
                   jax.ShapeDtypeStruct((B, H), jnp.float32)),
        grid_spec=grid_spec,
        compiler_params=pltpu.CompilerParams(
            dimension_semantics=("parallel",)),
    )(tok3, h2d,
      params["embedding"],
      params["w_x"], params["w_h"], params["b_x"], params["b_h"],
      params["w_out"], params["b_out"])

    # (G, T*BB, V) -> (T, B, V) with b_global = g*BB + b_local.
    logp = (logp_blk.reshape(G, T, BB, V)
            .transpose(1, 0, 2, 3).reshape(T, B, V))
    return logp, h_final.reshape(1, B, H)


def init_params(key, hidden, vocab):
    """Per-gate f32 parameters mirroring nn.Embedding / nn.GRU / nn.Linear."""
    ks = jax.random.split(key, 16)
    s = 0.1
    p = {"embedding": jax.random.normal(ks[0], (vocab, hidden), jnp.float32) * s,
         "w_out": jax.random.normal(ks[1], (hidden, vocab), jnp.float32) * s,
         "b_out": jax.random.normal(ks[2], (1, vocab), jnp.float32) * s}
    for i, nm in enumerate(["w_ir", "w_iz", "w_in", "w_hr", "w_hz", "w_hn"]):
        p[nm] = jax.random.normal(ks[3 + i], (hidden, hidden), jnp.float32) * s
    for i, nm in enumerate(["b_ir", "b_iz", "b_in", "b_hr", "b_hz", "b_hn"]):
        p[nm] = jax.random.normal(ks[9 + i], (1, hidden), jnp.float32) * s
    return p


def prepare_params(p):
    """Fuse per-gate weights into (H,3H)/(1,3H) and cast weights to bfloat16."""
    return {
        "embedding": p["embedding"].astype(jnp.bfloat16),
        "w_x": jnp.concatenate([p["w_ir"], p["w_iz"], p["w_in"]], 1).astype(jnp.bfloat16),
        "w_h": jnp.concatenate([p["w_hr"], p["w_hz"], p["w_hn"]], 1).astype(jnp.bfloat16),
        "b_x": jnp.concatenate([p["b_ir"], p["b_iz"], p["b_in"]], 1).astype(jnp.float32),
        "b_h": jnp.concatenate([p["b_hr"], p["b_hz"], p["b_hn"]], 1).astype(jnp.float32),
        "w_out": p["w_out"].astype(jnp.bfloat16),
        "b_out": p["b_out"].astype(jnp.float32),
    }


def decoder_ref(tokens, h0, fp):
    """Pure-JAX reference with the same bf16-weight / f32-elementwise math."""
    H = fp["w_h"].shape[0]
    emb = fp["embedding"]

    def step(h, tok_t):
        x = jnp.maximum(emb[tok_t].astype(jnp.float32), 0.0)
        gx = jnp.dot(x.astype(jnp.bfloat16), fp["w_x"],
                     preferred_element_type=jnp.float32) + fp["b_x"]
        gh = jnp.dot(h.astype(jnp.bfloat16), fp["w_h"],
                     preferred_element_type=jnp.float32) + fp["b_h"]
        r = jax.nn.sigmoid(gx[:, :H] + gh[:, :H])
        z = jax.nn.sigmoid(gx[:, H:2 * H] + gh[:, H:2 * H])
        n = jnp.tanh(gx[:, 2 * H:] + r * gh[:, 2 * H:])
        h_new = (1.0 - z) * n + z * h
        logits = jnp.dot(h_new.astype(jnp.bfloat16), fp["w_out"],
                         preferred_element_type=jnp.float32) + fp["b_out"]
        return h_new, jax.nn.log_softmax(logits, axis=-1)

    h_final, logp = lax.scan(step, h0.reshape(-1, H).astype(jnp.float32), tokens)
    return logp, h_final.reshape(1, -1, H)


if __name__ == "__main__":
    key = jax.random.PRNGKey(0)
    kp, kh, kt = jax.random.split(key, 3)

    params = prepare_params(init_params(kp, HIDDEN, VOCAB))
    tokens = jax.random.randint(kt, (SEQ_LEN, BATCH), 0, VOCAB, dtype=jnp.int32)
    h0 = jax.random.normal(kh, (1, BATCH, HIDDEN), jnp.float32) * 0.1

    # Default: BB = B = 16, G = 1 (best for single-TensorCore v5e / v6e).
    logp, h_final = decoder_rnn_decode(tokens, h0, params)
    jax.block_until_ready((logp, h_final))

    assert logp.shape == (SEQ_LEN, BATCH, VOCAB)
    assert h_final.shape == (1, BATCH, HIDDEN)

    # Correctness check against a pure-JAX reference of the same math.
    ref_logp, ref_h = decoder_ref(tokens, h0, params)
    assert jnp.allclose(logp, ref_logp, atol=2e-2, rtol=2e-2)
    assert jnp.allclose(h_final, ref_h, atol=2e-2, rtol=2e-2)

    # v7x-style split: two BB=8 batch blocks on the "parallel" grid axis.
    logp2, h2 = decoder_rnn_decode(tokens, h0, params, batch_block=8)
    jax.block_until_ready((logp2, h2))
    assert jnp.allclose(logp2, ref_logp, atol=2e-2, rtol=2e-2)
    assert jnp.allclose(h2, ref_h, atol=2e-2, rtol=2e-2)

    print("KERNEL_OK")
</pallas_src>

<mosaic_0001>
module attributes {stable_mosaic.version = 11 : i64} {
  func.func @decoder_kernel(%arg0: i32, %arg1: memref<1x192x1xi32, #tpu.memory_space<vmem>>, %arg2: memref<16x256xf32, #tpu.memory_space<vmem>>, %arg3: memref<256x256xbf16, #tpu.memory_space<vmem>>, %arg4: memref<256x768xbf16, #tpu.memory_space<vmem>>, %arg5: memref<256x768xbf16, #tpu.memory_space<vmem>>, %arg6: memref<1x768xf32, #tpu.memory_space<vmem>>, %arg7: memref<1x768xf32, #tpu.memory_space<vmem>>, %arg8: memref<256x256xbf16, #tpu.memory_space<vmem>>, %arg9: memref<1x256xf32, #tpu.memory_space<vmem>>, %arg10: memref<1x192x256xf32, #tpu.memory_space<vmem>>, %arg11: memref<16x256xf32, #tpu.memory_space<vmem>>, %arg12: memref<192x768xf32, #tpu.memory_space<vmem>>, %arg13: memref<192x256xf32, #tpu.memory_space<vmem>>) attributes {dimension_semantics = [#tpu.dimension_semantics<parallel>], iteration_bounds = array<i64: 1>, scalar_prefetch = 0 : i64, scratch_operands = 2 : i64, tpu.core_type = #tpu.core_type<tc>, window_params = [{transform_indices = @transform_0, window_bounds = array<i64: 1, 192, 1>}, {transform_indices = @transform_1, window_bounds = array<i64: 16, 256>}, {pipeline_mode = #tpu.pipeline_mode<synchronous>, transform_indices = @transform_2, window_bounds = array<i64: 256, 256>}, {pipeline_mode = #tpu.pipeline_mode<synchronous>, transform_indices = @transform_3, window_bounds = array<i64: 256, 768>}, {pipeline_mode = #tpu.pipeline_mode<synchronous>, transform_indices = @transform_4, window_bounds = array<i64: 256, 768>}, {pipeline_mode = #tpu.pipeline_mode<synchronous>, transform_indices = @transform_5, window_bounds = array<i64: 1, 768>}, {pipeline_mode = #tpu.pipeline_mode<synchronous>, transform_indices = @transform_6, window_bounds = array<i64: 1, 768>}, {pipeline_mode = #tpu.pipeline_mode<synchronous>, transform_indices = @transform_7, window_bounds = array<i64: 256, 256>}, {pipeline_mode = #tpu.pipeline_mode<synchronous>, transform_indices = @transform_8, window_bounds = array<i64: 1, 256>}, {transform_indices = @transform_9, window_bounds = array<i64: 1, 192, 256>}, {transform_indices = @transform_10, window_bounds = array<i64: 16, 256>}]} {
    %c0 = arith.constant 0 : index
    %c0_0 = arith.constant 0 : index
    %c0_1 = arith.constant 0 : index
    %0 = vector.load %arg1[%c0, %c0_0, %c0_1] : memref<1x192x1xi32, #tpu.memory_space<vmem>>, vector<1x192x1xi32>
    %1 = vector.shape_cast %0 : vector<1x192x1xi32> to vector<192x1xi32>
    %2 = tpu.iota {dimensions = array<i32: 1>} : vector<192x256xi32>
    %3 = vector.broadcast %1 : vector<192x1xi32> to vector<192x256xi32>
    %4 = arith.cmpi eq, %2, %3 : vector<192x256xi32>
    %cst = arith.constant 1.000000e+00 : f32
    %cst_2 = arith.constant 0.000000e+00 : f32
    %5 = vector.broadcast %cst : f32 to vector<192x256xf32>
    %6 = vector.broadcast %cst_2 : f32 to vector<192x256xf32>
    %7 = arith.select %4, %5, %6 : vector<192x256xi1>, vector<192x256xf32>
    %8 = arith.truncf %7 : vector<192x256xf32> to vector<192x256xbf16>
    %c0_3 = arith.constant 0 : index
    %c0_4 = arith.constant 0 : index
    %9 = vector.load %arg3[%c0_3, %c0_4] : memref<256x256xbf16, #tpu.memory_space<vmem>>, vector<256x256xbf16>
    %cst_5 = arith.constant dense<0.000000e+00> : vector<192x256xf32>
    %10 = tpu.matmul %8, %9, %cst_5 {dimension_numbers = #tpu.dot_dimension_numbers<[1], [0], [0], [1], [0, 0, 1, 1], [], []>} : vector<192x256xbf16>, vector<256x256xbf16>, vector<192x256xf32> -> vector<192x256xf32>
    %cst_6 = arith.constant 0.000000e+00 : f32
    %11 = vector.broadcast %cst_6 : f32 to vector<192x256xf32>
    %12 = arith.maximumf %10, %11 : vector<192x256xf32>
    %13 = arith.truncf %12 : vector<192x256xf32> to vector<192x256xbf16>
    %c0_7 = arith.constant 0 : index
    %c0_8 = arith.constant 0 : index
    %14 = vector.load %arg4[%c0_7, %c0_8] : memref<256x768xbf16, #tpu.memory_space<vmem>>, vector<256x768xbf16>
    %cst_9 = arith.constant dense<0.000000e+00> : vector<192x768xf32>
    %15 = tpu.matmul %13, %14, %cst_9 {dimension_numbers = #tpu.dot_dimension_numbers<[1], [0], [0], [1], [0, 0, 1, 1], [], []>} : vector<192x256xbf16>, vector<256x768xbf16>, vector<192x768xf32> -> vector<192x768xf32>
    %c0_10 = arith.constant 0 : index
    %c0_11 = arith.constant 0 : index
    %16 = vector.load %arg6[%c0_10, %c0_11] : memref<1x768xf32, #tpu.memory_space<vmem>>, vector<1x768xf32>
    %17 = vector.broadcast %16 : vector<1x768xf32> to vector<192x768xf32>
    %18 = arith.addf %15, %17 : vector<192x768xf32>
    %c0_12 = arith.constant 0 : index
    %c0_13 = arith.constant 0 : index
    %19 = vector.load %arg12[%c0_12, %c0_13] : memref<192x768xf32, #tpu.memory_space<vmem>>, vector<192x768xf32>
    tpu.vector_store %arg12[%c0_12, %c0_13], %18 {strides = array<i32>} : memref<192x768xf32, #tpu.memory_space<vmem>>, vector<192x768xf32>,
    %c0_14 = arith.constant 0 : index
    %c0_15 = arith.constant 0 : index
    %20 = vector.load %arg7[%c0_14, %c0_15] : memref<1x768xf32, #tpu.memory_space<vmem>>, vector<1x768xf32>
    %21 = vector.shape_cast %20 : vector<1x768xf32> to vector<1x768xf32>
    %22 = vector.broadcast %21 : vector<1x768xf32> to vector<16x768xf32>
    %c0_16 = arith.constant 0 : index
    %c0_17 = arith.constant 0 : index
    %23 = vector.load %arg2[%c0_16, %c0_17] : memref<16x256xf32, #tpu.memory_space<vmem>>, vector<16x256xf32>
    %c0_18 = arith.constant 0 : index
    %c0_19 = arith.constant 0 : index
    %24 = vector.load %arg12[%c0_18, %c0_19] : memref<192x768xf32, #tpu.memory_space<vmem>>, vector<16x768xf32>
    %25 = arith.truncf %23 : vector<16x256xf32> to vector<16x256xbf16>
    %c0_20 = arith.constant 0 : index
    %c0_21 = arith.constant 0 : index
    %26 = vector.load %arg5[%c0_20, %c0_21] : memref<256x768xbf16, #tpu.memory_space<vmem>>, vector<256x768xbf16>
    %cst_22 = arith.constant dense<0.000000e+00> : vector<16x768xf32>
    %27 = tpu.matmul %25, %26, %cst_22 {dimension_numbers = #tpu.dot_dimension_numbers<[1], [0], [0], [1], [0, 0, 1, 1], [], []>} : vector<16x256xbf16>, vector<256x768xbf16>, vector<16x768xf32> -> vector<16x768xf32>
    %28 = arith.addf %27, %22 : vector<16x768xf32>
    %29 = vector.extract_strided_slice %24 {offsets = [0, 0], sizes = [16, 256], strides = [1, 1]} : vector<16x768xf32> to vector<16x256xf32>
    %30 = vector.extract_strided_slice %28 {offsets = [0, 0], sizes = [16, 256], strides = [1, 1]} : vector<16x768xf32> to vector<16x256xf32>
    %31 = arith.addf %29, %30 : vector<16x256xf32>
    %32 = arith.negf %31 : vector<16x256xf32>
    %33 = math.exp %32 : vector<16x256xf32>
    %cst_23 = arith.constant 1.000000e+00 : f32
    %34 = vector.broadcast %cst_23 : f32 to vector<16x256xf32>
    %35 = arith.addf %34, %33 : vector<16x256xf32>
    %36 = arith.divf %34, %35 : vector<16x256xf32>
    %37 = vector.extract_strided_slice %24 {offsets = [0, 256], sizes = [16, 256], strides = [1, 1]} : vector<16x768xf32> to vector<16x256xf32>
    %38 = vector.extract_strided_slice %28 {offsets = [0, 256], sizes = [16, 256], strides = [1, 1]} : vector<16x768xf32> to vector<16x256xf32>
    %39 = arith.addf %37, %38 : vector<16x256xf32>
    %40 = arith.negf %39 : vector<16x256xf32>
    %41 = math.exp %40 : vector<16x256xf32>
    %cst_24 = arith.constant 1.000000e+00 : f32
    %42 = vector.broadcast %cst_24 : f32 to vector<16x256xf32>
    %43 = arith.addf %42, %41 : vector<16x256xf32>
    %44 = arith.divf %42, %43 : vector<16x256xf32>
    %45 = vector.extract_strided_slice %24 {offsets = [0, 512], sizes = [16, 256], strides = [1, 1]} : vector<16x768xf32> to vector<16x256xf32>
    %46 = vector.extract_strided_slice %28 {offsets = [0, 512], sizes = [16, 256], strides = [1, 1]} : vector<16x768xf32> to vector<16x256xf32>
    %47 = arith.mulf %36, %46 : vector<16x256xf32>
    %48 = arith.addf %45, %47 : vector<16x256xf32>
    %49 = math.tanh %48 : vector<16x256xf32>
    %cst_25 = arith.constant 1.000000e+00 : f32
    %50 = vector.broadcast %cst_25 : f32 to vector<16x256xf32>
    %51 = arith.subf %50, %44 : vector<16x256xf32>
    %52 = arith.mulf %51, %49 : vector<16x256xf32>
    %53 = arith.mulf %44, %23 : vector<16x256xf32>
    %54 = arith.addf %52, %53 : vector<16x256xf32>
    %c0_26 = arith.constant 0 : index
    %c0_27 = arith.constant 0 : index
    %55 = vector.load %arg13[%c0_26, %c0_27] : memref<192x256xf32, #tpu.memory_space<vmem>>, vector<16x256xf32>
    tpu.vector_store %arg13[%c0_26, %c0_27], %54 {strides = array<i32>} : memref<192x256xf32, #tpu.memory_space<vmem>>, vector<16x256xf32>,
    %c16 = arith.constant 16 : index
    %c0_28 = arith.constant 0 : index
    %56 = vector.load %arg12[%c16, %c0_28] : memref<192x768xf32, #tpu.memory_space<vmem>>, vector<16x768xf32>
    %57 = arith.truncf %54 : vector<16x256xf32> to vector<16x256xbf16>
    %c0_29 = arith.constant 0 : index
    %c0_30 = arith.constant 0 : index
    %58 = vector.load %arg5[%c0_29, %c0_30] : memref<256x768xbf16, #tpu.memory_space<vmem>>, vector<256x768xbf16>
    %cst_31 = arith.constant dense<0.000000e+00> : vector<16x768xf32>
    %59 = tpu.matmul %57, %58, %cst_31 {dimension_numbers = #tpu.dot_dimension_numbers<[1], [0], [0], [1], [0, 0, 1, 1], [], []>} : vector<16x256xbf16>, vector<256x768xbf16>, vector<16x768xf32> -> vector<16x768xf32>
    %60 = arith.addf %59, %22 : vector<16x768xf32>
    %61 = vector.extract_strided_slice %56 {offsets = [0, 0], sizes = [16, 256], strides = [1, 1]} : vector<16x768xf32> to vector<16x256xf32>
    %62 = vector.extract_strided_slice %60 {offsets = [0, 0], sizes = [16, 256], strides = [1, 1]} : vector<16x768xf32> to vector<16x256xf32>
    %63 = arith.addf %61, %62 : vector<16x256xf32>
    %64 = arith.negf %63 : vector<16x256xf32>
    %65 = math.exp %64 : vector<16x256xf32>
    %cst_32 = arith.constant 1.000000e+00 : f32
    %66 = vector.broadcast %cst_32 : f32 to vector<16x256xf32>
    %67 = arith.addf %66, %65 : vector<16x256xf32>
    %68 = arith.divf %66, %67 : vector<16x256xf32>
    %69 = vector.extract_strided_slice %56 {offsets = [0, 256], sizes = [16, 256], strides = [1, 1]} : vector<16x768xf32> to vector<16x256xf32>
    %70 = vector.extract_strided_slice %60 {offsets = [0, 256], sizes = [16, 256], strides = [1, 1]} : vector<16x768xf32> to vector<16x256xf32>
    %71 = arith.addf %69, %70 : vector<16x256xf32>
    %72 = arith.negf %71 : vector<16x256xf32>
    %73 = math.exp %72 : vector<16x256xf32>
    %cst_33 = arith.constant 1.000000e+00 : f32
    %74 = vector.broadcast %cst_33 : f32 to vector<16x256xf32>
    %75 = arith.addf %74, %73 : vector<16x256xf32>
    %76 = arith.divf %74, %75 : vector<16x256xf32>
    %77 = vector.extract_strided_slice %56 {offsets = [0, 512], sizes = [16, 256], strides = [1, 1]} : vector<16x768xf32> to vector<16x256xf32>
    %78 = vector.extract_strided_slice %60 {offsets = [0, 512], sizes = [16, 256], strides = [1, 1]} : vector<16x768xf32> to vector<16x256xf32>
    %79 = arith.mulf %68, %78 : vector<16x256xf32>
    %80 = arith.addf %77, %79 : vector<16x256xf32>
    %81 = math.tanh %80 : vector<16x256xf32>
    %cst_34 = arith.constant 1.000000e+00 : f32
    %82 = vector.broadcast %cst_34 : f32 to vector<16x256xf32>
    %83 = arith.subf %82, %76 : vector<16x256xf32>
    %84 = arith.mulf %83, %81 : vector<16x256xf32>
    %85 = arith.mulf %76, %54 : vector<16x256xf32>
    %86 = arith.addf %84, %85 : vector<16x256xf32>
    %c16_35 = arith.constant 16 : index
    %c0_36 = arith.constant 0 : index
    %87 = vector.load %arg13[%c16_35, %c0_36] : memref<192x256xf32, #tpu.memory_space<vmem>>, vector<16x256xf32>
    tpu.vector_store %arg13[%c16_35, %c0_36], %86 {strides = array<i32>} : memref<192x256xf32, #tpu.memory_space<vmem>>, vector<16x256xf32>,
    %c32 = arith.constant 32 : index
    %c0_37 = arith.constant 0 : index
    %88 = vector.load %arg12[%c32, %c0_37] : memref<192x768xf32, #tpu.memory_space<vmem>>, vector<16x768xf32>
    %89 = arith.truncf %86 : vector<16x256xf32> to vector<16x256xbf16>
    %c0_38 = arith.constant 0 : index
    %c0_39 = arith.constant 0 : index
    %90 = vector.load %arg5[%c0_38, %c0_39] : memref<256x768xbf16, #tpu.memory_space<vmem>>, vector<256x768xbf16>
    %cst_40 = arith.constant dense<0.000000e+00> : vector<16x768xf32>
    %91 = tpu.matmul %89, %90, %cst_40 {dimension_numbers = #tpu.dot_dimension_numbers<[1], [0], [0], [1], [0, 0, 1, 1], [], []>} : vector<16x256xbf16>, vector<256x768xbf16>, vector<16x768xf32> -> vector<16x768xf32>
    %92 = arith.addf %91, %22 : vector<16x768xf32>
    %93 = vector.extract_strided_slice %88 {offsets = [0, 0], sizes = [16, 256], strides = [1, 1]} : vector<16x768xf32> to vector<16x256xf32>
    %94 = vector.extract_strided_slice %92 {offsets = [0, 0], sizes = [16, 256], strides = [1, 1]} : vector<16x768xf32> to vector<16x256xf32>
    %95 = arith.addf %93, %94 : vector<16x256xf32>
    %96 = arith.negf %95 : vector<16x256xf32>
    %97 = math.exp %96 : vector<16x256xf32>
    %cst_41 = arith.constant 1.000000e+00 : f32
    %98 = vector.broadcast %cst_41 : f32 to vector<16x256xf32>
    %99 = arith.addf %98, %97 : vector<16x256xf32>
    %100 = arith.divf %98, %99 : vector<16x256xf32>
    %101 = vector.extract_strided_slice %88 {offsets = [0, 256], sizes = [16, 256], strides = [1, 1]} : vector<16x768xf32> to vector<16x256xf32>
    %102 = vector.extract_strided_slice %92 {offsets = [0, 256], sizes = [16, 256], strides = [1, 1]} : vector<16x768xf32> to vector<16x256xf32>
    %103 = arith.addf %101, %102 : vector<16x256xf32>
    %104 = arith.negf %103 : vector<16x256xf32>
    %105 = math.exp %104 : vector<16x256xf32>
    %cst_42 = arith.constant 1.000000e+00 : f32
    %106 = vector.broadcast %cst_42 : f32 to vector<16x256xf32>
    %107 = arith.addf %106, %105 : vector<16x256xf32>
    %108 = arith.divf %106, %107 : vector<16x256xf32>
    %109 = vector.extract_strided_slice %88 {offsets = [0, 512], sizes = [16, 256], strides = [1, 1]} : vector<16x768xf32> to vector<16x256xf32>
    %110 = vector.extract_strided_slice %92 {offsets = [0, 512], sizes = [16, 256], strides = [1, 1]} : vector<16x768xf32> to vector<16x256xf32>
    %111 = arith.mulf %100, %110 : vector<16x256xf32>
    %112 = arith.addf %109, %111 : vector<16x256xf32>
    %113 = math.tanh %112 : vector<16x256xf32>
    %cst_43 = arith.constant 1.000000e+00 : f32
    %114 = vector.broadcast %cst_43 : f32 to vector<16x256xf32>
    %115 = arith.subf %114, %108 : vector<16x256xf32>
    %116 = arith.mulf %115, %113 : vector<16x256xf32>
    %117 = arith.mulf %108, %86 : vector<16x256xf32>
    %118 = arith.addf %116, %117 : vector<16x256xf32>
    %c32_44 = arith.constant 32 : index
    %c0_45 = arith.constant 0 : index
    %119 = vector.load %arg13[%c32_44, %c0_45] : memref<192x256xf32, #tpu.memory_space<vmem>>, vector<16x256xf32>
    tpu.vector_store %arg13[%c32_44, %c0_45], %118 {strides = array<i32>} : memref<192x256xf32, #tpu.memory_space<vmem>>, vector<16x256xf32>,
    %c48 = arith.constant 48 : index
    %c0_46 = arith.constant 0 : index
    %120 = vector.load %arg12[%c48, %c0_46] : memref<192x768xf32, #tpu.memory_space<vmem>>, vector<16x768xf32>
    %121 = arith.truncf %118 : vector<16x256xf32> to vector<16x256xbf16>
    %c0_47 = arith.constant 0 : index
    %c0_48 = arith.constant 0 : index
    %122 = vector.load %arg5[%c0_47, %c0_48] : memref<256x768xbf16, #tpu.memory_space<vmem>>, vector<256x768xbf16>
    %cst_49 = arith.constant dense<0.000000e+00> : vector<16x768xf32>
    %123 = tpu.matmul %121, %122, %cst_49 {dimension_numbers = #tpu.dot_dimension_numbers<[1], [0], [0], [1], [0, 0, 1, 1], [], []>} : vector<16x256xbf16>, vector<256x768xbf16>, vector<16x768xf32> -> vector<16x768xf32>
    %124 = arith.addf %123, %22 : vector<16x768xf32>
    %125 = vector.extract_strided_slice %120 {offsets = [0, 0], sizes = [16, 256], strides = [1, 1]} : vector<16x768xf32> to vector<16x256xf32>
    %126 = vector.extract_strided_slice %124 {offsets = [0, 0], sizes = [16, 256], strides = [1, 1]} : vector<16x768xf32> to vector<16x256xf32>
    %127 = arith.addf %125, %126 : vector<16x256xf32>
    %128 = arith.negf %127 : vector<16x256xf32>
    %129 = math.exp %128 : vector<16x256xf32>
    %cst_50 = arith.constant 1.000000e+00 : f32
    %130 = vector.broadcast %cst_50 : f32 to vector<16x256xf32>
    %131 = arith.addf %130, %129 : vector<16x256xf32>
    %132 = arith.divf %130, %131 : vector<16x256xf32>
    %133 = vector.extract_strided_slice %120 {offsets = [0, 256], sizes = [16, 256], strides = [1, 1]} : vector<16x768xf32> to vector<16x256xf32>
    %134 = vector.extract_strided_slice %124 {offsets = [0, 256], sizes = [16, 256], strides = [1, 1]} : vector<16x768xf32> to vector<16x256xf32>
    %135 = arith.addf %133, %134 : vector<16x256xf32>
    %136 = arith.negf %135 : vector<16x256xf32>
    %137 = math.exp %136 : vector<16x256xf32>
    %cst_51 = arith.constant 1.000000e+00 : f32
    %138 = vector.broadcast %cst_51 : f32 to vector<16x256xf32>
    %139 = arith.addf %138, %137 : vector<16x256xf32>
    %140 = arith.divf %138, %139 : vector<16x256xf32>
    %141 = vector.extract_strided_slice %120 {offsets = [0, 512], sizes = [16, 256], strides = [1, 1]} : vector<16x768xf32> to vector<16x256xf32>
    %142 = vector.extract_strided_slice %124 {offsets = [0, 512], sizes = [16, 256], strides = [1, 1]} : vector<16x768xf32> to vector<16x256xf32>
    %143 = arith.mulf %132, %142 : vector<16x256xf32>
    %144 = arith.addf %141, %143 : vector<16x256xf32>
    %145 = math.tanh %144 : vector<16x256xf32>
    %cst_52 = arith.constant 1.000000e+00 : f32
    %146 = vector.broadcast %cst_52 : f32 to vector<16x256xf32>
    %147 = arith.subf %146, %140 : vector<16x256xf32>
    %148 = arith.mulf %147, %145 : vector<16x256xf32>
    %149 = arith.mulf %140, %118 : vector<16x256xf32>
    %150 = arith.addf %148, %149 : vector<16x256xf32>
    %c48_53 = arith.constant 48 : index
    %c0_54 = arith.constant 0 : index
    %151 = vector.load %arg13[%c48_53, %c0_54] : memref<192x256xf32, #tpu.memory_space<vmem>>, vector<16x256xf32>
    tpu.vector_store %arg13[%c48_53, %c0_54], %150 {strides = array<i32>} : memref<192x256xf32, #tpu.memory_space<vmem>>, vector<16x256xf32>,
    %c64 = arith.constant 64 : index
    %c0_55 = arith.constant 0 : index
    %152 = vector.load %arg12[%c64, %c0_55] : memref<192x768xf32, #tpu.memory_space<vmem>>, vector<16x768xf32>
    %153 = arith.truncf %150 : vector<16x256xf32> to vector<16x256xbf16>
    %c0_56 = arith.constant 0 : index
    %c0_57 = arith.constant 0 : index
    %154 = vector.load %arg5[%c0_56, %c0_57] : memref<256x768xbf16, #tpu.memory_space<vmem>>, vector<256x768xbf16>
    %cst_58 = arith.constant dense<0.000000e+00> : vector<16x768xf32>
    %155 = tpu.matmul %153, %154, %cst_58 {dimension_numbers = #tpu.dot_dimension_numbers<[1], [0], [0], [1], [0, 0, 1, 1], [], []>} : vector<16x256xbf16>, vector<256x768xbf16>, vector<16x768xf32> -> vector<16x768xf32>
    %156 = arith.addf %155, %22 : vector<16x768xf32>
    %157 = vector.extract_strided_slice %152 {offsets = [0, 0], sizes = [16, 256], strides = [1, 1]} : vector<16x768xf32> to vector<16x256xf32>
    %158 = vector.extract_strided_slice %156 {offsets = [0, 0], sizes = [16, 256], strides = [1, 1]} : vector<16x768xf32> to vector<16x256xf32>
    %159 = arith.addf %157, %158 : vector<16x256xf32>
    %160 = arith.negf %159 : vector<16x256xf32>
    %161 = math.exp %160 : vector<16x256xf32>
    %cst_59 = arith.constant 1.000000e+00 : f32
    %162 = vector.broadcast %cst_59 : f32 to vector<16x256xf32>
    %163 = arith.addf %162, %161 : vector<16x256xf32>
    %164 = arith.divf %162, %163 : vector<16x256xf32>
    %165 = vector.extract_strided_slice %152 {offsets = [0, 256], sizes = [16, 256], strides = [1, 1]} : vector<16x768xf32> to vector<16x256xf32>
    %166 = vector.extract_strided_slice %156 {offsets = [0, 256], sizes = [16, 256], strides = [1, 1]} : vector<16x768xf32> to vector<16x256xf32>
    %167 = arith.addf %165, %166 : vector<16x256xf32>
    %168 = arith.negf %167 : vector<16x256xf32>
    %169 = math.exp %168 : vector<16x256xf32>
    %cst_60 = arith.constant 1.000000e+00 : f32
    %170 = vector.broadcast %cst_60 : f32 to vector<16x256xf32>
    %171 = arith.addf %170, %169 : vector<16x256xf32>
    %172 = arith.divf %170, %171 : vector<16x256xf32>
    %173 = vector.extract_strided_slice %152 {offsets = [0, 512], sizes = [16, 256], strides = [1, 1]} : vector<16x768xf32> to vector<16x256xf32>
    %174 = vector.extract_strided_slice %156 {offsets = [0, 512], sizes = [16, 256], strides = [1, 1]} : vector<16x768xf32> to vector<16x256xf32>
    %175 = arith.mulf %164, %174 : vector<16x256xf32>
    %176 = arith.addf %173, %175 : vector<16x256xf32>
    %177 = math.tanh %176 : vector<16x256xf32>
    %cst_61 = arith.constant 1.000000e+00 : f32
    %178 = vector.broadcast %cst_61 : f32 to vector<16x256xf32>
    %179 = arith.subf %178, %172 : vector<16x256xf32>
    %180 = arith.mulf %179, %177 : vector<16x256xf32>
    %181 = arith.mulf %172, %150 : vector<16x256xf32>
    %182 = arith.addf %180, %181 : vector<16x256xf32>
    %c64_62 = arith.constant 64 : index
    %c0_63 = arith.constant 0 : index
    %183 = vector.load %arg13[%c64_62, %c0_63] : memref<192x256xf32, #tpu.memory_space<vmem>>, vector<16x256xf32>
    tpu.vector_store %arg13[%c64_62, %c0_63], %182 {strides = array<i32>} : memref<192x256xf32, #tpu.memory_space<vmem>>, vector<16x256xf32>,
    %c80 = arith.constant 80 : index
    %c0_64 = arith.constant 0 : index
    %184 = vector.load %arg12[%c80, %c0_64] : memref<192x768xf32, #tpu.memory_space<vmem>>, vector<16x768xf32>
    %185 = arith.truncf %182 : vector<16x256xf32> to vector<16x256xbf16>
    %c0_65 = arith.constant 0 : index
    %c0_66 = arith.constant 0 : index
    %186 = vector.load %arg5[%c0_65, %c0_66] : memref<256x768xbf16, #tpu.memory_space<vmem>>, vector<256x768xbf16>
    %cst_67 = arith.constant dense<0.000000e+00> : vector<16x768xf32>
    %187 = tpu.matmul %185, %186, %cst_67 {dimension_numbers = #tpu.dot_dimension_numbers<[1], [0], [0], [1], [0, 0, 1, 1], [], []>} : vector<16x256xbf16>, vector<256x768xbf16>, vector<16x768xf32> -> vector<16x768xf32>
    %188 = arith.addf %187, %22 : vector<16x768xf32>
    %189 = vector.extract_strided_slice %184 {offsets = [0, 0], sizes = [16, 256], strides = [1, 1]} : vector<16x768xf32> to vector<16x256xf32>
    %190 = vector.extract_strided_slice %188 {offsets = [0, 0], sizes = [16, 256], strides = [1, 1]} : vector<16x768xf32> to vector<16x256xf32>
    %191 = arith.addf %189, %190 : vector<16x256xf32>
    %192 = arith.negf %191 : vector<16x256xf32>
    %193 = math.exp %192 : vector<16x256xf32>
    %cst_68 = arith.constant 1.000000e+00 : f32
    %194 = vector.broadcast %cst_68 : f32 to vector<16x256xf32>
    %195 = arith.addf %194, %193 : vector<16x256xf32>
    %196 = arith.divf %194, %195 : vector<16x256xf32>
    %197 = vector.extract_strided_slice %184 {offsets = [0, 256], sizes = [16, 256], strides = [1, 1]} : vector<16x768xf32> to vector<16x256xf32>
    %198 = vector.extract_strided_slice %188 {offsets = [0, 256], sizes = [16, 256], strides = [1, 1]} : vector<16x768xf32> to vector<16x256xf32>
    %199 = arith.addf %197, %198 : vector<16x256xf32>
    %200 = arith.negf %199 : vector<16x256xf32>
    %201 = math.exp %200 : vector<16x256xf32>
    %cst_69 = arith.constant 1.000000e+00 : f32
    %202 = vector.broadcast %cst_69 : f32 to vector<16x256xf32>
    %203 = arith.addf %202, %201 : vector<16x256xf32>
    %204 = arith.divf %202, %203 : vector<16x256xf32>
    %205 = vector.extract_strided_slice %184 {offsets = [0, 512], sizes = [16, 256], strides = [1, 1]} : vector<16x768xf32> to vector<16x256xf32>
    %206 = vector.extract_strided_slice %188 {offsets = [0, 512], sizes = [16, 256], strides = [1, 1]} : vector<16x768xf32> to vector<16x256xf32>
    %207 = arith.mulf %196, %206 : vector<16x256xf32>
    %208 = arith.addf %205, %207 : vector<16x256xf32>
    %209 = math.tanh %208 : vector<16x256xf32>
    %cst_70 = arith.constant 1.000000e+00 : f32
    %210 = vector.broadcast %cst_70 : f32 to vector<16x256xf32>
    %211 = arith.subf %210, %204 : vector<16x256xf32>
    %212 = arith.mulf %211, %209 : vector<16x256xf32>
    %213 = arith.mulf %204, %182 : vector<16x256xf32>
    %214 = arith.addf %212, %213 : vector<16x256xf32>
    %c80_71 = arith.constant 80 : index
    %c0_72 = arith.constant 0 : index
    %215 = vector.load %arg13[%c80_71, %c0_72] : memref<192x256xf32, #tpu.memory_space<vmem>>, vector<16x256xf32>
    tpu.vector_store %arg13[%c80_71, %c0_72], %214 {strides = array<i32>} : memref<192x256xf32, #tpu.memory_space<vmem>>, vector<16x256xf32>,
    %c96 = arith.constant 96 : index
    %c0_73 = arith.constant 0 : index
    %216 = vector.load %arg12[%c96, %c0_73] : memref<192x768xf32, #tpu.memory_space<vmem>>, vector<16x768xf32>
    %217 = arith.truncf %214 : vector<16x256xf32> to vector<16x256xbf16>
    %c0_74 = arith.constant 0 : index
    %c0_75 = arith.constant 0 : index
    %218 = vector.load %arg5[%c0_74, %c0_75] : memref<256x768xbf16, #tpu.memory_space<vmem>>, vector<256x768xbf16>
    %cst_76 = arith.constant dense<0.000000e+00> : vector<16x768xf32>
    %219 = tpu.matmul %217, %218, %cst_76 {dimension_numbers = #tpu.dot_dimension_numbers<[1], [0], [0], [1], [0, 0, 1, 1], [], []>} : vector<16x256xbf16>, vector<256x768xbf16>, vector<16x768xf32> -> vector<16x768xf32>
    %220 = arith.addf %219, %22 : vector<16x768xf32>
    %221 = vector.extract_strided_slice %216 {offsets = [0, 0], sizes = [16, 256], strides = [1, 1]} : vector<16x768xf32> to vector<16x256xf32>
    %222 = vector.extract_strided_slice %220 {offsets = [0, 0], sizes = [16, 256], strides = [1, 1]} : vector<16x768xf32> to vector<16x256xf32>
    %223 = arith.addf %221, %222 : vector<16x256xf32>
    %224 = arith.negf %223 : vector<16x256xf32>
    %225 = math.exp %224 : vector<16x256xf32>
    %cst_77 = arith.constant 1.000000e+00 : f32
    %226 = vector.broadcast %cst_77 : f32 to vector<16x256xf32>
    %227 = arith.addf %226, %225 : vector<16x256xf32>
    %228 = arith.divf %226, %227 : vector<16x256xf32>
    %229 = vector.extract_strided_slice %216 {offsets = [0, 256], sizes = [16, 256], strides = [1, 1]} : vector<16x768xf32> to vector<16x256xf32>
    %230 = vector.extract_strided_slice %220 {offsets = [0, 256], sizes = [16, 256], strides = [1, 1]} : vector<16x768xf32> to vector<16x256xf32>
    %231 = arith.addf %229, %230 : vector<16x256xf32>
    %232 = arith.negf %231 : vector<16x256xf32>
    %233 = math.exp %232 : vector<16x256xf32>
    %cst_78 = arith.constant 1.000000e+00 : f32
    %234 = vector.broadcast %cst_78 : f32 to vector<16x256xf32>
    %235 = arith.addf %234, %233 : vector<16x256xf32>
    %236 = arith.divf %234, %235 : vector<16x256xf32>
    %237 = vector.extract_strided_slice %216 {offsets = [0, 512], sizes = [16, 256], strides = [1, 1]} : vector<16x768xf32> to vector<16x256xf32>
    %238 = vector.extract_strided_slice %220 {offsets = [0, 512], sizes = [16, 256], strides = [1, 1]} : vector<16x768xf32> to vector<16x256xf32>
    %239 = arith.mulf %228, %238 : vector<16x256xf32>
    %240 = arith.addf %237, %239 : vector<16x256xf32>
    %241 = math.tanh %240 : vector<16x256xf32>
    %cst_79 = arith.constant 1.000000e+00 : f32
    %242 = vector.broadcast %cst_79 : f32 to vector<16x256xf32>
    %243 = arith.subf %242, %236 : vector<16x256xf32>
    %244 = arith.mulf %243, %241 : vector<16x256xf32>
    %245 = arith.mulf %236, %214 : vector<16x256xf32>
    %246 = arith.addf %244, %245 : vector<16x256xf32>
    %c96_80 = arith.constant 96 : index
    %c0_81 = arith.constant 0 : index
    %247 = vector.load %arg13[%c96_80, %c0_81] : memref<192x256xf32, #tpu.memory_space<vmem>>, vector<16x256xf32>
    tpu.vector_store %arg13[%c96_80, %c0_81], %246 {strides = array<i32>} : memref<192x256xf32, #tpu.memory_space<vmem>>, vector<16x256xf32>,
    %c112 = arith.constant 112 : index
    %c0_82 = arith.constant 0 : index
    %248 = vector.load %arg12[%c112, %c0_82] : memref<192x768xf32, #tpu.memory_space<vmem>>, vector<16x768xf32>
    %249 = arith.truncf %246 : vector<16x256xf32> to vector<16x256xbf16>
    %c0_83 = arith.constant 0 : index
    %c0_84 = arith.constant 0 : index
    %250 = vector.load %arg5[%c0_83, %c0_84] : memref<256x768xbf16, #tpu.memory_space<vmem>>, vector<256x768xbf16>
    %cst_85 = arith.constant dense<0.000000e+00> : vector<16x768xf32>
    %251 = tpu.matmul %249, %250, %cst_85 {dimension_numbers = #tpu.dot_dimension_numbers<[1], [0], [0], [1], [0, 0, 1, 1], [], []>} : vector<16x256xbf16>, vector<256x768xbf16>, vector<16x768xf32> -> vector<16x768xf32>
    %252 = arith.addf %251, %22 : vector<16x768xf32>
    %253 = vector.extract_strided_slice %248 {offsets = [0, 0], sizes = [16, 256], strides = [1, 1]} : vector<16x768xf32> to vector<16x256xf32>
    %254 = vector.extract_strided_slice %252 {offsets = [0, 0], sizes = [16, 256], strides = [1, 1]} : vector<16x768xf32> to vector<16x256xf32>
    %255 = arith.addf %253, %254 : vector<16x256xf32>
    %256 = arith.negf %255 : vector<16x256xf32>
    %257 = math.exp %256 : vector<16x256xf32>
    %cst_86 = arith.constant 1.000000e+00 : f32
    %258 = vector.broadcast %cst_86 : f32 to vector<16x256xf32>
    %259 = arith.addf %258, %257 : vector<16x256xf32>
    %260 = arith.divf %258, %259 : vector<16x256xf32>
    %261 = vector.extract_strided_slice %248 {offsets = [0, 256], sizes = [16, 256], strides = [1, 1]} : vector<16x768xf32> to vector<16x256xf32>
    %262 = vector.extract_strided_slice %252 {offsets = [0, 256], sizes = [16, 256], strides = [1, 1]} : vector<16x768xf32> to vector<16x256xf32>
    %263 = arith.addf %261, %262 : vector<16x256xf32>
    %264 = arith.negf %263 : vector<16x256xf32>
    %265 = math.exp %264 : vector<16x256xf32>
    %cst_87 = arith.constant 1.000000e+00 : f32
    %266 = vector.broadcast %cst_87 : f32 to vector<16x256xf32>
    %267 = arith.addf %266, %265 : vector<16x256xf32>
    %268 = arith.divf %266, %267 : vector<16x256xf32>
    %269 = vector.extract_strided_slice %248 {offsets = [0, 512], sizes = [16, 256], strides = [1, 1]} : vector<16x768xf32> to vector<16x256xf32>
    %270 = vector.extract_strided_slice %252 {offsets = [0, 512], sizes = [16, 256], strides = [1, 1]} : vector<16x768xf32> to vector<16x256xf32>
    %271 = arith.mulf %260, %270 : vector<16x256xf32>
    %272 = arith.addf %269, %271 : vector<16x256xf32>
    %273 = math.tanh %272 : vector<16x256xf32>
    %cst_88 = arith.constant 1.000000e+00 : f32
    %274 = vector.broadcast %cst_88 : f32 to vector<16x256xf32>
    %275 = arith.subf %274, %268 : vector<16x256xf32>
    %276 = arith.mulf %275, %273 : vector<16x256xf32>
    %277 = arith.mulf %268, %246 : vector<16x256xf32>
    %278 = arith.addf %276, %277 : vector<16x256xf32>
    %c112_89 = arith.constant 112 : index
    %c0_90 = arith.constant 0 : index
    %279 = vector.load %arg13[%c112_89, %c0_90] : memref<192x256xf32, #tpu.memory_space<vmem>>, vector<16x256xf32>
    tpu.vector_store %arg13[%c112_89, %c0_90], %278 {strides = array<i32>} : memref<192x256xf32, #tpu.memory_space<vmem>>, vector<16x256xf32>,
    %c128 = arith.constant 128 : index
    %c0_91 = arith.constant 0 : index
    %280 = vector.load %arg12[%c128, %c0_91] : memref<192x768xf32, #tpu.memory_space<vmem>>, vector<16x768xf32>
    %281 = arith.truncf %278 : vector<16x256xf32> to vector<16x256xbf16>
    %c0_92 = arith.constant 0 : index
    %c0_93 = arith.constant 0 : index
    %282 = vector.load %arg5[%c0_92, %c0_93] : memref<256x768xbf16, #tpu.memory_space<vmem>>, vector<256x768xbf16>
    %cst_94 = arith.constant dense<0.000000e+00> : vector<16x768xf32>
    %283 = tpu.matmul %281, %282, %cst_94 {dimension_numbers = #tpu.dot_dimension_numbers<[1], [0], [0], [1], [0, 0, 1, 1], [], []>} : vector<16x256xbf16>, vector<256x768xbf16>, vector<16x768xf32> -> vector<16x768xf32>
    %284 = arith.addf %283, %22 : vector<16x768xf32>
    %285 = vector.extract_strided_slice %280 {offsets = [0, 0], sizes = [16, 256], strides = [1, 1]} : vector<16x768xf32> to vector<16x256xf32>
    %286 = vector.extract_strided_slice %284 {offsets = [0, 0], sizes = [16, 256], strides = [1, 1]} : vector<16x768xf32> to vector<16x256xf32>
    %287 = arith.addf %285, %286 : vector<16x256xf32>
    %288 = arith.negf %287 : vector<16x256xf32>
    %289 = math.exp %288 : vector<16x256xf32>
    %cst_95 = arith.constant 1.000000e+00 : f32
    %290 = vector.broadcast %cst_95 : f32 to vector<16x256xf32>
    %291 = arith.addf %290, %289 : vector<16x256xf32>
    %292 = arith.divf %290, %291 : vector<16x256xf32>
    %293 = vector.extract_strided_slice %280 {offsets = [0, 256], sizes = [16, 256], strides = [1, 1]} : vector<16x768xf32> to vector<16x256xf32>
    %294 = vector.extract_strided_slice %284 {offsets = [0, 256], sizes = [16, 256], strides = [1, 1]} : vector<16x768xf32> to vector<16x256xf32>
    %295 = arith.addf %293, %294 : vector<16x256xf32>
    %296 = arith.negf %295 : vector<16x256xf32>
    %297 = math.exp %296 : vector<16x256xf32>
    %cst_96 = arith.constant 1.000000e+00 : f32
    %298 = vector.broadcast %cst_96 : f32 to vector<16x256xf32>
    %299 = arith.addf %298, %297 : vector<16x256xf32>
    %300 = arith.divf %298, %299 : vector<16x256xf32>
    %301 = vector.extract_strided_slice %280 {offsets = [0, 512], sizes = [16, 256], strides = [1, 1]} : vector<16x768xf32> to vector<16x256xf32>
    %302 = vector.extract_strided_slice %284 {offsets = [0, 512], sizes = [16, 256], strides = [1, 1]} : vector<16x768xf32> to vector<16x256xf32>
    %303 = arith.mulf %292, %302 : vector<16x256xf32>
    %304 = arith.addf %301, %303 : vector<16x256xf32>
    %305 = math.tanh %304 : vector<16x256xf32>
    %cst_97 = arith.constant 1.000000e+00 : f32
    %306 = vector.broadcast %cst_97 : f32 to vector<16x256xf32>
    %307 = arith.subf %306, %300 : vector<16x256xf32>
    %308 = arith.mulf %307, %305 : vector<16x256xf32>
    %309 = arith.mulf %300, %278 : vector<16x256xf32>
    %310 = arith.addf %308, %309 : vector<16x256xf32>
    %c128_98 = arith.constant 128 : index
    %c0_99 = arith.constant 0 : index
    %311 = vector.load %arg13[%c128_98, %c0_99] : memref<192x256xf32, #tpu.memory_space<vmem>>, vector<16x256xf32>
    tpu.vector_store %arg13[%c128_98, %c0_99], %310 {strides = array<i32>} : memref<192x256xf32, #tpu.memory_space<vmem>>, vector<16x256xf32>,
    %c144 = arith.constant 144 : index
    %c0_100 = arith.constant 0 : index
    %312 = vector.load %arg12[%c144, %c0_100] : memref<192x768xf32, #tpu.memory_space<vmem>>, vector<16x768xf32>
    %313 = arith.truncf %310 : vector<16x256xf32> to vector<16x256xbf16>
    %c0_101 = arith.constant 0 : index
    %c0_102 = arith.constant 0 : index
    %314 = vector.load %arg5[%c0_101, %c0_102] : memref<256x768xbf16, #tpu.memory_space<vmem>>, vector<256x768xbf16>
    %cst_103 = arith.constant dense<0.000000e+00> : vector<16x768xf32>
    %315 = tpu.matmul %313, %314, %cst_103 {dimension_numbers = #tpu.dot_dimension_numbers<[1], [0], [0], [1], [0, 0, 1, 1], [], []>} : vector<16x256xbf16>, vector<256x768xbf16>, vector<16x768xf32> -> vector<16x768xf32>
    %316 = arith.addf %315, %22 : vector<16x768xf32>
    %317 = vector.extract_strided_slice %312 {offsets = [0, 0], sizes = [16, 256], strides = [1, 1]} : vector<16x768xf32> to vector<16x256xf32>
    %318 = vector.extract_strided_slice %316 {offsets = [0, 0], sizes = [16, 256], strides = [1, 1]} : vector<16x768xf32> to vector<16x256xf32>
    %319 = arith.addf %317, %318 : vector<16x256xf32>
    %320 = arith.negf %319 : vector<16x256xf32>
    %321 = math.exp %320 : vector<16x256xf32>
    %cst_104 = arith.constant 1.000000e+00 : f32
    %322 = vector.broadcast %cst_104 : f32 to vector<16x256xf32>
    %323 = arith.addf %322, %321 : vector<16x256xf32>
    %324 = arith.divf %322, %323 : vector<16x256xf32>
    %325 = vector.extract_strided_slice %312 {offsets = [0, 256], sizes = [16, 256], strides = [1, 1]} : vector<16x768xf32> to vector<16x256xf32>
    %326 = vector.extract_strided_slice %316 {offsets = [0, 256], sizes = [16, 256], strides = [1, 1]} : vector<16x768xf32> to vector<16x256xf32>
    %327 = arith.addf %325, %326 : vector<16x256xf32>
    %328 = arith.negf %327 : vector<16x256xf32>
    %329 = math.exp %328 : vector<16x256xf32>
    %cst_105 = arith.constant 1.000000e+00 : f32
    %330 = vector.broadcast %cst_105 : f32 to vector<16x256xf32>
    %331 = arith.addf %330, %329 : vector<16x256xf32>
    %332 = arith.divf %330, %331 : vector<16x256xf32>
    %333 = vector.extract_strided_slice %312 {offsets = [0, 512], sizes = [16, 256], strides = [1, 1]} : vector<16x768xf32> to vector<16x256xf32>
    %334 = vector.extract_strided_slice %316 {offsets = [0, 512], sizes = [16, 256], strides = [1, 1]} : vector<16x768xf32> to vector<16x256xf32>
    %335 = arith.mulf %324, %334 : vector<16x256xf32>
    %336 = arith.addf %333, %335 : vector<16x256xf32>
    %337 = math.tanh %336 : vector<16x256xf32>
    %cst_106 = arith.constant 1.000000e+00 : f32
    %338 = vector.broadcast %cst_106 : f32 to vector<16x256xf32>
    %339 = arith.subf %338, %332 : vector<16x256xf32>
    %340 = arith.mulf %339, %337 : vector<16x256xf32>
    %341 = arith.mulf %332, %310 : vector<16x256xf32>
    %342 = arith.addf %340, %341 : vector<16x256xf32>
    %c144_107 = arith.constant 144 : index
    %c0_108 = arith.constant 0 : index
    %343 = vector.load %arg13[%c144_107, %c0_108] : memref<192x256xf32, #tpu.memory_space<vmem>>, vector<16x256xf32>
    tpu.vector_store %arg13[%c144_107, %c0_108], %342 {strides = array<i32>} : memref<192x256xf32, #tpu.memory_space<vmem>>, vector<16x256xf32>,
    %c160 = arith.constant 160 : index
    %c0_109 = arith.constant 0 : index
    %344 = vector.load %arg12[%c160, %c0_109] : memref<192x768xf32, #tpu.memory_space<vmem>>, vector<16x768xf32>
    %345 = arith.truncf %342 : vector<16x256xf32> to vector<16x256xbf16>
    %c0_110 = arith.constant 0 : index
    %c0_111 = arith.constant 0 : index
    %346 = vector.load %arg5[%c0_110, %c0_111] : memref<256x768xbf16, #tpu.memory_space<vmem>>, vector<256x768xbf16>
    %cst_112 = arith.constant dense<0.000000e+00> : vector<16x768xf32>
    %347 = tpu.matmul %345, %346, %cst_112 {dimension_numbers = #tpu.dot_dimension_numbers<[1], [0], [0], [1], [0, 0, 1, 1], [], []>} : vector<16x256xbf16>, vector<256x768xbf16>, vector<16x768xf32> -> vector<16x768xf32>
    %348 = arith.addf %347, %22 : vector<16x768xf32>
    %349 = vector.extract_strided_slice %344 {offsets = [0, 0], sizes = [16, 256], strides = [1, 1]} : vector<16x768xf32> to vector<16x256xf32>
    %350 = vector.extract_strided_slice %348 {offsets = [0, 0], sizes = [16, 256], strides = [1, 1]} : vector<16x768xf32> to vector<16x256xf32>
    %351 = arith.addf %349, %350 : vector<16x256xf32>
    %352 = arith.negf %351 : vector<16x256xf32>
    %353 = math.exp %352 : vector<16x256xf32>
    %cst_113 = arith.constant 1.000000e+00 : f32
    %354 = vector.broadcast %cst_113 : f32 to vector<16x256xf32>
    %355 = arith.addf %354, %353 : vector<16x256xf32>
    %356 = arith.divf %354, %355 : vector<16x256xf32>
    %357 = vector.extract_strided_slice %344 {offsets = [0, 256], sizes = [16, 256], strides = [1, 1]} : vector<16x768xf32> to vector<16x256xf32>
    %358 = vector.extract_strided_slice %348 {offsets = [0, 256], sizes = [16, 256], strides = [1, 1]} : vector<16x768xf32> to vector<16x256xf32>
    %359 = arith.addf %357, %358 : vector<16x256xf32>
    %360 = arith.negf %359 : vector<16x256xf32>
    %361 = math.exp %360 : vector<16x256xf32>
    %cst_114 = arith.constant 1.000000e+00 : f32
    %362 = vector.broadcast %cst_114 : f32 to vector<16x256xf32>
    %363 = arith.addf %362, %361 : vector<16x256xf32>
    %364 = arith.divf %362, %363 : vector<16x256xf32>
    %365 = vector.extract_strided_slice %344 {offsets = [0, 512], sizes = [16, 256], strides = [1, 1]} : vector<16x768xf32> to vector<16x256xf32>
    %366 = vector.extract_strided_slice %348 {offsets = [0, 512], sizes = [16, 256], strides = [1, 1]} : vector<16x768xf32> to vector<16x256xf32>
    %367 = arith.mulf %356, %366 : vector<16x256xf32>
    %368 = arith.addf %365, %367 : vector<16x256xf32>
    %369 = math.tanh %368 : vector<16x256xf32>
    %cst_115 = arith.constant 1.000000e+00 : f32
    %370 = vector.broadcast %cst_115 : f32 to vector<16x256xf32>
    %371 = arith.subf %370, %364 : vector<16x256xf32>
    %372 = arith.mulf %371, %369 : vector<16x256xf32>
    %373 = arith.mulf %364, %342 : vector<16x256xf32>
    %374 = arith.addf %372, %373 : vector<16x256xf32>
    %c160_116 = arith.constant 160 : index
    %c0_117 = arith.constant 0 : index
    %375 = vector.load %arg13[%c160_116, %c0_117] : memref<192x256xf32, #tpu.memory_space<vmem>>, vector<16x256xf32>
    tpu.vector_store %arg13[%c160_116, %c0_117], %374 {strides = array<i32>} : memref<192x256xf32, #tpu.memory_space<vmem>>, vector<16x256xf32>,
    %c176 = arith.constant 176 : index
    %c0_118 = arith.constant 0 : index
    %376 = vector.load %arg12[%c176, %c0_118] : memref<192x768xf32, #tpu.memory_space<vmem>>, vector<16x768xf32>
    %377 = arith.truncf %374 : vector<16x256xf32> to vector<16x256xbf16>
    %c0_119 = arith.constant 0 : index
    %c0_120 = arith.constant 0 : index
    %378 = vector.load %arg5[%c0_119, %c0_120] : memref<256x768xbf16, #tpu.memory_space<vmem>>, vector<256x768xbf16>
    %cst_121 = arith.constant dense<0.000000e+00> : vector<16x768xf32>
    %379 = tpu.matmul %377, %378, %cst_121 {dimension_numbers = #tpu.dot_dimension_numbers<[1], [0], [0], [1], [0, 0, 1, 1], [], []>} : vector<16x256xbf16>, vector<256x768xbf16>, vector<16x768xf32> -> vector<16x768xf32>
    %380 = arith.addf %379, %22 : vector<16x768xf32>
    %381 = vector.extract_strided_slice %376 {offsets = [0, 0], sizes = [16, 256], strides = [1, 1]} : vector<16x768xf32> to vector<16x256xf32>
    %382 = vector.extract_strided_slice %380 {offsets = [0, 0], sizes = [16, 256], strides = [1, 1]} : vector<16x768xf32> to vector<16x256xf32>
    %383 = arith.addf %381, %382 : vector<16x256xf32>
    %384 = arith.negf %383 : vector<16x256xf32>
    %385 = math.exp %384 : vector<16x256xf32>
    %cst_122 = arith.constant 1.000000e+00 : f32
    %386 = vector.broadcast %cst_122 : f32 to vector<16x256xf32>
    %387 = arith.addf %386, %385 : vector<16x256xf32>
    %388 = arith.divf %386, %387 : vector<16x256xf32>
    %389 = vector.extract_strided_slice %376 {offsets = [0, 256], sizes = [16, 256], strides = [1, 1]} : vector<16x768xf32> to vector<16x256xf32>
    %390 = vector.extract_strided_slice %380 {offsets = [0, 256], sizes = [16, 256], strides = [1, 1]} : vector<16x768xf32> to vector<16x256xf32>
    %391 = arith.addf %389, %390 : vector<16x256xf32>
    %392 = arith.negf %391 : vector<16x256xf32>
    %393 = math.exp %392 : vector<16x256xf32>
    %cst_123 = arith.constant 1.000000e+00 : f32
    %394 = vector.broadcast %cst_123 : f32 to vector<16x256xf32>
    %395 = arith.addf %394, %393 : vector<16x256xf32>
    %396 = arith.divf %394, %395 : vector<16x256xf32>
    %397 = vector.extract_strided_slice %376 {offsets = [0, 512], sizes = [16, 256], strides = [1, 1]} : vector<16x768xf32> to vector<16x256xf32>
    %398 = vector.extract_strided_slice %380 {offsets = [0, 512], sizes = [16, 256], strides = [1, 1]} : vector<16x768xf32> to vector<16x256xf32>
    %399 = arith.mulf %388, %398 : vector<16x256xf32>
    %400 = arith.addf %397, %399 : vector<16x256xf32>
    %401 = math.tanh %400 : vector<16x256xf32>
    %cst_124 = arith.constant 1.000000e+00 : f32
    %402 = vector.broadcast %cst_124 : f32 to vector<16x256xf32>
    %403 = arith.subf %402, %396 : vector<16x256xf32>
    %404 = arith.mulf %403, %401 : vector<16x256xf32>
    %405 = arith.mulf %396, %374 : vector<16x256xf32>
    %406 = arith.addf %404, %405 : vector<16x256xf32>
    %c176_125 = arith.constant 176 : index
    %c0_126 = arith.constant 0 : index
    %407 = vector.load %arg13[%c176_125, %c0_126] : memref<192x256xf32, #tpu.memory_space<vmem>>, vector<16x256xf32>
    tpu.vector_store %arg13[%c176_125, %c0_126], %406 {strides = array<i32>} : memref<192x256xf32, #tpu.memory_space<vmem>>, vector<16x256xf32>,
    %c0_127 = arith.constant 0 : index
    %c0_128 = arith.constant 0 : index
    %408 = vector.load %arg11[%c0_127, %c0_128] : memref<16x256xf32, #tpu.memory_space<vmem>>, vector<16x256xf32>
    tpu.vector_store %arg11[%c0_127, %c0_128], %406 {strides = array<i32>} : memref<16x256xf32, #tpu.memory_space<vmem>>, vector<16x256xf32>,
    %c0_129 = arith.constant 0 : index
    %c0_130 = arith.constant 0 : index
    %409 = vector.load %arg13[%c0_129, %c0_130] : memref<192x256xf32, #tpu.memory_space<vmem>>, vector<192x256xf32>
    %410 = arith.truncf %409 : vector<192x256xf32> to vector<192x256xbf16>
    %c0_131 = arith.constant 0 : index
    %c0_132 = arith.constant 0 : index
    %411 = vector.load %arg8[%c0_131, %c0_132] : memref<256x256xbf16, #tpu.memory_space<vmem>>, vector<256x256xbf16>
    %cst_133 = arith.constant dense<0.000000e+00> : vector<192x256xf32>
    %412 = tpu.matmul %410, %411, %cst_133 {dimension_numbers = #tpu.dot_dimension_numbers<[1], [0], [0], [1], [0, 0, 1, 1], [], []>} : vector<192x256xbf16>, vector<256x256xbf16>, vector<192x256xf32> -> vector<192x256xf32>
    %c0_134 = arith.constant 0 : index
    %c0_135 = arith.constant 0 : index
    %413 = vector.load %arg9[%c0_134, %c0_135] : memref<1x256xf32, #tpu.memory_space<vmem>>, vector<1x256xf32>
    %414 = vector.broadcast %413 : vector<1x256xf32> to vector<192x256xf32>
    %415 = arith.addf %412, %414 : vector<192x256xf32>
    %cst_136 = arith.constant dense<0xFF800000> : vector<192xf32>
    %416 = vector.multi_reduction <maximumf>, %415, %cst_136 [1] : vector<192x256xf32> to vector<192xf32>
    %417 = vector.shape_cast %416 : vector<192xf32> to vector<192x1xf32>
    %418 = vector.broadcast %417 : vector<192x1xf32> to vector<192x256xf32>
    %419 = arith.subf %415, %418 : vector<192x256xf32>
    %420 = math.exp %419 : vector<192x256xf32>
    %cst_137 = arith.constant dense<0.000000e+00> : vector<192xf32>
    %421 = vector.multi_reduction <add>, %420, %cst_137 [1] : vector<192x256xf32> to vector<192xf32>
    %422 = vector.shape_cast %421 : vector<192xf32> to vector<192x1xf32>
    %423 = math.log %422 : vector<192x1xf32>
    %424 = vector.broadcast %423 : vector<192x1xf32> to vector<192x256xf32>
    %425 = arith.subf %419, %424 : vector<192x256xf32>
    %426 = vector.shape_cast %425 : vector<192x256xf32> to vector<1x192x256xf32>
    %c0_138 = arith.constant 0 : index
    %c0_139 = arith.constant 0 : index
    %c0_140 = arith.constant 0 : index
    %427 = vector.load %arg10[%c0_138, %c0_139, %c0_140] : memref<1x192x256xf32, #tpu.memory_space<vmem>>, vector<1x192x256xf32>
    tpu.vector_store %arg10[%c0_138, %c0_139, %c0_140], %426 {strides = array<i32>} : memref<1x192x256xf32, #tpu.memory_space<vmem>>, vector<1x192x256xf32>,
    return
  }
  func.func @transform_0(%arg0: i32) -> (i32, i32, i32) {
    %c0_i32 = arith.constant 0 : i32
    %c0_i32_0 = arith.constant 0 : i32
    %c0_i32_1 = arith.constant 0 : i32
    return %arg0, %c0_i32, %c0_i32_0 : i32, i32, i32
  }
  func.func @transform_1(%arg0: i32) -> (i32, i32) {
    %c0_i32 = arith.constant 0 : i32
    %c0_i32_0 = arith.constant 0 : i32
    return %arg0, %c0_i32 : i32, i32
  }
  func.func @transform_2(%arg0: i32) -> (i32, i32) {
    %c0_i32 = arith.constant 0 : i32
    %c0_i32_0 = arith.constant 0 : i32
    %c0_i32_1 = arith.constant 0 : i32
    return %c0_i32, %c0_i32_0 : i32, i32
  }
  func.func @transform_3(%arg0: i32) -> (i32, i32) {
    %c0_i32 = arith.constant 0 : i32
    %c0_i32_0 = arith.constant 0 : i32
    %c0_i32_1 = arith.constant 0 : i32
    return %c0_i32, %c0_i32_0 : i32, i32
  }
  func.func @transform_4(%arg0: i32) -> (i32, i32) {
    %c0_i32 = arith.constant 0 : i32
    %c0_i32_0 = arith.constant 0 : i32
    %c0_i32_1 = arith.constant 0 : i32
    return %c0_i32, %c0_i32_0 : i32, i32
  }
  func.func @transform_5(%arg0: i32) -> (i32, i32) {
    %c0_i32 = arith.constant 0 : i32
    %c0_i32_0 = arith.constant 0 : i32
    %c0_i32_1 = arith.constant 0 : i32
    return %c0_i32, %c0_i32_0 : i32, i32
  }
  func.func @transform_6(%arg0: i32) -> (i32, i32) {
    %c0_i32 = arith.constant 0 : i32
    %c0_i32_0 = arith.constant 0 : i32
    %c0_i32_1 = arith.constant 0 : i32
    return %c0_i32, %c0_i32_0 : i32, i32
  }
  func.func @transform_7(%arg0: i32) -> (i32, i32) {
    %c0_i32 = arith.constant 0 : i32
    %c0_i32_0 = arith.constant 0 : i32
    %c0_i32_1 = arith.constant 0 : i32
    return %c0_i32, %c0_i32_0 : i32, i32
  }
  func.func @transform_8(%arg0: i32) -> (i32, i32) {
    %c0_i32 = arith.constant 0 : i32
    %c0_i32_0 = arith.constant 0 : i32
    %c0_i32_1 = arith.constant 0 : i32
    return %c0_i32, %c0_i32_0 : i32, i32
  }
  func.func @transform_9(%arg0: i32) -> (i32, i32, i32) {
    %c0_i32 = arith.constant 0 : i32
    %c0_i32_0 = arith.constant 0 : i32
    %c0_i32_1 = arith.constant 0 : i32
    return %arg0, %c0_i32, %c0_i32_0 : i32, i32, i32
  }
  func.func @transform_10(%arg0: i32) -> (i32, i32) {
    %c0_i32 = arith.constant 0 : i32
    %c0_i32_0 = arith.constant 0 : i32
    return %arg0, %c0_i32 : i32, i32
  }
}

</mosaic_0001>

<bundles_post_ra>
// kernel: tpu_custom_call.1
= control target key start
LH: loop header
LB: loop body
LE: loop exit
PB: predicated region body
PF: predicated region fallthrough
CT: control target
= control target key end

     0   :  { %16 = vsyncpa [#allocation5], 0  ;;  %s20004_s0 = inlined_call_operand.vmem [shape: s32[1,192,1], index: 0, kind: input, shape index: {}]   ;;  %s20005_s1 = inlined_call_operand.vmem [shape: f32[16,256], index: 1, kind: input, shape index: {}]   ;;  %s20006_s2 = inlined_call_operand.hbm [shape: bf16[256,256], index: 2, kind: input, shape index: {}]   ;;  %s20007_s3 = inlined_call_operand.hbm [shape: bf16[256,768], index: 3, kind: input, shape index: {}]   ;;  %s20008_s4 = inlined_call_operand.hbm [shape: bf16[256,768], index: 4, kind: input, shape index: {}]   ;;  %s20009_s5 = inlined_call_operand.vmem [shape: f32[1,768], index: 5, kind: input, shape index: {}]   ;;  %s20010_s6 = inlined_call_operand.vmem [shape: f32[1,768], index: 6, kind: input, shape index: {}]   ;;  %s20011_s7 = inlined_call_operand.hbm [shape: bf16[256,256], index: 7, kind: input, shape index: {}]   ;;  %s20012_s8 = inlined_call_operand.vmem [shape: f32[1,256], index: 8, kind: input, shape index: {}]   ;;  %s20013_s9 = inlined_call_operand.hbm [shape: f32[1,192,256], index: 9, kind: output, shape index: {0}]   ;;  %s20014_s10 = inlined_call_operand.hbm [shape: f32[16,256], index: 10, kind: output, shape index: {1}]  }
   0x1   :  { %17 = vsyncpa [#allocation8], 0 }
   0x2   :  { %18 = vsyncpa [#allocation11], 0 }
   0x3   :  { %19 = vsyncpa [#allocation6], 0 }
   0x4   :  { %20 = vsyncpa [#allocation14], 0  ;;  %s16272_s13 = smov [#allocation7]   ;;  %s16130_s17 = scalar_lea.hbm %s20007_s3, 12288 }
   0x5   :  { %s42_s14 = sshll.u32 %s16272_s13, 4  ;;  %p16131_p0 = scmp.ne.s32.totalorder %s20007_s3, %s16130_s17  ;;  %s43_s14 = int_to_ptr.vmem [resolvable:$true] %s42_s14 }
   0x6   :  { %p16134_p1 = scmp.lt.u32.totalorder %s16130_s17, %s20007_s3 }
   0x8   :  { %p16136_p2 = pnand %p16134_p1, %p16131_p0 }
   0xa   :  { %16139 = shalt.err (!%p16136_p2)
}
   0xb   :  { %s16140_s22 = scalar_lea.vmem %s43_s14, 12288  ;;  %p16145_p4 = scmp.lt.s32.totalorder %s43_s14, %s43_s14 }
   0xc   :  { %p16141_p3 = scmp.ne.s32.totalorder %s43_s14, %s16140_s22  ;;  %p16146_p5 = scmp.lt.s32.totalorder %s16140_s22, %s16140_s22 }
   0xe   :  { %p16147_p6 = por %p16146_p5, %p16145_p4 }
  0x10   :  { %p16148_p7 = pnand %p16147_p6, %p16141_p3 }
  0x12   :  { %16151 = shalt.err (!%p16148_p7)
}
  0x13   :  { %s16273_s23 = smov 384   ;;  %s16274_s24 = smov 24  }
  0x14   :  { %48 = dma.hbm_to_vmem [thread:$0]  %s20007_s3, 12288, %s43_s14, [#allocation8], %s16273_s23, %s16273_s23, %s16274_s24  }
  0x15   :  { %s16275_s27 = smov [#allocation4]   ;;  %s16152_s11 = scalar_lea.hbm %s20006_s2, 4096 }
  0x16   :  { %s30_s28 = sshll.u32 %s16275_s27, 4  ;;  %p16153_p8 = scmp.ne.s32.totalorder %s20006_s2, %s16152_s11  ;;  %s31_s28 = int_to_ptr.vmem [resolvable:$true] %s30_s28 }
  0x17   :  { %p16156_p9 = scmp.lt.u32.totalorder %s16152_s11, %s20006_s2 }
  0x19   :  { %p16158_p10 = pnand %p16156_p9, %p16153_p8 }
  0x1b   :  { %16161 = shalt.err (!%p16158_p10)
}
  0x1c   :  { %s16162_s17 = scalar_lea.vmem %s31_s28, 4096  ;;  %p16167_p12 = scmp.lt.s32.totalorder %s31_s28, %s31_s28 }
  0x1d   :  { %p16163_p11 = scmp.ne.s32.totalorder %s31_s28, %s16162_s17  ;;  %p16168_p13 = scmp.lt.s32.totalorder %s16162_s17, %s16162_s17 }
  0x1f   :  { %p16169_p0 = por %p16168_p13, %p16167_p12 }
  0x21   :  { %p16170_p1 = pnand %p16169_p0, %p16163_p11 }
  0x23   :  { %16173 = shalt.err (!%p16170_p1)
}
  0x24   :  { %s16276_s3 = smov 128   ;;  %s16277_s14 = smov 8  }
  0x25   :  { %36 = dma.hbm_to_vmem [thread:$0]  %s20006_s2, 4096, %s31_s28, [#allocation5], %s16276_s3, %s16276_s3, %s16277_s14  }
  0x26   :  { %s16278_s20 = smov [#allocation9]   ;;  %s16279_s22 = smov [#allocation10]  }
  0x27   :  { %s54_s21 = sshll.u32 %s16278_s20, 4  ;;  %s70_s25 = sshll.u32 %s16279_s22, 4  ;;  %s55_s21 = int_to_ptr.vmem [resolvable:$true] %s54_s21  ;;  %s16371_s25 = int_to_ptr.vmem [resolvable:$true] %s70_s25 }
  0x28   :  { %s16174_s29 = scalar_lea.hbm %s20008_s4, 12288 }
  0x29   :  { %p16175_p2 = scmp.ne.s32.totalorder %s20008_s4, %s16174_s29  ;;  %p16178_p3 = scmp.lt.u32.totalorder %s16174_s29, %s20008_s4 }
  0x2b   :  { %p16180_p4 = pnand %p16178_p3, %p16175_p2 }
  0x2d   :  { %16183 = shalt.err (!%p16180_p4)
}
  0x2e   :  { %s16184_s2 = scalar_lea.vmem %s55_s21, 12288  ;;  %p16189_p6 = scmp.lt.s32.totalorder %s55_s21, %s55_s21 }
  0x2f   :  { %p16185_p5 = scmp.ne.s32.totalorder %s55_s21, %s16184_s2  ;;  %p16190_p7 = scmp.lt.s32.totalorder %s16184_s2, %s16184_s2 }
  0x31   :  { %p16191_p8 = por %p16190_p7, %p16189_p6 }
  0x33   :  { %p16192_p9 = pnand %p16191_p8, %p16185_p5 }
  0x35   :  { %16195 = shalt.err (!%p16192_p9)
}
  0x36   :  { %60 = dma.hbm_to_vmem [thread:$0]  %s20008_s4, 12288, %s55_s21, [#allocation8], %s16273_s23, %s16273_s23, %s16274_s24  }
  0x37   :  { %s16196_s18 = scalar_lea.hbm %s20011_s7, 4096 }
  0x38   :  { %p16197_p10 = scmp.ne.s32.totalorder %s20011_s7, %s16196_s18  ;;  %p16200_p11 = scmp.lt.u32.totalorder %s16196_s18, %s20011_s7 }
  0x3a   :  { %p16202_p12 = pnand %p16200_p11, %p16197_p10 }
  0x3c   :  { %16205 = shalt.err (!%p16202_p12)
}
  0x3d   :  { %s16206_s27 = scalar_lea.vmem %s16371_s25, 4096  ;;  %p16211_p0 = scmp.lt.s32.totalorder %s16371_s25, %s16371_s25 }
  0x3e   :  { %p16207_p13 = scmp.ne.s32.totalorder %s16371_s25, %s16206_s27  ;;  %p16212_p1 = scmp.lt.s32.totalorder %s16206_s27, %s16206_s27 }
  0x40   :  { %p16213_p2 = por %p16212_p1, %p16211_p0 }
  0x42   :  { %p16214_p3 = pnand %p16213_p2, %p16207_p13 }
  0x44   :  { %16217 = shalt.err (!%p16214_p3)
}
  0x45   :  { %76 = dma.hbm_to_vmem [thread:$0]  %s20011_s7, 4096, %s16371_s25, [#allocation11], %s16276_s3, %s16276_s3, %s16277_s14  }
  0x46   :  { %16262 = dma.done.wait [#allocation5], 4096  }
  0x47   :  { %16263 = vsyncadd [#allocation5], 4294963200 }
  0x48   :  { %16264 = dma.done.wait [#allocation8], 24576  }
  0x49   :  { %16265 = vsyncadd [#allocation8], 4294942720 }
  0x4a   :  { %16266 = dma.done.wait [#allocation11], 4096  }
  0x4b   :  { %16267 = vsyncadd [#allocation11], 4294963200  ;;  %v16280_v0 = vmov 0   ;;  %v93_v1 = vld [vmem:[%s20004_s0 + $0x10] sm:$0xff]  ;;  %v91_v2 = vld [vmem:[%s20004_s0] sm:$0xff] }
  0x4c   :  { %14317 = vset.pattern.permute.xlu1 %v16280_v0  ;;  %14316 = vset.pattern.permute.xlu0 %v16280_v0  ;;  %v94_v3 = vld [vmem:[%s20004_s0 + $0x18] sm:$0xff]  ;;  %v92_v4 = vld [vmem:[%s20004_s0 + $0x8] sm:$0xff]  ;;  %v95_v6 = vld [vmem:[%s20004_s0 + $0x20] sm:$0xff] }
  0x4d   :  { %125 = vperm.xlu1 %14317, %v93_v1   ;;  %119 = vperm.xlu0 %14316, %v91_v2   ;;  %v96_v5 = vld [vmem:[%s20004_s0 + $0x28] sm:$0xff]  ;;  %v98_v7 = vld [vmem:[%s20004_s0 + $0x38] sm:$0xff]  ;;  %v97_v10 = vld [vmem:[%s20004_s0 + $0x30] sm:$0xff] }
  0x4e   :  { %v14318_v8 = vld [vmem:[#allocation4 + $0x4] ss:$8 sps:$4 sm:$0xff]   ;;  %v14320_v9 = vld [vmem:[#allocation4] ss:$8 sps:$4 sm:$0xff]   ;;  %v14321_v11 = vld [vmem:[#allocation4 + $0x14] ss:$8 sps:$4 sm:$0xff]  }
  0x4f   :  { %502 = vmatprep.subr.bf16.mxu0 %v14318_v8  ;;  %v14323_v12 = vld [vmem:[#allocation4 + $0x10] ss:$8 sps:$4 sm:$0xff]   ;;  %v14324_v13 = vld [vmem:[#allocation4 + $0x24] ss:$8 sps:$4 sm:$0xff]   ;;  %v14326_v16 = vld [vmem:[#allocation4 + $0x20] ss:$8 sps:$4 sm:$0xff]  }
  0x50   :  { %503 = vmatpush1.bf16.msra.mxu0 %v14320_v9  ;;  %v100_v14 = vld [vmem:[%s20004_s0 + $0x48] sm:$0xff]  ;;  %v99_v15 = vld [vmem:[%s20004_s0 + $0x40] sm:$0xff]  ;;  %v102_v18 = vld [vmem:[%s20004_s0 + $0x58] sm:$0xff]  ;;  %v20015_v9 = vlaneseq }
  0x51   :  { %128 = vperm.xlu1 %14317, %v94_v3   ;;  %122 = vperm.xlu0 %14316, %v92_v4   ;;  %v14327_v17 = vld [vmem:[#allocation4 + $0x34] ss:$8 sps:$4 sm:$0xff]   ;;  %v101_v19 = vld [vmem:[%s20004_s0 + $0x50] sm:$0xff]  ;;  %v14329_v20 = vld [vmem:[#allocation4 + $0x30] ss:$8 sps:$4 sm:$0xff]  }
  0x52   :  { %504 = vmatprep.subr.bf16.mxu0 %v14321_v11  ;;  %v14330_v21 = vld [vmem:[#allocation4 + $0x44] ss:$8 sps:$4 sm:$0xff]   ;;  %v104_v22 = vld [vmem:[%s20004_s0 + $0x68] sm:$0xff]  ;;  %v103_v23 = vld [vmem:[%s20004_s0 + $0x60] sm:$0xff] }
  0x53   :  { %v14332_v24 = vld [vmem:[#allocation4 + $0x40] ss:$8 sps:$4 sm:$0xff]   ;;  %v14333_v25 = vld [vmem:[#allocation4 + $0x54] ss:$8 sps:$4 sm:$0xff]   ;;  %v14335_v28 = vld [vmem:[#allocation4 + $0x50] ss:$8 sps:$4 sm:$0xff]  }
  0x54   :  { %505 = vmatpush1.bf16.msra.mxu0 %v14323_v12  ;;  %v106_v26 = vld [vmem:[%s20004_s0 + $0x78] sm:$0xff]  ;;  %v105_v27 = vld [vmem:[%s20004_s0 + $0x70] sm:$0xff]  ;;  %v108_v29 = vld [vmem:[%s20004_s0 + $0x88] sm:$0xff]  ;;  %v16481_v12 = vand.u32 127, %v20015_v9 }
  0x55   :  { %134 = vperm.xlu1 %14317, %v96_v5   ;;  %131 = vperm.xlu0 %14316, %v95_v6   ;;  %v107_v30 = vld [vmem:[%s20004_s0 + $0x80] sm:$0xff]  ;;  %v14336_v31 = vld [vmem:[#allocation4 + $0x64] ss:$8 sps:$4 sm:$0xff]   ;;  %v14338_v32 = vld [vmem:[#allocation4 + $0x60] ss:$8 sps:$4 sm:$0xff]  }
  0x56   :  { %506 = vmatprep.subr.bf16.mxu0 %v14324_v13  ;;  %v14339_v33 = vld [vmem:[#allocation4 + $0x74] ss:$8 sps:$4 sm:$0xff]   ;;  %v110_v34 = vld [vmem:[%s20004_s0 + $0x98] sm:$0xff]  ;;  %v109_v35 = vld [vmem:[%s20004_s0 + $0x90] sm:$0xff] }
  0x57   :  { %v14341_v36 = vld [vmem:[#allocation4 + $0x70] ss:$8 sps:$4 sm:$0xff]   ;;  %v14342_v37 = vld [vmem:[#allocation4 + $0x84] ss:$8 sps:$4 sm:$0xff]   ;;  %v14344_v40 = vld [vmem:[#allocation4 + $0x80] ss:$8 sps:$4 sm:$0xff]  }
  0x58   :  { %507 = vmatpush1.bf16.msra.mxu0 %v14326_v16  ;;  %v112_v38 = vld [vmem:[%s20004_s0 + $0xa8] sm:$0xff]  ;;  %v111_v39 = vld [vmem:[%s20004_s0 + $0xa0] sm:$0xff]  ;;  %v114_v42 = vld [vmem:[%s20004_s0 + $0xb8] sm:$0xff] }
  0x59   :  { %140 = vperm.xlu1 %14317, %v98_v7   ;;  %137 = vperm.xlu0 %14316, %v97_v10   ;;  %v14345_v41 = vld [vmem:[#allocation4 + $0x94] ss:$8 sps:$4 sm:$0xff]   ;;  %v113_v43 = vld [vmem:[%s20004_s0 + $0xb0] sm:$0xff]  ;;  %v14347_v44 = vld [vmem:[#allocation4 + $0x90] ss:$8 sps:$4 sm:$0xff]  }
  0x5a   :  { %508 = vmatprep.subr.bf16.mxu0 %v14327_v17  ;;  %v14348_v45 = vld [vmem:[#allocation4 + $0xa4] ss:$8 sps:$4 sm:$0xff]   ;;  %v14350_v46 = vld [vmem:[#allocation4 + $0xa0] ss:$8 sps:$4 sm:$0xff]   ;;  %v14351_v47 = vld [vmem:[#allocation4 + $0xb4] ss:$8 sps:$4 sm:$0xff]  }
  0x5b   :  { %v14353_v48 = vld [vmem:[#allocation4 + $0xb0] ss:$8 sps:$4 sm:$0xff]   ;;  %v14354_v49 = vld [vmem:[#allocation4 + $0xc4] ss:$8 sps:$4 sm:$0xff]   ;;  %v14356_v50 = vld [vmem:[#allocation4 + $0xc0] ss:$8 sps:$4 sm:$0xff]  }
  0x5c   :  { %509 = vmatpush1.bf16.msra.mxu0 %v14329_v20  ;;  %v14357_v51 = vld [vmem:[#allocation4 + $0xd4] ss:$8 sps:$4 sm:$0xff]   ;;  %v14359_v52 = vld [vmem:[#allocation4 + $0xd0] ss:$8 sps:$4 sm:$0xff]   ;;  %v14360_v53 = vld [vmem:[#allocation4 + $0xe4] ss:$8 sps:$4 sm:$0xff]  }
  0x5d   :  { %146 = vperm.xlu1 %14317, %v100_v14   ;;  %143 = vperm.xlu0 %14316, %v99_v15   ;;  %v14362_v54 = vld [vmem:[#allocation4 + $0xe0] ss:$8 sps:$4 sm:$0xff]   ;;  %v14363_v55 = vld [vmem:[#allocation4 + $0xf4] ss:$8 sps:$4 sm:$0xff]   ;;  %v14365_v56 = vld [vmem:[#allocation4 + $0xf0] ss:$8 sps:$4 sm:$0xff]  }
  0x5e   :  { %510 = vmatprep.subr.bf16.mxu0 %v14330_v21  ;;  %v14366_v57 = vld [vmem:[#allocation7 + $0x4] ss:$24 sps:$4 sm:$0xff]   ;;  %v14368_v58 = vld [vmem:[#allocation7] ss:$24 sps:$4 sm:$0xff]   ;;  %v14372_v60 = vld [vmem:[#allocation7 + $0x34] ss:$24 sps:$4 sm:$0xff]  }
  0x5f   :  { %v14371_v59 = vld [vmem:[#allocation7 + $0xc] ss:$24 sps:$4 sm:$0xff]   ;;  %1335 = vmatprep.subr.bf16.mxu1 %v14366_v57  ;;  %v14374_v61 = vld [vmem:[#allocation7 + $0x30] ss:$24 sps:$4 sm:$0xff]   ;;  %v14380_v63 = vld [vmem:[#allocation7 + $0x60] ss:$24 sps:$4 sm:$0xff]  }
  0x60   :  { %511 = vmatpush1.bf16.msra.mxu0 %v14332_v24  ;;  %1336 = vmatpush1.bf16.msra.mxu1 %v14368_v58  ;;  %v14378_v62 = vld [vmem:[#allocation7 + $0x64] ss:$24 sps:$4 sm:$0xff]   ;;  %v14384_v0 = vld [vmem:[#allocation7 + $0x94] ss:$24 sps:$4 sm:$0xff]   ;;  %v14386_v1 = vld [vmem:[#allocation7 + $0x90] ss:$24 sps:$4 sm:$0xff]  }
  0x61   :  { %152 = vperm.xlu1 %14317, %v102_v18   ;;  %149 = vperm.xlu0 %14316, %v101_v19   ;;  %v14390_v2 = vld [vmem:[#allocation7 + $0xc4] ss:$24 sps:$4 sm:$0xff]   ;;  %v14392_v3 = vld [vmem:[#allocation7 + $0xc0] ss:$24 sps:$4 sm:$0xff]   ;;  %v14396_v4 = vld [vmem:[#allocation7 + $0xf4] ss:$24 sps:$4 sm:$0xff]  }
  0x62   :  { %512 = vmatprep.subr.bf16.mxu0 %v14333_v25  ;;  %1337 = vmatprep.subr.bf16.mxu1 %v14372_v60  ;;  %v14398_v5 = vld [vmem:[#allocation7 + $0xf0] ss:$24 sps:$4 sm:$0xff]   ;;  %v14402_v6 = vld [vmem:[#allocation7 + $0x124] ss:$24 sps:$4 sm:$0xff]   ;;  %v14404_v7 = vld [vmem:[#allocation7 + $0x120] ss:$24 sps:$4 sm:$0xff]  }
  0x63   :  { %v14408_v8 = vld [vmem:[#allocation7 + $0x154] ss:$24 sps:$4 sm:$0xff]   ;;  %v14410_v10 = vld [vmem:[#allocation7 + $0x150] ss:$24 sps:$4 sm:$0xff]   ;;  %v14414_v11 = vld [vmem:[#allocation7 + $0x184] ss:$24 sps:$4 sm:$0xff]  }
  0x64   :  { %513 = vmatpush1.bf16.msra.mxu0 %v14335_v28  ;;  %1338 = vmatpush1.bf16.msra.mxu1 %v14374_v61  ;;  %v14416_v15 = vld [vmem:[#allocation7 + $0x180] ss:$24 sps:$4 sm:$0xff]   ;;  %v14420_v16 = vld [vmem:[#allocation7 + $0x1b4] ss:$24 sps:$4 sm:$0xff]   ;;  %v16484_v17 = vadd.s32 128, %v16481_v12 }
  0x65   :  { %158 = vperm.xlu1 %14317, %v104_v22   ;;  %155 = vperm.xlu0 %14316, %v103_v23   ;;  %v14422_v20 = vld [vmem:[#allocation7 + $0x1b0] ss:$24 sps:$4 sm:$0xff]   ;;  %v14426_v22 = vld [vmem:[#allocation7 + $0x1e4] ss:$24 sps:$4 sm:$0xff]   ;;  %v16281_v24 = vmov 1.0|1.0  }
  0x66   :  { %514 = vmatprep.subr.bf16.mxu0 %v14336_v31  ;;  %1339 = vmatprep.subr.bf16.mxu1 %v14378_v62  ;;  %v14369_v21 = vld [vmem:[#allocation7 + $0x8] ss:$24 sps:$4 sm:$0xff]   ;;  %v14377_v23 = vld [vmem:[#allocation7 + $0x3c] ss:$24 sps:$4 sm:$0xff]   ;;  %v14375_v25 = vld [vmem:[#allocation7 + $0x38] ss:$24 sps:$4 sm:$0xff]  }
  0x67   :  { %v14432_v28 = vld [vmem:[#allocation7 + $0x214] ss:$24 sps:$4 sm:$0xff]   ;;  %v14381_v31 = vld [vmem:[#allocation7 + $0x68] ss:$24 sps:$4 sm:$0xff]   ;;  %v14423_v58 = vld [vmem:[#allocation7 + $0x1b8] ss:$24 sps:$4 sm:$0xff]  }
  0x68   :  { %515 = vmatpush1.bf16.msra.mxu0 %v14338_v32  ;;  %1340 = vmatpush1.bf16.msra.mxu1 %v14380_v63  ;;  %v14434_v32 = vld [vmem:[#allocation7 + $0x210] ss:$24 sps:$4 sm:$0xff]   ;;  %v14425_v57 = vld [vmem:[#allocation7 + $0x1bc] ss:$24 sps:$4 sm:$0xff]  }
  0x69   :  { %164 = vperm.xlu1 %14317, %v106_v26   ;;  %161 = vperm.xlu0 %14316, %v105_v27   ;;  %v14428_v26 = vld [vmem:[#allocation7 + $0x1e0] ss:$24 sps:$4 sm:$0xff]   ;;  %v14383_v27 = vld [vmem:[#allocation7 + $0x6c] ss:$24 sps:$4 sm:$0xff]   ;;  %v14437_v63 = vld [vmem:[#allocation7 + $0x21c] ss:$24 sps:$4 sm:$0xff]  }
  0x6a   :  { %516 = vmatprep.subr.bf16.mxu0 %v14339_v33  ;;  %1341 = vmatprep.subr.bf16.mxu1 %v14384_v0  ;;  %v14389_v33 = vld [vmem:[#allocation7 + $0x9c] ss:$24 sps:$4 sm:$0xff]   ;;  %v14429_v62 = vld [vmem:[#allocation7 + $0x1e8] ss:$24 sps:$4 sm:$0xff]  }
  0x6b   :  { %v14474_v0 = vld [vmem:[#allocation7 + $0xd0] ss:$24 sps:$4 sm:$0xff]   ;;  %v17007_v9 = vld [vmem:[#allocation9 + $0x2a4] ss:$24 sps:$4 sm:$0xff]  }
  0x6c   :  { %517 = vmatpush1.bf16.msra.mxu0 %v14341_v36  ;;  %1342 = vmatpush1.bf16.msra.mxu1 %v14386_v1  ;;  %v14444_v36 = vld [vmem:[#allocation7 + $0x274] ss:$24 sps:$4 sm:$0xff]   ;;  %v14435_v1 = vld [vmem:[#allocation7 + $0x218] ss:$24 sps:$4 sm:$0xff]  }
  0x6d   :  { %170 = vperm.xlu1 %14317, %v108_v29   ;;  %167 = vperm.xlu0 %14316, %v107_v30  }
  0x6e   :  { %518 = vmatprep.subr.bf16.mxu0 %v14342_v37  ;;  %1343 = vmatprep.subr.bf16.mxu1 %v14390_v2  ;;  %v14387_v37 = vld [vmem:[#allocation7 + $0x98] ss:$24 sps:$4 sm:$0xff]  }
  0x70   :  { %519 = vmatpush1.bf16.msra.mxu0 %v14344_v40  ;;  %1344 = vmatpush1.bf16.msra.mxu1 %v14392_v3  ;;  %v14443_v3 = vld [vmem:[#allocation7 + $0x24c] ss:$24 sps:$4 sm:$0xff]  }
  0x71   :  { %176 = vperm.xlu1 %14317, %v110_v34   ;;  %173 = vperm.xlu0 %14316, %v109_v35   ;;  %v14438_v34 = vld [vmem:[#allocation7 + $0x244] ss:$24 sps:$4 sm:$0xff]   ;;  %v14440_v35 = vld [vmem:[#allocation7 + $0x240] ss:$24 sps:$4 sm:$0xff]  }
  0x72   :  { %520 = vmatprep.subr.bf16.mxu0 %v14345_v41  ;;  %1345 = vmatprep.subr.bf16.mxu1 %v14396_v4  ;;  %v14393_v41 = vld [vmem:[#allocation7 + $0xc8] ss:$24 sps:$4 sm:$0xff]  }
  0x74   :  { %521 = vmatpush1.bf16.msra.mxu0 %v14347_v44  ;;  %1346 = vmatpush1.bf16.msra.mxu1 %v14398_v5  ;;  %v14399_v44 = vld [vmem:[#allocation7 + $0xf8] ss:$24 sps:$4 sm:$0xff]  }
  0x75   :  { %182 = vperm.xlu1 %14317, %v112_v38   ;;  %179 = vperm.xlu0 %14316, %v111_v39   ;;  %v14395_v38 = vld [vmem:[#allocation7 + $0xcc] ss:$24 sps:$4 sm:$0xff]  }
  0x76   :  { %522 = vmatprep.subr.bf16.mxu0 %v14348_v45  ;;  %1347 = vmatprep.subr.bf16.mxu1 %v14402_v6  ;;  %v14441_v6 = vld [vmem:[#allocation7 + $0x248] ss:$24 sps:$4 sm:$0xff]  }
  0x78   :  { %523 = vmatpush1.bf16.msra.mxu0 %v14350_v46  ;;  %1348 = vmatpush1.bf16.msra.mxu1 %v14404_v7  ;;  %v14449_v7 = vld [vmem:[#allocation7 + $0x27c] ss:$24 sps:$4 sm:$0xff]  }
  0x79   :  { %188 = vperm.xlu1 %14317, %v114_v42   ;;  %185 = vperm.xlu0 %14316, %v113_v43   ;;  %v14446_v42 = vld [vmem:[#allocation7 + $0x270] ss:$24 sps:$4 sm:$0xff]   ;;  %v14401_v43 = vld [vmem:[#allocation7 + $0xfc] ss:$24 sps:$4 sm:$0xff]  }
  0x7a   :  { %524 = vmatprep.subr.bf16.mxu0 %v14351_v47  ;;  %1349 = vmatprep.subr.bf16.mxu1 %v14408_v8  ;;  %v14407_v47 = vld [vmem:[#allocation7 + $0x12c] ss:$24 sps:$4 sm:$0xff]  }
  0x7c   :  { %525 = vmatpush1.bf16.msra.mxu0 %v14353_v48  ;;  %1350 = vmatpush1.bf16.msra.mxu1 %v14410_v10  ;;  %v14405_v48 = vld [vmem:[#allocation7 + $0x128] ss:$24 sps:$4 sm:$0xff]   ;;  %v14447_v10 = vld [vmem:[#allocation7 + $0x278] ss:$24 sps:$4 sm:$0xff]  }
  0x7d   :  { %526 = vmatprep.subr.bf16.mxu0 %v14354_v49  ;;  %1351 = vmatprep.subr.bf16.mxu1 %v14414_v11  ;;  %v14413_v49 = vld [vmem:[#allocation7 + $0x15c] ss:$24 sps:$4 sm:$0xff]  }
  0x80   :  { %527 = vmatpush1.bf16.msra.mxu0 %v14356_v50  ;;  %1352 = vmatpush1.bf16.msra.mxu1 %v14416_v15 }
  0x81   :  { %528 = vmatprep.subr.bf16.mxu0 %v14357_v51  ;;  %1353 = vmatprep.subr.bf16.mxu1 %v14420_v16 }
  0x84   :  { %529 = vmatpush1.bf16.msra.mxu0 %v14359_v52  ;;  %1354 = vmatpush1.bf16.msra.mxu1 %v14422_v20  ;;  %v14411_v52 = vld [vmem:[#allocation7 + $0x158] ss:$24 sps:$4 sm:$0xff]   ;;  %v14455_v20 = vld [vmem:[#allocation7 + $0x2ac] ss:$24 sps:$4 sm:$0xff]  }
  0x85   :  { %530 = vmatprep.subr.bf16.mxu0 %v14360_v53  ;;  %1355 = vmatprep.subr.bf16.mxu1 %v14426_v22  ;;  %v14419_v53 = vld [vmem:[#allocation7 + $0x18c] ss:$24 sps:$4 sm:$0xff]   ;;  %v14453_v22 = vld [vmem:[#allocation7 + $0x2a8] ss:$24 sps:$4 sm:$0xff]  }
  0x88   :  { %531 = vmatpush1.bf16.msra.mxu0 %v14362_v54  ;;  %1356 = vmatpush1.bf16.msra.mxu1 %v14428_v26  ;;  %v14417_v54 = vld [vmem:[#allocation7 + $0x188] ss:$24 sps:$4 sm:$0xff]   ;;  %v14459_v26 = vld [vmem:[#allocation7 + $0x2d8] ss:$24 sps:$4 sm:$0xff]  }
  0x89   :  { %532 = vmatprep.subr.bf16.mxu0 %v14363_v55  ;;  %1357 = vmatprep.subr.bf16.mxu1 %v14432_v28 }
  0x8c   :  { %533 = vmatpush1.bf16.msra.mxu0 %v14365_v56  ;;  %1358 = vmatpush1.bf16.msra.mxu1 %v14434_v32 }
  0x8d   :  { %1488 = vmatprep.subr.bf16.mxu0 %v14371_v59  ;;  %1359 = vmatprep.subr.bf16.mxu1 %v14438_v34  ;;  %v14431_v59 = vld [vmem:[#allocation7 + $0x1ec] ss:$24 sps:$4 sm:$0xff]  }
  0x90   :  { %1360 = vmatpush1.bf16.msra.mxu1 %v14440_v35 }
  0x91   :  { %1361 = vmatprep.subr.bf16.mxu1 %v14444_v36 }
  0x94   :  { %1362 = vmatpush1.bf16.msra.mxu1 %v14446_v42 }
  0xcc   :  { %v126_v13 = vpop.permute.xlu1 %125  ;;  %v120_v14 = vpop.permute.xlu0 %119 }
  0xcd   :  { %vm195_vm0 = vcmp.eq.s32.totalorder %v16484_v17, %v126_v13  ;;  %vm190_vm4 = vcmp.eq.s32.totalorder %v16481_v12, %v120_v14  ;;  %vm191_vm7 = vcmp.eq.s32.totalorder %v16484_v17, %v120_v14  ;;  %vm194_vm9 = vcmp.eq.s32.totalorder %v16481_v12, %v126_v13 }
  0xd0   :  { %v129_v18 = vpop.permute.xlu1 %128  ;;  %v123_v19 = vpop.permute.xlu0 %122 }
  0xd1   :  { %vm197_vm1 = vcmp.eq.s32.totalorder %v16484_v17, %v129_v18  ;;  %vm192_vm2 = vcmp.eq.s32.totalorder %v16481_v12, %v123_v19  ;;  %vm193_vm3 = vcmp.eq.s32.totalorder %v16484_v17, %v123_v19  ;;  %vm196_vm10 = vcmp.eq.s32.totalorder %v16481_v12, %v129_v18  ;;  %v14450_v19 = vld [vmem:[#allocation7 + $0x2a4] ss:$24 sps:$4 sm:$0xff]  }
  0xd2   :  { %vm12594_vm5 = vmpackc.low %vm197_vm1, %vm195_vm0  ;;  %1363 = vmatprep.subr.bf16.mxu1 %v14450_v19 }
  0xd3   :  { %vm12592_vm6 = vmpackc.low %vm192_vm2, %vm190_vm4 }
  0xd4   :  { %vm12590_vm8 = vmpackc.low %vm193_vm3, %vm191_vm7  ;;  %v135_v29 = vpop.permute.xlu1 %134  ;;  %v132_v30 = vpop.permute.xlu0 %131 }
  0xd5   :  { %12591 = vmatprep.mubr.msk.bf16.mxu0 %vm12590_vm8, %v16281_v24  ;;  %vm201_vm11 = vcmp.eq.s32.totalorder %v16484_v17, %v135_v29  ;;  %vm199_vm12 = vcmp.eq.s32.totalorder %v16484_v17, %v132_v30  ;;  %vm12596_vm13 = vmpackc.low %vm196_vm10, %vm194_vm9  ;;  %vm200_vm15 = vcmp.eq.s32.totalorder %v16481_v12, %v135_v29  ;;  %vm198_vm0 = vcmp.eq.s32.totalorder %v16481_v12, %v132_v30 }
  0xd6   :  { %12593 = vmatmul.mubr.msk.bf16.vlgmr.msra.gmra.mrb[0].mxu0 %vm12592_vm6, %v16281_v24  ;;  %vm12598_vm14 = vmpackc.low %vm201_vm11, %vm199_vm12 }
  0xd7   :  { %12595 = vmatprep.mubr.msk.bf16.mxu0 %vm12594_vm5, %v16281_v24  ;;  %1489 = vmatpush1.bf16.msra.mxu0 %v14369_v21  ;;  %vm12600_vm3 = vmpackc.low %vm200_vm15, %vm198_vm0  ;;  %v14452_v21 = vld [vmem:[#allocation7 + $0x2a0] ss:$24 sps:$4 sm:$0xff]  }
  0xd8   :  { %1490 = vmatprep.subr.bf16.mxu0 %v14377_v23  ;;  %v141_v39 = vpop.permute.xlu1 %140  ;;  %v138_v40 = vpop.permute.xlu0 %137  ;;  %1364 = vmatpush1.bf16.msra.mxu1 %v14452_v21  ;;  %v14461_v23 = vld [vmem:[#allocation7 + $0x2dc] ss:$24 sps:$4 sm:$0xff]  }
  0xd9   :  { %vm205_vm1 = vcmp.eq.s32.totalorder %v16484_v17, %v141_v39  ;;  %vm203_vm2 = vcmp.eq.s32.totalorder %v16484_v17, %v138_v40  ;;  %vm204_vm5 = vcmp.eq.s32.totalorder %v16481_v12, %v141_v39  ;;  %vm202_vm6 = vcmp.eq.s32.totalorder %v16481_v12, %v138_v40  ;;  %v14542_v21 = vld [vmem:[#allocation9 + $0x14] ss:$24 sps:$4 sm:$0xff]  }
  0xda   :  { %vm12602_vm4 = vmpackc.low %vm205_vm1, %vm203_vm2 }
  0xdb   :  { %1491 = vmatpush1.bf16.msra.mxu0 %v14375_v25  ;;  %vm12604_vm9 = vmpackc.low %vm204_vm5, %vm202_vm6  ;;  %v14458_v25 = vld [vmem:[#allocation7 + $0x2d0] ss:$24 sps:$4 sm:$0xff]  }
  0xdc   :  { %1492 = vmatprep.subr.bf16.mxu0 %v14383_v27  ;;  %v147_v45 = vpop.permute.xlu1 %146  ;;  %v144_v46 = vpop.permute.xlu0 %143 }
  0xdd   :  { %vm209_vm7 = vcmp.eq.s32.totalorder %v16484_v17, %v147_v45  ;;  %vm207_vm8 = vcmp.eq.s32.totalorder %v16484_v17, %v144_v46  ;;  %vm208_vm11 = vcmp.eq.s32.totalorder %v16481_v12, %v147_v45  ;;  %vm206_vm12 = vcmp.eq.s32.totalorder %v16481_v12, %v144_v46  ;;  %v14470_v45 = vld [vmem:[#allocation7 + $0x74] ss:$24 sps:$4 sm:$0xff]  }
  0xde   :  { %12597 = vmatmul.mubr.msk.bf16.gmra.mrb[4].mxu0 %vm12596_vm13, %v16281_v24  ;;  %vm12606_vm10 = vmpackc.low %vm209_vm7, %vm207_vm8 }
  0xdf   :  { %12599 = vmatprep.mubr.msk.bf16.mxu0 %vm12598_vm14, %v16281_v24  ;;  %1493 = vmatpush1.bf16.msra.mxu0 %v14381_v31  ;;  %vm12608_vm15 = vmpackc.low %vm208_vm11, %vm206_vm12 }
  0xe0   :  { %1494 = vmatprep.subr.bf16.mxu0 %v14389_v33  ;;  %v153_v50 = vpop.permute.xlu1 %152  ;;  %v150_v51 = vpop.permute.xlu0 %149 }
  0xe1   :  { %vm213_vm13 = vcmp.eq.s32.totalorder %v16484_v17, %v153_v50  ;;  %vm211_vm14 = vcmp.eq.s32.totalorder %v16484_v17, %v150_v51  ;;  %vm212_vm0 = vcmp.eq.s32.totalorder %v16481_v12, %v153_v50  ;;  %vm210_vm1 = vcmp.eq.s32.totalorder %v16481_v12, %v150_v51  ;;  %v14468_v50 = vld [vmem:[#allocation7 + $0x70] ss:$24 sps:$4 sm:$0xff]   ;;  %v14473_v51 = vld [vmem:[#allocation7 + $0xa4] ss:$24 sps:$4 sm:$0xff]  }
  0xe2   :  { %vm12610_vm2 = vmpackc.low %vm213_vm13, %vm211_vm14 }
  0xe3   :  { %1495 = vmatpush1.bf16.msra.mxu0 %v14387_v37  ;;  %vm12612_vm5 = vmpackc.low %vm212_vm0, %vm210_vm1  ;;  %v14462_v37 = vld [vmem:[#allocation7 + $0x10] ss:$24 sps:$4 sm:$0xff]  }
  0xe4   :  { %1496 = vmatprep.subr.bf16.mxu0 %v14395_v38  ;;  %v159_v55 = vpop.permute.xlu1 %158  ;;  %v156_v56 = vpop.permute.xlu0 %155 }
  0xe5   :  { %vm216_vm6 = vcmp.eq.s32.totalorder %v16481_v12, %v159_v55  ;;  %vm214_vm7 = vcmp.eq.s32.totalorder %v16481_v12, %v156_v56 }
  0xe6   :  { %12601 = vmatmul.mubr.msk.bf16.gmra.mrb[8].mxu0 %vm12600_vm3, %v16281_v24  ;;  %vm217_vm3 = vcmp.eq.s32.totalorder %v16484_v17, %v159_v55  ;;  %vm16527_vm11 = vmpackc.low %vm216_vm6, %vm214_vm7  ;;  %v14471_v55 = vld [vmem:[#allocation7 + $0xa0] ss:$24 sps:$4 sm:$0xff]  }
  0xe7   :  { %12603 = vmatprep.mubr.msk.bf16.mxu0 %vm12602_vm4, %v16281_v24  ;;  %1497 = vmatpush1.bf16.msra.mxu0 %v14393_v41  ;;  %vm215_vm4 = vcmp.eq.s32.totalorder %v16484_v17, %v156_v56  ;;  %v14465_v41 = vld [vmem:[#allocation7 + $0x40] ss:$24 sps:$4 sm:$0xff]  }
  0xe8   :  { %1498 = vmatprep.subr.bf16.mxu0 %v14401_v43  ;;  %v165_v60 = vpop.permute.xlu1 %164  ;;  %v162_v61 = vpop.permute.xlu0 %161  ;;  %vm12614_vm8 = vmpackc.low %vm217_vm3, %vm215_vm4 }
  0xe9   :  { %vm220_vm13 = vcmp.eq.s32.totalorder %v16481_v12, %v165_v60  ;;  %vm218_vm14 = vcmp.eq.s32.totalorder %v16481_v12, %v162_v61 }
  0xea   :  { %vm16541_vm1 = vmpackc.low %vm220_vm13, %vm218_vm14 }
  0xeb   :  { %1499 = vmatpush1.bf16.msra.mxu0 %v14399_v44 }
  0xec   :  { %1500 = vmatprep.subr.bf16.mxu0 %v14407_v47  ;;  %v171_v4 = vpop.permute.xlu1 %170  ;;  %v168_v5 = vpop.permute.xlu0 %167 }
  0xed   :  { %vm223_vm0 = vcmp.eq.s32.totalorder %v16484_v17, %v168_v5  ;;  %vm224_vm3 = vcmp.eq.s32.totalorder %v16481_v12, %v171_v4  ;;  %vm222_vm4 = vcmp.eq.s32.totalorder %v16481_v12, %v168_v5  ;;  %v14477_v5 = vld [vmem:[#allocation7 + $0x100] ss:$24 sps:$4 sm:$0xff]  }
  0xee   :  { %12605 = vmatmul.mubr.msk.bf16.gmra.mrb[12].mxu0 %vm12604_vm9, %v16281_v24  ;;  %vm221_vm9 = vcmp.eq.s32.totalorder %v16484_v17, %v165_v60  ;;  %vm12624_vm7 = vmpackc.low %vm224_vm3, %vm222_vm4 }
  0xef   :  { %12607 = vmatprep.mubr.msk.bf16.mxu0 %vm12606_vm10, %v16281_v24  ;;  %1501 = vmatpush1.bf16.msra.mxu0 %v14405_v48  ;;  %vm219_vm10 = vcmp.eq.s32.totalorder %v16484_v17, %v162_v61 }
  0xf0   :  { %1502 = vmatprep.subr.bf16.mxu0 %v14413_v49  ;;  %vm16531_vm12 = vmpackc.low %vm221_vm9, %vm219_vm10  ;;  %v177_v11 = vpop.permute.xlu1 %176  ;;  %v174_v13 = vpop.permute.xlu0 %173 }
  0xf1   :  { %vm227_vm6 = vcmp.eq.s32.totalorder %v16484_v17, %v174_v13  ;;  %vm228_vm9 = vcmp.eq.s32.totalorder %v16481_v12, %v177_v11  ;;  %vm226_vm10 = vcmp.eq.s32.totalorder %v16481_v12, %v174_v13 }
  0xf2   :  { %vm12628_vm13 = vmpackc.low %vm228_vm9, %vm226_vm10 }
  0xf3   :  { %1503 = vmatpush1.bf16.msra.mxu0 %v14411_v52 }
  0xf4   :  { %1504 = vmatprep.subr.bf16.mxu0 %v14419_v53  ;;  %v183_v14 = vpop.permute.xlu1 %182  ;;  %v180_v15 = vpop.permute.xlu0 %179 }
  0xf6   :  { %12609 = vmatmul.mubr.msk.bf16.gmra.mrb[16].mxu0 %vm12608_vm15, %v16281_v24  ;;  %vm225_vm15 = vcmp.eq.s32.totalorder %v16484_v17, %v171_v4 }
  0xf7   :  { %12611 = vmatprep.mubr.msk.bf16.mxu0 %vm12610_vm2, %v16281_v24  ;;  %1505 = vmatpush1.bf16.msra.mxu0 %v14417_v54  ;;  %vm12622_vm2 = vmpackc.low %vm225_vm15, %vm223_vm0  ;;  %vm232_vm15 = vcmp.eq.s32.totalorder %v16481_v12, %v183_v14  ;;  %vm230_vm0 = vcmp.eq.s32.totalorder %v16481_v12, %v180_v15 }
  0xf8   :  { %1506 = vmatprep.subr.bf16.mxu0 %v14425_v57  ;;  %v189_v16 = vpop.permute.xlu1 %188  ;;  %v186_v18 = vpop.permute.xlu0 %185  ;;  %vm12632_vm3 = vmpackc.low %vm232_vm15, %vm230_vm0 }
  0xfb   :  { %1507 = vmatpush1.bf16.msra.mxu0 %v14423_v58 }
  0xfc   :  { %1508 = vmatprep.subr.bf16.mxu0 %v14431_v59  ;;  %v14476_v59 = vld [vmem:[#allocation7 + $0xd4] ss:$24 sps:$4 sm:$0xff]  }
  0xfe   :  { %12613 = vmatmul.mubr.msk.bf16.gmra.mrb[20].mxu0 %vm12612_vm5, %v16281_v24  ;;  %vm229_vm5 = vcmp.eq.s32.totalorder %v16484_v17, %v177_v11 }
  0xff   :  { %12615 = vmatprep.mubr.msk.bf16.mxu0 %vm12614_vm8, %v16281_v24  ;;  %1509 = vmatpush1.bf16.msra.mxu0 %v14429_v62  ;;  %vm12626_vm8 = vmpackc.low %vm229_vm5, %vm227_vm6  ;;  %vm236_vm5 = vcmp.eq.s32.totalorder %v16481_v12, %v189_v16  ;;  %vm234_vm6 = vcmp.eq.s32.totalorder %v16481_v12, %v186_v18  ;;  %v14464_v12 = vld [vmem:[#allocation7 + $0x14] ss:$24 sps:$4 sm:$0xff]  }
 0x100   :  { %1510 = vmatprep.subr.bf16.mxu0 %v14437_v63 }
 0x103   :  { %1511 = vmatpush1.bf16.msra.mxu0 %v14435_v1  ;;  %v14479_v1 = vld [vmem:[#allocation7 + $0x104] ss:$24 sps:$4 sm:$0xff]  }
 0x104   :  { %1512 = vmatprep.subr.bf16.mxu0 %v14443_v3 }
 0x106   :  { %12617 = vmatmul.mubr.msk.bf16.gmra.mrb[24].mxu0 %vm16527_vm11, %v16281_v24  ;;  %vm233_vm11 = vcmp.eq.s32.totalorder %v16484_v17, %v183_v14 }
 0x107   :  { %12619 = vmatprep.mubr.msk.bf16.mxu0 %vm16531_vm12, %v16281_v24  ;;  %1513 = vmatpush1.bf16.msra.mxu0 %v14441_v6  ;;  %vm231_vm12 = vcmp.eq.s32.totalorder %v16484_v17, %v180_v15 }
 0x108   :  { %1514 = vmatprep.subr.bf16.mxu0 %v14449_v7  ;;  %vm12630_vm14 = vmpackc.low %vm233_vm11, %vm231_vm12 }
 0x10b   :  { %1515 = vmatpush1.bf16.msra.mxu0 %v14447_v10  ;;  %v14482_v10 = vld [vmem:[#allocation7 + $0x134] ss:$24 sps:$4 sm:$0xff]  }
 0x10c   :  { %1516 = vmatprep.subr.bf16.mxu0 %v14455_v20 }
 0x10e   :  { %12621 = vmatmul.mubr.msk.bf16.gmra.mrb[28].mxu0 %vm16541_vm1, %v16281_v24  ;;  %vm237_vm1 = vcmp.eq.s32.totalorder %v16484_v17, %v189_v16  ;;  %v14480_v16 = vld [vmem:[#allocation7 + $0x130] ss:$24 sps:$4 sm:$0xff]  }
 0x10f   :  { %12623 = vmatprep.mubr.msk.bf16.mxu0 %vm12622_vm2, %v16281_v24  ;;  %vm235_vm2 = vcmp.eq.s32.totalorder %v16484_v17, %v186_v18  ;;  %1517 = vmatpush1.bf16.msra.mxu0 %v14453_v22  ;;  %v14456_v17 = vld [vmem:[#allocation7 + $0x2d4] ss:$24 sps:$4 sm:$0xff]   ;;  %v14485_v18 = vld [vmem:[#allocation7 + $0x164] ss:$24 sps:$4 sm:$0xff]  }
 0x110   :  { %vm12634_vm4 = vmpackc.low %vm237_vm1, %vm235_vm2  ;;  %1365 = vmatprep.subr.bf16.mxu1 %v14456_v17  ;;  %1518 = vmatprep.subr.bf16.mxu0 %v14461_v23  ;;  %v14483_v17 = vld [vmem:[#allocation7 + $0x160] ss:$24 sps:$4 sm:$0xff]   ;;  %v14540_v23 = vld [vmem:[#allocation9 + $0x10] ss:$24 sps:$4 sm:$0xff]  }
 0x111   :  { %1366 = vmatpush1.bf16.msra.mxu1 %v14458_v25 }
 0x112   :  { %1641 = vmatprep.subr.bf16.mxu1 %v14464_v12 }
 0x113   :  { %1519 = vmatpush1.bf16.msra.mxu0 %v14459_v26 }
 0x114   :  { %2650 = vmatprep.subr.bf16.mxu0 %v14542_v21 }
 0x116   :  { %12625 = vmatmul.mubr.msk.bf16.gmra.mrb[32].mxu0 %vm12624_vm7, %v16281_v24  ;;  %vm12636_vm7 = vmpackc.low %vm236_vm5, %vm234_vm6 }
 0x117   :  { %12627 = vmatprep.mubr.msk.bf16.mxu0 %vm12626_vm8, %v16281_v24 }
 0x11e   :  { %12629 = vmatmul.mubr.msk.bf16.gmra.mrb[36].mxu0 %vm12628_vm13, %v16281_v24 }
 0x11f   :  { %12631 = vmatprep.mubr.msk.bf16.mxu0 %vm12630_vm14, %v16281_v24 }
 0x126   :  { %12633 = vmatmul.mubr.msk.bf16.gmra.mrb[40].mxu0 %vm12632_vm3, %v16281_v24 }
 0x127   :  { %12635 = vmatprep.mubr.msk.bf16.mxu0 %vm12634_vm4, %v16281_v24 }
 0x12e   :  { %12637 = vmatmul.mubr.msk.bf16.gmra.mrb[44].mxu0 %vm12636_vm7, %v16281_v24  ;;  %v14467_v24 = vld [vmem:[#allocation7 + $0x44] ss:$24 sps:$4 sm:$0xff]  }
 0x1a9   :  { %v536_v27 = vpop.f32.mrb[0].mxu0 }
 0x1aa   :  { %v538_v28 = vpop.f32.mrb[1].mxu0  ;;  %v655_v30 = vmax.f32 %v536_v27, 0.0  ;;  %v14488_v27 = vld [vmem:[#allocation7 + $0x194] ss:$24 sps:$4 sm:$0xff]  }
 0x1ab   :  { %v540_v29 = vpop.f32.mrb[2].mxu0  ;;  %v656_v33 = vmax.f32 %v538_v28, 0.0 }
 0x1ac   :  { %v657_v31 = vmax.f32 %v540_v29, 0.0  ;;  %v542_v32 = vpop.f32.mrb[3].mxu0 }
 0x1ad   :  { %v658_v34 = vmax.f32 %v542_v32, 0.0 }
 0x1ae   :  { %v16576_v35 = vpack.c.bf16 %v657_v31, %v655_v30  ;;  %v14548_v30 = vld [vmem:[#allocation9 + $0x44] ss:$24 sps:$4 sm:$0xff]  }
 0x1af   :  { %v16578_v36 = vpack.c.bf16 %v658_v34, %v656_v33  ;;  %v14486_v33 = vld [vmem:[#allocation7 + $0x190] ss:$24 sps:$4 sm:$0xff]   ;;  %v14546_v34 = vld [vmem:[#allocation9 + $0x40] ss:$24 sps:$4 sm:$0xff]  }
 0x1b1   :  { %v546_v38 = vpop.f32.mrb[4].mxu0  ;;  %1367 = vmatprep.mubr.bf16.mxu1 %v16578_v36  ;;  %1520 = vmatprep.mubr.bf16.mxu0 %v16578_v36 }
 0x1b2   :  { %v548_v39 = vpop.f32.mrb[5].mxu0  ;;  %1368 = vmatmul.mubr.bf16.vlgmr.msra.gmra.mrb[0].mxu1 %v16576_v35  ;;  %1521 = vmatmul.mubr.bf16.vlgmr.msra.gmra.mrb[48].mxu0 %v16576_v35  ;;  %v659_v42 = vmax.f32 %v546_v38, 0.0 }
 0x1b3   :  { %1642 = vmatpush1.bf16.msra.mxu1 %v14462_v37  ;;  %v550_v40 = vpop.f32.mrb[6].mxu0  ;;  %v660_v46 = vmax.f32 %v548_v39, 0.0  ;;  %2651 = vmatpush1.bf16.msra.mxu0 %v14540_v23  ;;  %v14491_v37 = vld [vmem:[#allocation7 + $0x1c4] ss:$24 sps:$4 sm:$0xff]   ;;  %v14554_v39 = vld [vmem:[#allocation9 + $0x74] ss:$24 sps:$4 sm:$0xff]  }
 0x1b4   :  { %v661_v43 = vmax.f32 %v550_v40, 0.0  ;;  %v552_v44 = vpop.f32.mrb[7].mxu0  ;;  %1643 = vmatprep.subr.bf16.mxu1 %v14467_v24  ;;  %2652 = vmatprep.subr.bf16.mxu0 %v14548_v30 }
 0x1b5   :  { %v662_v47 = vmax.f32 %v552_v44, 0.0 }
 0x1b6   :  { %v16584_v48 = vpack.c.bf16 %v661_v43, %v659_v42  ;;  %v14494_v42 = vld [vmem:[#allocation7 + $0x1f4] ss:$24 sps:$4 sm:$0xff]  }
 0x1b7   :  { %v16586_v49 = vpack.c.bf16 %v662_v47, %v660_v46  ;;  %1644 = vmatpush1.bf16.msra.mxu1 %v14465_v41  ;;  %v14489_v41 = vld [vmem:[#allocation7 + $0x1c0] ss:$24 sps:$4 sm:$0xff]   ;;  %2653 = vmatpush1.bf16.msra.mxu0 %v14546_v34  ;;  %v14552_v46 = vld [vmem:[#allocation9 + $0x70] ss:$24 sps:$4 sm:$0xff]  }
 0x1b8   :  { %1645 = vmatprep.subr.bf16.mxu1 %v14470_v45  ;;  %2654 = vmatprep.subr.bf16.mxu0 %v14554_v39  ;;  %v14504_v34 = vld [vmem:[#allocation7 + $0x2b0] ss:$24 sps:$4 sm:$0xff]  }
 0x1b9   :  { %v556_v52 = vpop.f32.mrb[8].mxu0  ;;  %1377 = vmatprep.mubr.bf16.mxu1 %v16586_v49  ;;  %1530 = vmatprep.mubr.bf16.mxu0 %v16586_v49 }
 0x1ba   :  { %v558_v53 = vpop.f32.mrb[9].mxu0  ;;  %1378 = vmatmul.mubr.bf16.gmra.mrb[4].mxu1 %v16584_v48  ;;  %1531 = vmatmul.mubr.bf16.gmra.mrb[52].mxu0 %v16584_v48  ;;  %v663_v56 = vmax.f32 %v556_v52, 0.0 }
 0x1bb   :  { %v560_v54 = vpop.f32.mrb[10].mxu0  ;;  %1646 = vmatpush1.bf16.msra.mxu1 %v14468_v50  ;;  %v664_v60 = vmax.f32 %v558_v53, 0.0  ;;  %2655 = vmatpush1.bf16.msra.mxu0 %v14552_v46 }
 0x1bc   :  { %v665_v57 = vmax.f32 %v560_v54, 0.0  ;;  %v562_v58 = vpop.f32.mrb[11].mxu0  ;;  %1647 = vmatprep.subr.bf16.mxu1 %v14473_v51  ;;  %v14557_v51 = vld [vmem:[#allocation9 + $0xa4] ss:$24 sps:$4 sm:$0xff]   ;;  %v14492_v54 = vld [vmem:[#allocation7 + $0x1f0] ss:$24 sps:$4 sm:$0xff]  }
 0x1bd   :  { %v666_v61 = vmax.f32 %v562_v58, 0.0  ;;  %2656 = vmatprep.subr.bf16.mxu0 %v14557_v51 }
 0x1be   :  { %v16592_v62 = vpack.c.bf16 %v665_v57, %v663_v56  ;;  %v14497_v56 = vld [vmem:[#allocation7 + $0x224] ss:$24 sps:$4 sm:$0xff]  }
 0x1bf   :  { %v16594_v63 = vpack.c.bf16 %v666_v61, %v664_v60  ;;  %1648 = vmatpush1.bf16.msra.mxu1 %v14471_v55  ;;  %v14555_v55 = vld [vmem:[#allocation9 + $0xa0] ss:$24 sps:$4 sm:$0xff]  }
 0x1c0   :  { %1649 = vmatprep.subr.bf16.mxu1 %v14476_v59  ;;  %v14563_v59 = vld [vmem:[#allocation9 + $0xd4] ss:$24 sps:$4 sm:$0xff]   ;;  %v14495_v61 = vld [vmem:[#allocation7 + $0x220] ss:$24 sps:$4 sm:$0xff]   ;;  %2657 = vmatpush1.bf16.msra.mxu0 %v14555_v55 }
 0x1c1   :  { %v566_v2 = vpop.f32.mrb[12].mxu0  ;;  %1387 = vmatprep.mubr.bf16.mxu1 %v16594_v63  ;;  %1540 = vmatprep.mubr.bf16.mxu0 %v16594_v63 }
 0x1c2   :  { %v568_v3 = vpop.f32.mrb[13].mxu0  ;;  %1388 = vmatmul.mubr.bf16.gmra.mrb[8].mxu1 %v16592_v62  ;;  %1541 = vmatmul.mubr.bf16.gmra.mrb[56].mxu0 %v16592_v62  ;;  %v667_v6 = vmax.f32 %v566_v2, 0.0 }
 0x1c3   :  { %v570_v4 = vpop.f32.mrb[14].mxu0  ;;  %1650 = vmatpush1.bf16.msra.mxu1 %v14474_v0  ;;  %v668_v11 = vmax.f32 %v568_v3, 0.0  ;;  %v14561_v0 = vld [vmem:[#allocation9 + $0xd0] ss:$24 sps:$4 sm:$0xff]   ;;  %2658 = vmatprep.subr.bf16.mxu0 %v14563_v59 }
 0x1c4   :  { %v669_v7 = vmax.f32 %v570_v4, 0.0  ;;  %v572_v8 = vpop.f32.mrb[15].mxu0  ;;  %1651 = vmatprep.subr.bf16.mxu1 %v14479_v1  ;;  %v14500_v4 = vld [vmem:[#allocation7 + $0x254] ss:$24 sps:$4 sm:$0xff]   ;;  %2659 = vmatpush1.bf16.msra.mxu0 %v14561_v0 }
 0x1c5   :  { %v670_v13 = vmax.f32 %v572_v8, 0.0  ;;  %v14593_v0 = vld [vmem:[#allocation9 + $0x1f4] ss:$24 sps:$4 sm:$0xff]  }
 0x1c6   :  { %v16600_v14 = vpack.c.bf16 %v669_v7, %v667_v6  ;;  %v14569_v7 = vld [vmem:[#allocation9 + $0x104] ss:$24 sps:$4 sm:$0xff]  }
 0x1c7   :  { %v16602_v15 = vpack.c.bf16 %v670_v13, %v668_v11  ;;  %1652 = vmatpush1.bf16.msra.mxu1 %v14477_v5  ;;  %v14498_v11 = vld [vmem:[#allocation7 + $0x250] ss:$24 sps:$4 sm:$0xff]   ;;  %v14567_v13 = vld [vmem:[#allocation9 + $0x100] ss:$24 sps:$4 sm:$0xff]   ;;  %2660 = vmatprep.subr.bf16.mxu0 %v14569_v7 }
 0x1c8   :  { %1653 = vmatprep.subr.bf16.mxu1 %v14482_v10  ;;  %2661 = vmatpush1.bf16.msra.mxu0 %v14567_v13  ;;  %v14597_v13 = vld [vmem:[#allocation9 + $0x220] ss:$24 sps:$4 sm:$0xff]  }
 0x1c9   :  { %v576_v19 = vpop.f32.mrb[16].mxu0  ;;  %1397 = vmatprep.mubr.bf16.mxu1 %v16602_v15  ;;  %1550 = vmatprep.mubr.bf16.mxu0 %v16602_v15 }
 0x1ca   :  { %v578_v20 = vpop.f32.mrb[17].mxu0  ;;  %1398 = vmatmul.mubr.bf16.gmra.mrb[12].mxu1 %v16600_v14  ;;  %1551 = vmatmul.mubr.bf16.gmra.mrb[60].mxu0 %v16600_v14  ;;  %v671_v25 = vmax.f32 %v576_v19, 0.0 }
 0x1cb   :  { %v580_v22 = vpop.f32.mrb[18].mxu0  ;;  %1654 = vmatpush1.bf16.msra.mxu1 %v14480_v16  ;;  %v672_v28 = vmax.f32 %v578_v20, 0.0  ;;  %v14503_v16 = vld [vmem:[#allocation7 + $0x284] ss:$24 sps:$4 sm:$0xff]   ;;  %v14572_v20 = vld [vmem:[#allocation9 + $0x134] ss:$24 sps:$4 sm:$0xff]  }
 0x1cc   :  { %v673_v26 = vmax.f32 %v580_v22, 0.0  ;;  %v582_v12 = vpop.f32.mrb[19].mxu0  ;;  %1655 = vmatprep.subr.bf16.mxu1 %v14485_v18  ;;  %v14501_v22 = vld [vmem:[#allocation7 + $0x280] ss:$24 sps:$4 sm:$0xff]   ;;  %2662 = vmatprep.subr.bf16.mxu0 %v14572_v20  ;;  %v14605_v20 = vld [vmem:[#allocation9 + $0x254] ss:$24 sps:$4 sm:$0xff]  }
 0x1cd   :  { %v674_v29 = vmax.f32 %v582_v12, 0.0  ;;  %v14506_v12 = vld [vmem:[#allocation7 + $0x2b4] ss:$24 sps:$4 sm:$0xff]  }
 0x1ce   :  { %v16608_v31 = vpack.c.bf16 %v673_v26, %v671_v25 }
 0x1cf   :  { %v16610_v32 = vpack.c.bf16 %v674_v29, %v672_v28  ;;  %1656 = vmatpush1.bf16.msra.mxu1 %v14483_v17  ;;  %v14570_v17 = vld [vmem:[#allocation9 + $0x130] ss:$24 sps:$4 sm:$0xff]   ;;  %v14578_v29 = vld [vmem:[#allocation9 + $0x164] ss:$24 sps:$4 sm:$0xff]  }
 0x1d0   :  { %1657 = vmatprep.subr.bf16.mxu1 %v14488_v27  ;;  %2663 = vmatpush1.bf16.msra.mxu0 %v14570_v17 }
 0x1d1   :  { %v586_v24 = vpop.f32.mrb[20].mxu0  ;;  %1407 = vmatprep.mubr.bf16.mxu1 %v16610_v32  ;;  %1560 = vmatprep.mubr.bf16.mxu0 %v16610_v32 }
 0x1d2   :  { %v588_v38 = vpop.f32.mrb[21].mxu0  ;;  %1408 = vmatmul.mubr.bf16.gmra.mrb[16].mxu1 %v16608_v31  ;;  %1561 = vmatmul.mubr.bf16.gmra.mrb[64].mxu0 %v16608_v31  ;;  %v675_v43 = vmax.f32 %v586_v24, 0.0  ;;  %v14509_v24 = vld [vmem:[#allocation7 + $0x2e4] ss:$24 sps:$4 sm:$0xff]  }
 0x1d3   :  { %v590_v40 = vpop.f32.mrb[22].mxu0  ;;  %1658 = vmatpush1.bf16.msra.mxu1 %v14486_v33  ;;  %v676_v47 = vmax.f32 %v588_v38, 0.0  ;;  %2664 = vmatprep.subr.bf16.mxu0 %v14578_v29  ;;  %v14609_v29 = vld [vmem:[#allocation9 + $0x280] ss:$24 sps:$4 sm:$0xff]  }
 0x1d4   :  { %v677_v44 = vmax.f32 %v590_v40, 0.0  ;;  %v592_v45 = vpop.f32.mrb[23].mxu0  ;;  %1659 = vmatprep.subr.bf16.mxu1 %v14491_v37  ;;  %v14576_v37 = vld [vmem:[#allocation9 + $0x160] ss:$24 sps:$4 sm:$0xff]  }
 0x1d5   :  { %v678_v50 = vmax.f32 %v592_v45, 0.0  ;;  %v14507_v40 = vld [vmem:[#allocation7 + $0x2e0] ss:$24 sps:$4 sm:$0xff]   ;;  %2665 = vmatpush1.bf16.msra.mxu0 %v14576_v37 }
 0x1d6   :  { %v16616_v52 = vpack.c.bf16 %v677_v44, %v675_v43  ;;  %v14582_v43 = vld [vmem:[#allocation9 + $0x190] ss:$24 sps:$4 sm:$0xff]   ;;  %v14584_v44 = vld [vmem:[#allocation9 + $0x194] ss:$24 sps:$4 sm:$0xff]  }
 0x1d7   :  { %v16618_v53 = vpack.c.bf16 %v678_v50, %v676_v47  ;;  %1660 = vmatpush1.bf16.msra.mxu1 %v14489_v41  ;;  %v16640_v41 = vld [vmem:[#allocation9 + $0x4] ss:$24 sps:$4 sm:$0xff]   ;;  %2666 = vmatprep.subr.bf16.mxu0 %v14584_v44 }
 0x1d8   :  { %1661 = vmatprep.subr.bf16.mxu1 %v14494_v42  ;;  %v14587_v50 = vld [vmem:[#allocation9 + $0x1c4] ss:$24 sps:$4 sm:$0xff]  }
 0x1d9   :  { %v596_v57 = vpop.f32.mrb[24].mxu0  ;;  %1417 = vmatprep.mubr.bf16.mxu1 %v16618_v53  ;;  %1570 = vmatprep.mubr.bf16.mxu0 %v16618_v53 }
 0x1da   :  { %v598_v58 = vpop.f32.mrb[25].mxu0  ;;  %1418 = vmatmul.mubr.bf16.gmra.mrb[20].mxu1 %v16616_v52  ;;  %1571 = vmatmul.mubr.bf16.gmra.mrb[68].mxu0 %v16616_v52  ;;  %v679_v1 = vmax.f32 %v596_v57, 0.0  ;;  %v14585_v57 = vld [vmem:[#allocation9 + $0x1c0] ss:$24 sps:$4 sm:$0xff]  }
 0x1db   :  { %v600_v60 = vpop.f32.mrb[26].mxu0  ;;  %1662 = vmatpush1.bf16.msra.mxu1 %v14492_v54  ;;  %v680_v5 = vmax.f32 %v598_v58, 0.0  ;;  %2667 = vmatpush1.bf16.msra.mxu0 %v14582_v43  ;;  %v14615_v43 = vld [vmem:[#allocation9 + $0x2b0] ss:$24 sps:$4 sm:$0xff]  }
 0x1dc   :  { %v681_v2 = vmax.f32 %v600_v60, 0.0  ;;  %v602_v3 = vpop.f32.mrb[27].mxu0  ;;  %1663 = vmatprep.subr.bf16.mxu1 %v14497_v56  ;;  %2668 = vmatprep.subr.bf16.mxu0 %v14587_v50  ;;  %v16674_v50 = vld [vmem:[%s20005_s1 + $0x8] sm:$0xff] }
 0x1dd   :  { %v682_v6 = vmax.f32 %v602_v3, 0.0 }
 0x1de   :  { %v16624_v8 = vpack.c.bf16 %v681_v2, %v679_v1 }
 0x1df   :  { %v16626_v10 = vpack.c.bf16 %v682_v6, %v680_v5  ;;  %1664 = vmatpush1.bf16.msra.mxu1 %v14495_v61  ;;  %2669 = vmatpush1.bf16.msra.mxu0 %v14585_v57  ;;  %v14591_v61 = vld [vmem:[#allocation9 + $0x1f0] ss:$24 sps:$4 sm:$0xff]   ;;  %v14621_v57 = vld [vmem:[#allocation9 + $0x2e0] ss:$24 sps:$4 sm:$0xff]  }
 0x1e0   :  { %1665 = vmatprep.subr.bf16.mxu1 %v14500_v4  ;;  %2670 = vmatprep.subr.bf16.mxu0 %v14593_v0  ;;  %v16704_v0 = vld [vmem:[#allocation9] ss:$24 sps:$4 sm:$0xff]  }
 0x1e1   :  { %v606_v18 = vpop.f32.mrb[28].mxu0  ;;  %1427 = vmatprep.mubr.bf16.mxu1 %v16626_v10  ;;  %1580 = vmatprep.mubr.bf16.mxu0 %v16626_v10 }
 0x1e2   :  { %v608_v19 = vpop.f32.mrb[29].mxu0  ;;  %1428 = vmatmul.mubr.bf16.gmra.mrb[24].mxu1 %v16624_v8  ;;  %1581 = vmatmul.mubr.bf16.gmra.mrb[72].mxu0 %v16624_v8  ;;  %v683_v23 = vmax.f32 %v606_v18, 0.0 }
 0x1e3   :  { %v610_v21 = vpop.f32.mrb[30].mxu0  ;;  %1666 = vmatpush1.bf16.msra.mxu1 %v14498_v11  ;;  %v684_v27 = vmax.f32 %v608_v19, 0.0  ;;  %2671 = vmatpush1.bf16.msra.mxu0 %v14591_v61  ;;  %v14599_v11 = vld [vmem:[#allocation9 + $0x224] ss:$24 sps:$4 sm:$0xff]  }
 0x1e4   :  { %v685_v25 = vmax.f32 %v610_v21, 0.0  ;;  %v612_v26 = vpop.f32.mrb[31].mxu0  ;;  %1667 = vmatprep.subr.bf16.mxu1 %v14503_v16  ;;  %2672 = vmatprep.subr.bf16.mxu0 %v14599_v11  ;;  %v16701_v61 = vld [vmem:[%s20005_s1 + $0x10] sm:$0xff] }
 0x1e5   :  { %v686_v28 = vmax.f32 %v612_v26, 0.0  ;;  %v16730_v11 = vld [vmem:[#allocation9 + $0x60] ss:$24 sps:$4 sm:$0xff]  }
 0x1e6   :  { %v16632_v30 = vpack.c.bf16 %v685_v25, %v683_v23  ;;  %v14603_v23 = vld [vmem:[#allocation9 + $0x250] ss:$24 sps:$4 sm:$0xff]  }
 0x1e7   :  { %v16634_v33 = vpack.c.bf16 %v686_v28, %v684_v27  ;;  %1668 = vmatpush1.bf16.msra.mxu1 %v14501_v22  ;;  %2673 = vmatpush1.bf16.msra.mxu0 %v14597_v13  ;;  %v14611_v28 = vld [vmem:[#allocation9 + $0x284] ss:$24 sps:$4 sm:$0xff]  }
 0x1e8   :  { %1669 = vmatprep.subr.bf16.mxu1 %v14506_v12  ;;  %2674 = vmatprep.subr.bf16.mxu0 %v14605_v20  ;;  %v16732_v13 = vld [vmem:[#allocation9 + $0x6c] ss:$24 sps:$4 sm:$0xff]  }
 0x1e9   :  { %v616_v38 = vpop.f32.mrb[32].mxu0  ;;  %1437 = vmatprep.mubr.bf16.mxu1 %v16634_v33  ;;  %1590 = vmatprep.mubr.bf16.mxu0 %v16634_v33  ;;  %v14524_v20 = vld [vmem:[#allocation9 + $0xc4] ss:$24 sps:$4 sm:$0xff]  }
 0x1ea   :  { %v618_v39 = vpop.f32.mrb[33].mxu0  ;;  %1438 = vmatmul.mubr.bf16.gmra.mrb[28].mxu1 %v16632_v30  ;;  %1591 = vmatmul.mubr.bf16.gmra.mrb[76].mxu0 %v16632_v30  ;;  %v687_v45 = vmax.f32 %v616_v38, 0.0  ;;  %v14617_v38 = vld [vmem:[#allocation9 + $0x2b4] ss:$24 sps:$4 sm:$0xff]  }
 0x1eb   :  { %v620_v42 = vpop.f32.mrb[34].mxu0  ;;  %1670 = vmatpush1.bf16.msra.mxu1 %v14504_v34  ;;  %v688_v51 = vmax.f32 %v618_v39, 0.0  ;;  %2675 = vmatpush1.bf16.msra.mxu0 %v14603_v23  ;;  %v14525_v23 = vld [vmem:[#allocation9 + $0xf0] ss:$24 sps:$4 sm:$0xff]  }
 0x1ec   :  { %v689_v46 = vmax.f32 %v620_v42, 0.0  ;;  %v622_v47 = vpop.f32.mrb[35].mxu0  ;;  %1671 = vmatprep.subr.bf16.mxu1 %v14509_v24  ;;  %2676 = vmatprep.subr.bf16.mxu0 %v14611_v28  ;;  %v16766_v28 = vld [vmem:[#allocation9 + $0xf8] ss:$24 sps:$4 sm:$0xff]  }
 0x1ed   :  { %v690_v54 = vmax.f32 %v622_v47, 0.0 }
 0x1ee   :  { %v16642_v55 = vpack.c.bf16 %v689_v46, %v687_v45 }
 0x1ef   :  { %v16644_v56 = vpack.c.bf16 %v690_v54, %v688_v51  ;;  %1672 = vmatpush1.bf16.msra.mxu1 %v14507_v40  ;;  %2677 = vmatpush1.bf16.msra.mxu0 %v14609_v29  ;;  %v16679_v51 = vld [vmem:[%s20005_s1 + $0x18] sm:$0xff]  ;;  %v14623_v54 = vld [vmem:[#allocation9 + $0x2e4] ss:$24 sps:$4 sm:$0xff]   ;;  %v14528_v29 = vld [vmem:[#allocation9 + $0x120] ss:$24 sps:$4 sm:$0xff]  }
 0x1f0   :  { %2564 = vmatprep.subr.bf16.mxu1 %v16640_v41  ;;  %2678 = vmatprep.subr.bf16.mxu0 %v14617_v38  ;;  %v14536_v38 = vld [vmem:[#allocation9 + $0x184] ss:$24 sps:$4 sm:$0xff]  }
 0x1f1   :  { %v626_v58 = vpop.f32.mrb[36].mxu0  ;;  %1447 = vmatprep.mubr.bf16.mxu1 %v16644_v56  ;;  %1600 = vmatprep.mubr.bf16.mxu0 %v16644_v56 }
 0x1f2   :  { %v628_v59 = vpop.f32.mrb[37].mxu0  ;;  %1448 = vmatmul.mubr.bf16.gmra.mrb[32].mxu1 %v16642_v55  ;;  %1601 = vmatmul.mubr.bf16.gmra.mrb[80].mxu0 %v16642_v55  ;;  %v691_v1 = vmax.f32 %v626_v58, 0.0  ;;  %v16687_v58 = vpack.c.bf16 %v16679_v51, %v16674_v50 }
 0x1f3   :  { %v630_v60 = vpop.f32.mrb[38].mxu0  ;;  %v692_v4 = vmax.f32 %v628_v59, 0.0  ;;  %2679 = vmatpush1.bf16.msra.mxu0 %v14615_v43  ;;  %v16690_v59 = vld [vmem:[#allocation9 + $0xc] ss:$24 sps:$4 sm:$0xff]   ;;  %v14537_v43 = vld [vmem:[#allocation9 + $0x1b0] ss:$24 sps:$4 sm:$0xff]  }
 0x1f4   :  { %v693_v2 = vmax.f32 %v630_v60, 0.0  ;;  %v632_v3 = vpop.f32.mrb[39].mxu0  ;;  %2680 = vmatprep.subr.bf16.mxu0 %v14623_v54  ;;  %v16696_v60 = vld [vmem:[%s20005_s1] sm:$0xff] }
 0x1f5   :  { %v694_v5 = vmax.f32 %v632_v3, 0.0  ;;  %v16718_v3 = vld [vmem:[#allocation9 + $0x30] ss:$24 sps:$4 sm:$0xff]  }
 0x1f6   :  { %v16651_v6 = vpack.c.bf16 %v693_v2, %v691_v1  ;;  %v16710_v1 = vpack.c.bf16 %v16701_v61, %v16696_v60  ;;  %v16713_v2 = vld [vmem:[#allocation9 + $0x8] ss:$24 sps:$4 sm:$0xff]   ;;  %v16794_v54 = vld [vmem:[#allocation9 + $0x1b8] ss:$24 sps:$4 sm:$0xff]  }
 0x1f7   :  { %v16653_v7 = vpack.c.bf16 %v694_v5, %v692_v4  ;;  %2681 = vmatpush1.bf16.msra.mxu0 %v14621_v57  ;;  %v16720_v4 = vld [vmem:[#allocation9 + $0x3c] ss:$24 sps:$4 sm:$0xff]   ;;  %v14543_v57 = vld [vmem:[#allocation9 + $0x1e0] ss:$24 sps:$4 sm:$0xff]  }
 0x1f8   :  { %3414 = vmatprep.subr.bf16.mxu0 %v16690_v59  ;;  %v16723_v5 = vld [vmem:[#allocation9 + $0x64] ss:$24 sps:$4 sm:$0xff]  }
 0x1f9   :  { %v636_v16 = vpop.f32.mrb[40].mxu0  ;;  %1457 = vmatprep.mubr.bf16.mxu1 %v16653_v7  ;;  %1610 = vmatprep.mubr.bf16.mxu0 %v16653_v7 }
 0x1fa   :  { %v638_v18 = vpop.f32.mrb[41].mxu0  ;;  %1458 = vmatmul.mubr.bf16.gmra.mrb[36].mxu1 %v16651_v6  ;;  %1611 = vmatmul.mubr.bf16.gmra.mrb[84].mxu0 %v16651_v6  ;;  %v695_v21 = vmax.f32 %v636_v16, 0.0  ;;  %v16740_v16 = vld [vmem:[#allocation9 + $0x68] ss:$24 sps:$4 sm:$0xff]  }
 0x1fb   :  { %v640_v19 = vpop.f32.mrb[42].mxu0  ;;  %v696_v25 = vmax.f32 %v638_v18, 0.0  ;;  %v16744_v18 = vld [vmem:[#allocation9 + $0x90] ss:$24 sps:$4 sm:$0xff]  }
 0x1fc   :  { %v697_v22 = vmax.f32 %v640_v19, 0.0  ;;  %v642_v17 = vpop.f32.mrb[43].mxu0  ;;  %v16746_v19 = vld [vmem:[#allocation9 + $0x9c] ss:$24 sps:$4 sm:$0xff]  }
 0x1fd   :  { %v698_v26 = vmax.f32 %v642_v17, 0.0  ;;  %v16759_v17 = vld [vmem:[#allocation9 + $0xc8] ss:$24 sps:$4 sm:$0xff]  }
 0x1fe   :  { %v16659_v12 = vpack.c.bf16 %v697_v22, %v695_v21  ;;  %v16751_v21 = vld [vmem:[#allocation9 + $0x98] ss:$24 sps:$4 sm:$0xff]   ;;  %v16754_v22 = vld [vmem:[#allocation9 + $0xcc] ss:$24 sps:$4 sm:$0xff]  }
 0x1ff   :  { %v16661_v27 = vpack.c.bf16 %v698_v26, %v696_v25  ;;  %v16762_v25 = vld [vmem:[#allocation9 + $0xfc] ss:$24 sps:$4 sm:$0xff]  }
 0x200   :  { %v14530_v26 = vld [vmem:[#allocation9 + $0x124] ss:$24 sps:$4 sm:$0xff]  }
 0x201   :  { %v646_v34 = vpop.f32.mrb[44].mxu0  ;;  %1467 = vmatprep.mubr.bf16.mxu1 %v16661_v27  ;;  %1620 = vmatprep.mubr.bf16.mxu0 %v16661_v27 }
 0x202   :  { %v648_v37 = vpop.f32.mrb[45].mxu0  ;;  %1468 = vmatmul.mubr.bf16.gmra.mrb[40].mxu1 %v16659_v12  ;;  %1621 = vmatmul.mubr.bf16.gmra.mrb[88].mxu0 %v16659_v12  ;;  %v699_v39 = vmax.f32 %v646_v34, 0.0  ;;  %v16768_v34 = vld [vmem:[#allocation9 + $0x12c] ss:$24 sps:$4 sm:$0xff]  }
 0x203   :  { %v650_v24 = vpop.f32.mrb[46].mxu0  ;;  %v700_v44 = vmax.f32 %v648_v37, 0.0  ;;  %v14531_v37 = vld [vmem:[#allocation9 + $0x150] ss:$24 sps:$4 sm:$0xff]  }
 0x204   :  { %v701_v40 = vmax.f32 %v650_v24, 0.0  ;;  %v652_v42 = vpop.f32.mrb[47].mxu0  ;;  %v16776_v24 = vld [vmem:[#allocation9 + $0x15c] ss:$24 sps:$4 sm:$0xff]  }
 0x205   :  { %v702_v45 = vmax.f32 %v652_v42, 0.0  ;;  %v16782_v42 = vld [vmem:[#allocation9 + $0x18c] ss:$24 sps:$4 sm:$0xff]  }
 0x206   :  { %v16667_v46 = vpack.c.bf16 %v701_v40, %v699_v39  ;;  %v16780_v39 = vld [vmem:[#allocation9 + $0x158] ss:$24 sps:$4 sm:$0xff]  }
 0x207   :  { %v16669_v47 = vpack.c.bf16 %v702_v45, %v700_v44  ;;  %v14534_v40 = vld [vmem:[#allocation9 + $0x180] ss:$24 sps:$4 sm:$0xff]   ;;  %v16790_v44 = vld [vmem:[#allocation9 + $0x1bc] ss:$24 sps:$4 sm:$0xff]  }
 0x208   :  { %v14545_v45 = vld [vmem:[#allocation9 + $0x1e4] ss:$24 sps:$4 sm:$0xff]  }
 0x209   :  { %1477 = vmatprep.mubr.bf16.mxu1 %v16669_v47  ;;  %1630 = vmatprep.mubr.bf16.mxu0 %v16669_v47 }
 0x20a   :  { %1478 = vmatmul.mubr.bf16.gmra.mrb[44].mxu1 %v16667_v46  ;;  %1631 = vmatmul.mubr.bf16.gmra.mrb[92].mxu0 %v16667_v46 }
 0x20b   :  { %1673 = vmatprep.mubr.bf16.mxu1 %v16578_v36  ;;  %2682 = vmatprep.mubr.bf16.mxu0 %v16687_v58  ;;  %v16706_v36 = vld [vmem:[#allocation9 + $0x34] ss:$24 sps:$4 sm:$0xff]  }
 0x212   :  { %1674 = vmatmul.mubr.bf16.vlgmr.msra.gmra.mrb[48].mxu1 %v16576_v35  ;;  %2683 = vmatmul.mubr.bf16.vlgmr.msra.gmra.mrb[96].mxu0 %v16710_v1  ;;  %v16727_v35 = vld [vmem:[#allocation9 + $0x38] ss:$24 sps:$4 sm:$0xff]  }
 0x213   :  { %2565 = vmatpush1.bf16.msra.mxu1 %v16704_v0  ;;  %1683 = vmatprep.mubr.bf16.mxu1 %v16586_v49  ;;  %v16735_v49 = vld [vmem:[#allocation9 + $0x94] ss:$24 sps:$4 sm:$0xff]  }
 0x214   :  { %2566 = vmatprep.subr.bf16.mxu1 %v16706_v36  ;;  %3415 = vmatpush1.bf16.msra.mxu0 %v16713_v2 }
 0x215   :  { %3416 = vmatprep.subr.bf16.mxu0 %v16720_v4 }
 0x217   :  { %2567 = vmatpush1.bf16.msra.mxu1 %v16718_v3 }
 0x218   :  { %2568 = vmatprep.subr.bf16.mxu1 %v16723_v5  ;;  %3417 = vmatpush1.bf16.msra.mxu0 %v16727_v35 }
 0x219   :  { %3418 = vmatprep.subr.bf16.mxu0 %v16732_v13 }
 0x21a   :  { %1684 = vmatmul.mubr.bf16.gmra.mrb[52].mxu1 %v16584_v48  ;;  %v14522_v48 = vld [vmem:[#allocation9 + $0xc0] ss:$24 sps:$4 sm:$0xff]  }
 0x21b   :  { %1693 = vmatprep.mubr.bf16.mxu1 %v16594_v63  ;;  %2569 = vmatpush1.bf16.msra.mxu1 %v16730_v11  ;;  %v14527_v63 = vld [vmem:[#allocation9 + $0xf4] ss:$24 sps:$4 sm:$0xff]  }
 0x21c   :  { %2570 = vmatprep.subr.bf16.mxu1 %v16735_v49  ;;  %3419 = vmatpush1.bf16.msra.mxu0 %v16740_v16 }
 0x21d   :  { %3420 = vmatprep.subr.bf16.mxu0 %v16746_v19 }
 0x21f   :  { %2571 = vmatpush1.bf16.msra.mxu1 %v16744_v18 }
 0x220   :  { %2572 = vmatprep.subr.bf16.mxu1 %v14524_v20  ;;  %3421 = vmatpush1.bf16.msra.mxu0 %v16751_v21  ;;  %v16796_v20 = vld [vmem:[#allocation9 + $0x1ec] ss:$24 sps:$4 sm:$0xff]  }
 0x221   :  { %3422 = vmatprep.subr.bf16.mxu0 %v16754_v22 }
 0x222   :  { %1694 = vmatmul.mubr.bf16.gmra.mrb[56].mxu1 %v16592_v62  ;;  %v14533_v62 = vld [vmem:[#allocation9 + $0x154] ss:$24 sps:$4 sm:$0xff]  }
 0x223   :  { %1703 = vmatprep.mubr.bf16.mxu1 %v16602_v15  ;;  %2573 = vmatpush1.bf16.msra.mxu1 %v14522_v48  ;;  %v16773_v15 = vld [vmem:[#allocation9 + $0x128] ss:$24 sps:$4 sm:$0xff]  }
 0x224   :  { %2574 = vmatprep.subr.bf16.mxu1 %v14527_v63  ;;  %3423 = vmatpush1.bf16.msra.mxu0 %v16759_v17  ;;  %v14549_v48 = vld [vmem:[#allocation9 + $0x210] ss:$24 sps:$4 sm:$0xff]   ;;  %v16804_v63 = vld [vmem:[#allocation9 + $0x21c] ss:$24 sps:$4 sm:$0xff]  }
 0x225   :  { %3424 = vmatprep.subr.bf16.mxu0 %v16762_v25 }
 0x227   :  { %2575 = vmatpush1.bf16.msra.mxu1 %v14525_v23  ;;  %v14560_v23 = vld [vmem:[#allocation9 + $0x244] ss:$24 sps:$4 sm:$0xff]  }
 0x228   :  { %2576 = vmatprep.subr.bf16.mxu1 %v14530_v26  ;;  %3425 = vmatpush1.bf16.msra.mxu0 %v16766_v28  ;;  %v16808_v26 = vld [vmem:[#allocation9 + $0x218] ss:$24 sps:$4 sm:$0xff]  }
 0x229   :  { %3426 = vmatprep.subr.bf16.mxu0 %v16768_v34 }
 0x22a   :  { %1704 = vmatmul.mubr.bf16.gmra.mrb[60].mxu1 %v16600_v14  ;;  %v14539_v14 = vld [vmem:[#allocation9 + $0x1b4] ss:$24 sps:$4 sm:$0xff]  }
 0x22b   :  { %1713 = vmatprep.mubr.bf16.mxu1 %v16610_v32  ;;  %2577 = vmatpush1.bf16.msra.mxu1 %v14528_v29  ;;  %v16787_v32 = vld [vmem:[#allocation9 + $0x188] ss:$24 sps:$4 sm:$0xff]  }
 0x22c   :  { %2578 = vmatprep.subr.bf16.mxu1 %v14533_v62  ;;  %3427 = vmatpush1.bf16.msra.mxu0 %v16773_v15  ;;  %v14558_v29 = vld [vmem:[#allocation9 + $0x240] ss:$24 sps:$4 sm:$0xff]   ;;  %v16810_v62 = vld [vmem:[#allocation9 + $0x24c] ss:$24 sps:$4 sm:$0xff]  }
 0x22d   :  { %3428 = vmatprep.subr.bf16.mxu0 %v16776_v24 }
 0x22f   :  { %2579 = vmatpush1.bf16.msra.mxu1 %v14531_v37  ;;  %v14564_v37 = vld [vmem:[#allocation9 + $0x270] ss:$24 sps:$4 sm:$0xff]  }
 0x230   :  { %2580 = vmatprep.subr.bf16.mxu1 %v14536_v38  ;;  %3429 = vmatpush1.bf16.msra.mxu0 %v16780_v39  ;;  %v16818_v38 = vld [vmem:[#allocation9 + $0x27c] ss:$24 sps:$4 sm:$0xff]  }
 0x231   :  { %3430 = vmatprep.subr.bf16.mxu0 %v16782_v42 }
 0x232   :  { %1714 = vmatmul.mubr.bf16.gmra.mrb[64].mxu1 %v16608_v31  ;;  %v14551_v31 = vld [vmem:[#allocation9 + $0x214] ss:$24 sps:$4 sm:$0xff]  }
 0x233   :  { %1723 = vmatprep.mubr.bf16.mxu1 %v16618_v53  ;;  %2581 = vmatpush1.bf16.msra.mxu1 %v14534_v40  ;;  %v16801_v53 = vld [vmem:[#allocation9 + $0x1e8] ss:$24 sps:$4 sm:$0xff]   ;;  %v14575_v40 = vld [vmem:[#allocation9 + $0x2a4] ss:$24 sps:$4 sm:$0xff]  }
 0x234   :  { %2582 = vmatprep.subr.bf16.mxu1 %v14539_v14  ;;  %3431 = vmatpush1.bf16.msra.mxu0 %v16787_v32  ;;  %v14645_v14 = vld [vmem:[#allocation9 + $0x278] ss:$24 sps:$4 sm:$0xff]  }
 0x235   :  { %3432 = vmatprep.subr.bf16.mxu0 %v16790_v44 }
 0x237   :  { %2583 = vmatpush1.bf16.msra.mxu1 %v14537_v43  ;;  %v14573_v43 = vld [vmem:[#allocation9 + $0x2a0] ss:$24 sps:$4 sm:$0xff]  }
 0x238   :  { %2584 = vmatprep.subr.bf16.mxu1 %v14545_v45  ;;  %3433 = vmatpush1.bf16.msra.mxu0 %v16794_v54  ;;  %v14650_v45 = vld [vmem:[#allocation9 + $0x2ac] ss:$24 sps:$4 sm:$0xff]  }
 0x239   :  { %3434 = vmatprep.subr.bf16.mxu0 %v16796_v20 }
 0x23a   :  { %1724 = vmatmul.mubr.bf16.gmra.mrb[68].mxu1 %v16616_v52  ;;  %v14566_v52 = vld [vmem:[#allocation9 + $0x274] ss:$24 sps:$4 sm:$0xff]  }
 0x23b   :  { %1733 = vmatprep.mubr.bf16.mxu1 %v16626_v10  ;;  %2585 = vmatpush1.bf16.msra.mxu1 %v14543_v57  ;;  %v16815_v10 = vld [vmem:[#allocation9 + $0x248] ss:$24 sps:$4 sm:$0xff]  }
 0x23c   :  { %2586 = vmatprep.subr.bf16.mxu1 %v14551_v31  ;;  %3435 = vmatpush1.bf16.msra.mxu0 %v16801_v53  ;;  %v14579_v57 = vld [vmem:[#allocation9 + $0x2d0] ss:$24 sps:$4 sm:$0xff]   ;;  %v14653_v31 = vld [vmem:[#allocation9 + $0x2dc] ss:$24 sps:$4 sm:$0xff]  }
 0x23d   :  { %3436 = vmatprep.subr.bf16.mxu0 %v16804_v63 }
 0x23f   :  { %2587 = vmatpush1.bf16.msra.mxu1 %v14549_v48  ;;  %v14651_v48 = vld [vmem:[#allocation9 + $0x2d8] ss:$24 sps:$4 sm:$0xff]  }
 0x240   :  { %2588 = vmatprep.subr.bf16.mxu1 %v14560_v23  ;;  %3437 = vmatpush1.bf16.msra.mxu0 %v16808_v26 }
 0x241   :  { %3438 = vmatprep.subr.bf16.mxu0 %v16810_v62 }
 0x242   :  { %1734 = vmatmul.mubr.bf16.gmra.mrb[72].mxu1 %v16624_v8  ;;  %v14581_v8 = vld [vmem:[#allocation9 + $0x2d4] ss:$24 sps:$4 sm:$0xff]  }
 0x243   :  { %1743 = vmatprep.mubr.bf16.mxu1 %v16634_v33  ;;  %2589 = vmatpush1.bf16.msra.mxu1 %v14558_v29  ;;  %v14648_v33 = vld [vmem:[#allocation9 + $0x2a8] ss:$24 sps:$4 sm:$0xff]   ;;  %v16970_v29 = vld [vmem:[#allocation9 + $0x1e4] ss:$24 sps:$4 sm:$0xff]  }
 0x244   :  { %2590 = vmatprep.subr.bf16.mxu1 %v14566_v52  ;;  %3439 = vmatpush1.bf16.msra.mxu0 %v16815_v10 }
 0x245   :  { %3440 = vmatprep.subr.bf16.mxu0 %v16818_v38 }
 0x247   :  { %2591 = vmatpush1.bf16.msra.mxu1 %v14564_v37 }
 0x248   :  { %2592 = vmatprep.subr.bf16.mxu1 %v14575_v40  ;;  %3441 = vmatpush1.bf16.msra.mxu0 %v14645_v14 }
 0x249   :  { %3442 = vmatprep.subr.bf16.mxu0 %v14650_v45 }
 0x24a   :  { %1744 = vmatmul.mubr.bf16.gmra.mrb[76].mxu1 %v16632_v30 }
 0x24b   :  { %1753 = vmatprep.mubr.bf16.mxu1 %v16644_v56  ;;  %2593 = vmatpush1.bf16.msra.mxu1 %v14573_v43  ;;  %v16990_v43 = vld [vmem:[#allocation9 + $0x240] ss:$24 sps:$4 sm:$0xff]  }
 0x24c   :  { %2594 = vmatprep.subr.bf16.mxu1 %v14581_v8  ;;  %3443 = vmatpush1.bf16.msra.mxu0 %v14648_v33  ;;  %v16994_v8 = vld [vmem:[#allocation9 + $0x274] ss:$24 sps:$4 sm:$0xff]  }
 0x24d   :  { %3444 = vmatprep.subr.bf16.mxu0 %v14653_v31 }
 0x24f   :  { %2595 = vmatpush1.bf16.msra.mxu1 %v14579_v57 }
 0x250   :  { %2607 = vmatprep.subr.bf16.mxu1 %v16690_v59  ;;  %3445 = vmatpush1.bf16.msra.mxu0 %v14651_v48 }
 0x252   :  { %1754 = vmatmul.mubr.bf16.gmra.mrb[80].mxu1 %v16642_v55 }
 0x253   :  { %1763 = vmatprep.mubr.bf16.mxu1 %v16653_v7 }
 0x25a   :  { %1764 = vmatmul.mubr.bf16.gmra.mrb[84].mxu1 %v16651_v6 }
 0x25b   :  { %1773 = vmatprep.mubr.bf16.mxu1 %v16661_v27 }
 0x262   :  { %1774 = vmatmul.mubr.bf16.gmra.mrb[88].mxu1 %v16659_v12 }
 0x263   :  { %1783 = vmatprep.mubr.bf16.mxu1 %v16669_v47 }
 0x26a   :  { %1784 = vmatmul.mubr.bf16.gmra.mrb[92].mxu1 %v16667_v46 }
 0x26b   :  { %2596 = vmatprep.mubr.bf16.mxu1 %v16687_v58 }
 0x272   :  { %2597 = vmatmul.mubr.bf16.vlgmr.msra.gmra.mrb[0].mxu1 %v16710_v1 }
 0x273   :  { %2608 = vmatpush1.bf16.msra.mxu1 %v16713_v2  ;;  %2639 = vmatprep.mubr.bf16.mxu1 %v16687_v58  ;;  %v16902_v2 = vld [vmem:[#allocation9 + $0xf0] ss:$24 sps:$4 sm:$0xff]  }
 0x274   :  { %2609 = vmatprep.subr.bf16.mxu1 %v16720_v4 }
 0x277   :  { %2610 = vmatpush1.bf16.msra.mxu1 %v16727_v35 }
 0x278   :  { %2611 = vmatprep.subr.bf16.mxu1 %v16732_v13 }
 0x27b   :  { %2612 = vmatpush1.bf16.msra.mxu1 %v16740_v16 }
 0x27c   :  { %2613 = vmatprep.subr.bf16.mxu1 %v16746_v19 }
 0x27f   :  { %2614 = vmatpush1.bf16.msra.mxu1 %v16751_v21 }
 0x280   :  { %2615 = vmatprep.subr.bf16.mxu1 %v16754_v22 }
 0x283   :  { %2616 = vmatpush1.bf16.msra.mxu1 %v16759_v17  ;;  %v16930_v17 = vld [vmem:[#allocation9 + $0x124] ss:$24 sps:$4 sm:$0xff]  }
 0x284   :  { %2617 = vmatprep.subr.bf16.mxu1 %v16762_v25  ;;  %v16932_v25 = vld [vmem:[#allocation9 + $0x120] ss:$24 sps:$4 sm:$0xff]  }
 0x285   :  { %v16845_v30 = vpop.f32.mrb[48].mxu0 }
 0x286   :  { %v16847_v55 = vpop.f32.mrb[49].mxu0 }
 0x287   :  { %2618 = vmatpush1.bf16.msra.mxu1 %v16766_v28  ;;  %v16850_v56 = vpop.f32.mrb[50].mxu0 }
 0x288   :  { %v16852_v6 = vpop.f32.mrb[51].mxu0  ;;  %2619 = vmatprep.subr.bf16.mxu1 %v16768_v34 }
 0x28b   :  { %2620 = vmatpush1.bf16.msra.mxu1 %v16773_v15 }
 0x28c   :  { %2621 = vmatprep.subr.bf16.mxu1 %v16776_v24  ;;  %v16942_v24 = vld [vmem:[#allocation9 + $0x154] ss:$24 sps:$4 sm:$0xff]  }
 0x28f   :  { %2622 = vmatpush1.bf16.msra.mxu1 %v16780_v39 }
 0x290   :  { %2623 = vmatprep.subr.bf16.mxu1 %v16782_v42  ;;  %v16946_v42 = vld [vmem:[#allocation9 + $0x150] ss:$24 sps:$4 sm:$0xff]  }
 0x293   :  { %2624 = vmatpush1.bf16.msra.mxu1 %v16787_v32  ;;  %v16950_v32 = vld [vmem:[#allocation9 + $0x184] ss:$24 sps:$4 sm:$0xff]  }
 0x294   :  { %2625 = vmatprep.subr.bf16.mxu1 %v16790_v44  ;;  %v16952_v44 = vld [vmem:[#allocation9 + $0x180] ss:$24 sps:$4 sm:$0xff]  }
 0x297   :  { %2626 = vmatpush1.bf16.msra.mxu1 %v16794_v54 }
 0x298   :  { %2627 = vmatprep.subr.bf16.mxu1 %v16796_v20 }
 0x29b   :  { %2628 = vmatpush1.bf16.msra.mxu1 %v16801_v53 }
 0x29c   :  { %2629 = vmatprep.subr.bf16.mxu1 %v16804_v63  ;;  %v16962_v63 = vld [vmem:[#allocation9 + $0x1b4] ss:$24 sps:$4 sm:$0xff]  }
 0x29f   :  { %2630 = vmatpush1.bf16.msra.mxu1 %v16808_v26  ;;  %v16966_v26 = vld [vmem:[#allocation9 + $0x1b0] ss:$24 sps:$4 sm:$0xff]  }
 0x2a0   :  { %2631 = vmatprep.subr.bf16.mxu1 %v16810_v62  ;;  %v16972_v62 = vld [vmem:[#allocation9 + $0x1e0] ss:$24 sps:$4 sm:$0xff]  }
 0x2a3   :  { %2632 = vmatpush1.bf16.msra.mxu1 %v16815_v10 }
 0x2a4   :  { %2633 = vmatprep.subr.bf16.mxu1 %v16818_v38  ;;  %v16982_v38 = vld [vmem:[#allocation9 + $0x214] ss:$24 sps:$4 sm:$0xff]  }
 0x2a7   :  { %2634 = vmatpush1.bf16.msra.mxu1 %v14645_v14  ;;  %v16986_v14 = vld [vmem:[#allocation9 + $0x210] ss:$24 sps:$4 sm:$0xff]  }
 0x2a8   :  { %2635 = vmatprep.subr.bf16.mxu1 %v14650_v45  ;;  %v16992_v45 = vld [vmem:[#allocation9 + $0x244] ss:$24 sps:$4 sm:$0xff]  }
 0x2ab   :  { %2636 = vmatpush1.bf16.msra.mxu1 %v14648_v33 }
 0x2ac   :  { %2637 = vmatprep.subr.bf16.mxu1 %v14653_v31  ;;  %v17002_v31 = vld [vmem:[#allocation9 + $0x270] ss:$24 sps:$4 sm:$0xff]  }
 0x2af   :  { %2638 = vmatpush1.bf16.msra.mxu1 %v14651_v48 }
 0x2b0   :  { %3371 = vmatprep.subr.bf16.mxu1 %v16640_v41 }
 0x2b2   :  { %2640 = vmatmul.mubr.bf16.vlgmr.msra.gmra.mrb[96].mxu1 %v16710_v1  ;;  %v16898_v1 = vld [vmem:[#allocation9 + $0xf4] ss:$24 sps:$4 sm:$0xff]  }
 0x2b3   :  { %3372 = vmatpush1.bf16.msra.mxu1 %v16704_v0  ;;  %v16894_v0 = vld [vmem:[#allocation9 + $0xc0] ss:$24 sps:$4 sm:$0xff]  }
 0x2b4   :  { %3373 = vmatprep.subr.bf16.mxu1 %v16706_v36  ;;  %v16896_v36 = vld [vmem:[#allocation9 + $0xc4] ss:$24 sps:$4 sm:$0xff]  }
 0x2b7   :  { %3374 = vmatpush1.bf16.msra.mxu1 %v16718_v3 }
 0x2b8   :  { %3375 = vmatprep.subr.bf16.mxu1 %v16723_v5 }
 0x2bb   :  { %3376 = vmatpush1.bf16.msra.mxu1 %v16730_v11 }
 0x2bc   :  { %3377 = vmatprep.subr.bf16.mxu1 %v16735_v49 }
 0x2bf   :  { %3378 = vmatpush1.bf16.msra.mxu1 %v16744_v18 }
 0x2c0   :  { %3379 = vmatprep.subr.bf16.mxu1 %v16896_v36 }
 0x2c3   :  { %3380 = vmatpush1.bf16.msra.mxu1 %v16894_v0 }
 0x2c4   :  { %3381 = vmatprep.subr.bf16.mxu1 %v16898_v1 }
 0x2c7   :  { %3382 = vmatpush1.bf16.msra.mxu1 %v16902_v2 }
 0x2c8   :  { %3383 = vmatprep.subr.bf16.mxu1 %v16930_v17 }
 0x2cb   :  { %3384 = vmatpush1.bf16.msra.mxu1 %v16932_v25 }
 0x2cc   :  { %3385 = vmatprep.subr.bf16.mxu1 %v16942_v24 }
 0x2cf   :  { %3386 = vmatpush1.bf16.msra.mxu1 %v16946_v42 }
 0x2d0   :  { %3387 = vmatprep.subr.bf16.mxu1 %v16950_v32 }
 0x2d3   :  { %3388 = vmatpush1.bf16.msra.mxu1 %v16952_v44 }
 0x2d4   :  { %3389 = vmatprep.subr.bf16.mxu1 %v16962_v63 }
 0x2d7   :  { %3390 = vmatpush1.bf16.msra.mxu1 %v16966_v26 }
 0x2d8   :  { %3391 = vmatprep.subr.bf16.mxu1 %v16970_v29 }
 0x2db   :  { %3392 = vmatpush1.bf16.msra.mxu1 %v16972_v62 }
 0x2dc   :  { %3393 = vmatprep.subr.bf16.mxu1 %v16982_v38 }
 0x2df   :  { %3394 = vmatpush1.bf16.msra.mxu1 %v16986_v14 }
 0x2e0   :  { %3395 = vmatprep.subr.bf16.mxu1 %v16992_v45 }
 0x2e3   :  { %3396 = vmatpush1.bf16.msra.mxu1 %v16990_v43 }
 0x2e4   :  { %3397 = vmatprep.subr.bf16.mxu1 %v16994_v8 }
 0x2e5   :  { %v16878_v7 = vpop.f32.mrb[48].mxu1  ;;  %v16880_v12 = vpop.f32.mrb[96].mxu0 }
 0x2e6   :  { %v16882_v41 = vpop.f32.mrb[49].mxu1  ;;  %v16884_v27 = vpop.f32.mrb[97].mxu0 }
 0x2e7   :  { %v16886_v46 = vpop.f32.mrb[50].mxu1  ;;  %v16888_v47 = vpop.f32.mrb[98].mxu0  ;;  %3398 = vmatpush1.bf16.msra.mxu1 %v17002_v31 }
 0x2e8   :  { %v16890_v58 = vpop.f32.mrb[51].mxu1  ;;  %v16892_v59 = vpop.f32.mrb[99].mxu0  ;;  %3399 = vmatprep.subr.bf16.mxu1 %v17007_v9 }
 0x2ed   :  { %v16904_v3 = vpop.f32.mrb[52].mxu1 }
 0x2ee   :  { %20267 = vst [vmem:[#allocation20_spill] sm:$0xff] %v16904_v3  ;;  %v16907_v4 = vpop.f32.mrb[53].mxu1 }
 0x2ef   :  { %20268 = vst [vmem:[#allocation21_spill] sm:$0xff] %v16907_v4  ;;  %v16909_v5 = vpop.f32.mrb[54].mxu1 }
 0x2f0   :  { %20269 = vst [vmem:[#allocation22_spill] sm:$0xff] %v16909_v5  ;;  %v16911_v35 = vpop.f32.mrb[55].mxu1 }
 0x2f1   :  { %20270 = vst [vmem:[#allocation23_spill] sm:$0xff] %v16911_v35 }
 0x2f5   :  { %v16914_v11 = vpop.f32.mrb[56].mxu1 }
 0x2f6   :  { %20271 = vst [vmem:[#allocation24_spill] sm:$0xff] %v16914_v11  ;;  %v16916_v13 = vpop.f32.mrb[57].mxu1 }
 0x2f7   :  { %20272 = vst [vmem:[#allocation25_spill] sm:$0xff] %v16916_v13  ;;  %v16918_v49 = vpop.f32.mrb[58].mxu1 }
 0x2f8   :  { %20273 = vst [vmem:[#allocation26_spill] sm:$0xff] %v16918_v49  ;;  %v16920_v16 = vpop.f32.mrb[59].mxu1 }
 0x2f9   :  { %20274 = vst [vmem:[#allocation27_spill] sm:$0xff] %v16920_v16 }
 0x2fd   :  { %v16922_v18 = vpop.f32.mrb[60].mxu1 }
 0x2fe   :  { %20275 = vst [vmem:[#allocation28_spill] sm:$0xff] %v16922_v18  ;;  %v16924_v19 = vpop.f32.mrb[61].mxu1 }
 0x2ff   :  { %20276 = vst [vmem:[#allocation29_spill] sm:$0xff] %v16924_v19  ;;  %v16926_v21 = vpop.f32.mrb[62].mxu1 }
 0x300   :  { %20277 = vst [vmem:[#allocation30_spill] sm:$0xff] %v16926_v21  ;;  %v16928_v22 = vpop.f32.mrb[63].mxu1 }
 0x301   :  { %20278 = vst [vmem:[#allocation31_spill] sm:$0xff] %v16928_v22 }
 0x305   :  { %v16934_v28 = vpop.f32.mrb[64].mxu1 }
 0x306   :  { %20279 = vst [vmem:[#allocation32_spill] sm:$0xff] %v16934_v28  ;;  %v16937_v34 = vpop.f32.mrb[65].mxu1 }
 0x307   :  { %20280 = vst [vmem:[#allocation33_spill] sm:$0xff] %v16937_v34  ;;  %v16940_v15 = vpop.f32.mrb[66].mxu1 }
 0x308   :  { %20281 = vst [vmem:[#allocation34_spill] sm:$0xff] %v16940_v15  ;;  %v16944_v39 = vpop.f32.mrb[67].mxu1 }
 0x309   :  { %20282 = vst [vmem:[#allocation35_spill] sm:$0xff] %v16944_v39 }
 0x30d   :  { %v16954_v54 = vpop.f32.mrb[68].mxu1 }
 0x30e   :  { %20283 = vst [vmem:[#allocation36_spill] sm:$0xff] %v16954_v54  ;;  %v16957_v20 = vpop.f32.mrb[69].mxu1 }
 0x30f   :  { %20284 = vst [vmem:[#allocation37_spill] sm:$0xff] %v16957_v20  ;;  %v16960_v53 = vpop.f32.mrb[70].mxu1 }
 0x310   :  { %20285 = vst [vmem:[#allocation38_spill] sm:$0xff] %v16960_v53  ;;  %v16964_v23 = vpop.f32.mrb[71].mxu1 }
 0x311   :  { %20286 = vst [vmem:[#allocation39_spill] sm:$0xff] %v16964_v23  ;;  %v17030_v23 = vld [vmem:[#allocation9 + $0x14] ss:$24 sps:$4 sm:$0xff]  }
 0x315   :  { %v16974_v52 = vpop.f32.mrb[72].mxu1 }
 0x316   :  { %20287 = vst [vmem:[#allocation40_spill] sm:$0xff] %v16974_v52  ;;  %v16977_v10 = vpop.f32.mrb[73].mxu1 }
 0x317   :  { %20288 = vst [vmem:[#allocation41_spill] sm:$0xff] %v16977_v10  ;;  %v16980_v37 = vpop.f32.mrb[74].mxu1 }
 0x318   :  { %20289 = vst [vmem:[#allocation42_spill] sm:$0xff] %v16980_v37  ;;  %v16984_v40 = vpop.f32.mrb[75].mxu1  ;;  %v17012_v37 = vld [vmem:[#allocation9 + $0x2a0] ss:$24 sps:$4 sm:$0xff]  }
 0x319   :  { %20290 = vst [vmem:[#allocation43_spill] sm:$0xff] %v16984_v40  ;;  %3400 = vmatpush1.bf16.msra.mxu1 %v17012_v37 }
 0x31d   :  { %v16997_v33 = vpop.f32.mrb[76].mxu1 }
 0x31e   :  { %20291 = vst [vmem:[#allocation44_spill] sm:$0xff] %v16997_v33  ;;  %v16999_v57 = vpop.f32.mrb[77].mxu1  ;;  %v17015_v33 = vld [vmem:[#allocation9 + $0x2d4] ss:$24 sps:$4 sm:$0xff]  }
 0x31f   :  { %20292 = vst [vmem:[#allocation45_spill] sm:$0xff] %v16999_v57  ;;  %v17004_v48 = vpop.f32.mrb[78].mxu1  ;;  %3401 = vmatprep.subr.bf16.mxu1 %v17015_v33 }
 0x320   :  { %20293 = vst [vmem:[#allocation46_spill] sm:$0xff] %v17004_v48  ;;  %v17009_v40 = vpop.f32.mrb[79].mxu1  ;;  %v17022_v48 = vld [vmem:[#allocation9 + $0x2d0] ss:$24 sps:$4 sm:$0xff]  }
 0x321   :  { %20294 = vst [vmem:[#allocation47_spill] sm:$0xff] %v17009_v40  ;;  %3402 = vmatpush1.bf16.msra.mxu1 %v17022_v48 }
 0x322   :  { %3457 = vmatprep.subr.bf16.mxu1 %v17030_v23 }
 0x325   :  { %v17017_v57 = vpop.f32.mrb[80].mxu1 }
 0x326   :  { %20295 = vst [vmem:[#allocation48_spill] sm:$0xff] %v17017_v57  ;;  %v17019_v10 = vpop.f32.mrb[81].mxu1 }
 0x327   :  { %20296 = vst [vmem:[#allocation49_spill] sm:$0xff] %v17019_v10  ;;  %v17024_v52 = vpop.f32.mrb[82].mxu1 }
 0x328   :  { %20297 = vst [vmem:[#allocation50_spill] sm:$0xff] %v17024_v52  ;;  %v17027_v40 = vpop.f32.mrb[83].mxu1 }
 0x329   :  { %20298 = vst [vmem:[#allocation51_spill] sm:$0xff] %v17027_v40  ;;  %v20306_v40 = vlaneseq }
 0x32b   :  { %v17048_v15 = vshrl.u32 %v20306_v40, 7  ;;  %v17068_v40 = vld [vmem:[%s20010_s6] sm:$0x3f] }
 0x32d   :  { %v17032_v53 = vpop.f32.mrb[84].mxu1 }
 0x32e   :  { %20299 = vst [vmem:[#allocation52_spill] sm:$0xff] %v17032_v53  ;;  %v17035_v57 = vpop.f32.mrb[85].mxu1  ;;  %v17053_v53 = vsub.s32 0, %v17048_v15 }
 0x32f   :  { %20300 = vst [vmem:[#allocation53_spill] sm:$0xff] %v17035_v57  ;;  %v17037_v10 = vpop.f32.mrb[86].mxu1  ;;  %v17056_v57 = vsub.s32 1, %v17048_v15 }
 0x330   :  { %20301 = vst [vmem:[#allocation54_spill] sm:$0xff] %v17037_v10  ;;  %v17039_v20 = vpop.f32.mrb[87].mxu1  ;;  %20308 = vst [vmem:[#allocation60_spill] sm:$0xff] %v17053_v53 }
 0x331   :  { %20302 = vst [vmem:[#allocation55_spill] sm:$0xff] %v17039_v20  ;;  %20309 = vst [vmem:[#allocation61_spill] sm:$0xff] %v17056_v57  ;;  %v17061_v20 = vld [vmem:[%s20009_s5] sm:$0x3f] }
 0x332   :  { %v832_v10 = vrot.slane %v17061_v20, %v17056_v57 }
 0x335   :  { %v17041_v54 = vpop.f32.mrb[88].mxu1 }
 0x336   :  { %20303 = vst [vmem:[#allocation56_spill] sm:$0xff] %v17041_v54  ;;  %v17043_v52 = vpop.f32.mrb[89].mxu1 }
 0x337   :  { %20304 = vst [vmem:[#allocation57_spill] sm:$0xff] %v17043_v52  ;;  %v17045_v39 = vpop.f32.mrb[90].mxu1  ;;  %v1943_v52 = vrot.slane %v17068_v40, %v17053_v53 }
 0x338   :  { %20305 = vst [vmem:[#allocation58_spill] sm:$0xff] %v17045_v39  ;;  %v17050_v34 = vpop.f32.mrb[91].mxu1 }
 0x339   :  { %20307 = vst [vmem:[#allocation59_spill] sm:$0xff] %v17050_v34  ;;  %v828_v34 = vrot.slane %v17061_v20, %v17053_v53 }
 0x33b   :  { %v17084_v21 = vadd.f32 %v1943_v52, %v828_v34 }
 0x33d   :  { %v17063_v54 = vpop.f32.mrb[92].mxu1  ;;  %20314 = vst [vmem:[#allocation66_spill] sm:$0xff] %v17084_v21 }
 0x33e   :  { %20310 = vst [vmem:[#allocation62_spill] sm:$0xff] %v17063_v54  ;;  %v17072_v39 = vpop.f32.mrb[93].mxu1  ;;  %v1947_v54 = vrot.slane %v17068_v40, %v17056_v57 }
 0x33f   :  { %20311 = vst [vmem:[#allocation63_spill] sm:$0xff] %v17072_v39  ;;  %v17078_v28 = vpop.f32.mrb[94].mxu1 }
 0x340   :  { %20312 = vst [vmem:[#allocation64_spill] sm:$0xff] %v17078_v28  ;;  %v17082_v22 = vpop.f32.mrb[95].mxu1  ;;  %v17086_v19 = vadd.f32 %v1947_v54, %v832_v10 }
 0x341   :  { %20313 = vst [vmem:[#allocation65_spill] sm:$0xff] %v17082_v22 }
 0x342   :  { %20315 = vst [vmem:[#allocation67_spill] sm:$0xff] %v17086_v19 }
 0x345   :  { %v2598_v18 = vpop.f32.mrb[0].mxu1 }
 0x346   :  { %v14015_v39 = vadd.f32 %v17084_v21, %v2598_v18  ;;  %v2600_v16 = vpop.f32.mrb[1].mxu1 }
 0x347   :  { %v14017_v53 = vadd.f32 %v17086_v19, %v2600_v16  ;;  %v2602_v49 = vpop.f32.mrb[2].mxu1 }
 0x348   :  { %v12830_v13 = vmul.f32 -1.442695, %v14015_v39  ;;  %v14019_v11 = vadd.f32 %v17084_v21, %v2602_v49  ;;  %v2604_v28 = vpop.f32.mrb[3].mxu1  ;;  %v843_v49 = vsub.s32 4, %v17048_v15 }
 0x349   :  { %v12831_v35 = vmul.f32 -1.442695, %v14017_v53  ;;  %v14021_v57 = vadd.f32 %v17086_v19, %v2604_v28  ;;  %v847_v28 = vsub.s32 5, %v17048_v15 }
 0x34a   :  { %15506 = vpow2.f32 %v12830_v13  ;;  %v12832_v22 = vmul.f32 -1.442695, %v14019_v11  ;;  %v17101_v13 = vrot.slane %v17061_v20, %v843_v49 }
 0x34b   :  { %15508 = vpow2.f32 %v12831_v35  ;;  %v12833_v34 = vmul.f32 -1.442695, %v14021_v57  ;;  %v17095_v35 = vrot.slane %v17068_v40, %v843_v49  ;;  %v17098_v11 = vrot.slane %v17068_v40, %v847_v28 }
 0x34c   :  { %15510 = vpow2.f32 %v12832_v22  ;;  %v17106_v57 = vrot.slane %v17061_v20, %v847_v28 }
 0x34d   :  { %15512 = vpow2.f32 %v12833_v34  ;;  %20316 = vst [vmem:[#allocation68_spill] sm:$0xff] %v17095_v35  ;;  %20317 = vst [vmem:[#allocation69_spill] sm:$0xff] %v17098_v11  ;;  %v2685_v22 = vadd.f32 %v16880_v12, %v17095_v35  ;;  %v2689_v34 = vadd.f32 %v16888_v47, %v17095_v35 }
 0x34e   :  { %v1678_v12 = vadd.f32 %v16882_v41, %v17106_v57  ;;  %v1682_v4 = vadd.f32 %v16890_v58, %v17106_v57 }
 0x354   :  { %v15507_v54 = vpop.eup %15506 }
 0x355   :  { %v15509_v52 = vpop.eup %15508  ;;  %v2709_v18 = vadd.f32 1.0, %v15507_v54 }
 0x356   :  { %v15511_v10 = vpop.eup %15510  ;;  %v2710_v5 = vadd.f32 1.0, %v15509_v52  ;;  %v2691_v52 = vadd.f32 %v16892_v59, %v17098_v11 }
 0x357   :  { %v15513_v16 = vpop.eup %15512  ;;  %15514 = vrcp.f32 %v2709_v18  ;;  %v2711_v39 = vadd.f32 1.0, %v15511_v10  ;;  %v1676_v10 = vadd.f32 %v16878_v7, %v17101_v13  ;;  %v835_v7 = vsub.s32 2, %v17048_v15 }
 0x358   :  { %15516 = vrcp.f32 %v2710_v5  ;;  %v2712_v53 = vadd.f32 1.0, %v15513_v16  ;;  %v2687_v5 = vadd.f32 %v16884_v27, %v17098_v11  ;;  %v1680_v27 = vadd.f32 %v16886_v46, %v17101_v13 }
 0x359   :  { %15518 = vrcp.f32 %v2711_v39  ;;  %v17125_v41 = vrot.slane %v17061_v20, %v835_v7 }
 0x35a   :  { %15520 = vrcp.f32 %v2712_v53 }
 0x35b   :  { %v1523_v46 = vadd.f32 %v16845_v30, %v17125_v41 }
 0x361   :  { %v15515_v54 = vpop.eup %15514 }
 0x362   :  { %v15517_v18 = vpop.eup %15516  ;;  %v2749_v16 = vmul.f32 %v15515_v54, %v2685_v22  ;;  %v839_v22 = vsub.s32 3, %v17048_v15 }
 0x363   :  { %v15519_v39 = vpop.eup %15518  ;;  %v2750_v49 = vmul.f32 %v15517_v18, %v2687_v5 }
 0x364   :  { %v15521_v53 = vpop.eup %15520  ;;  %v2753_v28 = vadd.f32 %v2749_v16, %v1676_v10  ;;  %v2751_v47 = vmul.f32 %v15519_v39, %v2689_v34  ;;  %v17128_v5 = vrot.slane %v17061_v20, %v839_v22  ;;  %v17133_v34 = vrot.slane %v17068_v40, %v835_v7 }
 0x365   :  { %v2754_v59 = vadd.f32 %v2750_v49, %v1678_v12  ;;  %v2752_v3 = vmul.f32 %v15521_v53, %v2691_v52 }
 0x366   :  { %v2755_v11 = vadd.f32 %v2751_v47, %v1680_v27  ;;  %v1525_v58 = vadd.f32 %v16847_v55, %v17128_v5  ;;  %v1529_v15 = vadd.f32 %v16852_v6, %v17128_v5  ;;  %v14111_v20 = vadd.f32 %v17133_v34, %v1523_v46 }
 0x367   :  { %v2756_v35 = vadd.f32 %v2752_v3, %v1682_v4  ;;  %v17138_v3 = vrot.slane %v17068_v40, %v839_v22  ;;  %v1527_v4 = vadd.f32 %v16850_v56, %v17125_v41 }
 0x369   :  { %v14114_v30 = vadd.f32 %v17138_v3, %v1525_v58  ;;  %v14117_v10 = vadd.f32 %v17133_v34, %v1527_v4  ;;  %v14120_v40 = vadd.f32 %v17138_v3, %v1529_v15 }
 0x385   :  { %v2641_v54 = vpop.f32.mrb[96].mxu1 }
 0x386   :  { %v14112_v52 = vadd.f32 %v14111_v20, %v2641_v54  ;;  %v2643_v18 = vpop.f32.mrb[97].mxu1 }
 0x387   :  { %v14115_v16 = vadd.f32 %v14114_v30, %v2643_v18  ;;  %v2645_v55 = vpop.f32.mrb[98].mxu1 }
 0x388   :  { %v12834_v39 = vmul.f32 -1.442695, %v14112_v52  ;;  %v14118_v12 = vadd.f32 %v14117_v10, %v2645_v55  ;;  %v2647_v49 = vpop.f32.mrb[99].mxu1 }
 0x389   :  { %v12835_v56 = vmul.f32 -1.442695, %v14115_v16  ;;  %v14121_v53 = vadd.f32 %v14120_v40, %v2647_v49 }
 0x38a   :  { %15522 = vpow2.f32 %v12834_v39  ;;  %v12836_v6 = vmul.f32 -1.442695, %v14118_v12 }
 0x38b   :  { %15524 = vpow2.f32 %v12835_v56  ;;  %v12837_v27 = vmul.f32 -1.442695, %v14121_v53 }
 0x38c   :  { %15526 = vpow2.f32 %v12836_v6 }
 0x38d   :  { %15528 = vpow2.f32 %v12837_v27 }
 0x38e   :  { %15530 = vtanh.f32 %v2753_v28 }
 0x38f   :  { %15532 = vtanh.f32 %v2754_v59 }
 0x394   :  { %v15523_v47 = vpop.eup %15522 }
 0x395   :  { %v15525_v7 = vpop.eup %15524  ;;  %v2737_v22 = vadd.f32 1.0, %v15523_v47 }
 0x396   :  { %v15527_v46 = vpop.eup %15526  ;;  %v2738_v58 = vadd.f32 1.0, %v15525_v7 }
 0x397   :  { %v15529_v4 = vpop.eup %15528  ;;  %15534 = vrcp.f32 %v2737_v22  ;;  %v2739_v15 = vadd.f32 1.0, %v15527_v46 }
 0x398   :  { %15536 = vrcp.f32 %v2738_v58  ;;  %v2740_v20 = vadd.f32 1.0, %v15529_v4  ;;  %v15531_v54 = vpop.eup %15530  ;;  %v17170_v4 = vld [vmem:[#allocation9 + $0x44] ss:$24 sps:$4 sm:$0xff]  }
 0x399   :  { %15538 = vrcp.f32 %v2739_v15  ;;  %v15533_v30 = vpop.eup %15532  ;;  %v17181_v15 = vld [vmem:[#allocation9 + $0x74] ss:$24 sps:$4 sm:$0xff]  }
 0x39a   :  { %15540 = vrcp.f32 %v2740_v20  ;;  %v17184_v20 = vld [vmem:[#allocation9 + $0x70] ss:$24 sps:$4 sm:$0xff]  }
 0x39b   :  { %15542 = vtanh.f32 %v2755_v11 }
 0x39c   :  { %15544 = vtanh.f32 %v2756_v35 }
 0x3a1   :  { %v15535_v52 = vpop.eup %15534 }
 0x3a2   :  { %v15537_v18 = vpop.eup %15536  ;;  %v2761_v10 = vsub.f32 1.0, %v15535_v52  ;;  %v2769_v39 = vmul.f32 %v15535_v52, %v16696_v60  ;;  %v17193_v52 = vld [vmem:[#allocation9 + $0xd4] ss:$24 sps:$4 sm:$0xff]  }
 0x3a3   :  { %v15539_v16 = vpop.eup %15538  ;;  %v2762_v28 = vsub.f32 1.0, %v15537_v18  ;;  %v2770_v53 = vmul.f32 %v15537_v18, %v16674_v50  ;;  %v17164_v50 = vld [vmem:[#allocation9 + $0x10] ss:$24 sps:$4 sm:$0xff]  }
 0x3a4   :  { %v15541_v55 = vpop.eup %15540  ;;  %v2763_v40 = vsub.f32 1.0, %v15539_v16  ;;  %v2765_v59 = vmul.f32 %v15531_v54, %v2761_v10  ;;  %v2771_v35 = vmul.f32 %v15539_v16, %v16701_v61  ;;  %v17187_v54 = vld [vmem:[#allocation9 + $0xa4] ss:$24 sps:$4 sm:$0xff]   ;;  %v17196_v18 = vld [vmem:[#allocation9 + $0xd0] ss:$24 sps:$4 sm:$0xff]  }
 0x3a5   :  { %v15543_v12 = vpop.eup %15542  ;;  %v2764_v49 = vsub.f32 1.0, %v15541_v55  ;;  %v2766_v56 = vmul.f32 %v15533_v30, %v2762_v28  ;;  %v2772_v7 = vmul.f32 %v15541_v55, %v16679_v51  ;;  %v17178_v51 = vld [vmem:[#allocation9 + $0x40] ss:$24 sps:$4 sm:$0xff]   ;;  %v17199_v10 = vld [vmem:[#allocation9 + $0x104] ss:$24 sps:$4 sm:$0xff]  }
 0x3a6   :  { %v15545_v6 = vpop.eup %15544  ;;  %v2767_v11 = vmul.f32 %v15543_v12, %v2763_v40  ;;  %v17151_v27 = vadd.f32 %v2769_v39, %v2765_v59  ;;  %v17190_v30 = vld [vmem:[#allocation9 + $0xa0] ss:$24 sps:$4 sm:$0xff]   ;;  %v17205_v28 = vld [vmem:[#allocation9 + $0x134] ss:$24 sps:$4 sm:$0xff]   ;;  %v17208_v55 = vld [vmem:[#allocation9 + $0x130] ss:$24 sps:$4 sm:$0xff]  }
 0x3a7   :  { %v2768_v47 = vmul.f32 %v15545_v6, %v2764_v49  ;;  %v17154_v22 = vadd.f32 %v2770_v53, %v2766_v56  ;;  %v17202_v16 = vld [vmem:[#allocation9 + $0x100] ss:$24 sps:$4 sm:$0xff]   ;;  %v17211_v40 = vld [vmem:[#allocation9 + $0x164] ss:$24 sps:$4 sm:$0xff]   ;;  %v17217_v39 = vld [vmem:[#allocation9 + $0x194] ss:$24 sps:$4 sm:$0xff]  }
 0x3a8   :  { %v17156_v46 = vadd.f32 %v2771_v35, %v2767_v11  ;;  %20320 = vst [vmem:[#allocation72_spill] sm:$0xff] %v17211_v40  ;;  %v17214_v59 = vld [vmem:[#allocation9 + $0x160] ss:$24 sps:$4 sm:$0xff]   ;;  %20322 = vst [vmem:[#allocation74_spill] sm:$0xff] %v17217_v39  ;;  %v17220_v12 = vld [vmem:[#allocation9 + $0x190] ss:$24 sps:$4 sm:$0xff]  }
 0x3a9   :  { %v17158_v58 = vadd.f32 %v2772_v7, %v2768_v47  ;;  %20321 = vst [vmem:[#allocation73_spill] sm:$0xff] %v17214_v59  ;;  %20323 = vst [vmem:[#allocation75_spill] sm:$0xff] %v17220_v12  ;;  %v17223_v49 = vld [vmem:[#allocation9 + $0x1c4] ss:$24 sps:$4 sm:$0xff]   ;;  %v17226_v56 = vld [vmem:[#allocation9 + $0x1c0] ss:$24 sps:$4 sm:$0xff]  }
 0x3aa   :  { %v17168_v61 = vpack.c.bf16 %v17156_v46, %v17151_v27  ;;  %20324 = vst [vmem:[#allocation76_spill] sm:$0xff] %v17223_v49  ;;  %20325 = vst [vmem:[#allocation77_spill] sm:$0xff] %v17226_v56  ;;  %v17229_v53 = vld [vmem:[#allocation9 + $0x1f4] ss:$24 sps:$4 sm:$0xff]   ;;  %v17232_v6 = vld [vmem:[#allocation9 + $0x1f0] ss:$24 sps:$4 sm:$0xff]  }
 0x3ab   :  { %v17162_v60 = vpack.c.bf16 %v17158_v58, %v17154_v22  ;;  %20326 = vst [vmem:[#allocation78_spill] sm:$0xff] %v17229_v53  ;;  %20327 = vst [vmem:[#allocation79_spill] sm:$0xff] %v17232_v6  ;;  %v17235_v11 = vld [vmem:[#allocation9 + $0x224] ss:$24 sps:$4 sm:$0xff]   ;;  %v17238_v35 = vld [vmem:[#allocation9 + $0x220] ss:$24 sps:$4 sm:$0xff]  }
 0x3ac   :  { %20319 = vst [vmem:[#allocation71_spill] sm:$0xff] %v17168_v61  ;;  %20328 = vst [vmem:[#allocation80_spill] sm:$0xff] %v17235_v11  ;;  %v17241_v47 = vld [vmem:[#allocation9 + $0x254] ss:$24 sps:$4 sm:$0xff]   ;;  %v17244_v7 = vld [vmem:[#allocation9 + $0x250] ss:$24 sps:$4 sm:$0xff]  }
 0x3ad   :  { %20318 = vst [vmem:[#allocation70_spill] sm:$0xff] %v17162_v60  ;;  %3403 = vmatprep.mubr.bf16.mxu1 %v17162_v60  ;;  %3446 = vmatprep.mubr.bf16.mxu0 %v17162_v60  ;;  %20329 = vst [vmem:[#allocation81_spill] sm:$0xff] %v17238_v35 }
 0x3ae   :  { %3404 = vmatmul.mubr.bf16.vlgmr.msra.gmra.mrb[4].mxu1 %v17168_v61  ;;  %3447 = vmatmul.mubr.bf16.vlgmr.msra.gmra.mrb[52].mxu0 %v17168_v61  ;;  %20330 = vst [vmem:[#allocation82_spill] sm:$0xff] %v17241_v47  ;;  %20331 = vst [vmem:[#allocation83_spill] sm:$0xff] %v17244_v7 }
 0x3af   :  { %3458 = vmatpush1.bf16.msra.mxu1 %v17164_v50  ;;  %3489 = vmatprep.mubr.bf16.mxu1 %v17162_v60  ;;  %v17247_v60 = vld [vmem:[#allocation9 + $0x284] ss:$24 sps:$4 sm:$0xff]  }
 0x3b0   :  { %3459 = vmatprep.subr.bf16.mxu1 %v17170_v4  ;;  %20332 = vst [vmem:[#allocation84_spill] sm:$0xff] %v17247_v60 }
 0x3b3   :  { %3460 = vmatpush1.bf16.msra.mxu1 %v17178_v51 }
 0x3b4   :  { %3461 = vmatprep.subr.bf16.mxu1 %v17181_v15 }
 0x3b7   :  { %3462 = vmatpush1.bf16.msra.mxu1 %v17184_v20 }
 0x3b8   :  { %3463 = vmatprep.subr.bf16.mxu1 %v17187_v54 }
 0x3bb   :  { %3464 = vmatpush1.bf16.msra.mxu1 %v17190_v30 }
 0x3bc   :  { %3465 = vmatprep.subr.bf16.mxu1 %v17193_v52 }
 0x3bf   :  { %3466 = vmatpush1.bf16.msra.mxu1 %v17196_v18 }
 0x3c0   :  { %3467 = vmatprep.subr.bf16.mxu1 %v17199_v10 }
 0x3c3   :  { %3468 = vmatpush1.bf16.msra.mxu1 %v17202_v16 }
 0x3c4   :  { %3469 = vmatprep.subr.bf16.mxu1 %v17205_v28 }
 0x3c7   :  { %3470 = vmatpush1.bf16.msra.mxu1 %v17208_v55 }
 0x3c8   :  { %3471 = vmatprep.subr.bf16.mxu1 %v17211_v40  ;;  %v17328_v40 = vld [vmem:[#allocation9 + $0x12c] ss:$24 sps:$4 sm:$0xff]  }
 0x3cb   :  { %3472 = vmatpush1.bf16.msra.mxu1 %v17214_v59  ;;  %v17312_v59 = vld [vmem:[#allocation9 + $0xcc] ss:$24 sps:$4 sm:$0xff]  }
 0x3cc   :  { %3473 = vmatprep.subr.bf16.mxu1 %v17217_v39  ;;  %v17306_v39 = vld [vmem:[#allocation9 + $0x98] ss:$24 sps:$4 sm:$0xff]  }
 0x3cd   :  { %20345 = vst [vmem:[#allocation97_spill] sm:$0xff] %v17306_v39 }
 0x3cf   :  { %3474 = vmatpush1.bf16.msra.mxu1 %v17220_v12  ;;  %v17300_v12 = vld [vmem:[#allocation9 + $0x9c] ss:$24 sps:$4 sm:$0xff]  }
 0x3d0   :  { %3475 = vmatprep.subr.bf16.mxu1 %v17223_v49  ;;  %v17291_v49 = vld [vmem:[#allocation9 + $0x64] ss:$24 sps:$4 sm:$0xff]   ;;  %20344 = vst [vmem:[#allocation96_spill] sm:$0xff] %v17300_v12 }
 0x3d3   :  { %3476 = vmatpush1.bf16.msra.mxu1 %v17226_v56  ;;  %v17273_v56 = vld [vmem:[#allocation9 + $0x4] ss:$24 sps:$4 sm:$0xff]  }
 0x3d4   :  { %3477 = vmatprep.subr.bf16.mxu1 %v17229_v53  ;;  %v17250_v53 = vld [vmem:[#allocation9 + $0x280] ss:$24 sps:$4 sm:$0xff]  }
 0x3d5   :  { %20333 = vst [vmem:[#allocation85_spill] sm:$0xff] %v17250_v53 }
 0x3d7   :  { %3478 = vmatpush1.bf16.msra.mxu1 %v17232_v6  ;;  %v17253_v6 = vld [vmem:[#allocation9 + $0x2b4] ss:$24 sps:$4 sm:$0xff]  }
 0x3d8   :  { %3479 = vmatprep.subr.bf16.mxu1 %v17235_v11  ;;  %20334 = vst [vmem:[#allocation86_spill] sm:$0xff] %v17253_v6  ;;  %v17256_v11 = vld [vmem:[#allocation9 + $0x2b0] ss:$24 sps:$4 sm:$0xff]  }
 0x3d9   :  { %20335 = vst [vmem:[#allocation87_spill] sm:$0xff] %v17256_v11 }
 0x3db   :  { %3480 = vmatpush1.bf16.msra.mxu1 %v17238_v35  ;;  %v17259_v35 = vld [vmem:[#allocation9 + $0x2e4] ss:$24 sps:$4 sm:$0xff]  }
 0x3dc   :  { %3481 = vmatprep.subr.bf16.mxu1 %v17241_v47  ;;  %20336 = vst [vmem:[#allocation88_spill] sm:$0xff] %v17259_v35  ;;  %v17262_v47 = vld [vmem:[#allocation9 + $0x2e0] ss:$24 sps:$4 sm:$0xff]  }
 0x3dd   :  { %20337 = vst [vmem:[#allocation89_spill] sm:$0xff] %v17262_v47 }
 0x3df   :  { %3482 = vmatpush1.bf16.msra.mxu1 %v17244_v7  ;;  %v17269_v7 = vld [vmem:[#allocation9 + $0xc] ss:$24 sps:$4 sm:$0xff]  }
 0x3e0   :  { %3483 = vmatprep.subr.bf16.mxu1 %v17247_v60  ;;  %v17267_v60 = vld [vmem:[#allocation9 + $0x8] ss:$24 sps:$4 sm:$0xff]   ;;  %20339 = vst [vmem:[#allocation91_spill] sm:$0xff] %v17269_v7  ;;  %4221 = vmatprep.subr.bf16.mxu0 %v17269_v7 }
 0x3e1   :  { %20338 = vst [vmem:[#allocation90_spill] sm:$0xff] %v17267_v60  ;;  %4222 = vmatpush1.bf16.msra.mxu0 %v17267_v60  ;;  %v17294_v7 = vld [vmem:[#allocation9 + $0x68] ss:$24 sps:$4 sm:$0xff]  }
 0x3e2   :  { %20343 = vst [vmem:[#allocation95_spill] sm:$0xff] %v17294_v7  ;;  %v17298_v60 = vld [vmem:[#allocation9 + $0x60] ss:$24 sps:$4 sm:$0xff]  }
 0x3e3   :  { %3484 = vmatpush1.bf16.msra.mxu1 %v17250_v53  ;;  %v17271_v53 = vld [vmem:[#allocation9] ss:$24 sps:$4 sm:$0xff]  }
 0x3e4   :  { %3485 = vmatprep.subr.bf16.mxu1 %v17253_v6  ;;  %v17275_v6 = vld [vmem:[#allocation9 + $0x3c] ss:$24 sps:$4 sm:$0xff]  }
 0x3e5   :  { %20340 = vst [vmem:[#allocation92_spill] sm:$0xff] %v17275_v6  ;;  %4223 = vmatprep.subr.bf16.mxu0 %v17275_v6  ;;  %v17303_v6 = vld [vmem:[#allocation9 + $0x94] ss:$24 sps:$4 sm:$0xff]  }
 0x3e7   :  { %3486 = vmatpush1.bf16.msra.mxu1 %v17256_v11  ;;  %v17278_v11 = vld [vmem:[#allocation9 + $0x34] ss:$24 sps:$4 sm:$0xff]  }
 0x3e8   :  { %3487 = vmatprep.subr.bf16.mxu1 %v17259_v35  ;;  %v17288_v35 = vld [vmem:[#allocation9 + $0x6c] ss:$24 sps:$4 sm:$0xff]  }
 0x3e9   :  { %20342 = vst [vmem:[#allocation94_spill] sm:$0xff] %v17288_v35 }
 0x3eb   :  { %3488 = vmatpush1.bf16.msra.mxu1 %v17262_v47  ;;  %v17282_v47 = vld [vmem:[#allocation9 + $0x38] ss:$24 sps:$4 sm:$0xff]  }
 0x3ec   :  { %4178 = vmatprep.subr.bf16.mxu1 %v17273_v56  ;;  %20341 = vst [vmem:[#allocation93_spill] sm:$0xff] %v17282_v47  ;;  %4224 = vmatpush1.bf16.msra.mxu0 %v17282_v47  ;;  %v17310_v47 = vld [vmem:[#allocation9 + $0x90] ss:$24 sps:$4 sm:$0xff]  }
 0x3ed   :  { %4225 = vmatprep.subr.bf16.mxu0 %v17288_v35  ;;  %v17316_v35 = vld [vmem:[#allocation9 + $0xc8] ss:$24 sps:$4 sm:$0xff]  }
 0x3ee   :  { %3490 = vmatmul.mubr.bf16.vlgmr.msra.gmra.mrb[100].mxu1 %v17168_v61  ;;  %v17286_v61 = vld [vmem:[#allocation9 + $0x30] ss:$24 sps:$4 sm:$0xff]  }
 0x3ef   :  { %4179 = vmatpush1.bf16.msra.mxu1 %v17271_v53 }
 0x3f0   :  { %4180 = vmatprep.subr.bf16.mxu1 %v17278_v11  ;;  %4226 = vmatpush1.bf16.msra.mxu0 %v17294_v7  ;;  %v17320_v7 = vld [vmem:[#allocation9 + $0xfc] ss:$24 sps:$4 sm:$0xff]  }
 0x3f1   :  { %4227 = vmatprep.subr.bf16.mxu0 %v17300_v12  ;;  %v17324_v12 = vld [vmem:[#allocation9 + $0xf8] ss:$24 sps:$4 sm:$0xff]  }
 0x3f3   :  { %4181 = vmatpush1.bf16.msra.mxu1 %v17286_v61 }
 0x3f4   :  { %4182 = vmatprep.subr.bf16.mxu1 %v17291_v49  ;;  %4228 = vmatpush1.bf16.msra.mxu0 %v17306_v39  ;;  %v17332_v39 = vld [vmem:[#allocation9 + $0x128] ss:$24 sps:$4 sm:$0xff]  }
 0x3f5   :  { %4229 = vmatprep.subr.bf16.mxu0 %v17312_v59 }
 0x3f7   :  { %4183 = vmatpush1.bf16.msra.mxu1 %v17298_v60 }
 0x3f8   :  { %4184 = vmatprep.subr.bf16.mxu1 %v17303_v6  ;;  %4230 = vmatpush1.bf16.msra.mxu0 %v17316_v35 }
 0x3f9   :  { %4231 = vmatprep.subr.bf16.mxu0 %v17320_v7 }
 0x3fb   :  { %4185 = vmatpush1.bf16.msra.mxu1 %v17310_v47 }
 0x3fc   :  { %4186 = vmatprep.subr.bf16.mxu1 %v16896_v36  ;;  %4232 = vmatpush1.bf16.msra.mxu0 %v17324_v12  ;;  %v17336_v36 = vld [vmem:[#allocation9 + $0x15c] ss:$24 sps:$4 sm:$0xff]  }
 0x3fd   :  { %4233 = vmatprep.subr.bf16.mxu0 %v17328_v40 }
 0x3ff   :  { %4187 = vmatpush1.bf16.msra.mxu1 %v16894_v0  ;;  %v17340_v0 = vld [vmem:[#allocation9 + $0x158] ss:$24 sps:$4 sm:$0xff]  }
 0x400   :  { %4188 = vmatprep.subr.bf16.mxu1 %v16898_v1  ;;  %4234 = vmatpush1.bf16.msra.mxu0 %v17332_v39  ;;  %v17344_v1 = vld [vmem:[#allocation9 + $0x18c] ss:$24 sps:$4 sm:$0xff]  }
 0x401   :  { %4235 = vmatprep.subr.bf16.mxu0 %v17336_v36 }
 0x403   :  { %4189 = vmatpush1.bf16.msra.mxu1 %v16902_v2  ;;  %v17348_v2 = vld [vmem:[#allocation9 + $0x188] ss:$24 sps:$4 sm:$0xff]  }
 0x404   :  { %4190 = vmatprep.subr.bf16.mxu1 %v16930_v17  ;;  %4236 = vmatpush1.bf16.msra.mxu0 %v17340_v0  ;;  %v17352_v17 = vld [vmem:[#allocation9 + $0x1bc] ss:$24 sps:$4 sm:$0xff]  }
 0x405   :  { %4237 = vmatprep.subr.bf16.mxu0 %v17344_v1 }
 0x407   :  { %4191 = vmatpush1.bf16.msra.mxu1 %v16932_v25  ;;  %v17356_v25 = vld [vmem:[#allocation9 + $0x1b8] ss:$24 sps:$4 sm:$0xff]  }
 0x408   :  { %4192 = vmatprep.subr.bf16.mxu1 %v16942_v24  ;;  %4238 = vmatpush1.bf16.msra.mxu0 %v17348_v2  ;;  %v17364_v24 = vld [vmem:[#allocation9 + $0x1ec] ss:$24 sps:$4 sm:$0xff]  }
 0x409   :  { %4239 = vmatprep.subr.bf16.mxu0 %v17352_v17 }
 0x40b   :  { %4193 = vmatpush1.bf16.msra.mxu1 %v16946_v42  ;;  %v17366_v42 = vld [vmem:[#allocation9 + $0x1e8] ss:$24 sps:$4 sm:$0xff]  }
 0x40c   :  { %4194 = vmatprep.subr.bf16.mxu1 %v16950_v32  ;;  %4240 = vmatpush1.bf16.msra.mxu0 %v17356_v25  ;;  %20346 = vst [vmem:[#allocation98_spill] sm:$0xff] %v17366_v42  ;;  %v17372_v32 = vld [vmem:[#allocation9 + $0x21c] ss:$24 sps:$4 sm:$0xff]  }
 0x40d   :  { %4241 = vmatprep.subr.bf16.mxu0 %v17364_v24  ;;  %20347 = vst [vmem:[#allocation99_spill] sm:$0xff] %v17372_v32 }
 0x40f   :  { %4195 = vmatpush1.bf16.msra.mxu1 %v16952_v44  ;;  %v17374_v44 = vld [vmem:[#allocation9 + $0x218] ss:$24 sps:$4 sm:$0xff]  }
 0x410   :  { %4196 = vmatprep.subr.bf16.mxu1 %v16962_v63  ;;  %4242 = vmatpush1.bf16.msra.mxu0 %v17366_v42  ;;  %20348 = vst [vmem:[#allocation100_spill] sm:$0xff] %v17374_v44  ;;  %v17378_v63 = vld [vmem:[#allocation9 + $0x24c] ss:$24 sps:$4 sm:$0xff]  }
 0x411   :  { %4243 = vmatprep.subr.bf16.mxu0 %v17372_v32  ;;  %20349 = vst [vmem:[#allocation101_spill] sm:$0xff] %v17378_v63  ;;  %v17423_v32 = vadd.f32 %v17138_v3, %v17128_v5 }
 0x413   :  { %4197 = vmatpush1.bf16.msra.mxu1 %v16966_v26  ;;  %v17382_v26 = vld [vmem:[#allocation9 + $0x248] ss:$24 sps:$4 sm:$0xff]   ;;  %20358 = vst [vmem:[#allocation110_spill] sm:$0xff] %v17423_v32 }
 0x414   :  { %4198 = vmatprep.subr.bf16.mxu1 %v16970_v29  ;;  %4244 = vmatpush1.bf16.msra.mxu0 %v17374_v44  ;;  %20350 = vst [vmem:[#allocation102_spill] sm:$0xff] %v17382_v26  ;;  %v17385_v29 = vld [vmem:[#allocation9 + $0x27c] ss:$24 sps:$4 sm:$0xff]  }
 0x415   :  { %4245 = vmatprep.subr.bf16.mxu0 %v17378_v63  ;;  %20351 = vst [vmem:[#allocation103_spill] sm:$0xff] %v17385_v29 }
 0x417   :  { %4199 = vmatpush1.bf16.msra.mxu1 %v16972_v62  ;;  %v17390_v62 = vld [vmem:[#allocation9 + $0x278] ss:$24 sps:$4 sm:$0xff]  }
 0x418   :  { %4200 = vmatprep.subr.bf16.mxu1 %v16982_v38  ;;  %4246 = vmatpush1.bf16.msra.mxu0 %v17382_v26  ;;  %20352 = vst [vmem:[#allocation104_spill] sm:$0xff] %v17390_v62  ;;  %v17393_v38 = vld [vmem:[#allocation9 + $0x2ac] ss:$24 sps:$4 sm:$0xff]  }
 0x419   :  { %4247 = vmatprep.subr.bf16.mxu0 %v17385_v29  ;;  %20353 = vst [vmem:[#allocation105_spill] sm:$0xff] %v17393_v38 }
 0x41b   :  { %4201 = vmatpush1.bf16.msra.mxu1 %v16986_v14  ;;  %v17398_v14 = vld [vmem:[#allocation9 + $0x2a8] ss:$24 sps:$4 sm:$0xff]  }
 0x41c   :  { %4202 = vmatprep.subr.bf16.mxu1 %v16992_v45  ;;  %4248 = vmatpush1.bf16.msra.mxu0 %v17390_v62  ;;  %20354 = vst [vmem:[#allocation106_spill] sm:$0xff] %v17398_v14  ;;  %v17406_v45 = vld [vmem:[#allocation9 + $0x2d8] ss:$24 sps:$4 sm:$0xff]  }
 0x41d   :  { %4249 = vmatprep.subr.bf16.mxu0 %v17393_v38  ;;  %20356 = vst [vmem:[#allocation108_spill] sm:$0xff] %v17406_v45 }
 0x41f   :  { %4203 = vmatpush1.bf16.msra.mxu1 %v16990_v43  ;;  %v17401_v43 = vld [vmem:[#allocation9 + $0x2dc] ss:$24 sps:$4 sm:$0xff]  }
 0x420   :  { %4204 = vmatprep.subr.bf16.mxu1 %v16994_v8  ;;  %20355 = vst [vmem:[#allocation107_spill] sm:$0xff] %v17401_v43  ;;  %4250 = vmatpush1.bf16.msra.mxu0 %v17398_v14 }
 0x421   :  { %4251 = vmatprep.subr.bf16.mxu0 %v17401_v43 }
 0x423   :  { %4205 = vmatpush1.bf16.msra.mxu1 %v17002_v31 }
 0x424   :  { %4206 = vmatprep.subr.bf16.mxu1 %v17007_v9  ;;  %4252 = vmatpush1.bf16.msra.mxu0 %v17406_v45 }
 0x425   :  { %4264 = vmatprep.subr.bf16.mxu0 %v17030_v23  ;;  %v17419_v23 = vadd.f32 %v17133_v34, %v17125_v41 }
 0x427   :  { %4207 = vmatpush1.bf16.msra.mxu1 %v17012_v37  ;;  %20357 = vst [vmem:[#allocation109_spill] sm:$0xff] %v17419_v23 }
 0x428   :  { %4208 = vmatprep.subr.bf16.mxu1 %v17015_v33 }
 0x42b   :  { %4209 = vmatpush1.bf16.msra.mxu1 %v17022_v48 }
 0x42c   :  { %4985 = vmatprep.subr.bf16.mxu1 %v17273_v56 }
 0x481   :  { %v3405_v9 = vpop.f32.mrb[4].mxu1  ;;  %v3448_v8 = vpop.f32.mrb[52].mxu0 }
 0x482   :  { %v3407_v31 = vpop.f32.mrb[5].mxu1  ;;  %v3450_v37 = vpop.f32.mrb[53].mxu0  ;;  %v14023_v29 = vadd.f32 %v17084_v21, %v3405_v9  ;;  %v14123_v9 = vadd.f32 %v17419_v23, %v3448_v8 }
 0x483   :  { %v3409_v38 = vpop.f32.mrb[6].mxu1  ;;  %v3452_v33 = vpop.f32.mrb[54].mxu0  ;;  %v14025_v43 = vadd.f32 %v17086_v19, %v3407_v31 }
 0x484   :  { %v3411_v62 = vpop.f32.mrb[7].mxu1  ;;  %v3454_v14 = vpop.f32.mrb[55].mxu0  ;;  %v14027_v48 = vadd.f32 %v17084_v21, %v3409_v38  ;;  %v12934_v26 = vmul.f32 -1.442695, %v14023_v29  ;;  %v14127_v29 = vadd.f32 %v17419_v23, %v3452_v33 }
 0x485   :  { %v14029_v56 = vadd.f32 %v17086_v19, %v3411_v62  ;;  %v12935_v45 = vmul.f32 -1.442695, %v14025_v43  ;;  %v14125_v62 = vadd.f32 %v17423_v32, %v3450_v37  ;;  %v14129_v38 = vadd.f32 %v17423_v32, %v3454_v14 }
 0x486   :  { %v12936_v63 = vmul.f32 -1.442695, %v14027_v48  ;;  %15546 = vpow2.f32 %v12934_v26  ;;  %v12938_v43 = vmul.f32 -1.442695, %v14123_v9  ;;  %v12940_v34 = vmul.f32 -1.442695, %v14127_v29 }
 0x487   :  { %v12937_v44 = vmul.f32 -1.442695, %v14029_v56  ;;  %15548 = vpow2.f32 %v12935_v45  ;;  %v12939_v41 = vmul.f32 -1.442695, %v14125_v62  ;;  %v12941_v48 = vmul.f32 -1.442695, %v14129_v38 }
 0x488   :  { %15550 = vpow2.f32 %v12936_v63 }
 0x489   :  { %15552 = vpow2.f32 %v12937_v44 }
 0x48a   :  { %15554 = vpow2.f32 %v12938_v43  ;;  %v20359_v43 = vld [vmem:[#allocation68_spill] sm:$0xff] }
 0x48b   :  { %15556 = vpow2.f32 %v12939_v41 }
 0x48c   :  { %15558 = vpow2.f32 %v12940_v34 }
 0x48d   :  { %15560 = vpow2.f32 %v12941_v48  ;;  %v20360_v48 = vld [vmem:[#allocation69_spill] sm:$0xff] }
 0x490   :  { %v15547_v31 = vpop.eup %15546 }
 0x491   :  { %v15549_v56 = vpop.eup %15548  ;;  %v3516_v63 = vadd.f32 1.0, %v15547_v31 }
 0x492   :  { %v15551_v5 = vpop.eup %15550  ;;  %v3517_v26 = vadd.f32 1.0, %v15549_v56 }
 0x493   :  { %v15553_v3 = vpop.eup %15552  ;;  %v3518_v44 = vadd.f32 1.0, %v15551_v5  ;;  %15562 = vrcp.f32 %v3516_v63 }
 0x494   :  { %v3519_v45 = vadd.f32 1.0, %v15553_v3  ;;  %15564 = vrcp.f32 %v3517_v26  ;;  %v15555_v14 = vpop.eup %15554  ;;  %v20361_v26 = vld [vmem:[#allocation20_spill] sm:$0xff] }
 0x495   :  { %15566 = vrcp.f32 %v3518_v44  ;;  %v15557_v8 = vpop.eup %15556  ;;  %v3544_v9 = vadd.f32 1.0, %v15555_v14  ;;  %v1686_v44 = vadd.f32 %v20361_v26, %v17101_v13 }
 0x496   :  { %15568 = vrcp.f32 %v3519_v45  ;;  %v15559_v37 = vpop.eup %15558  ;;  %v3545_v62 = vadd.f32 1.0, %v15557_v8 }
 0x497   :  { %v15561_v33 = vpop.eup %15560  ;;  %v3546_v38 = vadd.f32 1.0, %v15559_v37  ;;  %15570 = vrcp.f32 %v3544_v9  ;;  %v20362_v37 = vld [vmem:[#allocation21_spill] sm:$0xff]  ;;  %v20364_v9 = vld [vmem:[#allocation23_spill] sm:$0xff] }
 0x498   :  { %v3547_v56 = vadd.f32 1.0, %v15561_v33  ;;  %v1688_v23 = vadd.f32 %v20362_v37, %v17106_v57  ;;  %15572 = vrcp.f32 %v3545_v62 }
 0x499   :  { %15574 = vrcp.f32 %v3546_v38 }
 0x49a   :  { %15576 = vrcp.f32 %v3547_v56 }
 0x49d   :  { %v15563_v34 = vpop.eup %15562 }
 0x49e   :  { %v15565_v63 = vpop.eup %15564 }
 0x49f   :  { %v15567_v8 = vpop.eup %15566 }
 0x4a0   :  { %v15569_v19 = vpop.eup %15568 }
 0x4c1   :  { %v3491_v29 = vpop.f32.mrb[100].mxu1 }
 0x4c2   :  { %v3492_v41 = vadd.f32 %v3491_v29, %v20359_v43  ;;  %v3493_v31 = vpop.f32.mrb[101].mxu1 }
 0x4c3   :  { %v3494_v5 = vadd.f32 %v3493_v31, %v20360_v48  ;;  %v3495_v3 = vpop.f32.mrb[102].mxu1  ;;  %v20363_v31 = vld [vmem:[#allocation22_spill] sm:$0xff] }
 0x4c4   :  { %v3556_v45 = vmul.f32 %v15563_v34, %v3492_v41  ;;  %v3496_v32 = vadd.f32 %v3495_v3, %v20359_v43  ;;  %v3497_v14 = vpop.f32.mrb[103].mxu1  ;;  %v1690_v21 = vadd.f32 %v20363_v31, %v17101_v13  ;;  %v1692_v41 = vadd.f32 %v20364_v9, %v17106_v57 }
 0x4c5   :  { %v3557_v29 = vmul.f32 %v15565_v63, %v3494_v5  ;;  %v3498_v33 = vadd.f32 %v3497_v14, %v20360_v48  ;;  %v15571_v5 = vpop.eup %15570 }
 0x4c6   :  { %v3560_v42 = vadd.f32 %v3556_v45, %v1686_v44  ;;  %v3558_v26 = vmul.f32 %v15567_v8, %v3496_v32  ;;  %v15573_v63 = vpop.eup %15572  ;;  %v3568_v31 = vsub.f32 1.0, %v15571_v5  ;;  %v3576_v56 = vmul.f32 %v15571_v5, %v17151_v27  ;;  %v20389_v5 = vld [vmem:[#allocation94_spill] sm:$0xff] }
 0x4c7   :  { %v3561_v34 = vadd.f32 %v3557_v29, %v1688_v23  ;;  %v3559_v3 = vmul.f32 %v15569_v19, %v3498_v33  ;;  %v15575_v14 = vpop.eup %15574  ;;  %v3569_v44 = vsub.f32 1.0, %v15573_v63 }
 0x4c8   :  { %15578 = vtanh.f32 %v3560_v42  ;;  %v3562_v43 = vadd.f32 %v3558_v26, %v1690_v21  ;;  %v15577_v37 = vpop.eup %15576  ;;  %v3570_v45 = vsub.f32 1.0, %v15575_v14  ;;  %v3577_v21 = vmul.f32 %v15573_v63, %v17154_v22  ;;  %v20390_v63 = vld [vmem:[#allocation95_spill] sm:$0xff] }
 0x4c9   :  { %15580 = vtanh.f32 %v3561_v34  ;;  %v3563_v62 = vadd.f32 %v3559_v3, %v1692_v41  ;;  %v3571_v19 = vsub.f32 1.0, %v15577_v37  ;;  %v3578_v33 = vmul.f32 %v15575_v14, %v17156_v46  ;;  %v20367_v46 = vld [vmem:[#allocation72_spill] sm:$0xff] }
 0x4ca   :  { %15582 = vtanh.f32 %v3562_v43  ;;  %v3579_v41 = vmul.f32 %v15577_v37, %v17158_v58  ;;  %v20368_v58 = vld [vmem:[#allocation73_spill] sm:$0xff]  ;;  %v20391_v14 = vld [vmem:[#allocation96_spill] sm:$0xff] }
 0x4cb   :  { %15584 = vtanh.f32 %v3563_v62  ;;  %v20392_v37 = vld [vmem:[#allocation97_spill] sm:$0xff] }
 0x4d2   :  { %v15579_v38 = vpop.eup %15578 }
 0x4d3   :  { %v15581_v32 = vpop.eup %15580  ;;  %v3572_v8 = vmul.f32 %v15579_v38, %v3568_v31  ;;  %v20399_v31 = vld [vmem:[#allocation104_spill] sm:$0xff]  ;;  %v20400_v38 = vld [vmem:[#allocation105_spill] sm:$0xff] }
 0x4d4   :  { %v15583_v23 = vpop.eup %15582  ;;  %v3573_v42 = vmul.f32 %v15581_v32, %v3569_v44  ;;  %v17554_v44 = vld [vmem:[#allocation9 + $0x150] ss:$24 sps:$4 sm:$0xff]   ;;  %v17557_v32 = vld [vmem:[#allocation9 + $0x184] ss:$24 sps:$4 sm:$0xff]  }
 0x4d5   :  { %v15585_v29 = vpop.eup %15584  ;;  %v3574_v43 = vmul.f32 %v15583_v23, %v3570_v45  ;;  %v17444_v26 = vadd.f32 %v3576_v56, %v3572_v8  ;;  %v20401_v45 = vld [vmem:[#allocation106_spill] sm:$0xff]  ;;  %v20402_v8 = vld [vmem:[#allocation107_spill] sm:$0xff] }
 0x4d6   :  { %v3575_v9 = vmul.f32 %v15585_v29, %v3571_v19  ;;  %v17447_v34 = vadd.f32 %v3577_v21, %v3573_v42  ;;  %v17562_v56 = vld [vmem:[#allocation9 + $0x180] ss:$24 sps:$4 sm:$0xff]   ;;  %v17565_v23 = vld [vmem:[#allocation9 + $0x1b4] ss:$24 sps:$4 sm:$0xff]   ;;  %v17569_v42 = vld [vmem:[#allocation9 + $0x1b0] ss:$24 sps:$4 sm:$0xff]  }
 0x4d7   :  { %v17449_v3 = vadd.f32 %v3578_v33, %v3574_v43  ;;  %v20403_v19 = vld [vmem:[#allocation108_spill] sm:$0xff]  ;;  %v17579_v43 = vld [vmem:[#allocation9 + $0x214] ss:$24 sps:$4 sm:$0xff]   ;;  %v17581_v33 = vld [vmem:[#allocation9 + $0x210] ss:$24 sps:$4 sm:$0xff]  }
 0x4d8   :  { %v17451_v62 = vadd.f32 %v3579_v41, %v3575_v9  ;;  %v17573_v21 = vld [vmem:[#allocation9 + $0x1e4] ss:$24 sps:$4 sm:$0xff]   ;;  %v17575_v29 = vld [vmem:[#allocation9 + $0x1e0] ss:$24 sps:$4 sm:$0xff]  }
 0x4d9   :  { %v17459_v22 = vpack.c.bf16 %v17449_v3, %v17444_v26  ;;  %v17584_v9 = vld [vmem:[#allocation9 + $0x244] ss:$24 sps:$4 sm:$0xff]   ;;  %v17587_v41 = vld [vmem:[#allocation9 + $0x240] ss:$24 sps:$4 sm:$0xff]  }
 0x4da   :  { %v17455_v27 = vpack.c.bf16 %v17451_v62, %v17447_v34 }
 0x4db   :  { %20366 = vst [vmem:[#allocation20_spill] sm:$0xff] %v17459_v22 }
 0x4dc   :  { %20365 = vst [vmem:[#allocation69_spill] sm:$0xff] %v17455_v27  ;;  %4210 = vmatprep.mubr.bf16.mxu1 %v17455_v27  ;;  %4253 = vmatprep.mubr.bf16.mxu0 %v17455_v27 }
 0x4dd   :  { %4211 = vmatmul.mubr.bf16.vlgmr.msra.gmra.mrb[8].mxu1 %v17459_v22  ;;  %4254 = vmatmul.mubr.bf16.vlgmr.msra.gmra.mrb[56].mxu0 %v17459_v22 }
 0x4de   :  { %4265 = vmatpush1.bf16.msra.mxu0 %v17164_v50  ;;  %4296 = vmatprep.mubr.bf16.mxu0 %v17455_v27  ;;  %v20370_v50 = vld [vmem:[#allocation75_spill] sm:$0xff] }
 0x4df   :  { %4266 = vmatprep.subr.bf16.mxu0 %v17170_v4  ;;  %4986 = vmatpush1.bf16.msra.mxu1 %v17271_v53  ;;  %v20372_v4 = vld [vmem:[#allocation77_spill] sm:$0xff]  ;;  %v20385_v53 = vld [vmem:[#allocation91_spill] sm:$0xff] }
 0x4e0   :  { %4987 = vmatprep.subr.bf16.mxu1 %v17278_v11  ;;  %v20387_v11 = vld [vmem:[#allocation92_spill] sm:$0xff] }
 0x4e1   :  { %v17731_v27 = vld [vmem:[#allocation9 + $0x284] ss:$24 sps:$4 sm:$0xff]  }
 0x4e2   :  { %4267 = vmatpush1.bf16.msra.mxu0 %v17178_v51  ;;  %v20373_v51 = vld [vmem:[#allocation78_spill] sm:$0xff] }
 0x4e3   :  { %4268 = vmatprep.subr.bf16.mxu0 %v17181_v15  ;;  %4988 = vmatpush1.bf16.msra.mxu1 %v17286_v61  ;;  %v20371_v61 = vld [vmem:[#allocation76_spill] sm:$0xff]  ;;  %v20374_v15 = vld [vmem:[#allocation79_spill] sm:$0xff] }
 0x4e4   :  { %4989 = vmatprep.subr.bf16.mxu1 %v17291_v49  ;;  %v20384_v49 = vld [vmem:[#allocation89_spill] sm:$0xff] }
 0x4e6   :  { %4269 = vmatpush1.bf16.msra.mxu0 %v17184_v20  ;;  %v20375_v20 = vld [vmem:[#allocation80_spill] sm:$0xff] }
 0x4e7   :  { %4270 = vmatprep.subr.bf16.mxu0 %v17187_v54  ;;  %4990 = vmatpush1.bf16.msra.mxu1 %v17298_v60  ;;  %v20369_v60 = vld [vmem:[#allocation74_spill] sm:$0xff]  ;;  %v20376_v54 = vld [vmem:[#allocation81_spill] sm:$0xff] }
 0x4e8   :  { %4991 = vmatprep.subr.bf16.mxu1 %v17303_v6  ;;  %v20386_v6 = vld [vmem:[#allocation90_spill] sm:$0xff] }
 0x4ea   :  { %4271 = vmatpush1.bf16.msra.mxu0 %v17190_v30  ;;  %v20377_v30 = vld [vmem:[#allocation82_spill] sm:$0xff] }
 0x4eb   :  { %4272 = vmatprep.subr.bf16.mxu0 %v17193_v52  ;;  %4992 = vmatpush1.bf16.msra.mxu1 %v17310_v47  ;;  %v20378_v52 = vld [vmem:[#allocation83_spill] sm:$0xff]  ;;  %v20388_v47 = vld [vmem:[#allocation93_spill] sm:$0xff] }
 0x4ec   :  { %20427 = vst [vmem:[#allocation83_spill] sm:$0xff] %v17731_v27 }
 0x4ee   :  { %4273 = vmatpush1.bf16.msra.mxu0 %v17196_v18  ;;  %v20379_v18 = vld [vmem:[#allocation84_spill] sm:$0xff] }
 0x4ef   :  { %4274 = vmatprep.subr.bf16.mxu0 %v17199_v10  ;;  %v20380_v10 = vld [vmem:[#allocation85_spill] sm:$0xff] }
 0x4f2   :  { %4275 = vmatpush1.bf16.msra.mxu0 %v17202_v16  ;;  %v20381_v16 = vld [vmem:[#allocation86_spill] sm:$0xff] }
 0x4f3   :  { %4276 = vmatprep.subr.bf16.mxu0 %v17205_v28  ;;  %v20382_v28 = vld [vmem:[#allocation87_spill] sm:$0xff] }
 0x4f6   :  { %4277 = vmatpush1.bf16.msra.mxu0 %v17208_v55  ;;  %v20383_v55 = vld [vmem:[#allocation88_spill] sm:$0xff] }
 0x4f7   :  { %4278 = vmatprep.subr.bf16.mxu0 %v20367_v46  ;;  %v17590_v46 = vld [vmem:[#allocation9 + $0x274] ss:$24 sps:$4 sm:$0xff]  }
 0x4fa   :  { %4279 = vmatpush1.bf16.msra.mxu0 %v20368_v58  ;;  %v17593_v58 = vld [vmem:[#allocation9 + $0x270] ss:$24 sps:$4 sm:$0xff]  }
 0x4fb   :  { %4280 = vmatprep.subr.bf16.mxu0 %v20369_v60  ;;  %v17596_v60 = vld [vmem:[#allocation9 + $0x2a4] ss:$24 sps:$4 sm:$0xff]  }
 0x4fe   :  { %4281 = vmatpush1.bf16.msra.mxu0 %v20370_v50  ;;  %v17599_v50 = vld [vmem:[#allocation9 + $0x2a0] ss:$24 sps:$4 sm:$0xff]  }
 0x4ff   :  { %4282 = vmatprep.subr.bf16.mxu0 %v20371_v61  ;;  %v17602_v61 = vld [vmem:[#allocation9 + $0x2d4] ss:$24 sps:$4 sm:$0xff]  }
 0x502   :  { %4283 = vmatpush1.bf16.msra.mxu0 %v20372_v4  ;;  %v17605_v4 = vld [vmem:[#allocation9 + $0x2d0] ss:$24 sps:$4 sm:$0xff]  }
 0x503   :  { %4284 = vmatprep.subr.bf16.mxu0 %v20373_v51  ;;  %v17609_v51 = vld [vmem:[#allocation9 + $0x14] ss:$24 sps:$4 sm:$0xff]  }
 0x506   :  { %4285 = vmatpush1.bf16.msra.mxu0 %v20374_v15 }
 0x507   :  { %4286 = vmatprep.subr.bf16.mxu0 %v20375_v20 }
 0x50a   :  { %4287 = vmatpush1.bf16.msra.mxu0 %v20376_v54 }
 0x50b   :  { %4288 = vmatprep.subr.bf16.mxu0 %v20377_v30 }
 0x50e   :  { %4289 = vmatpush1.bf16.msra.mxu0 %v20378_v52 }
 0x50f   :  { %4290 = vmatprep.subr.bf16.mxu0 %v20379_v18 }
 0x512   :  { %4291 = vmatpush1.bf16.msra.mxu0 %v20380_v10 }
 0x513   :  { %4292 = vmatprep.subr.bf16.mxu0 %v20381_v16 }
 0x516   :  { %4293 = vmatpush1.bf16.msra.mxu0 %v20382_v28  ;;  %v20404_v28 = vld [vmem:[#allocation66_spill] sm:$0xff] }
 0x517   :  { %4294 = vmatprep.subr.bf16.mxu0 %v20383_v55 }
 0x51a   :  { %4295 = vmatpush1.bf16.msra.mxu0 %v20384_v49  ;;  %v20405_v49 = vld [vmem:[#allocation67_spill] sm:$0xff] }
 0x51b   :  { %5028 = vmatprep.subr.bf16.mxu0 %v20385_v53 }
 0x51d   :  { %4297 = vmatmul.mubr.bf16.vlgmr.msra.gmra.mrb[100].mxu0 %v17459_v22  ;;  %v17728_v22 = vld [vmem:[#allocation9 + $0x250] ss:$24 sps:$4 sm:$0xff]  }
 0x51e   :  { %5029 = vmatpush1.bf16.msra.mxu0 %v20386_v6  ;;  %20426 = vst [vmem:[#allocation82_spill] sm:$0xff] %v17728_v22 }
 0x51f   :  { %5030 = vmatprep.subr.bf16.mxu0 %v20387_v11 }
 0x522   :  { %5031 = vmatpush1.bf16.msra.mxu0 %v20388_v47 }
 0x523   :  { %5032 = vmatprep.subr.bf16.mxu0 %v20389_v5 }
 0x526   :  { %5033 = vmatpush1.bf16.msra.mxu0 %v20390_v63 }
 0x527   :  { %5034 = vmatprep.subr.bf16.mxu0 %v20391_v14 }
 0x52a   :  { %5035 = vmatpush1.bf16.msra.mxu0 %v20392_v37  ;;  %v20406_v37 = vld [vmem:[#allocation109_spill] sm:$0xff] }
 0x52b   :  { %5036 = vmatprep.subr.bf16.mxu0 %v17312_v59  ;;  %v20393_v59 = vld [vmem:[#allocation98_spill] sm:$0xff] }
 0x52e   :  { %5037 = vmatpush1.bf16.msra.mxu0 %v17316_v35  ;;  %v17532_v35 = vld [vmem:[#allocation9 + $0xf4] ss:$24 sps:$4 sm:$0xff]  }
 0x52f   :  { %5038 = vmatprep.subr.bf16.mxu0 %v17320_v7  ;;  %v20395_v7 = vld [vmem:[#allocation100_spill] sm:$0xff] }
 0x532   :  { %5039 = vmatpush1.bf16.msra.mxu0 %v17324_v12  ;;  %v20394_v12 = vld [vmem:[#allocation99_spill] sm:$0xff] }
 0x533   :  { %5040 = vmatprep.subr.bf16.mxu0 %v17328_v40  ;;  %v17528_v40 = vld [vmem:[#allocation9 + $0xc0] ss:$24 sps:$4 sm:$0xff]  }
 0x536   :  { %5041 = vmatpush1.bf16.msra.mxu0 %v17332_v39  ;;  %v17530_v39 = vld [vmem:[#allocation9 + $0xc4] ss:$24 sps:$4 sm:$0xff]  }
 0x537   :  { %5042 = vmatprep.subr.bf16.mxu0 %v17336_v36  ;;  %4993 = vmatprep.subr.bf16.mxu1 %v17530_v39  ;;  %v20396_v36 = vld [vmem:[#allocation101_spill] sm:$0xff] }
 0x538   :  { %4994 = vmatpush1.bf16.msra.mxu1 %v17528_v40 }
 0x539   :  { %4995 = vmatprep.subr.bf16.mxu1 %v17532_v35 }
 0x53a   :  { %5043 = vmatpush1.bf16.msra.mxu0 %v17340_v0  ;;  %v17538_v0 = vld [vmem:[#allocation9 + $0xf0] ss:$24 sps:$4 sm:$0xff]  }
 0x53b   :  { %5044 = vmatprep.subr.bf16.mxu0 %v17344_v1  ;;  %v17541_v1 = vld [vmem:[#allocation9 + $0x124] ss:$24 sps:$4 sm:$0xff]  }
 0x53c   :  { %4996 = vmatpush1.bf16.msra.mxu1 %v17538_v0 }
 0x53d   :  { %4997 = vmatprep.subr.bf16.mxu1 %v17541_v1 }
 0x53e   :  { %5045 = vmatpush1.bf16.msra.mxu0 %v17348_v2  ;;  %v20397_v2 = vld [vmem:[#allocation102_spill] sm:$0xff] }
 0x53f   :  { %5046 = vmatprep.subr.bf16.mxu0 %v17352_v17  ;;  %v20398_v17 = vld [vmem:[#allocation103_spill] sm:$0xff] }
 0x542   :  { %5047 = vmatpush1.bf16.msra.mxu0 %v17356_v25  ;;  %v17546_v25 = vld [vmem:[#allocation9 + $0x120] ss:$24 sps:$4 sm:$0xff]  }
 0x543   :  { %5048 = vmatprep.subr.bf16.mxu0 %v17364_v24  ;;  %v17549_v24 = vld [vmem:[#allocation9 + $0x154] ss:$24 sps:$4 sm:$0xff]   ;;  %4998 = vmatpush1.bf16.msra.mxu1 %v17546_v25 }
 0x544   :  { %4999 = vmatprep.subr.bf16.mxu1 %v17549_v24 }
 0x546   :  { %5049 = vmatpush1.bf16.msra.mxu0 %v20393_v59 }
 0x547   :  { %5050 = vmatprep.subr.bf16.mxu0 %v20394_v12  ;;  %5000 = vmatpush1.bf16.msra.mxu1 %v17554_v44  ;;  %v20407_v12 = vld [vmem:[#allocation110_spill] sm:$0xff] }
 0x548   :  { %5001 = vmatprep.subr.bf16.mxu1 %v17557_v32 }
 0x54a   :  { %5051 = vmatpush1.bf16.msra.mxu0 %v20395_v7 }
 0x54b   :  { %5052 = vmatprep.subr.bf16.mxu0 %v20396_v36  ;;  %5002 = vmatpush1.bf16.msra.mxu1 %v17562_v56 }
 0x54c   :  { %5003 = vmatprep.subr.bf16.mxu1 %v17565_v23 }
 0x54e   :  { %5053 = vmatpush1.bf16.msra.mxu0 %v20397_v2 }
 0x54f   :  { %5054 = vmatprep.subr.bf16.mxu0 %v20398_v17  ;;  %5004 = vmatpush1.bf16.msra.mxu1 %v17569_v42 }
 0x550   :  { %5005 = vmatprep.subr.bf16.mxu1 %v17573_v21 }
 0x552   :  { %5055 = vmatpush1.bf16.msra.mxu0 %v20399_v31 }
 0x553   :  { %5056 = vmatprep.subr.bf16.mxu0 %v20400_v38  ;;  %5006 = vmatpush1.bf16.msra.mxu1 %v17575_v29 }
 0x554   :  { %5007 = vmatprep.subr.bf16.mxu1 %v17579_v43 }
 0x556   :  { %5057 = vmatpush1.bf16.msra.mxu0 %v20401_v45 }
 0x557   :  { %5058 = vmatprep.subr.bf16.mxu0 %v20402_v8  ;;  %5008 = vmatpush1.bf16.msra.mxu1 %v17581_v33 }
 0x558   :  { %5009 = vmatprep.subr.bf16.mxu1 %v17584_v9 }
 0x55a   :  { %5059 = vmatpush1.bf16.msra.mxu0 %v20403_v19 }
 0x55b   :  { %5010 = vmatpush1.bf16.msra.mxu1 %v17587_v41 }
 0x55c   :  { %5011 = vmatprep.subr.bf16.mxu1 %v17590_v46 }
 0x55f   :  { %5012 = vmatpush1.bf16.msra.mxu1 %v17593_v58 }
 0x560   :  { %5013 = vmatprep.subr.bf16.mxu1 %v17596_v60 }
 0x563   :  { %5014 = vmatpush1.bf16.msra.mxu1 %v17599_v50 }
 0x564   :  { %5015 = vmatprep.subr.bf16.mxu1 %v17602_v61 }
 0x567   :  { %5016 = vmatpush1.bf16.msra.mxu1 %v17605_v4 }
 0x568   :  { %5071 = vmatprep.subr.bf16.mxu1 %v17609_v51 }
 0x5b0   :  { %v4212_v15 = vpop.f32.mrb[8].mxu1  ;;  %v4255_v20 = vpop.f32.mrb[56].mxu0 }
 0x5b1   :  { %v4214_v54 = vpop.f32.mrb[9].mxu1  ;;  %v4257_v30 = vpop.f32.mrb[57].mxu0  ;;  %v14031_v55 = vadd.f32 %v20404_v28, %v4212_v15  ;;  %v14131_v59 = vadd.f32 %v20406_v37, %v4255_v20 }
 0x5b2   :  { %v4216_v52 = vpop.f32.mrb[10].mxu1  ;;  %v4259_v18 = vpop.f32.mrb[58].mxu0  ;;  %v14033_v53 = vadd.f32 %v20405_v49, %v4214_v54  ;;  %v14133_v7 = vadd.f32 %v20407_v12, %v4257_v30 }
 0x5b3   :  { %v4218_v10 = vpop.f32.mrb[11].mxu1  ;;  %v4261_v16 = vpop.f32.mrb[59].mxu0  ;;  %v14035_v6 = vadd.f32 %v20404_v28, %v4216_v52  ;;  %v13038_v47 = vmul.f32 -1.442695, %v14031_v55  ;;  %v14135_v36 = vadd.f32 %v20406_v37, %v4259_v18  ;;  %v13042_v17 = vmul.f32 -1.442695, %v14131_v59 }
 0x5b4   :  { %v14037_v11 = vadd.f32 %v20405_v49, %v4218_v10  ;;  %v13039_v5 = vmul.f32 -1.442695, %v14033_v53  ;;  %v14137_v2 = vadd.f32 %v20407_v12, %v4261_v16  ;;  %v13043_v31 = vmul.f32 -1.442695, %v14133_v7 }
 0x5b5   :  { %v13040_v63 = vmul.f32 -1.442695, %v14035_v6  ;;  %15586 = vpow2.f32 %v13038_v47  ;;  %v13044_v38 = vmul.f32 -1.442695, %v14135_v36 }
 0x5b6   :  { %v13041_v14 = vmul.f32 -1.442695, %v14037_v11  ;;  %15588 = vpow2.f32 %v13039_v5  ;;  %v13045_v8 = vmul.f32 -1.442695, %v14137_v2 }
 0x5b7   :  { %15590 = vpow2.f32 %v13040_v63  ;;  %v20408_v63 = vld [vmem:[#allocation68_spill] sm:$0xff] }
 0x5b8   :  { %15592 = vpow2.f32 %v13041_v14 }
 0x5b9   :  { %15594 = vpow2.f32 %v13042_v17 }
 0x5ba   :  { %15596 = vpow2.f32 %v13043_v31 }
 0x5bb   :  { %15598 = vpow2.f32 %v13044_v38  ;;  %v20409_v38 = vld [vmem:[#allocation24_spill] sm:$0xff] }
 0x5bc   :  { %15600 = vpow2.f32 %v13045_v8 }
 0x5bf   :  { %v15587_v45 = vpop.eup %15586 }
 0x5c0   :  { %v15589_v19 = vpop.eup %15588  ;;  %v4323_v52 = vadd.f32 1.0, %v15587_v45  ;;  %v1696_v45 = vadd.f32 %v20409_v38, %v17101_v13 }
 0x5c1   :  { %v15591_v15 = vpop.eup %15590  ;;  %v4324_v20 = vadd.f32 1.0, %v15589_v19 }
 0x5c2   :  { %v15593_v54 = vpop.eup %15592  ;;  %v4325_v10 = vadd.f32 1.0, %v15591_v15  ;;  %15602 = vrcp.f32 %v4323_v52  ;;  %v20410_v52 = vld [vmem:[#allocation25_spill] sm:$0xff] }
 0x5c3   :  { %v4326_v30 = vadd.f32 1.0, %v15593_v54  ;;  %15604 = vrcp.f32 %v4324_v20  ;;  %v15595_v18 = vpop.eup %15594  ;;  %v1698_v20 = vadd.f32 %v20410_v52, %v17106_v57 }
 0x5c4   :  { %15606 = vrcp.f32 %v4325_v10  ;;  %v15597_v16 = vpop.eup %15596  ;;  %v4351_v6 = vadd.f32 1.0, %v15595_v18 }
 0x5c5   :  { %15608 = vrcp.f32 %v4326_v30  ;;  %v15599_v55 = vpop.eup %15598  ;;  %v4352_v11 = vadd.f32 1.0, %v15597_v16  ;;  %v20411_v16 = vld [vmem:[#allocation26_spill] sm:$0xff] }
 0x5c6   :  { %v15601_v53 = vpop.eup %15600  ;;  %v4353_v5 = vadd.f32 1.0, %v15599_v55  ;;  %15610 = vrcp.f32 %v4351_v6  ;;  %v1700_v55 = vadd.f32 %v20411_v16, %v17101_v13  ;;  %v20412_v6 = vld [vmem:[#allocation27_spill] sm:$0xff] }
 0x5c7   :  { %v4354_v36 = vadd.f32 1.0, %v15601_v53  ;;  %15612 = vrcp.f32 %v4352_v11 }
 0x5c8   :  { %15614 = vrcp.f32 %v4353_v5 }
 0x5c9   :  { %15616 = vrcp.f32 %v4354_v36 }
 0x5cc   :  { %v15603_v7 = vpop.eup %15602 }
 0x5cd   :  { %v15605_v31 = vpop.eup %15604 }
 0x5ce   :  { %v15607_v54 = vpop.eup %15606 }
 0x5cf   :  { %v15609_v18 = vpop.eup %15608 }
 0x5f0   :  { %v4298_v47 = vpop.f32.mrb[100].mxu0 }
 0x5f1   :  { %v4299_v14 = vadd.f32 %v4298_v47, %v20408_v63  ;;  %v4300_v59 = vpop.f32.mrb[101].mxu0 }
 0x5f2   :  { %v4301_v2 = vadd.f32 %v4300_v59, %v20360_v48  ;;  %v4302_v17 = vpop.f32.mrb[102].mxu0 }
 0x5f3   :  { %v4363_v8 = vmul.f32 %v15603_v7, %v4299_v14  ;;  %v4303_v19 = vadd.f32 %v4302_v17, %v20408_v63  ;;  %v4304_v15 = vpop.f32.mrb[103].mxu0  ;;  %v1702_v14 = vadd.f32 %v20412_v6, %v17106_v57 }
 0x5f4   :  { %v4364_v10 = vmul.f32 %v15605_v31, %v4301_v2  ;;  %v4305_v30 = vadd.f32 %v4304_v15, %v20360_v48  ;;  %v15611_v2 = vpop.eup %15610 }
 0x5f5   :  { %v4367_v53 = vadd.f32 %v4363_v8, %v1696_v45  ;;  %v4365_v47 = vmul.f32 %v15607_v54, %v4303_v19  ;;  %v15613_v31 = vpop.eup %15612  ;;  %v4375_v52 = vsub.f32 1.0, %v15611_v2  ;;  %v4383_v36 = vmul.f32 %v15611_v2, %v17444_v26  ;;  %v17665_v2 = vld [vmem:[#allocation9 + $0x74] ss:$24 sps:$4 sm:$0xff]  }
 0x5f6   :  { %v4368_v59 = vadd.f32 %v4364_v10, %v1698_v20  ;;  %v4366_v7 = vmul.f32 %v15609_v18, %v4305_v30  ;;  %v15615_v38 = vpop.eup %15614  ;;  %v4376_v45 = vsub.f32 1.0, %v15613_v31  ;;  %v4384_v18 = vmul.f32 %v15613_v31, %v17447_v34  ;;  %v17648_v34 = vld [vmem:[#allocation9 + $0x10] ss:$24 sps:$4 sm:$0xff]  }
 0x5f7   :  { %15618 = vtanh.f32 %v4367_v53  ;;  %v4369_v17 = vadd.f32 %v4365_v47, %v1700_v55  ;;  %v15617_v15 = vpop.eup %15616  ;;  %v4377_v19 = vsub.f32 1.0, %v15615_v38  ;;  %v4385_v53 = vmul.f32 %v15615_v38, %v17449_v3  ;;  %v17668_v31 = vld [vmem:[#allocation9 + $0x70] ss:$24 sps:$4 sm:$0xff]   ;;  %v17671_v38 = vld [vmem:[#allocation9 + $0xa4] ss:$24 sps:$4 sm:$0xff]  }
 0x5f8   :  { %15620 = vtanh.f32 %v4368_v59  ;;  %v4370_v11 = vadd.f32 %v4366_v7, %v1702_v14  ;;  %v4378_v10 = vsub.f32 1.0, %v15617_v15  ;;  %v4386_v14 = vmul.f32 %v15617_v15, %v17451_v62  ;;  %v17662_v62 = vld [vmem:[#allocation9 + $0x40] ss:$24 sps:$4 sm:$0xff]  }
 0x5f9   :  { %15622 = vtanh.f32 %v4369_v17  ;;  %v17674_v15 = vld [vmem:[#allocation9 + $0xa0] ss:$24 sps:$4 sm:$0xff]  }
 0x5fa   :  { %15624 = vtanh.f32 %v4370_v11  ;;  %v17654_v11 = vld [vmem:[#allocation9 + $0x44] ss:$24 sps:$4 sm:$0xff]  }
 0x601   :  { %v15619_v5 = vpop.eup %15618 }
 0x602   :  { %v15621_v8 = vpop.eup %15620  ;;  %v4379_v54 = vmul.f32 %v15619_v5, %v4375_v52  ;;  %v17677_v52 = vld [vmem:[#allocation9 + $0xd4] ss:$24 sps:$4 sm:$0xff]   ;;  %v17680_v5 = vld [vmem:[#allocation9 + $0xd0] ss:$24 sps:$4 sm:$0xff]  }
 0x603   :  { %v15623_v20 = vpop.eup %15622  ;;  %v4380_v30 = vmul.f32 %v15621_v8, %v4376_v45  ;;  %v17683_v45 = vld [vmem:[#allocation9 + $0x104] ss:$24 sps:$4 sm:$0xff]   ;;  %v17686_v8 = vld [vmem:[#allocation9 + $0x100] ss:$24 sps:$4 sm:$0xff]  }
 0x604   :  { %v15625_v16 = vpop.eup %15624  ;;  %v4381_v55 = vmul.f32 %v15623_v20, %v4377_v19  ;;  %v17635_v47 = vadd.f32 %v4383_v36, %v4379_v54  ;;  %v17689_v19 = vld [vmem:[#allocation9 + $0x134] ss:$24 sps:$4 sm:$0xff]   ;;  %v17692_v54 = vld [vmem:[#allocation9 + $0x130] ss:$24 sps:$4 sm:$0xff]   ;;  %v17695_v36 = vld [vmem:[#allocation9 + $0x164] ss:$24 sps:$4 sm:$0xff]  }
 0x605   :  { %v4382_v6 = vmul.f32 %v15625_v16, %v4378_v10  ;;  %v17638_v59 = vadd.f32 %v4384_v18, %v4380_v30  ;;  %20415 = vst [vmem:[#allocation23_spill] sm:$0xff] %v17695_v36  ;;  %v17698_v20 = vld [vmem:[#allocation9 + $0x160] ss:$24 sps:$4 sm:$0xff]   ;;  %v17701_v10 = vld [vmem:[#allocation9 + $0x194] ss:$24 sps:$4 sm:$0xff]  }
 0x606   :  { %v17640_v7 = vadd.f32 %v4385_v53, %v4381_v55  ;;  %20416 = vst [vmem:[#allocation72_spill] sm:$0xff] %v17698_v20  ;;  %20417 = vst [vmem:[#allocation73_spill] sm:$0xff] %v17701_v10  ;;  %v17704_v30 = vld [vmem:[#allocation9 + $0x190] ss:$24 sps:$4 sm:$0xff]   ;;  %v17707_v18 = vld [vmem:[#allocation9 + $0x1c4] ss:$24 sps:$4 sm:$0xff]  }
 0x607   :  { %v17642_v17 = vadd.f32 %v4386_v14, %v4382_v6  ;;  %20418 = vst [vmem:[#allocation74_spill] sm:$0xff] %v17704_v30  ;;  %20419 = vst [vmem:[#allocation75_spill] sm:$0xff] %v17707_v18  ;;  %v17710_v16 = vld [vmem:[#allocation9 + $0x1c0] ss:$24 sps:$4 sm:$0xff]   ;;  %v17713_v55 = vld [vmem:[#allocation9 + $0x1f4] ss:$24 sps:$4 sm:$0xff]  }
 0x608   :  { %v17652_v3 = vpack.c.bf16 %v17640_v7, %v17635_v47  ;;  %20420 = vst [vmem:[#allocation76_spill] sm:$0xff] %v17710_v16  ;;  %20421 = vst [vmem:[#allocation77_spill] sm:$0xff] %v17713_v55  ;;  %v17716_v53 = vld [vmem:[#allocation9 + $0x1f0] ss:$24 sps:$4 sm:$0xff]   ;;  %v17719_v6 = vld [vmem:[#allocation9 + $0x224] ss:$24 sps:$4 sm:$0xff]  }
 0x609   :  { %v17646_v26 = vpack.c.bf16 %v17642_v17, %v17638_v59  ;;  %20422 = vst [vmem:[#allocation78_spill] sm:$0xff] %v17716_v53  ;;  %20423 = vst [vmem:[#allocation79_spill] sm:$0xff] %v17719_v6  ;;  %v17722_v14 = vld [vmem:[#allocation9 + $0x220] ss:$24 sps:$4 sm:$0xff]  }
 0x60a   :  { %20414 = vst [vmem:[#allocation22_spill] sm:$0xff] %v17652_v3  ;;  %20424 = vst [vmem:[#allocation80_spill] sm:$0xff] %v17722_v14 }
 0x60b   :  { %20413 = vst [vmem:[#allocation21_spill] sm:$0xff] %v17646_v26  ;;  %5017 = vmatprep.mubr.bf16.mxu1 %v17646_v26  ;;  %5060 = vmatprep.mubr.bf16.mxu0 %v17646_v26 }
 0x60c   :  { %5018 = vmatmul.mubr.bf16.vlgmr.msra.gmra.mrb[12].mxu1 %v17652_v3  ;;  %5061 = vmatmul.mubr.bf16.vlgmr.msra.gmra.mrb[60].mxu0 %v17652_v3 }
 0x60d   :  { %5072 = vmatpush1.bf16.msra.mxu1 %v17648_v34  ;;  %5103 = vmatprep.mubr.bf16.mxu1 %v17646_v26  ;;  %v17725_v26 = vld [vmem:[#allocation9 + $0x254] ss:$24 sps:$4 sm:$0xff]  }
 0x60e   :  { %5073 = vmatprep.subr.bf16.mxu1 %v17654_v11  ;;  %20425 = vst [vmem:[#allocation81_spill] sm:$0xff] %v17725_v26 }
 0x611   :  { %5074 = vmatpush1.bf16.msra.mxu1 %v17662_v62 }
 0x612   :  { %5075 = vmatprep.subr.bf16.mxu1 %v17665_v2 }
 0x615   :  { %5076 = vmatpush1.bf16.msra.mxu1 %v17668_v31 }
 0x616   :  { %5077 = vmatprep.subr.bf16.mxu1 %v17671_v38 }
 0x619   :  { %5078 = vmatpush1.bf16.msra.mxu1 %v17674_v15 }
 0x61a   :  { %5079 = vmatprep.subr.bf16.mxu1 %v17677_v52 }
 0x61d   :  { %5080 = vmatpush1.bf16.msra.mxu1 %v17680_v5 }
 0x61e   :  { %5081 = vmatprep.subr.bf16.mxu1 %v17683_v45 }
 0x621   :  { %5082 = vmatpush1.bf16.msra.mxu1 %v17686_v8 }
 0x622   :  { %5083 = vmatprep.subr.bf16.mxu1 %v17689_v19 }
 0x625   :  { %5084 = vmatpush1.bf16.msra.mxu1 %v17692_v54 }
 0x626   :  { %5085 = vmatprep.subr.bf16.mxu1 %v17695_v36  ;;  %v17812_v36 = vld [vmem:[#allocation9 + $0x12c] ss:$24 sps:$4 sm:$0xff]  }
 0x629   :  { %5086 = vmatpush1.bf16.msra.mxu1 %v17698_v20  ;;  %v17796_v20 = vld [vmem:[#allocation9 + $0xcc] ss:$24 sps:$4 sm:$0xff]  }
 0x62a   :  { %5087 = vmatprep.subr.bf16.mxu1 %v17701_v10  ;;  %v17790_v10 = vld [vmem:[#allocation9 + $0x98] ss:$24 sps:$4 sm:$0xff]  }
 0x62b   :  { %20440 = vst [vmem:[#allocation96_spill] sm:$0xff] %v17790_v10 }
 0x62d   :  { %5088 = vmatpush1.bf16.msra.mxu1 %v17704_v30  ;;  %v17784_v30 = vld [vmem:[#allocation9 + $0x9c] ss:$24 sps:$4 sm:$0xff]  }
 0x62e   :  { %5089 = vmatprep.subr.bf16.mxu1 %v17707_v18  ;;  %v17775_v18 = vld [vmem:[#allocation9 + $0x64] ss:$24 sps:$4 sm:$0xff]   ;;  %20439 = vst [vmem:[#allocation95_spill] sm:$0xff] %v17784_v30 }
 0x631   :  { %5090 = vmatpush1.bf16.msra.mxu1 %v17710_v16  ;;  %v17757_v16 = vld [vmem:[#allocation9 + $0x4] ss:$24 sps:$4 sm:$0xff]  }
 0x632   :  { %5091 = vmatprep.subr.bf16.mxu1 %v17713_v55  ;;  %v17734_v55 = vld [vmem:[#allocation9 + $0x280] ss:$24 sps:$4 sm:$0xff]  }
 0x633   :  { %20428 = vst [vmem:[#allocation84_spill] sm:$0xff] %v17734_v55 }
 0x635   :  { %5092 = vmatpush1.bf16.msra.mxu1 %v17716_v53  ;;  %v17737_v53 = vld [vmem:[#allocation9 + $0x2b4] ss:$24 sps:$4 sm:$0xff]  }
 0x636   :  { %5093 = vmatprep.subr.bf16.mxu1 %v17719_v6  ;;  %20429 = vst [vmem:[#allocation85_spill] sm:$0xff] %v17737_v53  ;;  %v17740_v6 = vld [vmem:[#allocation9 + $0x2b0] ss:$24 sps:$4 sm:$0xff]  }
 0x637   :  { %20430 = vst [vmem:[#allocation86_spill] sm:$0xff] %v17740_v6 }
 0x639   :  { %5094 = vmatpush1.bf16.msra.mxu1 %v17722_v14  ;;  %v17743_v14 = vld [vmem:[#allocation9 + $0x2e4] ss:$24 sps:$4 sm:$0xff]  }
 0x63a   :  { %5095 = vmatprep.subr.bf16.mxu1 %v17725_v26  ;;  %20431 = vst [vmem:[#allocation87_spill] sm:$0xff] %v17743_v14  ;;  %v17746_v26 = vld [vmem:[#allocation9 + $0x2e0] ss:$24 sps:$4 sm:$0xff]  }
 0x63b   :  { %20432 = vst [vmem:[#allocation88_spill] sm:$0xff] %v17746_v26 }
 0x63d   :  { %5096 = vmatpush1.bf16.msra.mxu1 %v17728_v22  ;;  %v17753_v22 = vld [vmem:[#allocation9 + $0xc] ss:$24 sps:$4 sm:$0xff]  }
 0x63e   :  { %5097 = vmatprep.subr.bf16.mxu1 %v17731_v27  ;;  %v17751_v27 = vld [vmem:[#allocation9 + $0x8] ss:$24 sps:$4 sm:$0xff]   ;;  %20434 = vst [vmem:[#allocation91_spill] sm:$0xff] %v17753_v22  ;;  %5835 = vmatprep.subr.bf16.mxu0 %v17753_v22 }
 0x63f   :  { %20433 = vst [vmem:[#allocation89_spill] sm:$0xff] %v17751_v27  ;;  %5836 = vmatpush1.bf16.msra.mxu0 %v17751_v27  ;;  %v17778_v22 = vld [vmem:[#allocation9 + $0x68] ss:$24 sps:$4 sm:$0xff]  }
 0x640   :  { %20438 = vst [vmem:[#allocation94_spill] sm:$0xff] %v17778_v22  ;;  %v17782_v27 = vld [vmem:[#allocation9 + $0x60] ss:$24 sps:$4 sm:$0xff]  }
 0x641   :  { %5098 = vmatpush1.bf16.msra.mxu1 %v17734_v55  ;;  %v17755_v55 = vld [vmem:[#allocation9] ss:$24 sps:$4 sm:$0xff]  }
 0x642   :  { %5099 = vmatprep.subr.bf16.mxu1 %v17737_v53  ;;  %v17759_v53 = vld [vmem:[#allocation9 + $0x3c] ss:$24 sps:$4 sm:$0xff]  }
 0x643   :  { %20435 = vst [vmem:[#allocation90_spill] sm:$0xff] %v17759_v53  ;;  %5837 = vmatprep.subr.bf16.mxu0 %v17759_v53  ;;  %v17787_v53 = vld [vmem:[#allocation9 + $0x94] ss:$24 sps:$4 sm:$0xff]  }
 0x645   :  { %5100 = vmatpush1.bf16.msra.mxu1 %v17740_v6  ;;  %v17762_v6 = vld [vmem:[#allocation9 + $0x34] ss:$24 sps:$4 sm:$0xff]  }
 0x646   :  { %5101 = vmatprep.subr.bf16.mxu1 %v17743_v14  ;;  %v17772_v14 = vld [vmem:[#allocation9 + $0x6c] ss:$24 sps:$4 sm:$0xff]  }
 0x647   :  { %20437 = vst [vmem:[#allocation93_spill] sm:$0xff] %v17772_v14 }
 0x649   :  { %5102 = vmatpush1.bf16.msra.mxu1 %v17746_v26  ;;  %v17766_v26 = vld [vmem:[#allocation9 + $0x38] ss:$24 sps:$4 sm:$0xff]  }
 0x64a   :  { %5792 = vmatprep.subr.bf16.mxu1 %v17757_v16  ;;  %20436 = vst [vmem:[#allocation92_spill] sm:$0xff] %v17766_v26  ;;  %5838 = vmatpush1.bf16.msra.mxu0 %v17766_v26  ;;  %v17794_v26 = vld [vmem:[#allocation9 + $0x90] ss:$24 sps:$4 sm:$0xff]  }
 0x64b   :  { %5839 = vmatprep.subr.bf16.mxu0 %v17772_v14  ;;  %v17800_v14 = vld [vmem:[#allocation9 + $0xc8] ss:$24 sps:$4 sm:$0xff]  }
 0x64c   :  { %5104 = vmatmul.mubr.bf16.vlgmr.msra.gmra.mrb[104].mxu1 %v17652_v3  ;;  %v17770_v3 = vld [vmem:[#allocation9 + $0x30] ss:$24 sps:$4 sm:$0xff]  }
 0x64d   :  { %5793 = vmatpush1.bf16.msra.mxu1 %v17755_v55 }
 0x64e   :  { %5794 = vmatprep.subr.bf16.mxu1 %v17762_v6  ;;  %5840 = vmatpush1.bf16.msra.mxu0 %v17778_v22  ;;  %v17804_v22 = vld [vmem:[#allocation9 + $0xfc] ss:$24 sps:$4 sm:$0xff]  }
 0x64f   :  { %5841 = vmatprep.subr.bf16.mxu0 %v17784_v30  ;;  %v17808_v30 = vld [vmem:[#allocation9 + $0xf8] ss:$24 sps:$4 sm:$0xff]  }
 0x651   :  { %5795 = vmatpush1.bf16.msra.mxu1 %v17770_v3 }
 0x652   :  { %5796 = vmatprep.subr.bf16.mxu1 %v17775_v18  ;;  %5842 = vmatpush1.bf16.msra.mxu0 %v17790_v10  ;;  %v17816_v10 = vld [vmem:[#allocation9 + $0x128] ss:$24 sps:$4 sm:$0xff]  }
 0x653   :  { %5843 = vmatprep.subr.bf16.mxu0 %v17796_v20 }
 0x655   :  { %5797 = vmatpush1.bf16.msra.mxu1 %v17782_v27 }
 0x656   :  { %5798 = vmatprep.subr.bf16.mxu1 %v17787_v53  ;;  %5844 = vmatpush1.bf16.msra.mxu0 %v17800_v14 }
 0x657   :  { %5845 = vmatprep.subr.bf16.mxu0 %v17804_v22 }
 0x659   :  { %5799 = vmatpush1.bf16.msra.mxu1 %v17794_v26 }
 0x65a   :  { %5800 = vmatprep.subr.bf16.mxu1 %v17530_v39  ;;  %5846 = vmatpush1.bf16.msra.mxu0 %v17808_v30  ;;  %v17820_v39 = vld [vmem:[#allocation9 + $0x15c] ss:$24 sps:$4 sm:$0xff]  }
 0x65b   :  { %5847 = vmatprep.subr.bf16.mxu0 %v17812_v36 }
 0x65d   :  { %5801 = vmatpush1.bf16.msra.mxu1 %v17528_v40  ;;  %v17824_v40 = vld [vmem:[#allocation9 + $0x158] ss:$24 sps:$4 sm:$0xff]  }
 0x65e   :  { %5802 = vmatprep.subr.bf16.mxu1 %v17532_v35  ;;  %5848 = vmatpush1.bf16.msra.mxu0 %v17816_v10  ;;  %v17828_v35 = vld [vmem:[#allocation9 + $0x18c] ss:$24 sps:$4 sm:$0xff]  }
 0x65f   :  { %5849 = vmatprep.subr.bf16.mxu0 %v17820_v39 }
 0x661   :  { %5803 = vmatpush1.bf16.msra.mxu1 %v17538_v0  ;;  %v17832_v0 = vld [vmem:[#allocation9 + $0x188] ss:$24 sps:$4 sm:$0xff]  }
 0x662   :  { %5804 = vmatprep.subr.bf16.mxu1 %v17541_v1  ;;  %5850 = vmatpush1.bf16.msra.mxu0 %v17824_v40  ;;  %v17836_v1 = vld [vmem:[#allocation9 + $0x1bc] ss:$24 sps:$4 sm:$0xff]  }
 0x663   :  { %5851 = vmatprep.subr.bf16.mxu0 %v17828_v35 }
 0x665   :  { %5805 = vmatpush1.bf16.msra.mxu1 %v17546_v25  ;;  %v17840_v25 = vld [vmem:[#allocation9 + $0x1b8] ss:$24 sps:$4 sm:$0xff]  }
 0x666   :  { %5806 = vmatprep.subr.bf16.mxu1 %v17549_v24  ;;  %5852 = vmatpush1.bf16.msra.mxu0 %v17832_v0  ;;  %v17848_v24 = vld [vmem:[#allocation9 + $0x1ec] ss:$24 sps:$4 sm:$0xff]  }
 0x667   :  { %5853 = vmatprep.subr.bf16.mxu0 %v17836_v1 }
 0x669   :  { %5807 = vmatpush1.bf16.msra.mxu1 %v17554_v44  ;;  %v17850_v44 = vld [vmem:[#allocation9 + $0x1e8] ss:$24 sps:$4 sm:$0xff]  }
 0x66a   :  { %5808 = vmatprep.subr.bf16.mxu1 %v17557_v32  ;;  %5854 = vmatpush1.bf16.msra.mxu0 %v17840_v25  ;;  %20441 = vst [vmem:[#allocation97_spill] sm:$0xff] %v17850_v44  ;;  %v17856_v32 = vld [vmem:[#allocation9 + $0x21c] ss:$24 sps:$4 sm:$0xff]  }
 0x66b   :  { %5855 = vmatprep.subr.bf16.mxu0 %v17848_v24  ;;  %20442 = vst [vmem:[#allocation98_spill] sm:$0xff] %v17856_v32 }
 0x66d   :  { %5809 = vmatpush1.bf16.msra.mxu1 %v17562_v56  ;;  %v17858_v56 = vld [vmem:[#allocation9 + $0x218] ss:$24 sps:$4 sm:$0xff]  }
 0x66e   :  { %5810 = vmatprep.subr.bf16.mxu1 %v17565_v23  ;;  %5856 = vmatpush1.bf16.msra.mxu0 %v17850_v44  ;;  %20443 = vst [vmem:[#allocation99_spill] sm:$0xff] %v17858_v56  ;;  %v17862_v23 = vld [vmem:[#allocation9 + $0x24c] ss:$24 sps:$4 sm:$0xff]  }
 0x66f   :  { %5857 = vmatprep.subr.bf16.mxu0 %v17856_v32  ;;  %20444 = vst [vmem:[#allocation100_spill] sm:$0xff] %v17862_v23 }
 0x671   :  { %5811 = vmatpush1.bf16.msra.mxu1 %v17569_v42  ;;  %v17866_v42 = vld [vmem:[#allocation9 + $0x248] ss:$24 sps:$4 sm:$0xff]  }
 0x672   :  { %5812 = vmatprep.subr.bf16.mxu1 %v17573_v21  ;;  %5858 = vmatpush1.bf16.msra.mxu0 %v17858_v56  ;;  %20445 = vst [vmem:[#allocation101_spill] sm:$0xff] %v17866_v42  ;;  %v17869_v21 = vld [vmem:[#allocation9 + $0x27c] ss:$24 sps:$4 sm:$0xff]  }
 0x673   :  { %5859 = vmatprep.subr.bf16.mxu0 %v17862_v23  ;;  %20446 = vst [vmem:[#allocation102_spill] sm:$0xff] %v17869_v21 }
 0x675   :  { %5813 = vmatpush1.bf16.msra.mxu1 %v17575_v29  ;;  %v17874_v29 = vld [vmem:[#allocation9 + $0x278] ss:$24 sps:$4 sm:$0xff]  }
 0x676   :  { %5814 = vmatprep.subr.bf16.mxu1 %v17579_v43  ;;  %5860 = vmatpush1.bf16.msra.mxu0 %v17866_v42  ;;  %20447 = vst [vmem:[#allocation103_spill] sm:$0xff] %v17874_v29  ;;  %v17877_v43 = vld [vmem:[#allocation9 + $0x2ac] ss:$24 sps:$4 sm:$0xff]  }
 0x677   :  { %5861 = vmatprep.subr.bf16.mxu0 %v17869_v21  ;;  %20448 = vst [vmem:[#allocation104_spill] sm:$0xff] %v17877_v43 }
 0x679   :  { %5815 = vmatpush1.bf16.msra.mxu1 %v17581_v33  ;;  %v17882_v33 = vld [vmem:[#allocation9 + $0x2a8] ss:$24 sps:$4 sm:$0xff]  }
 0x67a   :  { %5816 = vmatprep.subr.bf16.mxu1 %v17584_v9  ;;  %5862 = vmatpush1.bf16.msra.mxu0 %v17874_v29  ;;  %20449 = vst [vmem:[#allocation105_spill] sm:$0xff] %v17882_v33  ;;  %v17885_v9 = vld [vmem:[#allocation9 + $0x2dc] ss:$24 sps:$4 sm:$0xff]  }
 0x67b   :  { %5863 = vmatprep.subr.bf16.mxu0 %v17877_v43  ;;  %20450 = vst [vmem:[#allocation106_spill] sm:$0xff] %v17885_v9 }
 0x67d   :  { %5817 = vmatpush1.bf16.msra.mxu1 %v17587_v41  ;;  %v17890_v41 = vld [vmem:[#allocation9 + $0x2d8] ss:$24 sps:$4 sm:$0xff]  }
 0x67e   :  { %5818 = vmatprep.subr.bf16.mxu1 %v17590_v46  ;;  %5864 = vmatpush1.bf16.msra.mxu0 %v17882_v33  ;;  %20451 = vst [vmem:[#allocation107_spill] sm:$0xff] %v17890_v41 }
 0x67f   :  { %5865 = vmatprep.subr.bf16.mxu0 %v17885_v9 }
 0x681   :  { %5819 = vmatpush1.bf16.msra.mxu1 %v17593_v58 }
 0x682   :  { %5820 = vmatprep.subr.bf16.mxu1 %v17596_v60  ;;  %5866 = vmatpush1.bf16.msra.mxu0 %v17890_v41 }
 0x683   :  { %5878 = vmatprep.subr.bf16.mxu0 %v17609_v51 }
 0x685   :  { %5821 = vmatpush1.bf16.msra.mxu1 %v17599_v50 }
 0x686   :  { %5822 = vmatprep.subr.bf16.mxu1 %v17602_v61 }
 0x689   :  { %5823 = vmatpush1.bf16.msra.mxu1 %v17605_v4 }
 0x68a   :  { %6599 = vmatprep.subr.bf16.mxu1 %v17757_v16 }
 0x6df   :  { %v5019_v46 = vpop.f32.mrb[12].mxu1  ;;  %v5062_v58 = vpop.f32.mrb[60].mxu0 }
 0x6e0   :  { %v5021_v60 = vpop.f32.mrb[13].mxu1  ;;  %v5064_v50 = vpop.f32.mrb[61].mxu0  ;;  %v14039_v21 = vadd.f32 %v20404_v28, %v5019_v46  ;;  %v14139_v56 = vadd.f32 %v20406_v37, %v5062_v58 }
 0x6e1   :  { %v5023_v43 = vpop.f32.mrb[14].mxu1  ;;  %v5066_v61 = vpop.f32.mrb[62].mxu0  ;;  %v14041_v9 = vadd.f32 %v20405_v49, %v5021_v60  ;;  %v14141_v32 = vadd.f32 %v20407_v12, %v5064_v50 }
 0x6e2   :  { %v5025_v29 = vpop.f32.mrb[15].mxu1  ;;  %v5068_v33 = vpop.f32.mrb[63].mxu0  ;;  %v14043_v4 = vadd.f32 %v20404_v28, %v5023_v43  ;;  %v13142_v42 = vmul.f32 -1.442695, %v14039_v21  ;;  %v14143_v46 = vadd.f32 %v20406_v37, %v5066_v61  ;;  %v13146_v44 = vmul.f32 -1.442695, %v14139_v56 }
 0x6e3   :  { %v14045_v16 = vadd.f32 %v20405_v49, %v5025_v29  ;;  %v13143_v41 = vmul.f32 -1.442695, %v14041_v9  ;;  %v14145_v60 = vadd.f32 %v20407_v12, %v5068_v33  ;;  %v13147_v43 = vmul.f32 -1.442695, %v14141_v32 }
 0x6e4   :  { %v13144_v23 = vmul.f32 -1.442695, %v14043_v4  ;;  %15626 = vpow2.f32 %v13142_v42  ;;  %v13148_v28 = vmul.f32 -1.442695, %v14143_v46 }
 0x6e5   :  { %v13145_v51 = vmul.f32 -1.442695, %v14045_v16  ;;  %15628 = vpow2.f32 %v13143_v41  ;;  %v13149_v21 = vmul.f32 -1.442695, %v14145_v60 }
 0x6e6   :  { %15630 = vpow2.f32 %v13144_v23 }
 0x6e7   :  { %15632 = vpow2.f32 %v13145_v51 }
 0x6e8   :  { %15634 = vpow2.f32 %v13146_v44 }
 0x6e9   :  { %15636 = vpow2.f32 %v13147_v43 }
 0x6ea   :  { %15638 = vpow2.f32 %v13148_v28 }
 0x6eb   :  { %15640 = vpow2.f32 %v13149_v21 }
 0x6ee   :  { %v15627_v29 = vpop.eup %15626 }
 0x6ef   :  { %v15629_v9 = vpop.eup %15628  ;;  %v5130_v23 = vadd.f32 1.0, %v15627_v29 }
 0x6f0   :  { %v15631_v4 = vpop.eup %15630  ;;  %v5131_v41 = vadd.f32 1.0, %v15629_v9 }
 0x6f1   :  { %v15633_v42 = vpop.eup %15632  ;;  %v5132_v58 = vadd.f32 1.0, %v15631_v4  ;;  %15642 = vrcp.f32 %v5130_v23 }
 0x6f2   :  { %v5133_v50 = vadd.f32 1.0, %v15633_v42  ;;  %15644 = vrcp.f32 %v5131_v41  ;;  %v15635_v56 = vpop.eup %15634  ;;  %v20452_v42 = vld [vmem:[#allocation28_spill] sm:$0xff] }
 0x6f3   :  { %15646 = vrcp.f32 %v5132_v58  ;;  %v15637_v32 = vpop.eup %15636  ;;  %v5158_v16 = vadd.f32 1.0, %v15635_v56  ;;  %v1706_v23 = vadd.f32 %v20452_v42, %v17101_v13 }
 0x6f4   :  { %15648 = vrcp.f32 %v5133_v50  ;;  %v15639_v33 = vpop.eup %15638  ;;  %v5159_v51 = vadd.f32 1.0, %v15637_v32  ;;  %v20453_v32 = vld [vmem:[#allocation29_spill] sm:$0xff] }
 0x6f5   :  { %v15641_v61 = vpop.eup %15640  ;;  %v5160_v46 = vadd.f32 1.0, %v15639_v33  ;;  %15650 = vrcp.f32 %v5158_v16  ;;  %v1708_v33 = vadd.f32 %v20453_v32, %v17106_v57  ;;  %v20455_v16 = vld [vmem:[#allocation31_spill] sm:$0xff] }
 0x6f6   :  { %v5161_v29 = vadd.f32 1.0, %v15641_v61  ;;  %15652 = vrcp.f32 %v5159_v51 }
 0x6f7   :  { %15654 = vrcp.f32 %v5160_v46 }
 0x6f8   :  { %15656 = vrcp.f32 %v5161_v29 }
 0x6fb   :  { %v15643_v28 = vpop.eup %15642 }
 0x6fc   :  { %v15645_v4 = vpop.eup %15644 }
 0x6fd   :  { %v15647_v56 = vpop.eup %15646 }
 0x6fe   :  { %v15649_v12 = vpop.eup %15648 }
 0x71f   :  { %v5105_v44 = vpop.f32.mrb[104].mxu1 }
 0x720   :  { %v5106_v60 = vadd.f32 %v5105_v44, %v20408_v63  ;;  %v5107_v43 = vpop.f32.mrb[105].mxu1 }
 0x721   :  { %v5108_v21 = vadd.f32 %v5107_v43, %v20360_v48  ;;  %v5109_v9 = vpop.f32.mrb[106].mxu1  ;;  %v20454_v43 = vld [vmem:[#allocation30_spill] sm:$0xff] }
 0x722   :  { %v5170_v41 = vmul.f32 %v15643_v28, %v5106_v60  ;;  %v5110_v58 = vadd.f32 %v5109_v9, %v20408_v63  ;;  %v5111_v50 = vpop.f32.mrb[107].mxu1  ;;  %v1710_v37 = vadd.f32 %v20454_v43, %v17101_v13  ;;  %v1712_v60 = vadd.f32 %v20455_v16, %v17106_v57 }
 0x723   :  { %v5171_v44 = vmul.f32 %v15645_v4, %v5108_v21  ;;  %v5112_v61 = vadd.f32 %v5111_v50, %v20360_v48  ;;  %v15651_v21 = vpop.eup %15650 }
 0x724   :  { %v5174_v49 = vadd.f32 %v5170_v41, %v1706_v23  ;;  %v5172_v42 = vmul.f32 %v15647_v56, %v5110_v58  ;;  %v15653_v4 = vpop.eup %15652  ;;  %v5182_v43 = vsub.f32 1.0, %v15651_v21  ;;  %v5190_v29 = vmul.f32 %v15651_v21, %v17635_v47  ;;  %v20480_v21 = vld [vmem:[#allocation93_spill] sm:$0xff] }
 0x725   :  { %v5175_v28 = vadd.f32 %v5171_v44, %v1708_v33  ;;  %v5173_v9 = vmul.f32 %v15649_v12, %v5112_v61  ;;  %v15655_v50 = vpop.eup %15654  ;;  %v5183_v23 = vsub.f32 1.0, %v15653_v4 }
 0x726   :  { %15658 = vtanh.f32 %v5174_v49  ;;  %v5176_v63 = vadd.f32 %v5172_v42, %v1710_v37  ;;  %v15657_v32 = vpop.eup %15656  ;;  %v5184_v58 = vsub.f32 1.0, %v15655_v50  ;;  %v5191_v37 = vmul.f32 %v15653_v4, %v17638_v59  ;;  %v20481_v4 = vld [vmem:[#allocation94_spill] sm:$0xff] }
 0x727   :  { %15660 = vtanh.f32 %v5175_v28  ;;  %v5177_v51 = vadd.f32 %v5173_v9, %v1712_v60  ;;  %v5185_v12 = vsub.f32 1.0, %v15657_v32  ;;  %v5192_v61 = vmul.f32 %v15655_v50, %v17640_v7  ;;  %v20458_v7 = vld [vmem:[#allocation23_spill] sm:$0xff] }
 0x728   :  { %15662 = vtanh.f32 %v5176_v63  ;;  %v5193_v60 = vmul.f32 %v15657_v32, %v17642_v17  ;;  %v20460_v17 = vld [vmem:[#allocation73_spill] sm:$0xff]  ;;  %v20482_v50 = vld [vmem:[#allocation95_spill] sm:$0xff]  ;;  %v20483_v32 = vld [vmem:[#allocation96_spill] sm:$0xff] }
 0x729   :  { %15664 = vtanh.f32 %v5177_v51 }
 0x730   :  { %v15659_v46 = vpop.eup %15658 }
 0x731   :  { %v15661_v41 = vpop.eup %15660  ;;  %v5186_v56 = vmul.f32 %v15659_v46, %v5182_v43  ;;  %v20490_v43 = vld [vmem:[#allocation103_spill] sm:$0xff]  ;;  %v20491_v46 = vld [vmem:[#allocation104_spill] sm:$0xff] }
 0x732   :  { %v15663_v33 = vpop.eup %15662  ;;  %v5187_v49 = vmul.f32 %v15661_v41, %v5183_v23  ;;  %v18030_v23 = vld [vmem:[#allocation9 + $0x150] ss:$24 sps:$4 sm:$0xff]   ;;  %v18033_v41 = vld [vmem:[#allocation9 + $0x184] ss:$24 sps:$4 sm:$0xff]  }
 0x733   :  { %v15665_v44 = vpop.eup %15664  ;;  %v5188_v63 = vmul.f32 %v15663_v33, %v5184_v58  ;;  %v17920_v42 = vadd.f32 %v5190_v29, %v5186_v56  ;;  %v20492_v58 = vld [vmem:[#allocation105_spill] sm:$0xff]  ;;  %v20493_v56 = vld [vmem:[#allocation106_spill] sm:$0xff]  ;;  %v18038_v29 = vld [vmem:[#allocation9 + $0x180] ss:$24 sps:$4 sm:$0xff]  }
 0x734   :  { %v5189_v16 = vmul.f32 %v15665_v44, %v5185_v12  ;;  %v17923_v28 = vadd.f32 %v5191_v37, %v5187_v49  ;;  %v18041_v33 = vld [vmem:[#allocation9 + $0x1b4] ss:$24 sps:$4 sm:$0xff]   ;;  %v20494_v12 = vld [vmem:[#allocation107_spill] sm:$0xff]  ;;  %v18045_v49 = vld [vmem:[#allocation9 + $0x1b0] ss:$24 sps:$4 sm:$0xff]  }
 0x735   :  { %v17925_v9 = vadd.f32 %v5192_v61, %v5188_v63  ;;  %v18049_v37 = vld [vmem:[#allocation9 + $0x1e4] ss:$24 sps:$4 sm:$0xff]   ;;  %v18051_v44 = vld [vmem:[#allocation9 + $0x1e0] ss:$24 sps:$4 sm:$0xff]   ;;  %v18055_v63 = vld [vmem:[#allocation9 + $0x214] ss:$24 sps:$4 sm:$0xff]  }
 0x736   :  { %v17927_v51 = vadd.f32 %v5193_v60, %v5189_v16  ;;  %v18057_v61 = vld [vmem:[#allocation9 + $0x210] ss:$24 sps:$4 sm:$0xff]   ;;  %v18060_v16 = vld [vmem:[#allocation9 + $0x244] ss:$24 sps:$4 sm:$0xff]   ;;  %v18063_v60 = vld [vmem:[#allocation9 + $0x240] ss:$24 sps:$4 sm:$0xff]  }
 0x737   :  { %v17935_v59 = vpack.c.bf16 %v17925_v9, %v17920_v42 }
 0x738   :  { %v17931_v47 = vpack.c.bf16 %v17927_v51, %v17923_v28 }
 0x739   :  { %20457 = vst [vmem:[#allocation24_spill] sm:$0xff] %v17935_v59 }
 0x73a   :  { %20456 = vst [vmem:[#allocation108_spill] sm:$0xff] %v17931_v47  ;;  %5824 = vmatprep.mubr.bf16.mxu1 %v17931_v47  ;;  %5867 = vmatprep.mubr.bf16.mxu0 %v17931_v47 }
 0x73b   :  { %5825 = vmatmul.mubr.bf16.vlgmr.msra.gmra.mrb[16].mxu1 %v17935_v59  ;;  %5868 = vmatmul.mubr.bf16.vlgmr.msra.gmra.mrb[64].mxu0 %v17935_v59 }
 0x73c   :  { %5879 = vmatpush1.bf16.msra.mxu0 %v17648_v34  ;;  %5910 = vmatprep.mubr.bf16.mxu0 %v17931_v47  ;;  %v20461_v34 = vld [vmem:[#allocation74_spill] sm:$0xff]  ;;  %v18207_v47 = vld [vmem:[#allocation9 + $0x284] ss:$24 sps:$4 sm:$0xff]  }
 0x73d   :  { %5880 = vmatprep.subr.bf16.mxu0 %v17654_v11  ;;  %6600 = vmatpush1.bf16.msra.mxu1 %v17755_v55  ;;  %v20464_v11 = vld [vmem:[#allocation77_spill] sm:$0xff] }
 0x73e   :  { %6601 = vmatprep.subr.bf16.mxu1 %v17762_v6  ;;  %v20477_v55 = vld [vmem:[#allocation89_spill] sm:$0xff]  ;;  %v20479_v6 = vld [vmem:[#allocation92_spill] sm:$0xff] }
 0x740   :  { %5881 = vmatpush1.bf16.msra.mxu0 %v17662_v62  ;;  %v20465_v62 = vld [vmem:[#allocation78_spill] sm:$0xff] }
 0x741   :  { %5882 = vmatprep.subr.bf16.mxu0 %v17665_v2  ;;  %6602 = vmatpush1.bf16.msra.mxu1 %v17770_v3  ;;  %v20462_v3 = vld [vmem:[#allocation75_spill] sm:$0xff]  ;;  %20518 = vst [vmem:[#allocation78_spill] sm:$0xff] %v18207_v47 }
 0x742   :  { %6603 = vmatprep.subr.bf16.mxu1 %v17775_v18  ;;  %v20466_v2 = vld [vmem:[#allocation79_spill] sm:$0xff] }
 0x743   :  { %v20476_v18 = vld [vmem:[#allocation91_spill] sm:$0xff] }
 0x744   :  { %5883 = vmatpush1.bf16.msra.mxu0 %v17668_v31  ;;  %v20467_v31 = vld [vmem:[#allocation80_spill] sm:$0xff] }
 0x745   :  { %5884 = vmatprep.subr.bf16.mxu0 %v17671_v38  ;;  %6604 = vmatpush1.bf16.msra.mxu1 %v17782_v27  ;;  %v20459_v27 = vld [vmem:[#allocation72_spill] sm:$0xff]  ;;  %v20468_v38 = vld [vmem:[#allocation81_spill] sm:$0xff] }
 0x746   :  { %6605 = vmatprep.subr.bf16.mxu1 %v17787_v53  ;;  %v20478_v53 = vld [vmem:[#allocation90_spill] sm:$0xff] }
 0x748   :  { %5885 = vmatpush1.bf16.msra.mxu0 %v17674_v15  ;;  %v20469_v15 = vld [vmem:[#allocation82_spill] sm:$0xff] }
 0x749   :  { %5886 = vmatprep.subr.bf16.mxu0 %v17677_v52  ;;  %6606 = vmatpush1.bf16.msra.mxu1 %v17794_v26  ;;  %v20463_v26 = vld [vmem:[#allocation76_spill] sm:$0xff]  ;;  %v20470_v52 = vld [vmem:[#allocation83_spill] sm:$0xff] }
 0x74c   :  { %5887 = vmatpush1.bf16.msra.mxu0 %v17680_v5  ;;  %v20471_v5 = vld [vmem:[#allocation84_spill] sm:$0xff] }
 0x74d   :  { %5888 = vmatprep.subr.bf16.mxu0 %v17683_v45  ;;  %v20472_v45 = vld [vmem:[#allocation85_spill] sm:$0xff] }
 0x750   :  { %5889 = vmatpush1.bf16.msra.mxu0 %v17686_v8  ;;  %v20473_v8 = vld [vmem:[#allocation86_spill] sm:$0xff] }
 0x751   :  { %5890 = vmatprep.subr.bf16.mxu0 %v17689_v19  ;;  %v20474_v19 = vld [vmem:[#allocation87_spill] sm:$0xff] }
 0x754   :  { %5891 = vmatpush1.bf16.msra.mxu0 %v17692_v54  ;;  %v20475_v54 = vld [vmem:[#allocation88_spill] sm:$0xff] }
 0x755   :  { %5892 = vmatprep.subr.bf16.mxu0 %v20458_v7  ;;  %v18066_v7 = vld [vmem:[#allocation9 + $0x274] ss:$24 sps:$4 sm:$0xff]  }
 0x758   :  { %5893 = vmatpush1.bf16.msra.mxu0 %v20459_v27  ;;  %v18069_v27 = vld [vmem:[#allocation9 + $0x270] ss:$24 sps:$4 sm:$0xff]  }
 0x759   :  { %5894 = vmatprep.subr.bf16.mxu0 %v20460_v17  ;;  %v18072_v17 = vld [vmem:[#allocation9 + $0x2a4] ss:$24 sps:$4 sm:$0xff]  }
 0x75c   :  { %5895 = vmatpush1.bf16.msra.mxu0 %v20461_v34  ;;  %v18075_v34 = vld [vmem:[#allocation9 + $0x2a0] ss:$24 sps:$4 sm:$0xff]  }
 0x75d   :  { %5896 = vmatprep.subr.bf16.mxu0 %v20462_v3  ;;  %v18078_v3 = vld [vmem:[#allocation9 + $0x2d4] ss:$24 sps:$4 sm:$0xff]  }
 0x760   :  { %5897 = vmatpush1.bf16.msra.mxu0 %v20463_v26  ;;  %v18081_v26 = vld [vmem:[#allocation9 + $0x2d0] ss:$24 sps:$4 sm:$0xff]  }
 0x761   :  { %5898 = vmatprep.subr.bf16.mxu0 %v20464_v11  ;;  %v18085_v11 = vld [vmem:[#allocation9 + $0x14] ss:$24 sps:$4 sm:$0xff]  }
 0x764   :  { %5899 = vmatpush1.bf16.msra.mxu0 %v20465_v62 }
 0x765   :  { %5900 = vmatprep.subr.bf16.mxu0 %v20466_v2 }
 0x768   :  { %5901 = vmatpush1.bf16.msra.mxu0 %v20467_v31 }
 0x769   :  { %5902 = vmatprep.subr.bf16.mxu0 %v20468_v38 }
 0x76c   :  { %5903 = vmatpush1.bf16.msra.mxu0 %v20469_v15 }
 0x76d   :  { %5904 = vmatprep.subr.bf16.mxu0 %v20470_v52 }
 0x770   :  { %5905 = vmatpush1.bf16.msra.mxu0 %v20471_v5 }
 0x771   :  { %5906 = vmatprep.subr.bf16.mxu0 %v20472_v45 }
 0x774   :  { %5907 = vmatpush1.bf16.msra.mxu0 %v20473_v8  ;;  %v20495_v8 = vld [vmem:[#allocation66_spill] sm:$0xff] }
 0x775   :  { %5908 = vmatprep.subr.bf16.mxu0 %v20474_v19 }
 0x778   :  { %5909 = vmatpush1.bf16.msra.mxu0 %v20475_v54  ;;  %v20496_v54 = vld [vmem:[#allocation67_spill] sm:$0xff] }
 0x779   :  { %6642 = vmatprep.subr.bf16.mxu0 %v20476_v18 }
 0x77b   :  { %5911 = vmatmul.mubr.bf16.vlgmr.msra.gmra.mrb[104].mxu0 %v17935_v59  ;;  %v18204_v59 = vld [vmem:[#allocation9 + $0x250] ss:$24 sps:$4 sm:$0xff]  }
 0x77c   :  { %6643 = vmatpush1.bf16.msra.mxu0 %v20477_v55  ;;  %20517 = vst [vmem:[#allocation77_spill] sm:$0xff] %v18204_v59 }
 0x77d   :  { %6644 = vmatprep.subr.bf16.mxu0 %v20478_v53 }
 0x780   :  { %6645 = vmatpush1.bf16.msra.mxu0 %v20479_v6 }
 0x781   :  { %6646 = vmatprep.subr.bf16.mxu0 %v20480_v21 }
 0x784   :  { %6647 = vmatpush1.bf16.msra.mxu0 %v20481_v4 }
 0x785   :  { %6648 = vmatprep.subr.bf16.mxu0 %v20482_v50 }
 0x788   :  { %6649 = vmatpush1.bf16.msra.mxu0 %v20483_v32  ;;  %v20497_v32 = vld [vmem:[#allocation109_spill] sm:$0xff] }
 0x789   :  { %6650 = vmatprep.subr.bf16.mxu0 %v17796_v20  ;;  %v20485_v20 = vld [vmem:[#allocation98_spill] sm:$0xff] }
 0x78c   :  { %6651 = vmatpush1.bf16.msra.mxu0 %v17800_v14  ;;  %v20486_v14 = vld [vmem:[#allocation99_spill] sm:$0xff] }
 0x78d   :  { %6652 = vmatprep.subr.bf16.mxu0 %v17804_v22  ;;  %v20484_v22 = vld [vmem:[#allocation97_spill] sm:$0xff] }
 0x790   :  { %6653 = vmatpush1.bf16.msra.mxu0 %v17808_v30  ;;  %v18008_v30 = vld [vmem:[#allocation9 + $0xf4] ss:$24 sps:$4 sm:$0xff]  }
 0x791   :  { %6654 = vmatprep.subr.bf16.mxu0 %v17812_v36  ;;  %v18004_v36 = vld [vmem:[#allocation9 + $0xc0] ss:$24 sps:$4 sm:$0xff]  }
 0x794   :  { %6655 = vmatpush1.bf16.msra.mxu0 %v17816_v10  ;;  %v18006_v10 = vld [vmem:[#allocation9 + $0xc4] ss:$24 sps:$4 sm:$0xff]  }
 0x795   :  { %6656 = vmatprep.subr.bf16.mxu0 %v17820_v39  ;;  %6607 = vmatprep.subr.bf16.mxu1 %v18006_v10  ;;  %v20487_v39 = vld [vmem:[#allocation100_spill] sm:$0xff] }
 0x796   :  { %6608 = vmatpush1.bf16.msra.mxu1 %v18004_v36 }
 0x797   :  { %6609 = vmatprep.subr.bf16.mxu1 %v18008_v30 }
 0x798   :  { %6657 = vmatpush1.bf16.msra.mxu0 %v17824_v40  ;;  %v18014_v40 = vld [vmem:[#allocation9 + $0xf0] ss:$24 sps:$4 sm:$0xff]  }
 0x799   :  { %6658 = vmatprep.subr.bf16.mxu0 %v17828_v35  ;;  %v18017_v35 = vld [vmem:[#allocation9 + $0x124] ss:$24 sps:$4 sm:$0xff]  }
 0x79a   :  { %6610 = vmatpush1.bf16.msra.mxu1 %v18014_v40 }
 0x79b   :  { %6611 = vmatprep.subr.bf16.mxu1 %v18017_v35 }
 0x79c   :  { %6659 = vmatpush1.bf16.msra.mxu0 %v17832_v0  ;;  %v20488_v0 = vld [vmem:[#allocation101_spill] sm:$0xff] }
 0x79d   :  { %6660 = vmatprep.subr.bf16.mxu0 %v17836_v1  ;;  %v20489_v1 = vld [vmem:[#allocation102_spill] sm:$0xff] }
 0x7a0   :  { %6661 = vmatpush1.bf16.msra.mxu0 %v17840_v25  ;;  %v18022_v25 = vld [vmem:[#allocation9 + $0x120] ss:$24 sps:$4 sm:$0xff]  }
 0x7a1   :  { %6662 = vmatprep.subr.bf16.mxu0 %v17848_v24  ;;  %v18025_v24 = vld [vmem:[#allocation9 + $0x154] ss:$24 sps:$4 sm:$0xff]   ;;  %6612 = vmatpush1.bf16.msra.mxu1 %v18022_v25 }
 0x7a2   :  { %6613 = vmatprep.subr.bf16.mxu1 %v18025_v24 }
 0x7a4   :  { %6663 = vmatpush1.bf16.msra.mxu0 %v20484_v22 }
 0x7a5   :  { %6664 = vmatprep.subr.bf16.mxu0 %v20485_v20  ;;  %6614 = vmatpush1.bf16.msra.mxu1 %v18030_v23  ;;  %v20498_v20 = vld [vmem:[#allocation110_spill] sm:$0xff] }
 0x7a6   :  { %6615 = vmatprep.subr.bf16.mxu1 %v18033_v41 }
 0x7a8   :  { %6665 = vmatpush1.bf16.msra.mxu0 %v20486_v14 }
 0x7a9   :  { %6666 = vmatprep.subr.bf16.mxu0 %v20487_v39  ;;  %6616 = vmatpush1.bf16.msra.mxu1 %v18038_v29 }
 0x7aa   :  { %6617 = vmatprep.subr.bf16.mxu1 %v18041_v33 }
 0x7ac   :  { %6667 = vmatpush1.bf16.msra.mxu0 %v20488_v0 }
 0x7ad   :  { %6668 = vmatprep.subr.bf16.mxu0 %v20489_v1  ;;  %6618 = vmatpush1.bf16.msra.mxu1 %v18045_v49 }
 0x7ae   :  { %6619 = vmatprep.subr.bf16.mxu1 %v18049_v37 }
 0x7b0   :  { %6669 = vmatpush1.bf16.msra.mxu0 %v20490_v43 }
 0x7b1   :  { %6670 = vmatprep.subr.bf16.mxu0 %v20491_v46  ;;  %6620 = vmatpush1.bf16.msra.mxu1 %v18051_v44 }
 0x7b2   :  { %6621 = vmatprep.subr.bf16.mxu1 %v18055_v63 }
 0x7b4   :  { %6671 = vmatpush1.bf16.msra.mxu0 %v20492_v58 }
 0x7b5   :  { %6672 = vmatprep.subr.bf16.mxu0 %v20493_v56  ;;  %6622 = vmatpush1.bf16.msra.mxu1 %v18057_v61 }
 0x7b6   :  { %6623 = vmatprep.subr.bf16.mxu1 %v18060_v16 }
 0x7b8   :  { %6673 = vmatpush1.bf16.msra.mxu0 %v20494_v12 }
 0x7b9   :  { %6624 = vmatpush1.bf16.msra.mxu1 %v18063_v60 }
 0x7ba   :  { %6625 = vmatprep.subr.bf16.mxu1 %v18066_v7 }
 0x7bd   :  { %6626 = vmatpush1.bf16.msra.mxu1 %v18069_v27 }
 0x7be   :  { %6627 = vmatprep.subr.bf16.mxu1 %v18072_v17 }
 0x7c1   :  { %6628 = vmatpush1.bf16.msra.mxu1 %v18075_v34 }
 0x7c2   :  { %6629 = vmatprep.subr.bf16.mxu1 %v18078_v3 }
 0x7c5   :  { %6630 = vmatpush1.bf16.msra.mxu1 %v18081_v26 }
 0x7c6   :  { %6685 = vmatprep.subr.bf16.mxu1 %v18085_v11 }
 0x80e   :  { %v5826_v62 = vpop.f32.mrb[16].mxu1  ;;  %v5869_v2 = vpop.f32.mrb[64].mxu0 }
 0x80f   :  { %v5828_v31 = vpop.f32.mrb[17].mxu1  ;;  %v5871_v38 = vpop.f32.mrb[65].mxu0  ;;  %v14047_v19 = vadd.f32 %v20495_v8, %v5826_v62  ;;  %v14147_v22 = vadd.f32 %v20497_v32, %v5869_v2 }
 0x810   :  { %v5830_v15 = vpop.f32.mrb[18].mxu1  ;;  %v5873_v52 = vpop.f32.mrb[66].mxu0  ;;  %v14049_v18 = vadd.f32 %v20496_v54, %v5828_v31  ;;  %v14149_v14 = vadd.f32 %v20498_v20, %v5871_v38 }
 0x811   :  { %v5832_v5 = vpop.f32.mrb[19].mxu1  ;;  %v5875_v45 = vpop.f32.mrb[67].mxu0  ;;  %v14051_v55 = vadd.f32 %v20495_v8, %v5830_v15  ;;  %v13246_v6 = vmul.f32 -1.442695, %v14047_v19  ;;  %v14151_v39 = vadd.f32 %v20497_v32, %v5873_v52  ;;  %v13250_v1 = vmul.f32 -1.442695, %v14147_v22 }
 0x812   :  { %v14053_v53 = vadd.f32 %v20496_v54, %v5832_v5  ;;  %v13247_v21 = vmul.f32 -1.442695, %v14049_v18  ;;  %v14153_v0 = vadd.f32 %v20498_v20, %v5875_v45  ;;  %v13251_v43 = vmul.f32 -1.442695, %v14149_v14 }
 0x813   :  { %v13248_v4 = vmul.f32 -1.442695, %v14051_v55  ;;  %15666 = vpow2.f32 %v13246_v6  ;;  %v13252_v46 = vmul.f32 -1.442695, %v14151_v39 }
 0x814   :  { %v13249_v50 = vmul.f32 -1.442695, %v14053_v53  ;;  %15668 = vpow2.f32 %v13247_v21  ;;  %v13253_v56 = vmul.f32 -1.442695, %v14153_v0 }
 0x815   :  { %15670 = vpow2.f32 %v13248_v4  ;;  %v20499_v4 = vld [vmem:[#allocation68_spill] sm:$0xff] }
 0x816   :  { %15672 = vpow2.f32 %v13249_v50 }
 0x817   :  { %15674 = vpow2.f32 %v13250_v1 }
 0x818   :  { %15676 = vpow2.f32 %v13251_v43 }
 0x819   :  { %15678 = vpow2.f32 %v13252_v46  ;;  %v20500_v46 = vld [vmem:[#allocation32_spill] sm:$0xff] }
 0x81a   :  { %15680 = vpow2.f32 %v13253_v56 }
 0x81d   :  { %v15667_v58 = vpop.eup %15666 }
 0x81e   :  { %v15669_v12 = vpop.eup %15668  ;;  %v5937_v15 = vadd.f32 1.0, %v15667_v58  ;;  %v1716_v58 = vadd.f32 %v20500_v46, %v17101_v13 }
 0x81f   :  { %v15671_v62 = vpop.eup %15670  ;;  %v5938_v2 = vadd.f32 1.0, %v15669_v12 }
 0x820   :  { %v15673_v31 = vpop.eup %15672  ;;  %v5939_v5 = vadd.f32 1.0, %v15671_v62  ;;  %15682 = vrcp.f32 %v5937_v15  ;;  %v20501_v15 = vld [vmem:[#allocation33_spill] sm:$0xff] }
 0x821   :  { %v5940_v38 = vadd.f32 1.0, %v15673_v31  ;;  %15684 = vrcp.f32 %v5938_v2  ;;  %v15675_v52 = vpop.eup %15674  ;;  %v1718_v2 = vadd.f32 %v20501_v15, %v17106_v57 }
 0x822   :  { %15686 = vrcp.f32 %v5939_v5  ;;  %v15677_v45 = vpop.eup %15676  ;;  %v5965_v55 = vadd.f32 1.0, %v15675_v52 }
 0x823   :  { %15688 = vrcp.f32 %v5940_v38  ;;  %v15679_v19 = vpop.eup %15678  ;;  %v5966_v53 = vadd.f32 1.0, %v15677_v45  ;;  %v20502_v45 = vld [vmem:[#allocation34_spill] sm:$0xff] }
 0x824   :  { %v15681_v18 = vpop.eup %15680  ;;  %v5967_v21 = vadd.f32 1.0, %v15679_v19  ;;  %15690 = vrcp.f32 %v5965_v55  ;;  %v1720_v19 = vadd.f32 %v20502_v45, %v17101_v13  ;;  %v20503_v55 = vld [vmem:[#allocation35_spill] sm:$0xff] }
 0x825   :  { %v5968_v39 = vadd.f32 1.0, %v15681_v18  ;;  %15692 = vrcp.f32 %v5966_v53 }
 0x826   :  { %15694 = vrcp.f32 %v5967_v21 }
 0x827   :  { %15696 = vrcp.f32 %v5968_v39 }
 0x82a   :  { %v15683_v14 = vpop.eup %15682 }
 0x82b   :  { %v15685_v43 = vpop.eup %15684 }
 0x82c   :  { %v15687_v31 = vpop.eup %15686 }
 0x82d   :  { %v15689_v52 = vpop.eup %15688 }
 0x84e   :  { %v5912_v6 = vpop.f32.mrb[104].mxu0 }
 0x84f   :  { %v5913_v50 = vadd.f32 %v5912_v6, %v20499_v4  ;;  %v5914_v22 = vpop.f32.mrb[105].mxu0 }
 0x850   :  { %v5915_v0 = vadd.f32 %v5914_v22, %v20360_v48  ;;  %v5916_v1 = vpop.f32.mrb[106].mxu0 }
 0x851   :  { %v5977_v56 = vmul.f32 %v15683_v14, %v5913_v50  ;;  %v5917_v12 = vadd.f32 %v5916_v1, %v20499_v4  ;;  %v5918_v62 = vpop.f32.mrb[107].mxu0  ;;  %v1722_v50 = vadd.f32 %v20503_v55, %v17106_v57 }
 0x852   :  { %v5978_v5 = vmul.f32 %v15685_v43, %v5915_v0  ;;  %v5919_v38 = vadd.f32 %v5918_v62, %v20360_v48  ;;  %v15691_v0 = vpop.eup %15690 }
 0x853   :  { %v5981_v18 = vadd.f32 %v5977_v56, %v1716_v58  ;;  %v5979_v6 = vmul.f32 %v15687_v31, %v5917_v12  ;;  %v15693_v43 = vpop.eup %15692  ;;  %v5989_v15 = vsub.f32 1.0, %v15691_v0  ;;  %v5997_v39 = vmul.f32 %v15691_v0, %v17920_v42  ;;  %v18141_v0 = vld [vmem:[#allocation9 + $0x74] ss:$24 sps:$4 sm:$0xff]  }
 0x854   :  { %v5982_v22 = vadd.f32 %v5978_v5, %v1718_v2  ;;  %v5980_v14 = vmul.f32 %v15689_v52, %v5919_v38  ;;  %v15695_v46 = vpop.eup %15694  ;;  %v5990_v58 = vsub.f32 1.0, %v15693_v43  ;;  %v5998_v52 = vmul.f32 %v15693_v43, %v17923_v28  ;;  %v18124_v28 = vld [vmem:[#allocation9 + $0x10] ss:$24 sps:$4 sm:$0xff]  }
 0x855   :  { %15698 = vtanh.f32 %v5981_v18  ;;  %v5983_v1 = vadd.f32 %v5979_v6, %v1720_v19  ;;  %v15697_v62 = vpop.eup %15696  ;;  %v5991_v12 = vsub.f32 1.0, %v15695_v46  ;;  %v5999_v18 = vmul.f32 %v15695_v46, %v17925_v9  ;;  %v18144_v43 = vld [vmem:[#allocation9 + $0x70] ss:$24 sps:$4 sm:$0xff]   ;;  %v18147_v46 = vld [vmem:[#allocation9 + $0xa4] ss:$24 sps:$4 sm:$0xff]  }
 0x856   :  { %15700 = vtanh.f32 %v5982_v22  ;;  %v5984_v53 = vadd.f32 %v5980_v14, %v1722_v50  ;;  %v5992_v5 = vsub.f32 1.0, %v15697_v62  ;;  %v6000_v50 = vmul.f32 %v15697_v62, %v17927_v51  ;;  %v18138_v51 = vld [vmem:[#allocation9 + $0x40] ss:$24 sps:$4 sm:$0xff]  }
 0x857   :  { %15702 = vtanh.f32 %v5983_v1  ;;  %v18150_v62 = vld [vmem:[#allocation9 + $0xa0] ss:$24 sps:$4 sm:$0xff]  }
 0x858   :  { %15704 = vtanh.f32 %v5984_v53  ;;  %v18130_v53 = vld [vmem:[#allocation9 + $0x44] ss:$24 sps:$4 sm:$0xff]  }
 0x85f   :  { %v15699_v21 = vpop.eup %15698 }
 0x860   :  { %v15701_v56 = vpop.eup %15700  ;;  %v5993_v31 = vmul.f32 %v15699_v21, %v5989_v15  ;;  %v18153_v15 = vld [vmem:[#allocation9 + $0xd4] ss:$24 sps:$4 sm:$0xff]   ;;  %v18156_v21 = vld [vmem:[#allocation9 + $0xd0] ss:$24 sps:$4 sm:$0xff]  }
 0x861   :  { %v15703_v2 = vpop.eup %15702  ;;  %v5994_v38 = vmul.f32 %v15701_v56, %v5990_v58  ;;  %v18159_v58 = vld [vmem:[#allocation9 + $0x104] ss:$24 sps:$4 sm:$0xff]   ;;  %v18162_v56 = vld [vmem:[#allocation9 + $0x100] ss:$24 sps:$4 sm:$0xff]  }
 0x862   :  { %v15705_v45 = vpop.eup %15704  ;;  %v5995_v19 = vmul.f32 %v15703_v2, %v5991_v12  ;;  %v18111_v6 = vadd.f32 %v5997_v39, %v5993_v31  ;;  %v18165_v12 = vld [vmem:[#allocation9 + $0x134] ss:$24 sps:$4 sm:$0xff]   ;;  %v18168_v31 = vld [vmem:[#allocation9 + $0x130] ss:$24 sps:$4 sm:$0xff]   ;;  %v18171_v39 = vld [vmem:[#allocation9 + $0x164] ss:$24 sps:$4 sm:$0xff]  }
 0x863   :  { %v5996_v55 = vmul.f32 %v15705_v45, %v5992_v5  ;;  %v18114_v22 = vadd.f32 %v5998_v52, %v5994_v38  ;;  %20506 = vst [vmem:[#allocation27_spill] sm:$0xff] %v18171_v39  ;;  %v18174_v2 = vld [vmem:[#allocation9 + $0x160] ss:$24 sps:$4 sm:$0xff]   ;;  %v18177_v5 = vld [vmem:[#allocation9 + $0x194] ss:$24 sps:$4 sm:$0xff]  }
 0x864   :  { %v18116_v14 = vadd.f32 %v5999_v18, %v5995_v19  ;;  %20507 = vst [vmem:[#allocation28_spill] sm:$0xff] %v18174_v2  ;;  %20508 = vst [vmem:[#allocation29_spill] sm:$0xff] %v18177_v5  ;;  %v18180_v38 = vld [vmem:[#allocation9 + $0x190] ss:$24 sps:$4 sm:$0xff]   ;;  %v18183_v52 = vld [vmem:[#allocation9 + $0x1c4] ss:$24 sps:$4 sm:$0xff]  }
 0x865   :  { %v18118_v1 = vadd.f32 %v6000_v50, %v5996_v55  ;;  %20509 = vst [vmem:[#allocation30_spill] sm:$0xff] %v18180_v38  ;;  %20510 = vst [vmem:[#allocation31_spill] sm:$0xff] %v18183_v52  ;;  %v18186_v45 = vld [vmem:[#allocation9 + $0x1c0] ss:$24 sps:$4 sm:$0xff]   ;;  %v18189_v19 = vld [vmem:[#allocation9 + $0x1f4] ss:$24 sps:$4 sm:$0xff]  }
 0x866   :  { %v18128_v9 = vpack.c.bf16 %v18116_v14, %v18111_v6  ;;  %20511 = vst [vmem:[#allocation23_spill] sm:$0xff] %v18186_v45  ;;  %20512 = vst [vmem:[#allocation72_spill] sm:$0xff] %v18189_v19  ;;  %v18192_v18 = vld [vmem:[#allocation9 + $0x1f0] ss:$24 sps:$4 sm:$0xff]   ;;  %v18195_v55 = vld [vmem:[#allocation9 + $0x224] ss:$24 sps:$4 sm:$0xff]  }
 0x867   :  { %v18122_v42 = vpack.c.bf16 %v18118_v1, %v18114_v22  ;;  %20513 = vst [vmem:[#allocation73_spill] sm:$0xff] %v18192_v18  ;;  %20514 = vst [vmem:[#allocation74_spill] sm:$0xff] %v18195_v55  ;;  %v18198_v50 = vld [vmem:[#allocation9 + $0x220] ss:$24 sps:$4 sm:$0xff]  }
 0x868   :  { %20505 = vst [vmem:[#allocation26_spill] sm:$0xff] %v18128_v9  ;;  %20515 = vst [vmem:[#allocation75_spill] sm:$0xff] %v18198_v50 }
 0x869   :  { %20504 = vst [vmem:[#allocation25_spill] sm:$0xff] %v18122_v42  ;;  %6631 = vmatprep.mubr.bf16.mxu1 %v18122_v42  ;;  %6674 = vmatprep.mubr.bf16.mxu0 %v18122_v42 }
 0x86a   :  { %6632 = vmatmul.mubr.bf16.vlgmr.msra.gmra.mrb[20].mxu1 %v18128_v9  ;;  %6675 = vmatmul.mubr.bf16.vlgmr.msra.gmra.mrb[68].mxu0 %v18128_v9 }
 0x86b   :  { %6686 = vmatpush1.bf16.msra.mxu1 %v18124_v28  ;;  %6717 = vmatprep.mubr.bf16.mxu1 %v18122_v42  ;;  %v18201_v42 = vld [vmem:[#allocation9 + $0x254] ss:$24 sps:$4 sm:$0xff]  }
 0x86c   :  { %6687 = vmatprep.subr.bf16.mxu1 %v18130_v53  ;;  %20516 = vst [vmem:[#allocation76_spill] sm:$0xff] %v18201_v42 }
 0x86f   :  { %6688 = vmatpush1.bf16.msra.mxu1 %v18138_v51 }
 0x870   :  { %6689 = vmatprep.subr.bf16.mxu1 %v18141_v0 }
 0x873   :  { %6690 = vmatpush1.bf16.msra.mxu1 %v18144_v43 }
 0x874   :  { %6691 = vmatprep.subr.bf16.mxu1 %v18147_v46 }
 0x877   :  { %6692 = vmatpush1.bf16.msra.mxu1 %v18150_v62 }
 0x878   :  { %6693 = vmatprep.subr.bf16.mxu1 %v18153_v15 }
 0x87b   :  { %6694 = vmatpush1.bf16.msra.mxu1 %v18156_v21 }
 0x87c   :  { %6695 = vmatprep.subr.bf16.mxu1 %v18159_v58 }
 0x87f   :  { %6696 = vmatpush1.bf16.msra.mxu1 %v18162_v56 }
 0x880   :  { %6697 = vmatprep.subr.bf16.mxu1 %v18165_v12 }
 0x883   :  { %6698 = vmatpush1.bf16.msra.mxu1 %v18168_v31 }
 0x884   :  { %6699 = vmatprep.subr.bf16.mxu1 %v18171_v39  ;;  %v18288_v39 = vld [vmem:[#allocation9 + $0x12c] ss:$24 sps:$4 sm:$0xff]  }
 0x887   :  { %6700 = vmatpush1.bf16.msra.mxu1 %v18174_v2  ;;  %v18272_v2 = vld [vmem:[#allocation9 + $0xcc] ss:$24 sps:$4 sm:$0xff]  }
 0x888   :  { %6701 = vmatprep.subr.bf16.mxu1 %v18177_v5  ;;  %v18266_v5 = vld [vmem:[#allocation9 + $0x98] ss:$24 sps:$4 sm:$0xff]  }
 0x889   :  { %20531 = vst [vmem:[#allocation90_spill] sm:$0xff] %v18266_v5 }
 0x88b   :  { %6702 = vmatpush1.bf16.msra.mxu1 %v18180_v38  ;;  %v18260_v38 = vld [vmem:[#allocation9 + $0x9c] ss:$24 sps:$4 sm:$0xff]  }
 0x88c   :  { %6703 = vmatprep.subr.bf16.mxu1 %v18183_v52  ;;  %v18251_v52 = vld [vmem:[#allocation9 + $0x64] ss:$24 sps:$4 sm:$0xff]   ;;  %20530 = vst [vmem:[#allocation89_spill] sm:$0xff] %v18260_v38 }
 0x88f   :  { %6704 = vmatpush1.bf16.msra.mxu1 %v18186_v45  ;;  %v18233_v45 = vld [vmem:[#allocation9 + $0x4] ss:$24 sps:$4 sm:$0xff]  }
 0x890   :  { %6705 = vmatprep.subr.bf16.mxu1 %v18189_v19  ;;  %v18210_v19 = vld [vmem:[#allocation9 + $0x280] ss:$24 sps:$4 sm:$0xff]  }
 0x891   :  { %20519 = vst [vmem:[#allocation79_spill] sm:$0xff] %v18210_v19 }
 0x893   :  { %6706 = vmatpush1.bf16.msra.mxu1 %v18192_v18  ;;  %v18213_v18 = vld [vmem:[#allocation9 + $0x2b4] ss:$24 sps:$4 sm:$0xff]  }
 0x894   :  { %6707 = vmatprep.subr.bf16.mxu1 %v18195_v55  ;;  %20520 = vst [vmem:[#allocation80_spill] sm:$0xff] %v18213_v18  ;;  %v18216_v55 = vld [vmem:[#allocation9 + $0x2b0] ss:$24 sps:$4 sm:$0xff]  }
 0x895   :  { %20521 = vst [vmem:[#allocation81_spill] sm:$0xff] %v18216_v55 }
 0x897   :  { %6708 = vmatpush1.bf16.msra.mxu1 %v18198_v50  ;;  %v18219_v50 = vld [vmem:[#allocation9 + $0x2e4] ss:$24 sps:$4 sm:$0xff]  }
 0x898   :  { %6709 = vmatprep.subr.bf16.mxu1 %v18201_v42  ;;  %20522 = vst [vmem:[#allocation82_spill] sm:$0xff] %v18219_v50  ;;  %v18222_v42 = vld [vmem:[#allocation9 + $0x2e0] ss:$24 sps:$4 sm:$0xff]  }
 0x899   :  { %20523 = vst [vmem:[#allocation83_spill] sm:$0xff] %v18222_v42 }
 0x89b   :  { %6710 = vmatpush1.bf16.msra.mxu1 %v18204_v59  ;;  %v18229_v59 = vld [vmem:[#allocation9 + $0xc] ss:$24 sps:$4 sm:$0xff]  }
 0x89c   :  { %6711 = vmatprep.subr.bf16.mxu1 %v18207_v47  ;;  %v18227_v47 = vld [vmem:[#allocation9 + $0x8] ss:$24 sps:$4 sm:$0xff]   ;;  %20525 = vst [vmem:[#allocation85_spill] sm:$0xff] %v18229_v59  ;;  %7449 = vmatprep.subr.bf16.mxu0 %v18229_v59 }
 0x89d   :  { %20524 = vst [vmem:[#allocation84_spill] sm:$0xff] %v18227_v47  ;;  %7450 = vmatpush1.bf16.msra.mxu0 %v18227_v47  ;;  %v18254_v59 = vld [vmem:[#allocation9 + $0x68] ss:$24 sps:$4 sm:$0xff]  }
 0x89e   :  { %20529 = vst [vmem:[#allocation91_spill] sm:$0xff] %v18254_v59  ;;  %v18258_v47 = vld [vmem:[#allocation9 + $0x60] ss:$24 sps:$4 sm:$0xff]  }
 0x89f   :  { %6712 = vmatpush1.bf16.msra.mxu1 %v18210_v19  ;;  %v18231_v19 = vld [vmem:[#allocation9] ss:$24 sps:$4 sm:$0xff]  }
 0x8a0   :  { %6713 = vmatprep.subr.bf16.mxu1 %v18213_v18  ;;  %v18235_v18 = vld [vmem:[#allocation9 + $0x3c] ss:$24 sps:$4 sm:$0xff]  }
 0x8a1   :  { %20526 = vst [vmem:[#allocation86_spill] sm:$0xff] %v18235_v18  ;;  %7451 = vmatprep.subr.bf16.mxu0 %v18235_v18  ;;  %v18263_v18 = vld [vmem:[#allocation9 + $0x94] ss:$24 sps:$4 sm:$0xff]  }
 0x8a3   :  { %6714 = vmatpush1.bf16.msra.mxu1 %v18216_v55  ;;  %v18238_v55 = vld [vmem:[#allocation9 + $0x34] ss:$24 sps:$4 sm:$0xff]  }
 0x8a4   :  { %6715 = vmatprep.subr.bf16.mxu1 %v18219_v50  ;;  %v18248_v50 = vld [vmem:[#allocation9 + $0x6c] ss:$24 sps:$4 sm:$0xff]  }
 0x8a5   :  { %20528 = vst [vmem:[#allocation88_spill] sm:$0xff] %v18248_v50 }
 0x8a7   :  { %6716 = vmatpush1.bf16.msra.mxu1 %v18222_v42  ;;  %v18242_v42 = vld [vmem:[#allocation9 + $0x38] ss:$24 sps:$4 sm:$0xff]  }
 0x8a8   :  { %7406 = vmatprep.subr.bf16.mxu1 %v18233_v45  ;;  %20527 = vst [vmem:[#allocation87_spill] sm:$0xff] %v18242_v42  ;;  %7452 = vmatpush1.bf16.msra.mxu0 %v18242_v42  ;;  %v18270_v42 = vld [vmem:[#allocation9 + $0x90] ss:$24 sps:$4 sm:$0xff]  }
 0x8a9   :  { %7453 = vmatprep.subr.bf16.mxu0 %v18248_v50  ;;  %v18276_v50 = vld [vmem:[#allocation9 + $0xc8] ss:$24 sps:$4 sm:$0xff]  }
 0x8aa   :  { %6718 = vmatmul.mubr.bf16.vlgmr.msra.gmra.mrb[108].mxu1 %v18128_v9  ;;  %v18246_v9 = vld [vmem:[#allocation9 + $0x30] ss:$24 sps:$4 sm:$0xff]  }
 0x8ab   :  { %7407 = vmatpush1.bf16.msra.mxu1 %v18231_v19 }
 0x8ac   :  { %7408 = vmatprep.subr.bf16.mxu1 %v18238_v55  ;;  %7454 = vmatpush1.bf16.msra.mxu0 %v18254_v59  ;;  %v18280_v59 = vld [vmem:[#allocation9 + $0xfc] ss:$24 sps:$4 sm:$0xff]  }
 0x8ad   :  { %7455 = vmatprep.subr.bf16.mxu0 %v18260_v38  ;;  %v18284_v38 = vld [vmem:[#allocation9 + $0xf8] ss:$24 sps:$4 sm:$0xff]  }
 0x8af   :  { %7409 = vmatpush1.bf16.msra.mxu1 %v18246_v9 }
 0x8b0   :  { %7410 = vmatprep.subr.bf16.mxu1 %v18251_v52  ;;  %7456 = vmatpush1.bf16.msra.mxu0 %v18266_v5  ;;  %v18292_v5 = vld [vmem:[#allocation9 + $0x128] ss:$24 sps:$4 sm:$0xff]  }
 0x8b1   :  { %7457 = vmatprep.subr.bf16.mxu0 %v18272_v2 }
 0x8b3   :  { %7411 = vmatpush1.bf16.msra.mxu1 %v18258_v47 }
 0x8b4   :  { %7412 = vmatprep.subr.bf16.mxu1 %v18263_v18  ;;  %7458 = vmatpush1.bf16.msra.mxu0 %v18276_v50 }
 0x8b5   :  { %7459 = vmatprep.subr.bf16.mxu0 %v18280_v59 }
 0x8b7   :  { %7413 = vmatpush1.bf16.msra.mxu1 %v18270_v42 }
 0x8b8   :  { %7414 = vmatprep.subr.bf16.mxu1 %v18006_v10  ;;  %7460 = vmatpush1.bf16.msra.mxu0 %v18284_v38  ;;  %v18296_v10 = vld [vmem:[#allocation9 + $0x15c] ss:$24 sps:$4 sm:$0xff]  }
 0x8b9   :  { %7461 = vmatprep.subr.bf16.mxu0 %v18288_v39 }
 0x8bb   :  { %7415 = vmatpush1.bf16.msra.mxu1 %v18004_v36  ;;  %v18300_v36 = vld [vmem:[#allocation9 + $0x158] ss:$24 sps:$4 sm:$0xff]  }
 0x8bc   :  { %7416 = vmatprep.subr.bf16.mxu1 %v18008_v30  ;;  %7462 = vmatpush1.bf16.msra.mxu0 %v18292_v5  ;;  %v18304_v30 = vld [vmem:[#allocation9 + $0x18c] ss:$24 sps:$4 sm:$0xff]  }
 0x8bd   :  { %7463 = vmatprep.subr.bf16.mxu0 %v18296_v10 }
 0x8bf   :  { %7417 = vmatpush1.bf16.msra.mxu1 %v18014_v40  ;;  %v18308_v40 = vld [vmem:[#allocation9 + $0x188] ss:$24 sps:$4 sm:$0xff]  }
 0x8c0   :  { %7418 = vmatprep.subr.bf16.mxu1 %v18017_v35  ;;  %7464 = vmatpush1.bf16.msra.mxu0 %v18300_v36  ;;  %v18312_v35 = vld [vmem:[#allocation9 + $0x1bc] ss:$24 sps:$4 sm:$0xff]  }
 0x8c1   :  { %7465 = vmatprep.subr.bf16.mxu0 %v18304_v30 }
 0x8c3   :  { %7419 = vmatpush1.bf16.msra.mxu1 %v18022_v25  ;;  %v18316_v25 = vld [vmem:[#allocation9 + $0x1b8] ss:$24 sps:$4 sm:$0xff]  }
 0x8c4   :  { %7420 = vmatprep.subr.bf16.mxu1 %v18025_v24  ;;  %7466 = vmatpush1.bf16.msra.mxu0 %v18308_v40  ;;  %v18324_v24 = vld [vmem:[#allocation9 + $0x1ec] ss:$24 sps:$4 sm:$0xff]  }
 0x8c5   :  { %7467 = vmatprep.subr.bf16.mxu0 %v18312_v35 }
 0x8c7   :  { %7421 = vmatpush1.bf16.msra.mxu1 %v18030_v23  ;;  %v18326_v23 = vld [vmem:[#allocation9 + $0x1e8] ss:$24 sps:$4 sm:$0xff]  }
 0x8c8   :  { %7422 = vmatprep.subr.bf16.mxu1 %v18033_v41  ;;  %7468 = vmatpush1.bf16.msra.mxu0 %v18316_v25  ;;  %20532 = vst [vmem:[#allocation92_spill] sm:$0xff] %v18326_v23  ;;  %v18332_v41 = vld [vmem:[#allocation9 + $0x21c] ss:$24 sps:$4 sm:$0xff]  }
 0x8c9   :  { %7469 = vmatprep.subr.bf16.mxu0 %v18324_v24  ;;  %20533 = vst [vmem:[#allocation93_spill] sm:$0xff] %v18332_v41 }
 0x8cb   :  { %7423 = vmatpush1.bf16.msra.mxu1 %v18038_v29  ;;  %v18334_v29 = vld [vmem:[#allocation9 + $0x218] ss:$24 sps:$4 sm:$0xff]  }
 0x8cc   :  { %7424 = vmatprep.subr.bf16.mxu1 %v18041_v33  ;;  %7470 = vmatpush1.bf16.msra.mxu0 %v18326_v23  ;;  %20534 = vst [vmem:[#allocation94_spill] sm:$0xff] %v18334_v29  ;;  %v18338_v33 = vld [vmem:[#allocation9 + $0x24c] ss:$24 sps:$4 sm:$0xff]  }
 0x8cd   :  { %7471 = vmatprep.subr.bf16.mxu0 %v18332_v41  ;;  %20535 = vst [vmem:[#allocation95_spill] sm:$0xff] %v18338_v33 }
 0x8cf   :  { %7425 = vmatpush1.bf16.msra.mxu1 %v18045_v49  ;;  %v18342_v49 = vld [vmem:[#allocation9 + $0x248] ss:$24 sps:$4 sm:$0xff]  }
 0x8d0   :  { %7426 = vmatprep.subr.bf16.mxu1 %v18049_v37  ;;  %7472 = vmatpush1.bf16.msra.mxu0 %v18334_v29  ;;  %20536 = vst [vmem:[#allocation96_spill] sm:$0xff] %v18342_v49  ;;  %v18345_v37 = vld [vmem:[#allocation9 + $0x27c] ss:$24 sps:$4 sm:$0xff]  }
 0x8d1   :  { %7473 = vmatprep.subr.bf16.mxu0 %v18338_v33  ;;  %20537 = vst [vmem:[#allocation97_spill] sm:$0xff] %v18345_v37 }
 0x8d3   :  { %7427 = vmatpush1.bf16.msra.mxu1 %v18051_v44  ;;  %v18350_v44 = vld [vmem:[#allocation9 + $0x278] ss:$24 sps:$4 sm:$0xff]  }
 0x8d4   :  { %7428 = vmatprep.subr.bf16.mxu1 %v18055_v63  ;;  %7474 = vmatpush1.bf16.msra.mxu0 %v18342_v49  ;;  %20538 = vst [vmem:[#allocation98_spill] sm:$0xff] %v18350_v44  ;;  %v18353_v63 = vld [vmem:[#allocation9 + $0x2ac] ss:$24 sps:$4 sm:$0xff]  }
 0x8d5   :  { %7475 = vmatprep.subr.bf16.mxu0 %v18345_v37  ;;  %20539 = vst [vmem:[#allocation99_spill] sm:$0xff] %v18353_v63 }
 0x8d7   :  { %7429 = vmatpush1.bf16.msra.mxu1 %v18057_v61  ;;  %v18358_v61 = vld [vmem:[#allocation9 + $0x2a8] ss:$24 sps:$4 sm:$0xff]  }
 0x8d8   :  { %7430 = vmatprep.subr.bf16.mxu1 %v18060_v16  ;;  %7476 = vmatpush1.bf16.msra.mxu0 %v18350_v44  ;;  %20540 = vst [vmem:[#allocation100_spill] sm:$0xff] %v18358_v61  ;;  %v18361_v16 = vld [vmem:[#allocation9 + $0x2dc] ss:$24 sps:$4 sm:$0xff]  }
 0x8d9   :  { %7477 = vmatprep.subr.bf16.mxu0 %v18353_v63  ;;  %20541 = vst [vmem:[#allocation101_spill] sm:$0xff] %v18361_v16 }
 0x8db   :  { %7431 = vmatpush1.bf16.msra.mxu1 %v18063_v60  ;;  %v18366_v60 = vld [vmem:[#allocation9 + $0x2d8] ss:$24 sps:$4 sm:$0xff]  }
 0x8dc   :  { %7432 = vmatprep.subr.bf16.mxu1 %v18066_v7  ;;  %7478 = vmatpush1.bf16.msra.mxu0 %v18358_v61  ;;  %20542 = vst [vmem:[#allocation102_spill] sm:$0xff] %v18366_v60 }
 0x8dd   :  { %7479 = vmatprep.subr.bf16.mxu0 %v18361_v16 }
 0x8df   :  { %7433 = vmatpush1.bf16.msra.mxu1 %v18069_v27 }
 0x8e0   :  { %7434 = vmatprep.subr.bf16.mxu1 %v18072_v17  ;;  %7480 = vmatpush1.bf16.msra.mxu0 %v18366_v60 }
 0x8e1   :  { %7492 = vmatprep.subr.bf16.mxu0 %v18085_v11 }
 0x8e3   :  { %7435 = vmatpush1.bf16.msra.mxu1 %v18075_v34 }
 0x8e4   :  { %7436 = vmatprep.subr.bf16.mxu1 %v18078_v3 }
 0x8e7   :  { %7437 = vmatpush1.bf16.msra.mxu1 %v18081_v26 }
 0x8e8   :  { %8213 = vmatprep.subr.bf16.mxu1 %v18233_v45 }
 0x93d   :  { %v6633_v7 = vpop.f32.mrb[20].mxu1  ;;  %v6676_v27 = vpop.f32.mrb[68].mxu0 }
 0x93e   :  { %v6635_v17 = vpop.f32.mrb[21].mxu1  ;;  %v6678_v34 = vpop.f32.mrb[69].mxu0  ;;  %v14055_v37 = vadd.f32 %v20495_v8, %v6633_v7  ;;  %v14155_v29 = vadd.f32 %v20497_v32, %v6676_v27 }
 0x93f   :  { %v6637_v63 = vpop.f32.mrb[22].mxu1  ;;  %v6680_v3 = vpop.f32.mrb[70].mxu0  ;;  %v14057_v16 = vadd.f32 %v20496_v54, %v6635_v17  ;;  %v14157_v41 = vadd.f32 %v20498_v20, %v6678_v34 }
 0x940   :  { %v6639_v44 = vpop.f32.mrb[23].mxu1  ;;  %v6682_v61 = vpop.f32.mrb[71].mxu0  ;;  %v14059_v26 = vadd.f32 %v20495_v8, %v6637_v63  ;;  %v13350_v49 = vmul.f32 -1.442695, %v14055_v37  ;;  %v14159_v7 = vadd.f32 %v20497_v32, %v6680_v3  ;;  %v13354_v23 = vmul.f32 -1.442695, %v14155_v29 }
 0x941   :  { %v14061_v45 = vadd.f32 %v20496_v54, %v6639_v44  ;;  %v13351_v60 = vmul.f32 -1.442695, %v14057_v16  ;;  %v14161_v17 = vadd.f32 %v20498_v20, %v6682_v61  ;;  %v13355_v63 = vmul.f32 -1.442695, %v14157_v41 }
 0x942   :  { %v13352_v33 = vmul.f32 -1.442695, %v14059_v26  ;;  %15706 = vpow2.f32 %v13350_v49  ;;  %v13356_v8 = vmul.f32 -1.442695, %v14159_v7 }
 0x943   :  { %v13353_v11 = vmul.f32 -1.442695, %v14061_v45  ;;  %15708 = vpow2.f32 %v13351_v60  ;;  %v13357_v37 = vmul.f32 -1.442695, %v14161_v17 }
 0x944   :  { %15710 = vpow2.f32 %v13352_v33 }
 0x945   :  { %15712 = vpow2.f32 %v13353_v11 }
 0x946   :  { %15714 = vpow2.f32 %v13354_v23 }
 0x947   :  { %15716 = vpow2.f32 %v13355_v63 }
 0x948   :  { %15718 = vpow2.f32 %v13356_v8 }
 0x949   :  { %15720 = vpow2.f32 %v13357_v37 }
 0x94c   :  { %v15707_v44 = vpop.eup %15706 }
 0x94d   :  { %v15709_v16 = vpop.eup %15708  ;;  %v6744_v33 = vadd.f32 1.0, %v15707_v44 }
 0x94e   :  { %v15711_v26 = vpop.eup %15710  ;;  %v6745_v60 = vadd.f32 1.0, %v15709_v16 }
 0x94f   :  { %v15713_v49 = vpop.eup %15712  ;;  %v6746_v27 = vadd.f32 1.0, %v15711_v26  ;;  %15722 = vrcp.f32 %v6744_v33 }
 0x950   :  { %v6747_v34 = vadd.f32 1.0, %v15713_v49  ;;  %15724 = vrcp.f32 %v6745_v60  ;;  %v15715_v29 = vpop.eup %15714  ;;  %v20543_v49 = vld [vmem:[#allocation36_spill] sm:$0xff] }
 0x951   :  { %15726 = vrcp.f32 %v6746_v27  ;;  %v15717_v41 = vpop.eup %15716  ;;  %v6772_v45 = vadd.f32 1.0, %v15715_v29  ;;  %v1726_v33 = vadd.f32 %v20543_v49, %v17101_v13 }
 0x952   :  { %15728 = vrcp.f32 %v6747_v34  ;;  %v15719_v61 = vpop.eup %15718  ;;  %v6773_v11 = vadd.f32 1.0, %v15717_v41  ;;  %v20544_v41 = vld [vmem:[#allocation37_spill] sm:$0xff] }
 0x953   :  { %v15721_v3 = vpop.eup %15720  ;;  %v6774_v7 = vadd.f32 1.0, %v15719_v61  ;;  %15730 = vrcp.f32 %v6772_v45  ;;  %v1728_v61 = vadd.f32 %v20544_v41, %v17106_v57  ;;  %v20546_v45 = vld [vmem:[#allocation39_spill] sm:$0xff] }
 0x954   :  { %v6775_v44 = vadd.f32 1.0, %v15721_v3  ;;  %15732 = vrcp.f32 %v6773_v11 }
 0x955   :  { %15734 = vrcp.f32 %v6774_v7 }
 0x956   :  { %15736 = vrcp.f32 %v6775_v44 }
 0x959   :  { %v15723_v8 = vpop.eup %15722 }
 0x95a   :  { %v15725_v26 = vpop.eup %15724 }
 0x95b   :  { %v15727_v29 = vpop.eup %15726 }
 0x95c   :  { %v15729_v20 = vpop.eup %15728 }
 0x97d   :  { %v6719_v23 = vpop.f32.mrb[108].mxu1 }
 0x97e   :  { %v6720_v17 = vadd.f32 %v6719_v23, %v20499_v4  ;;  %v6721_v63 = vpop.f32.mrb[109].mxu1 }
 0x97f   :  { %v6722_v37 = vadd.f32 %v6721_v63, %v20360_v48  ;;  %v6723_v16 = vpop.f32.mrb[110].mxu1  ;;  %v20545_v63 = vld [vmem:[#allocation38_spill] sm:$0xff] }
 0x980   :  { %v6784_v60 = vmul.f32 %v15723_v8, %v6720_v17  ;;  %v6724_v27 = vadd.f32 %v6723_v16, %v20499_v4  ;;  %v6725_v34 = vpop.f32.mrb[111].mxu1  ;;  %v1730_v32 = vadd.f32 %v20545_v63, %v17101_v13  ;;  %v1732_v17 = vadd.f32 %v20546_v45, %v17106_v57 }
 0x981   :  { %v6785_v23 = vmul.f32 %v15725_v26, %v6722_v37  ;;  %v6726_v3 = vadd.f32 %v6725_v34, %v20360_v48  ;;  %v15731_v37 = vpop.eup %15730 }
 0x982   :  { %v6788_v54 = vadd.f32 %v6784_v60, %v1726_v33  ;;  %v6786_v49 = vmul.f32 %v15727_v29, %v6724_v27  ;;  %v15733_v26 = vpop.eup %15732  ;;  %v6796_v63 = vsub.f32 1.0, %v15731_v37  ;;  %v6804_v44 = vmul.f32 %v15731_v37, %v18111_v6  ;;  %v20571_v37 = vld [vmem:[#allocation88_spill] sm:$0xff] }
 0x983   :  { %v6789_v8 = vadd.f32 %v6785_v23, %v1728_v61  ;;  %v6787_v16 = vmul.f32 %v15729_v20, %v6726_v3  ;;  %v15735_v34 = vpop.eup %15734  ;;  %v6797_v33 = vsub.f32 1.0, %v15733_v26 }
 0x984   :  { %15738 = vtanh.f32 %v6788_v54  ;;  %v6790_v4 = vadd.f32 %v6786_v49, %v1730_v32  ;;  %v15737_v41 = vpop.eup %15736  ;;  %v6798_v27 = vsub.f32 1.0, %v15735_v34  ;;  %v6805_v32 = vmul.f32 %v15733_v26, %v18114_v22  ;;  %v20572_v26 = vld [vmem:[#allocation91_spill] sm:$0xff] }
 0x985   :  { %15740 = vtanh.f32 %v6789_v8  ;;  %v6791_v11 = vadd.f32 %v6787_v16, %v1732_v17  ;;  %v6799_v20 = vsub.f32 1.0, %v15737_v41  ;;  %v6806_v3 = vmul.f32 %v15735_v34, %v18116_v14  ;;  %v20549_v14 = vld [vmem:[#allocation27_spill] sm:$0xff]  ;;  %v20573_v34 = vld [vmem:[#allocation89_spill] sm:$0xff] }
 0x986   :  { %15742 = vtanh.f32 %v6790_v4  ;;  %v6807_v17 = vmul.f32 %v15737_v41, %v18118_v1  ;;  %v20551_v1 = vld [vmem:[#allocation29_spill] sm:$0xff]  ;;  %v20574_v41 = vld [vmem:[#allocation90_spill] sm:$0xff] }
 0x987   :  { %15744 = vtanh.f32 %v6791_v11 }
 0x98e   :  { %v15739_v7 = vpop.eup %15738 }
 0x98f   :  { %v15741_v60 = vpop.eup %15740  ;;  %v6800_v29 = vmul.f32 %v15739_v7, %v6796_v63  ;;  %v20581_v63 = vld [vmem:[#allocation98_spill] sm:$0xff]  ;;  %v20582_v7 = vld [vmem:[#allocation99_spill] sm:$0xff] }
 0x990   :  { %v15743_v61 = vpop.eup %15742  ;;  %v6801_v54 = vmul.f32 %v15741_v60, %v6797_v33  ;;  %v18506_v33 = vld [vmem:[#allocation9 + $0x150] ss:$24 sps:$4 sm:$0xff]   ;;  %v18509_v60 = vld [vmem:[#allocation9 + $0x184] ss:$24 sps:$4 sm:$0xff]  }
 0x991   :  { %v15745_v23 = vpop.eup %15744  ;;  %v6802_v4 = vmul.f32 %v15743_v61, %v6798_v27  ;;  %v18396_v49 = vadd.f32 %v6804_v44, %v6800_v29  ;;  %v20583_v27 = vld [vmem:[#allocation100_spill] sm:$0xff]  ;;  %v20584_v29 = vld [vmem:[#allocation101_spill] sm:$0xff] }
 0x992   :  { %v6803_v45 = vmul.f32 %v15745_v23, %v6799_v20  ;;  %v18399_v8 = vadd.f32 %v6805_v32, %v6801_v54  ;;  %v18514_v44 = vld [vmem:[#allocation9 + $0x180] ss:$24 sps:$4 sm:$0xff]   ;;  %v18517_v61 = vld [vmem:[#allocation9 + $0x1b4] ss:$24 sps:$4 sm:$0xff]   ;;  %v18521_v54 = vld [vmem:[#allocation9 + $0x1b0] ss:$24 sps:$4 sm:$0xff]  }
 0x993   :  { %v18401_v16 = vadd.f32 %v6806_v3, %v6802_v4  ;;  %v20585_v20 = vld [vmem:[#allocation102_spill] sm:$0xff]  ;;  %v18525_v32 = vld [vmem:[#allocation9 + $0x1e4] ss:$24 sps:$4 sm:$0xff]   ;;  %v18527_v23 = vld [vmem:[#allocation9 + $0x1e0] ss:$24 sps:$4 sm:$0xff]  }
 0x994   :  { %v18403_v11 = vadd.f32 %v6807_v17, %v6803_v45  ;;  %v18531_v4 = vld [vmem:[#allocation9 + $0x214] ss:$24 sps:$4 sm:$0xff]   ;;  %v18533_v3 = vld [vmem:[#allocation9 + $0x210] ss:$24 sps:$4 sm:$0xff]   ;;  %v18536_v45 = vld [vmem:[#allocation9 + $0x244] ss:$24 sps:$4 sm:$0xff]  }
 0x995   :  { %v18411_v22 = vpack.c.bf16 %v18401_v16, %v18396_v49  ;;  %v18539_v17 = vld [vmem:[#allocation9 + $0x240] ss:$24 sps:$4 sm:$0xff]  }
 0x996   :  { %v18407_v6 = vpack.c.bf16 %v18403_v11, %v18399_v8 }
 0x997   :  { %20548 = vst [vmem:[#allocation104_spill] sm:$0xff] %v18411_v22 }
 0x998   :  { %20547 = vst [vmem:[#allocation103_spill] sm:$0xff] %v18407_v6  ;;  %7438 = vmatprep.mubr.bf16.mxu1 %v18407_v6  ;;  %7481 = vmatprep.mubr.bf16.mxu0 %v18407_v6 }
 0x999   :  { %7439 = vmatmul.mubr.bf16.vlgmr.msra.gmra.mrb[24].mxu1 %v18411_v22  ;;  %7482 = vmatmul.mubr.bf16.vlgmr.msra.gmra.mrb[72].mxu0 %v18411_v22 }
 0x99a   :  { %7493 = vmatpush1.bf16.msra.mxu0 %v18124_v28  ;;  %7524 = vmatprep.mubr.bf16.mxu0 %v18407_v6  ;;  %v20552_v28 = vld [vmem:[#allocation30_spill] sm:$0xff]  ;;  %v18683_v6 = vld [vmem:[#allocation9 + $0x284] ss:$24 sps:$4 sm:$0xff]  }
 0x99b   :  { %7494 = vmatprep.subr.bf16.mxu0 %v18130_v53  ;;  %8214 = vmatpush1.bf16.msra.mxu1 %v18231_v19  ;;  %v20555_v53 = vld [vmem:[#allocation72_spill] sm:$0xff]  ;;  %20609 = vst [vmem:[#allocation30_spill] sm:$0xff] %v18683_v6 }
 0x99c   :  { %8215 = vmatprep.subr.bf16.mxu1 %v18238_v55  ;;  %v20568_v19 = vld [vmem:[#allocation84_spill] sm:$0xff]  ;;  %v20570_v55 = vld [vmem:[#allocation87_spill] sm:$0xff] }
 0x99e   :  { %7495 = vmatpush1.bf16.msra.mxu0 %v18138_v51  ;;  %v20556_v51 = vld [vmem:[#allocation73_spill] sm:$0xff] }
 0x99f   :  { %7496 = vmatprep.subr.bf16.mxu0 %v18141_v0  ;;  %8216 = vmatpush1.bf16.msra.mxu1 %v18246_v9  ;;  %v20553_v9 = vld [vmem:[#allocation31_spill] sm:$0xff]  ;;  %v20557_v0 = vld [vmem:[#allocation74_spill] sm:$0xff] }
 0x9a0   :  { %8217 = vmatprep.subr.bf16.mxu1 %v18251_v52  ;;  %v20567_v52 = vld [vmem:[#allocation85_spill] sm:$0xff] }
 0x9a2   :  { %7497 = vmatpush1.bf16.msra.mxu0 %v18144_v43  ;;  %v20558_v43 = vld [vmem:[#allocation75_spill] sm:$0xff] }
 0x9a3   :  { %7498 = vmatprep.subr.bf16.mxu0 %v18147_v46  ;;  %8218 = vmatpush1.bf16.msra.mxu1 %v18258_v47  ;;  %v20550_v47 = vld [vmem:[#allocation28_spill] sm:$0xff] }
 0x9a4   :  { %8219 = vmatprep.subr.bf16.mxu1 %v18263_v18  ;;  %v20559_v46 = vld [vmem:[#allocation76_spill] sm:$0xff]  ;;  %v20569_v18 = vld [vmem:[#allocation86_spill] sm:$0xff] }
 0x9a6   :  { %7499 = vmatpush1.bf16.msra.mxu0 %v18150_v62  ;;  %v20560_v62 = vld [vmem:[#allocation77_spill] sm:$0xff] }
 0x9a7   :  { %7500 = vmatprep.subr.bf16.mxu0 %v18153_v15  ;;  %8220 = vmatpush1.bf16.msra.mxu1 %v18270_v42  ;;  %v20554_v42 = vld [vmem:[#allocation23_spill] sm:$0xff]  ;;  %v20561_v15 = vld [vmem:[#allocation78_spill] sm:$0xff] }
 0x9aa   :  { %7501 = vmatpush1.bf16.msra.mxu0 %v18156_v21  ;;  %v20562_v21 = vld [vmem:[#allocation79_spill] sm:$0xff] }
 0x9ab   :  { %7502 = vmatprep.subr.bf16.mxu0 %v18159_v58  ;;  %v20563_v58 = vld [vmem:[#allocation80_spill] sm:$0xff] }
 0x9ae   :  { %7503 = vmatpush1.bf16.msra.mxu0 %v18162_v56  ;;  %v20564_v56 = vld [vmem:[#allocation81_spill] sm:$0xff] }
 0x9af   :  { %7504 = vmatprep.subr.bf16.mxu0 %v18165_v12  ;;  %v20565_v12 = vld [vmem:[#allocation82_spill] sm:$0xff] }
 0x9b2   :  { %7505 = vmatpush1.bf16.msra.mxu0 %v18168_v31  ;;  %v20566_v31 = vld [vmem:[#allocation83_spill] sm:$0xff] }
 0x9b3   :  { %7506 = vmatprep.subr.bf16.mxu0 %v20549_v14  ;;  %v18542_v14 = vld [vmem:[#allocation9 + $0x274] ss:$24 sps:$4 sm:$0xff]  }
 0x9b6   :  { %7507 = vmatpush1.bf16.msra.mxu0 %v20550_v47  ;;  %v18545_v47 = vld [vmem:[#allocation9 + $0x270] ss:$24 sps:$4 sm:$0xff]  }
 0x9b7   :  { %7508 = vmatprep.subr.bf16.mxu0 %v20551_v1  ;;  %v18548_v1 = vld [vmem:[#allocation9 + $0x2a4] ss:$24 sps:$4 sm:$0xff]  }
 0x9ba   :  { %7509 = vmatpush1.bf16.msra.mxu0 %v20552_v28  ;;  %v18551_v28 = vld [vmem:[#allocation9 + $0x2a0] ss:$24 sps:$4 sm:$0xff]  }
 0x9bb   :  { %7510 = vmatprep.subr.bf16.mxu0 %v20553_v9  ;;  %v18554_v9 = vld [vmem:[#allocation9 + $0x2d4] ss:$24 sps:$4 sm:$0xff]  }
 0x9be   :  { %7511 = vmatpush1.bf16.msra.mxu0 %v20554_v42  ;;  %v18557_v42 = vld [vmem:[#allocation9 + $0x2d0] ss:$24 sps:$4 sm:$0xff]  }
 0x9bf   :  { %7512 = vmatprep.subr.bf16.mxu0 %v20555_v53  ;;  %v18561_v53 = vld [vmem:[#allocation9 + $0x14] ss:$24 sps:$4 sm:$0xff]  }
 0x9c2   :  { %7513 = vmatpush1.bf16.msra.mxu0 %v20556_v51 }
 0x9c3   :  { %7514 = vmatprep.subr.bf16.mxu0 %v20557_v0 }
 0x9c6   :  { %7515 = vmatpush1.bf16.msra.mxu0 %v20558_v43 }
 0x9c7   :  { %7516 = vmatprep.subr.bf16.mxu0 %v20559_v46 }
 0x9ca   :  { %7517 = vmatpush1.bf16.msra.mxu0 %v20560_v62 }
 0x9cb   :  { %7518 = vmatprep.subr.bf16.mxu0 %v20561_v15 }
 0x9ce   :  { %7519 = vmatpush1.bf16.msra.mxu0 %v20562_v21 }
 0x9cf   :  { %7520 = vmatprep.subr.bf16.mxu0 %v20563_v58 }
 0x9d2   :  { %7521 = vmatpush1.bf16.msra.mxu0 %v20564_v56  ;;  %v20586_v56 = vld [vmem:[#allocation66_spill] sm:$0xff] }
 0x9d3   :  { %7522 = vmatprep.subr.bf16.mxu0 %v20565_v12 }
 0x9d6   :  { %7523 = vmatpush1.bf16.msra.mxu0 %v20566_v31  ;;  %v20587_v31 = vld [vmem:[#allocation67_spill] sm:$0xff] }
 0x9d7   :  { %8256 = vmatprep.subr.bf16.mxu0 %v20567_v52 }
 0x9d9   :  { %7525 = vmatmul.mubr.bf16.vlgmr.msra.gmra.mrb[108].mxu0 %v18411_v22  ;;  %v18680_v22 = vld [vmem:[#allocation9 + $0x250] ss:$24 sps:$4 sm:$0xff]  }
 0x9da   :  { %8257 = vmatpush1.bf16.msra.mxu0 %v20568_v19  ;;  %20608 = vst [vmem:[#allocation29_spill] sm:$0xff] %v18680_v22 }
 0x9db   :  { %8258 = vmatprep.subr.bf16.mxu0 %v20569_v18 }
 0x9de   :  { %8259 = vmatpush1.bf16.msra.mxu0 %v20570_v55 }
 0x9df   :  { %8260 = vmatprep.subr.bf16.mxu0 %v20571_v37 }
 0x9e2   :  { %8261 = vmatpush1.bf16.msra.mxu0 %v20572_v26 }
 0x9e3   :  { %8262 = vmatprep.subr.bf16.mxu0 %v20573_v34 }
 0x9e6   :  { %8263 = vmatpush1.bf16.msra.mxu0 %v20574_v41  ;;  %v20588_v41 = vld [vmem:[#allocation109_spill] sm:$0xff] }
 0x9e7   :  { %8264 = vmatprep.subr.bf16.mxu0 %v18272_v2  ;;  %v20576_v2 = vld [vmem:[#allocation93_spill] sm:$0xff] }
 0x9ea   :  { %8265 = vmatpush1.bf16.msra.mxu0 %v18276_v50  ;;  %v20577_v50 = vld [vmem:[#allocation94_spill] sm:$0xff] }
 0x9eb   :  { %8266 = vmatprep.subr.bf16.mxu0 %v18280_v59  ;;  %v20575_v59 = vld [vmem:[#allocation92_spill] sm:$0xff] }
 0x9ee   :  { %8267 = vmatpush1.bf16.msra.mxu0 %v18284_v38  ;;  %v18484_v38 = vld [vmem:[#allocation9 + $0xf4] ss:$24 sps:$4 sm:$0xff]  }
 0x9ef   :  { %8268 = vmatprep.subr.bf16.mxu0 %v18288_v39  ;;  %v18480_v39 = vld [vmem:[#allocation9 + $0xc0] ss:$24 sps:$4 sm:$0xff]  }
 0x9f2   :  { %8269 = vmatpush1.bf16.msra.mxu0 %v18292_v5  ;;  %v18482_v5 = vld [vmem:[#allocation9 + $0xc4] ss:$24 sps:$4 sm:$0xff]  }
 0x9f3   :  { %8270 = vmatprep.subr.bf16.mxu0 %v18296_v10  ;;  %8221 = vmatprep.subr.bf16.mxu1 %v18482_v5  ;;  %v20578_v10 = vld [vmem:[#allocation95_spill] sm:$0xff] }
 0x9f4   :  { %8222 = vmatpush1.bf16.msra.mxu1 %v18480_v39 }
 0x9f5   :  { %8223 = vmatprep.subr.bf16.mxu1 %v18484_v38 }
 0x9f6   :  { %8271 = vmatpush1.bf16.msra.mxu0 %v18300_v36  ;;  %v18490_v36 = vld [vmem:[#allocation9 + $0xf0] ss:$24 sps:$4 sm:$0xff]  }
 0x9f7   :  { %8272 = vmatprep.subr.bf16.mxu0 %v18304_v30  ;;  %v18493_v30 = vld [vmem:[#allocation9 + $0x124] ss:$24 sps:$4 sm:$0xff]  }
 0x9f8   :  { %8224 = vmatpush1.bf16.msra.mxu1 %v18490_v36 }
 0x9f9   :  { %8225 = vmatprep.subr.bf16.mxu1 %v18493_v30 }
 0x9fa   :  { %8273 = vmatpush1.bf16.msra.mxu0 %v18308_v40  ;;  %v20579_v40 = vld [vmem:[#allocation96_spill] sm:$0xff] }
 0x9fb   :  { %8274 = vmatprep.subr.bf16.mxu0 %v18312_v35  ;;  %v20580_v35 = vld [vmem:[#allocation97_spill] sm:$0xff] }
 0x9fe   :  { %8275 = vmatpush1.bf16.msra.mxu0 %v18316_v25  ;;  %v18498_v25 = vld [vmem:[#allocation9 + $0x120] ss:$24 sps:$4 sm:$0xff]  }
 0x9ff   :  { %8276 = vmatprep.subr.bf16.mxu0 %v18324_v24  ;;  %v18501_v24 = vld [vmem:[#allocation9 + $0x154] ss:$24 sps:$4 sm:$0xff]   ;;  %8226 = vmatpush1.bf16.msra.mxu1 %v18498_v25 }
 0xa00   :  { %8227 = vmatprep.subr.bf16.mxu1 %v18501_v24 }
 0xa02   :  { %8277 = vmatpush1.bf16.msra.mxu0 %v20575_v59 }
 0xa03   :  { %8278 = vmatprep.subr.bf16.mxu0 %v20576_v2  ;;  %8228 = vmatpush1.bf16.msra.mxu1 %v18506_v33  ;;  %v20589_v2 = vld [vmem:[#allocation110_spill] sm:$0xff] }
 0xa04   :  { %8229 = vmatprep.subr.bf16.mxu1 %v18509_v60 }
 0xa06   :  { %8279 = vmatpush1.bf16.msra.mxu0 %v20577_v50 }
 0xa07   :  { %8280 = vmatprep.subr.bf16.mxu0 %v20578_v10  ;;  %8230 = vmatpush1.bf16.msra.mxu1 %v18514_v44 }
 0xa08   :  { %8231 = vmatprep.subr.bf16.mxu1 %v18517_v61 }
 0xa0a   :  { %8281 = vmatpush1.bf16.msra.mxu0 %v20579_v40 }
 0xa0b   :  { %8282 = vmatprep.subr.bf16.mxu0 %v20580_v35  ;;  %8232 = vmatpush1.bf16.msra.mxu1 %v18521_v54 }
 0xa0c   :  { %8233 = vmatprep.subr.bf16.mxu1 %v18525_v32 }
 0xa0e   :  { %8283 = vmatpush1.bf16.msra.mxu0 %v20581_v63 }
 0xa0f   :  { %8284 = vmatprep.subr.bf16.mxu0 %v20582_v7  ;;  %8234 = vmatpush1.bf16.msra.mxu1 %v18527_v23 }
 0xa10   :  { %8235 = vmatprep.subr.bf16.mxu1 %v18531_v4 }
 0xa12   :  { %8285 = vmatpush1.bf16.msra.mxu0 %v20583_v27 }
 0xa13   :  { %8286 = vmatprep.subr.bf16.mxu0 %v20584_v29  ;;  %8236 = vmatpush1.bf16.msra.mxu1 %v18533_v3 }
 0xa14   :  { %8237 = vmatprep.subr.bf16.mxu1 %v18536_v45 }
 0xa16   :  { %8287 = vmatpush1.bf16.msra.mxu0 %v20585_v20 }
 0xa17   :  { %8238 = vmatpush1.bf16.msra.mxu1 %v18539_v17 }
 0xa18   :  { %8239 = vmatprep.subr.bf16.mxu1 %v18542_v14 }
 0xa1b   :  { %8240 = vmatpush1.bf16.msra.mxu1 %v18545_v47 }
 0xa1c   :  { %8241 = vmatprep.subr.bf16.mxu1 %v18548_v1 }
 0xa1f   :  { %8242 = vmatpush1.bf16.msra.mxu1 %v18551_v28 }
 0xa20   :  { %8243 = vmatprep.subr.bf16.mxu1 %v18554_v9 }
 0xa23   :  { %8244 = vmatpush1.bf16.msra.mxu1 %v18557_v42 }
 0xa24   :  { %8299 = vmatprep.subr.bf16.mxu1 %v18561_v53 }
 0xa6c   :  { %v7440_v51 = vpop.f32.mrb[24].mxu1  ;;  %v7483_v0 = vpop.f32.mrb[72].mxu0 }
 0xa6d   :  { %v7442_v43 = vpop.f32.mrb[25].mxu1  ;;  %v7485_v46 = vpop.f32.mrb[73].mxu0  ;;  %v14063_v12 = vadd.f32 %v20586_v56, %v7440_v51  ;;  %v14163_v59 = vadd.f32 %v20588_v41, %v7483_v0 }
 0xa6e   :  { %v7444_v62 = vpop.f32.mrb[26].mxu1  ;;  %v7487_v15 = vpop.f32.mrb[74].mxu0  ;;  %v14065_v52 = vadd.f32 %v20587_v31, %v7442_v43  ;;  %v14165_v50 = vadd.f32 %v20589_v2, %v7485_v46 }
 0xa6f   :  { %v7446_v21 = vpop.f32.mrb[27].mxu1  ;;  %v7489_v58 = vpop.f32.mrb[75].mxu0  ;;  %v14067_v19 = vadd.f32 %v20586_v56, %v7444_v62  ;;  %v13454_v55 = vmul.f32 -1.442695, %v14063_v12  ;;  %v14167_v10 = vadd.f32 %v20588_v41, %v7487_v15  ;;  %v13458_v35 = vmul.f32 -1.442695, %v14163_v59 }
 0xa70   :  { %v14069_v18 = vadd.f32 %v20587_v31, %v7446_v21  ;;  %v13455_v37 = vmul.f32 -1.442695, %v14065_v52  ;;  %v14169_v40 = vadd.f32 %v20589_v2, %v7489_v58  ;;  %v13459_v63 = vmul.f32 -1.442695, %v14165_v50 }
 0xa71   :  { %v13456_v26 = vmul.f32 -1.442695, %v14067_v19  ;;  %15746 = vpow2.f32 %v13454_v55  ;;  %v13460_v7 = vmul.f32 -1.442695, %v14167_v10 }
 0xa72   :  { %v13457_v34 = vmul.f32 -1.442695, %v14069_v18  ;;  %15748 = vpow2.f32 %v13455_v37  ;;  %v13461_v29 = vmul.f32 -1.442695, %v14169_v40 }
 0xa73   :  { %15750 = vpow2.f32 %v13456_v26  ;;  %v20590_v26 = vld [vmem:[#allocation68_spill] sm:$0xff] }
 0xa74   :  { %15752 = vpow2.f32 %v13457_v34 }
 0xa75   :  { %15754 = vpow2.f32 %v13458_v35 }
 0xa76   :  { %15756 = vpow2.f32 %v13459_v63 }
 0xa77   :  { %15758 = vpow2.f32 %v13460_v7  ;;  %v20591_v7 = vld [vmem:[#allocation40_spill] sm:$0xff] }
 0xa78   :  { %15760 = vpow2.f32 %v13461_v29 }
 0xa7b   :  { %v15747_v27 = vpop.eup %15746 }
 0xa7c   :  { %v15749_v20 = vpop.eup %15748  ;;  %v7551_v62 = vadd.f32 1.0, %v15747_v27  ;;  %v1736_v27 = vadd.f32 %v20591_v7, %v17101_v13 }
 0xa7d   :  { %v15751_v51 = vpop.eup %15750  ;;  %v7552_v0 = vadd.f32 1.0, %v15749_v20 }
 0xa7e   :  { %v15753_v43 = vpop.eup %15752  ;;  %v7553_v21 = vadd.f32 1.0, %v15751_v51  ;;  %15762 = vrcp.f32 %v7551_v62  ;;  %v20592_v62 = vld [vmem:[#allocation41_spill] sm:$0xff] }
 0xa7f   :  { %v7554_v46 = vadd.f32 1.0, %v15753_v43  ;;  %15764 = vrcp.f32 %v7552_v0  ;;  %v15755_v15 = vpop.eup %15754  ;;  %v1738_v0 = vadd.f32 %v20592_v62, %v17106_v57 }
 0xa80   :  { %15766 = vrcp.f32 %v7553_v21  ;;  %v15757_v58 = vpop.eup %15756  ;;  %v7579_v19 = vadd.f32 1.0, %v15755_v15 }
 0xa81   :  { %15768 = vrcp.f32 %v7554_v46  ;;  %v15759_v12 = vpop.eup %15758  ;;  %v7580_v18 = vadd.f32 1.0, %v15757_v58  ;;  %v20593_v58 = vld [vmem:[#allocation42_spill] sm:$0xff] }
 0xa82   :  { %v15761_v52 = vpop.eup %15760  ;;  %v7581_v37 = vadd.f32 1.0, %v15759_v12  ;;  %15770 = vrcp.f32 %v7579_v19  ;;  %v1740_v12 = vadd.f32 %v20593_v58, %v17101_v13  ;;  %v20594_v19 = vld [vmem:[#allocation43_spill] sm:$0xff] }
 0xa83   :  { %v7582_v10 = vadd.f32 1.0, %v15761_v52  ;;  %15772 = vrcp.f32 %v7580_v18 }
 0xa84   :  { %15774 = vrcp.f32 %v7581_v37 }
 0xa85   :  { %15776 = vrcp.f32 %v7582_v10 }
 0xa88   :  { %v15763_v50 = vpop.eup %15762 }
 0xa89   :  { %v15765_v63 = vpop.eup %15764 }
 0xa8a   :  { %v15767_v43 = vpop.eup %15766 }
 0xa8b   :  { %v15769_v15 = vpop.eup %15768 }
 0xaac   :  { %v7526_v55 = vpop.f32.mrb[108].mxu0 }
 0xaad   :  { %v7527_v34 = vadd.f32 %v7526_v55, %v20590_v26  ;;  %v7528_v59 = vpop.f32.mrb[109].mxu0 }
 0xaae   :  { %v7529_v40 = vadd.f32 %v7528_v59, %v20360_v48  ;;  %v7530_v35 = vpop.f32.mrb[110].mxu0 }
 0xaaf   :  { %v7591_v29 = vmul.f32 %v15763_v50, %v7527_v34  ;;  %v7531_v20 = vadd.f32 %v7530_v35, %v20590_v26  ;;  %v7532_v51 = vpop.f32.mrb[111].mxu0  ;;  %v1742_v34 = vadd.f32 %v20594_v19, %v17106_v57 }
 0xab0   :  { %v7592_v21 = vmul.f32 %v15765_v63, %v7529_v40  ;;  %v7533_v46 = vadd.f32 %v7532_v51, %v20360_v48  ;;  %v15771_v40 = vpop.eup %15770 }
 0xab1   :  { %v7595_v52 = vadd.f32 %v7591_v29, %v1736_v27  ;;  %v7593_v55 = vmul.f32 %v15767_v43, %v7531_v20  ;;  %v15773_v63 = vpop.eup %15772  ;;  %v7603_v62 = vsub.f32 1.0, %v15771_v40  ;;  %v7611_v10 = vmul.f32 %v15771_v40, %v18396_v49  ;;  %v18617_v40 = vld [vmem:[#allocation9 + $0x74] ss:$24 sps:$4 sm:$0xff]  }
 0xab2   :  { %v7596_v59 = vadd.f32 %v7592_v21, %v1738_v0  ;;  %v7594_v50 = vmul.f32 %v15769_v15, %v7533_v46  ;;  %v15775_v7 = vpop.eup %15774  ;;  %v7604_v27 = vsub.f32 1.0, %v15773_v63  ;;  %v7612_v15 = vmul.f32 %v15773_v63, %v18399_v8  ;;  %v18600_v8 = vld [vmem:[#allocation9 + $0x10] ss:$24 sps:$4 sm:$0xff]  }
 0xab3   :  { %15778 = vtanh.f32 %v7595_v52  ;;  %v7597_v35 = vadd.f32 %v7593_v55, %v1740_v12  ;;  %v15777_v51 = vpop.eup %15776  ;;  %v7605_v20 = vsub.f32 1.0, %v15775_v7  ;;  %v7613_v52 = vmul.f32 %v15775_v7, %v18401_v16  ;;  %v18620_v63 = vld [vmem:[#allocation9 + $0x70] ss:$24 sps:$4 sm:$0xff]   ;;  %v18623_v7 = vld [vmem:[#allocation9 + $0xa4] ss:$24 sps:$4 sm:$0xff]  }
 0xab4   :  { %15780 = vtanh.f32 %v7596_v59  ;;  %v7598_v18 = vadd.f32 %v7594_v50, %v1742_v34  ;;  %v7606_v21 = vsub.f32 1.0, %v15777_v51  ;;  %v7614_v34 = vmul.f32 %v15777_v51, %v18403_v11  ;;  %v18614_v11 = vld [vmem:[#allocation9 + $0x40] ss:$24 sps:$4 sm:$0xff]  }
 0xab5   :  { %15782 = vtanh.f32 %v7597_v35  ;;  %v18626_v51 = vld [vmem:[#allocation9 + $0xa0] ss:$24 sps:$4 sm:$0xff]  }
 0xab6   :  { %15784 = vtanh.f32 %v7598_v18  ;;  %v18606_v18 = vld [vmem:[#allocation9 + $0x44] ss:$24 sps:$4 sm:$0xff]  }
 0xabd   :  { %v15779_v37 = vpop.eup %15778 }
 0xabe   :  { %v15781_v29 = vpop.eup %15780  ;;  %v7607_v43 = vmul.f32 %v15779_v37, %v7603_v62  ;;  %v18629_v62 = vld [vmem:[#allocation9 + $0xd4] ss:$24 sps:$4 sm:$0xff]   ;;  %v18632_v37 = vld [vmem:[#allocation9 + $0xd0] ss:$24 sps:$4 sm:$0xff]  }
 0xabf   :  { %v15783_v0 = vpop.eup %15782  ;;  %v7608_v46 = vmul.f32 %v15781_v29, %v7604_v27  ;;  %v18635_v27 = vld [vmem:[#allocation9 + $0x104] ss:$24 sps:$4 sm:$0xff]   ;;  %v18638_v29 = vld [vmem:[#allocation9 + $0x100] ss:$24 sps:$4 sm:$0xff]  }
 0xac0   :  { %v15785_v58 = vpop.eup %15784  ;;  %v7609_v12 = vmul.f32 %v15783_v0, %v7605_v20  ;;  %v18587_v55 = vadd.f32 %v7611_v10, %v7607_v43  ;;  %v18641_v20 = vld [vmem:[#allocation9 + $0x134] ss:$24 sps:$4 sm:$0xff]   ;;  %v18644_v43 = vld [vmem:[#allocation9 + $0x130] ss:$24 sps:$4 sm:$0xff]   ;;  %v18647_v10 = vld [vmem:[#allocation9 + $0x164] ss:$24 sps:$4 sm:$0xff]  }
 0xac1   :  { %v7610_v19 = vmul.f32 %v15785_v58, %v7606_v21  ;;  %v18590_v59 = vadd.f32 %v7612_v15, %v7608_v46  ;;  %20597 = vst [vmem:[#allocation107_spill] sm:$0xff] %v18647_v10  ;;  %v18650_v0 = vld [vmem:[#allocation9 + $0x160] ss:$24 sps:$4 sm:$0xff]   ;;  %v18653_v21 = vld [vmem:[#allocation9 + $0x194] ss:$24 sps:$4 sm:$0xff]  }
 0xac2   :  { %v18592_v50 = vadd.f32 %v7613_v52, %v7609_v12  ;;  %20598 = vst [vmem:[#allocation32_spill] sm:$0xff] %v18650_v0  ;;  %20599 = vst [vmem:[#allocation33_spill] sm:$0xff] %v18653_v21  ;;  %v18656_v46 = vld [vmem:[#allocation9 + $0x190] ss:$24 sps:$4 sm:$0xff]   ;;  %v18659_v15 = vld [vmem:[#allocation9 + $0x1c4] ss:$24 sps:$4 sm:$0xff]  }
 0xac3   :  { %v18594_v35 = vadd.f32 %v7614_v34, %v7610_v19  ;;  %20600 = vst [vmem:[#allocation34_spill] sm:$0xff] %v18656_v46  ;;  %20601 = vst [vmem:[#allocation35_spill] sm:$0xff] %v18659_v15  ;;  %v18662_v58 = vld [vmem:[#allocation9 + $0x1c0] ss:$24 sps:$4 sm:$0xff]   ;;  %v18665_v12 = vld [vmem:[#allocation9 + $0x1f4] ss:$24 sps:$4 sm:$0xff]  }
 0xac4   :  { %v18604_v16 = vpack.c.bf16 %v18592_v50, %v18587_v55  ;;  %20602 = vst [vmem:[#allocation36_spill] sm:$0xff] %v18662_v58  ;;  %20603 = vst [vmem:[#allocation37_spill] sm:$0xff] %v18665_v12  ;;  %v18668_v52 = vld [vmem:[#allocation9 + $0x1f0] ss:$24 sps:$4 sm:$0xff]   ;;  %v18671_v19 = vld [vmem:[#allocation9 + $0x224] ss:$24 sps:$4 sm:$0xff]  }
 0xac5   :  { %v18598_v49 = vpack.c.bf16 %v18594_v35, %v18590_v59  ;;  %20604 = vst [vmem:[#allocation38_spill] sm:$0xff] %v18668_v52  ;;  %20605 = vst [vmem:[#allocation39_spill] sm:$0xff] %v18671_v19  ;;  %v18674_v34 = vld [vmem:[#allocation9 + $0x220] ss:$24 sps:$4 sm:$0xff]  }
 0xac6   :  { %20596 = vst [vmem:[#allocation106_spill] sm:$0xff] %v18604_v16  ;;  %20606 = vst [vmem:[#allocation27_spill] sm:$0xff] %v18674_v34 }
 0xac7   :  { %20595 = vst [vmem:[#allocation105_spill] sm:$0xff] %v18598_v49  ;;  %8245 = vmatprep.mubr.bf16.mxu1 %v18598_v49  ;;  %8288 = vmatprep.mubr.bf16.mxu0 %v18598_v49 }
 0xac8   :  { %8246 = vmatmul.mubr.bf16.vlgmr.msra.gmra.mrb[28].mxu1 %v18604_v16  ;;  %8289 = vmatmul.mubr.bf16.vlgmr.msra.gmra.mrb[76].mxu0 %v18604_v16 }
 0xac9   :  { %8300 = vmatpush1.bf16.msra.mxu1 %v18600_v8  ;;  %8331 = vmatprep.mubr.bf16.mxu1 %v18598_v49  ;;  %v18677_v49 = vld [vmem:[#allocation9 + $0x254] ss:$24 sps:$4 sm:$0xff]  }
 0xaca   :  { %8301 = vmatprep.subr.bf16.mxu1 %v18606_v18  ;;  %20607 = vst [vmem:[#allocation28_spill] sm:$0xff] %v18677_v49 }
 0xacd   :  { %8302 = vmatpush1.bf16.msra.mxu1 %v18614_v11 }
 0xace   :  { %8303 = vmatprep.subr.bf16.mxu1 %v18617_v40 }
 0xad1   :  { %8304 = vmatpush1.bf16.msra.mxu1 %v18620_v63 }
 0xad2   :  { %8305 = vmatprep.subr.bf16.mxu1 %v18623_v7 }
 0xad5   :  { %8306 = vmatpush1.bf16.msra.mxu1 %v18626_v51 }
 0xad6   :  { %8307 = vmatprep.subr.bf16.mxu1 %v18629_v62 }
 0xad9   :  { %8308 = vmatpush1.bf16.msra.mxu1 %v18632_v37 }
 0xada   :  { %8309 = vmatprep.subr.bf16.mxu1 %v18635_v27 }
 0xadd   :  { %8310 = vmatpush1.bf16.msra.mxu1 %v18638_v29 }
 0xade   :  { %8311 = vmatprep.subr.bf16.mxu1 %v18641_v20 }
 0xae1   :  { %8312 = vmatpush1.bf16.msra.mxu1 %v18644_v43 }
 0xae2   :  { %8313 = vmatprep.subr.bf16.mxu1 %v18647_v10  ;;  %v18764_v10 = vld [vmem:[#allocation9 + $0x12c] ss:$24 sps:$4 sm:$0xff]  }
 0xae5   :  { %8314 = vmatpush1.bf16.msra.mxu1 %v18650_v0  ;;  %v18748_v0 = vld [vmem:[#allocation9 + $0xcc] ss:$24 sps:$4 sm:$0xff]  }
 0xae6   :  { %8315 = vmatprep.subr.bf16.mxu1 %v18653_v21  ;;  %v18742_v21 = vld [vmem:[#allocation9 + $0x98] ss:$24 sps:$4 sm:$0xff]  }
 0xae7   :  { %20622 = vst [vmem:[#allocation82_spill] sm:$0xff] %v18742_v21 }
 0xae9   :  { %8316 = vmatpush1.bf16.msra.mxu1 %v18656_v46  ;;  %v18736_v46 = vld [vmem:[#allocation9 + $0x9c] ss:$24 sps:$4 sm:$0xff]  }
 0xaea   :  { %8317 = vmatprep.subr.bf16.mxu1 %v18659_v15  ;;  %v18727_v15 = vld [vmem:[#allocation9 + $0x64] ss:$24 sps:$4 sm:$0xff]   ;;  %20621 = vst [vmem:[#allocation81_spill] sm:$0xff] %v18736_v46 }
 0xaed   :  { %8318 = vmatpush1.bf16.msra.mxu1 %v18662_v58  ;;  %v18709_v58 = vld [vmem:[#allocation9 + $0x4] ss:$24 sps:$4 sm:$0xff]  }
 0xaee   :  { %8319 = vmatprep.subr.bf16.mxu1 %v18665_v12  ;;  %v18686_v12 = vld [vmem:[#allocation9 + $0x280] ss:$24 sps:$4 sm:$0xff]  }
 0xaef   :  { %20610 = vst [vmem:[#allocation31_spill] sm:$0xff] %v18686_v12 }
 0xaf1   :  { %8320 = vmatpush1.bf16.msra.mxu1 %v18668_v52  ;;  %v18689_v52 = vld [vmem:[#allocation9 + $0x2b4] ss:$24 sps:$4 sm:$0xff]  }
 0xaf2   :  { %8321 = vmatprep.subr.bf16.mxu1 %v18671_v19  ;;  %20611 = vst [vmem:[#allocation23_spill] sm:$0xff] %v18689_v52  ;;  %v18692_v19 = vld [vmem:[#allocation9 + $0x2b0] ss:$24 sps:$4 sm:$0xff]  }
 0xaf3   :  { %20612 = vst [vmem:[#allocation72_spill] sm:$0xff] %v18692_v19 }
 0xaf5   :  { %8322 = vmatpush1.bf16.msra.mxu1 %v18674_v34  ;;  %v18695_v34 = vld [vmem:[#allocation9 + $0x2e4] ss:$24 sps:$4 sm:$0xff]  }
 0xaf6   :  { %8323 = vmatprep.subr.bf16.mxu1 %v18677_v49  ;;  %20613 = vst [vmem:[#allocation73_spill] sm:$0xff] %v18695_v34  ;;  %v18698_v49 = vld [vmem:[#allocation9 + $0x2e0] ss:$24 sps:$4 sm:$0xff]  }
 0xaf7   :  { %20614 = vst [vmem:[#allocation74_spill] sm:$0xff] %v18698_v49 }
 0xaf9   :  { %8324 = vmatpush1.bf16.msra.mxu1 %v18680_v22  ;;  %v18705_v22 = vld [vmem:[#allocation9 + $0xc] ss:$24 sps:$4 sm:$0xff]  }
 0xafa   :  { %8325 = vmatprep.subr.bf16.mxu1 %v18683_v6  ;;  %v18703_v6 = vld [vmem:[#allocation9 + $0x8] ss:$24 sps:$4 sm:$0xff]   ;;  %20616 = vst [vmem:[#allocation76_spill] sm:$0xff] %v18705_v22  ;;  %9063 = vmatprep.subr.bf16.mxu0 %v18705_v22 }
 0xafb   :  { %20615 = vst [vmem:[#allocation75_spill] sm:$0xff] %v18703_v6  ;;  %9064 = vmatpush1.bf16.msra.mxu0 %v18703_v6  ;;  %v18730_v22 = vld [vmem:[#allocation9 + $0x68] ss:$24 sps:$4 sm:$0xff]  }
 0xafc   :  { %20620 = vst [vmem:[#allocation80_spill] sm:$0xff] %v18730_v22  ;;  %v18734_v6 = vld [vmem:[#allocation9 + $0x60] ss:$24 sps:$4 sm:$0xff]  }
 0xafd   :  { %8326 = vmatpush1.bf16.msra.mxu1 %v18686_v12  ;;  %v18707_v12 = vld [vmem:[#allocation9] ss:$24 sps:$4 sm:$0xff]  }
 0xafe   :  { %8327 = vmatprep.subr.bf16.mxu1 %v18689_v52  ;;  %v18711_v52 = vld [vmem:[#allocation9 + $0x3c] ss:$24 sps:$4 sm:$0xff]  }
 0xaff   :  { %20617 = vst [vmem:[#allocation77_spill] sm:$0xff] %v18711_v52  ;;  %9065 = vmatprep.subr.bf16.mxu0 %v18711_v52  ;;  %v18739_v52 = vld [vmem:[#allocation9 + $0x94] ss:$24 sps:$4 sm:$0xff]  }
 0xb01   :  { %8328 = vmatpush1.bf16.msra.mxu1 %v18692_v19  ;;  %v18714_v19 = vld [vmem:[#allocation9 + $0x34] ss:$24 sps:$4 sm:$0xff]  }
 0xb02   :  { %8329 = vmatprep.subr.bf16.mxu1 %v18695_v34  ;;  %v18724_v34 = vld [vmem:[#allocation9 + $0x6c] ss:$24 sps:$4 sm:$0xff]  }
 0xb03   :  { %20619 = vst [vmem:[#allocation79_spill] sm:$0xff] %v18724_v34 }
 0xb05   :  { %8330 = vmatpush1.bf16.msra.mxu1 %v18698_v49  ;;  %v18718_v49 = vld [vmem:[#allocation9 + $0x38] ss:$24 sps:$4 sm:$0xff]  }
 0xb06   :  { %9020 = vmatprep.subr.bf16.mxu1 %v18709_v58  ;;  %20618 = vst [vmem:[#allocation78_spill] sm:$0xff] %v18718_v49  ;;  %9066 = vmatpush1.bf16.msra.mxu0 %v18718_v49  ;;  %v18746_v49 = vld [vmem:[#allocation9 + $0x90] ss:$24 sps:$4 sm:$0xff]  }
 0xb07   :  { %9067 = vmatprep.subr.bf16.mxu0 %v18724_v34  ;;  %v18752_v34 = vld [vmem:[#allocation9 + $0xc8] ss:$24 sps:$4 sm:$0xff]  }
 0xb08   :  { %8332 = vmatmul.mubr.bf16.vlgmr.msra.gmra.mrb[112].mxu1 %v18604_v16  ;;  %v18722_v16 = vld [vmem:[#allocation9 + $0x30] ss:$24 sps:$4 sm:$0xff]  }
 0xb09   :  { %9021 = vmatpush1.bf16.msra.mxu1 %v18707_v12 }
 0xb0a   :  { %9022 = vmatprep.subr.bf16.mxu1 %v18714_v19  ;;  %9068 = vmatpush1.bf16.msra.mxu0 %v18730_v22  ;;  %v18756_v22 = vld [vmem:[#allocation9 + $0xfc] ss:$24 sps:$4 sm:$0xff]  }
 0xb0b   :  { %9069 = vmatprep.subr.bf16.mxu0 %v18736_v46  ;;  %v18760_v46 = vld [vmem:[#allocation9 + $0xf8] ss:$24 sps:$4 sm:$0xff]  }
 0xb0d   :  { %9023 = vmatpush1.bf16.msra.mxu1 %v18722_v16 }
 0xb0e   :  { %9024 = vmatprep.subr.bf16.mxu1 %v18727_v15  ;;  %9070 = vmatpush1.bf16.msra.mxu0 %v18742_v21  ;;  %v18768_v21 = vld [vmem:[#allocation9 + $0x128] ss:$24 sps:$4 sm:$0xff]  }
 0xb0f   :  { %9071 = vmatprep.subr.bf16.mxu0 %v18748_v0 }
 0xb11   :  { %9025 = vmatpush1.bf16.msra.mxu1 %v18734_v6 }
 0xb12   :  { %9026 = vmatprep.subr.bf16.mxu1 %v18739_v52  ;;  %9072 = vmatpush1.bf16.msra.mxu0 %v18752_v34 }
 0xb13   :  { %9073 = vmatprep.subr.bf16.mxu0 %v18756_v22 }
 0xb15   :  { %9027 = vmatpush1.bf16.msra.mxu1 %v18746_v49 }
 0xb16   :  { %9028 = vmatprep.subr.bf16.mxu1 %v18482_v5  ;;  %9074 = vmatpush1.bf16.msra.mxu0 %v18760_v46  ;;  %v18772_v5 = vld [vmem:[#allocation9 + $0x15c] ss:$24 sps:$4 sm:$0xff]  }
 0xb17   :  { %9075 = vmatprep.subr.bf16.mxu0 %v18764_v10 }
 0xb19   :  { %9029 = vmatpush1.bf16.msra.mxu1 %v18480_v39  ;;  %v18776_v39 = vld [vmem:[#allocation9 + $0x158] ss:$24 sps:$4 sm:$0xff]  }
 0xb1a   :  { %9030 = vmatprep.subr.bf16.mxu1 %v18484_v38  ;;  %9076 = vmatpush1.bf16.msra.mxu0 %v18768_v21  ;;  %v18780_v38 = vld [vmem:[#allocation9 + $0x18c] ss:$24 sps:$4 sm:$0xff]  }
 0xb1b   :  { %9077 = vmatprep.subr.bf16.mxu0 %v18772_v5 }
 0xb1d   :  { %9031 = vmatpush1.bf16.msra.mxu1 %v18490_v36  ;;  %v18784_v36 = vld [vmem:[#allocation9 + $0x188] ss:$24 sps:$4 sm:$0xff]  }
 0xb1e   :  { %9032 = vmatprep.subr.bf16.mxu1 %v18493_v30  ;;  %9078 = vmatpush1.bf16.msra.mxu0 %v18776_v39  ;;  %v18788_v30 = vld [vmem:[#allocation9 + $0x1bc] ss:$24 sps:$4 sm:$0xff]  }
 0xb1f   :  { %9079 = vmatprep.subr.bf16.mxu0 %v18780_v38 }
 0xb21   :  { %9033 = vmatpush1.bf16.msra.mxu1 %v18498_v25  ;;  %v18792_v25 = vld [vmem:[#allocation9 + $0x1b8] ss:$24 sps:$4 sm:$0xff]  }
 0xb22   :  { %9034 = vmatprep.subr.bf16.mxu1 %v18501_v24  ;;  %9080 = vmatpush1.bf16.msra.mxu0 %v18784_v36  ;;  %v18800_v24 = vld [vmem:[#allocation9 + $0x1ec] ss:$24 sps:$4 sm:$0xff]  }
 0xb23   :  { %9081 = vmatprep.subr.bf16.mxu0 %v18788_v30 }
 0xb25   :  { %9035 = vmatpush1.bf16.msra.mxu1 %v18506_v33  ;;  %v18802_v33 = vld [vmem:[#allocation9 + $0x1e8] ss:$24 sps:$4 sm:$0xff]  }
 0xb26   :  { %9036 = vmatprep.subr.bf16.mxu1 %v18509_v60  ;;  %9082 = vmatpush1.bf16.msra.mxu0 %v18792_v25  ;;  %20623 = vst [vmem:[#allocation83_spill] sm:$0xff] %v18802_v33  ;;  %v18808_v60 = vld [vmem:[#allocation9 + $0x21c] ss:$24 sps:$4 sm:$0xff]  }
 0xb27   :  { %9083 = vmatprep.subr.bf16.mxu0 %v18800_v24  ;;  %20624 = vst [vmem:[#allocation85_spill] sm:$0xff] %v18808_v60 }
 0xb29   :  { %9037 = vmatpush1.bf16.msra.mxu1 %v18514_v44  ;;  %v18810_v44 = vld [vmem:[#allocation9 + $0x218] ss:$24 sps:$4 sm:$0xff]  }
 0xb2a   :  { %9038 = vmatprep.subr.bf16.mxu1 %v18517_v61  ;;  %9084 = vmatpush1.bf16.msra.mxu0 %v18802_v33  ;;  %20625 = vst [vmem:[#allocation84_spill] sm:$0xff] %v18810_v44  ;;  %v18814_v61 = vld [vmem:[#allocation9 + $0x24c] ss:$24 sps:$4 sm:$0xff]  }
 0xb2b   :  { %9085 = vmatprep.subr.bf16.mxu0 %v18808_v60  ;;  %20626 = vst [vmem:[#allocation86_spill] sm:$0xff] %v18814_v61 }
 0xb2d   :  { %9039 = vmatpush1.bf16.msra.mxu1 %v18521_v54  ;;  %v18818_v54 = vld [vmem:[#allocation9 + $0x248] ss:$24 sps:$4 sm:$0xff]  }
 0xb2e   :  { %9040 = vmatprep.subr.bf16.mxu1 %v18525_v32  ;;  %9086 = vmatpush1.bf16.msra.mxu0 %v18810_v44  ;;  %20627 = vst [vmem:[#allocation87_spill] sm:$0xff] %v18818_v54  ;;  %v18821_v32 = vld [vmem:[#allocation9 + $0x27c] ss:$24 sps:$4 sm:$0xff]  }
 0xb2f   :  { %9087 = vmatprep.subr.bf16.mxu0 %v18814_v61  ;;  %20628 = vst [vmem:[#allocation88_spill] sm:$0xff] %v18821_v32 }
 0xb31   :  { %9041 = vmatpush1.bf16.msra.mxu1 %v18527_v23  ;;  %v18826_v23 = vld [vmem:[#allocation9 + $0x278] ss:$24 sps:$4 sm:$0xff]  }
 0xb32   :  { %9042 = vmatprep.subr.bf16.mxu1 %v18531_v4  ;;  %9088 = vmatpush1.bf16.msra.mxu0 %v18818_v54  ;;  %20629 = vst [vmem:[#allocation91_spill] sm:$0xff] %v18826_v23  ;;  %v18829_v4 = vld [vmem:[#allocation9 + $0x2ac] ss:$24 sps:$4 sm:$0xff]  }
 0xb33   :  { %9089 = vmatprep.subr.bf16.mxu0 %v18821_v32  ;;  %20630 = vst [vmem:[#allocation89_spill] sm:$0xff] %v18829_v4 }
 0xb35   :  { %9043 = vmatpush1.bf16.msra.mxu1 %v18533_v3  ;;  %v18834_v3 = vld [vmem:[#allocation9 + $0x2a8] ss:$24 sps:$4 sm:$0xff]  }
 0xb36   :  { %9044 = vmatprep.subr.bf16.mxu1 %v18536_v45  ;;  %9090 = vmatpush1.bf16.msra.mxu0 %v18826_v23  ;;  %20631 = vst [vmem:[#allocation90_spill] sm:$0xff] %v18834_v3  ;;  %v18837_v45 = vld [vmem:[#allocation9 + $0x2dc] ss:$24 sps:$4 sm:$0xff]  }
 0xb37   :  { %9091 = vmatprep.subr.bf16.mxu0 %v18829_v4  ;;  %20632 = vst [vmem:[#allocation92_spill] sm:$0xff] %v18837_v45 }
 0xb39   :  { %9045 = vmatpush1.bf16.msra.mxu1 %v18539_v17  ;;  %v18842_v17 = vld [vmem:[#allocation9 + $0x2d8] ss:$24 sps:$4 sm:$0xff]  }
 0xb3a   :  { %9046 = vmatprep.subr.bf16.mxu1 %v18542_v14  ;;  %9092 = vmatpush1.bf16.msra.mxu0 %v18834_v3  ;;  %20633 = vst [vmem:[#allocation93_spill] sm:$0xff] %v18842_v17 }
 0xb3b   :  { %9093 = vmatprep.subr.bf16.mxu0 %v18837_v45 }
 0xb3d   :  { %9047 = vmatpush1.bf16.msra.mxu1 %v18545_v47 }
 0xb3e   :  { %9048 = vmatprep.subr.bf16.mxu1 %v18548_v1  ;;  %9094 = vmatpush1.bf16.msra.mxu0 %v18842_v17 }
 0xb3f   :  { %9106 = vmatprep.subr.bf16.mxu0 %v18561_v53 }
 0xb41   :  { %9049 = vmatpush1.bf16.msra.mxu1 %v18551_v28 }
 0xb42   :  { %9050 = vmatprep.subr.bf16.mxu1 %v18554_v9 }
 0xb45   :  { %9051 = vmatpush1.bf16.msra.mxu1 %v18557_v42 }
 0xb46   :  { %9827 = vmatprep.subr.bf16.mxu1 %v18709_v58 }
 0xb9b   :  { %v8247_v14 = vpop.f32.mrb[28].mxu1  ;;  %v8290_v47 = vpop.f32.mrb[76].mxu0 }
 0xb9c   :  { %v8249_v1 = vpop.f32.mrb[29].mxu1  ;;  %v8292_v28 = vpop.f32.mrb[77].mxu0  ;;  %v14071_v32 = vadd.f32 %v20586_v56, %v8247_v14  ;;  %v14171_v44 = vadd.f32 %v20588_v41, %v8290_v47 }
 0xb9d   :  { %v8251_v4 = vpop.f32.mrb[30].mxu1  ;;  %v8294_v9 = vpop.f32.mrb[78].mxu0  ;;  %v14073_v45 = vadd.f32 %v20587_v31, %v8249_v1  ;;  %v14173_v60 = vadd.f32 %v20589_v2, %v8292_v28 }
 0xb9e   :  { %v8253_v23 = vpop.f32.mrb[31].mxu1  ;;  %v8296_v3 = vpop.f32.mrb[79].mxu0  ;;  %v14075_v42 = vadd.f32 %v20586_v56, %v8251_v4  ;;  %v13558_v54 = vmul.f32 -1.442695, %v14071_v32  ;;  %v14175_v14 = vadd.f32 %v20588_v41, %v8294_v9  ;;  %v13562_v33 = vmul.f32 -1.442695, %v14171_v44 }
 0xb9f   :  { %v14077_v58 = vadd.f32 %v20587_v31, %v8253_v23  ;;  %v13559_v17 = vmul.f32 -1.442695, %v14073_v45  ;;  %v14177_v1 = vadd.f32 %v20589_v2, %v8296_v3  ;;  %v13563_v4 = vmul.f32 -1.442695, %v14173_v60 }
 0xba0   :  { %v13560_v61 = vmul.f32 -1.442695, %v14075_v42  ;;  %15786 = vpow2.f32 %v13558_v54  ;;  %v13564_v56 = vmul.f32 -1.442695, %v14175_v14 }
 0xba1   :  { %v13561_v53 = vmul.f32 -1.442695, %v14077_v58  ;;  %15788 = vpow2.f32 %v13559_v17  ;;  %v13565_v32 = vmul.f32 -1.442695, %v14177_v1 }
 0xba2   :  { %15790 = vpow2.f32 %v13560_v61 }
 0xba3   :  { %15792 = vpow2.f32 %v13561_v53 }
 0xba4   :  { %15794 = vpow2.f32 %v13562_v33 }
 0xba5   :  { %15796 = vpow2.f32 %v13563_v4 }
 0xba6   :  { %15798 = vpow2.f32 %v13564_v56 }
 0xba7   :  { %15800 = vpow2.f32 %v13565_v32 }
 0xbaa   :  { %v15787_v23 = vpop.eup %15786 }
 0xbab   :  { %v15789_v45 = vpop.eup %15788  ;;  %v8358_v61 = vadd.f32 1.0, %v15787_v23 }
 0xbac   :  { %v15791_v42 = vpop.eup %15790  ;;  %v8359_v17 = vadd.f32 1.0, %v15789_v45 }
 0xbad   :  { %v15793_v54 = vpop.eup %15792  ;;  %v8360_v47 = vadd.f32 1.0, %v15791_v42  ;;  %15802 = vrcp.f32 %v8358_v61 }
 0xbae   :  { %v8361_v28 = vadd.f32 1.0, %v15793_v54  ;;  %15804 = vrcp.f32 %v8359_v17  ;;  %v15795_v44 = vpop.eup %15794  ;;  %v20634_v54 = vld [vmem:[#allocation44_spill] sm:$0xff] }
 0xbaf   :  { %15806 = vrcp.f32 %v8360_v47  ;;  %v15797_v60 = vpop.eup %15796  ;;  %v8386_v58 = vadd.f32 1.0, %v15795_v44  ;;  %v1746_v61 = vadd.f32 %v20634_v54, %v17101_v13 }
 0xbb0   :  { %15808 = vrcp.f32 %v8361_v28  ;;  %v15799_v3 = vpop.eup %15798  ;;  %v8387_v53 = vadd.f32 1.0, %v15797_v60  ;;  %v20635_v60 = vld [vmem:[#allocation45_spill] sm:$0xff] }
 0xbb1   :  { %v15801_v9 = vpop.eup %15800  ;;  %v8388_v14 = vadd.f32 1.0, %v15799_v3  ;;  %15810 = vrcp.f32 %v8386_v58  ;;  %v1748_v3 = vadd.f32 %v20635_v60, %v17106_v57  ;;  %v20637_v58 = vld [vmem:[#allocation47_spill] sm:$0xff] }
 0xbb2   :  { %v8389_v23 = vadd.f32 1.0, %v15801_v9  ;;  %15812 = vrcp.f32 %v8387_v53 }
 0xbb3   :  { %15814 = vrcp.f32 %v8388_v14 }
 0xbb4   :  { %15816 = vrcp.f32 %v8389_v23 }
 0xbb7   :  { %v15803_v56 = vpop.eup %15802 }
 0xbb8   :  { %v15805_v42 = vpop.eup %15804 }
 0xbb9   :  { %v15807_v44 = vpop.eup %15806 }
 0xbba   :  { %v15809_v2 = vpop.eup %15808 }
 0xbdb   :  { %v8333_v33 = vpop.f32.mrb[112].mxu1 }
 0xbdc   :  { %v8334_v1 = vadd.f32 %v8333_v33, %v20590_v26  ;;  %v8335_v4 = vpop.f32.mrb[113].mxu1 }
 0xbdd   :  { %v8336_v32 = vadd.f32 %v8335_v4, %v20360_v48  ;;  %v8337_v45 = vpop.f32.mrb[114].mxu1  ;;  %v20636_v4 = vld [vmem:[#allocation46_spill] sm:$0xff] }
 0xbde   :  { %v8398_v17 = vmul.f32 %v15803_v56, %v8334_v1  ;;  %v8338_v47 = vadd.f32 %v8337_v45, %v20590_v26  ;;  %v8339_v28 = vpop.f32.mrb[115].mxu1  ;;  %v1750_v41 = vadd.f32 %v20636_v4, %v17101_v13  ;;  %v1752_v1 = vadd.f32 %v20637_v58, %v17106_v57 }
 0xbdf   :  { %v8399_v33 = vmul.f32 %v15805_v42, %v8336_v32  ;;  %v8340_v9 = vadd.f32 %v8339_v28, %v20360_v48  ;;  %v15811_v32 = vpop.eup %15810 }
 0xbe0   :  { %v8402_v31 = vadd.f32 %v8398_v17, %v1746_v61  ;;  %v8400_v54 = vmul.f32 %v15807_v44, %v8338_v47  ;;  %v15813_v42 = vpop.eup %15812  ;;  %v8410_v4 = vsub.f32 1.0, %v15811_v32  ;;  %v8418_v23 = vmul.f32 %v15811_v32, %v18587_v55  ;;  %v20662_v32 = vld [vmem:[#allocation79_spill] sm:$0xff] }
 0xbe1   :  { %v8403_v56 = vadd.f32 %v8399_v33, %v1748_v3  ;;  %v8401_v45 = vmul.f32 %v15809_v2, %v8340_v9  ;;  %v15815_v28 = vpop.eup %15814  ;;  %v8411_v61 = vsub.f32 1.0, %v15813_v42 }
 0xbe2   :  { %15818 = vtanh.f32 %v8402_v31  ;;  %v8404_v26 = vadd.f32 %v8400_v54, %v1750_v41  ;;  %v15817_v60 = vpop.eup %15816  ;;  %v8412_v47 = vsub.f32 1.0, %v15815_v28  ;;  %v8419_v41 = vmul.f32 %v15813_v42, %v18590_v59  ;;  %v20663_v42 = vld [vmem:[#allocation80_spill] sm:$0xff] }
 0xbe3   :  { %15820 = vtanh.f32 %v8403_v56  ;;  %v8405_v53 = vadd.f32 %v8401_v45, %v1752_v1  ;;  %v8413_v2 = vsub.f32 1.0, %v15817_v60  ;;  %v8420_v9 = vmul.f32 %v15815_v28, %v18592_v50  ;;  %v20640_v50 = vld [vmem:[#allocation107_spill] sm:$0xff]  ;;  %v20664_v28 = vld [vmem:[#allocation81_spill] sm:$0xff] }
 0xbe4   :  { %15822 = vtanh.f32 %v8404_v26  ;;  %v8421_v1 = vmul.f32 %v15817_v60, %v18594_v35  ;;  %v20642_v35 = vld [vmem:[#allocation33_spill] sm:$0xff]  ;;  %v20665_v60 = vld [vmem:[#allocation82_spill] sm:$0xff] }
 0xbe5   :  { %15824 = vtanh.f32 %v8405_v53 }
 0xbec   :  { %v15819_v14 = vpop.eup %15818 }
 0xbed   :  { %v15821_v17 = vpop.eup %15820  ;;  %v8414_v44 = vmul.f32 %v15819_v14, %v8410_v4  ;;  %v20672_v4 = vld [vmem:[#allocation91_spill] sm:$0xff]  ;;  %v20673_v14 = vld [vmem:[#allocation89_spill] sm:$0xff] }
 0xbee   :  { %v15823_v3 = vpop.eup %15822  ;;  %v8415_v31 = vmul.f32 %v15821_v17, %v8411_v61  ;;  %v18982_v61 = vld [vmem:[#allocation9 + $0x150] ss:$24 sps:$4 sm:$0xff]   ;;  %v18985_v17 = vld [vmem:[#allocation9 + $0x184] ss:$24 sps:$4 sm:$0xff]  }
 0xbef   :  { %v15825_v33 = vpop.eup %15824  ;;  %v8416_v26 = vmul.f32 %v15823_v3, %v8412_v47  ;;  %v18872_v54 = vadd.f32 %v8418_v23, %v8414_v44  ;;  %v20674_v47 = vld [vmem:[#allocation90_spill] sm:$0xff]  ;;  %v20675_v44 = vld [vmem:[#allocation92_spill] sm:$0xff] }
 0xbf0   :  { %v8417_v58 = vmul.f32 %v15825_v33, %v8413_v2  ;;  %v18875_v56 = vadd.f32 %v8419_v41, %v8415_v31  ;;  %v18990_v23 = vld [vmem:[#allocation9 + $0x180] ss:$24 sps:$4 sm:$0xff]   ;;  %v18993_v3 = vld [vmem:[#allocation9 + $0x1b4] ss:$24 sps:$4 sm:$0xff]   ;;  %v18997_v31 = vld [vmem:[#allocation9 + $0x1b0] ss:$24 sps:$4 sm:$0xff]  }
 0xbf1   :  { %v18877_v45 = vadd.f32 %v8420_v9, %v8416_v26  ;;  %v20676_v2 = vld [vmem:[#allocation93_spill] sm:$0xff]  ;;  %v19001_v41 = vld [vmem:[#allocation9 + $0x1e4] ss:$24 sps:$4 sm:$0xff]   ;;  %v19003_v33 = vld [vmem:[#allocation9 + $0x1e0] ss:$24 sps:$4 sm:$0xff]  }
 0xbf2   :  { %v18879_v53 = vadd.f32 %v8421_v1, %v8417_v58  ;;  %v19007_v26 = vld [vmem:[#allocation9 + $0x214] ss:$24 sps:$4 sm:$0xff]   ;;  %v19009_v9 = vld [vmem:[#allocation9 + $0x210] ss:$24 sps:$4 sm:$0xff]   ;;  %v19012_v58 = vld [vmem:[#allocation9 + $0x244] ss:$24 sps:$4 sm:$0xff]  }
 0xbf3   :  { %v18887_v59 = vpack.c.bf16 %v18877_v45, %v18872_v54  ;;  %v19015_v1 = vld [vmem:[#allocation9 + $0x240] ss:$24 sps:$4 sm:$0xff]  }
 0xbf4   :  { %v18883_v55 = vpack.c.bf16 %v18879_v53, %v18875_v56 }
 0xbf5   :  { %20639 = vst [vmem:[#allocation95_spill] sm:$0xff] %v18887_v59 }
 0xbf6   :  { %20638 = vst [vmem:[#allocation94_spill] sm:$0xff] %v18883_v55  ;;  %9052 = vmatprep.mubr.bf16.mxu1 %v18883_v55  ;;  %9095 = vmatprep.mubr.bf16.mxu0 %v18883_v55 }
 0xbf7   :  { %9053 = vmatmul.mubr.bf16.vlgmr.msra.gmra.mrb[32].mxu1 %v18887_v59  ;;  %9096 = vmatmul.mubr.bf16.vlgmr.msra.gmra.mrb[80].mxu0 %v18887_v59 }
 0xbf8   :  { %9107 = vmatpush1.bf16.msra.mxu0 %v18600_v8  ;;  %9138 = vmatprep.mubr.bf16.mxu0 %v18883_v55  ;;  %v20643_v8 = vld [vmem:[#allocation34_spill] sm:$0xff]  ;;  %v19159_v55 = vld [vmem:[#allocation9 + $0x284] ss:$24 sps:$4 sm:$0xff]  }
 0xbf9   :  { %9108 = vmatprep.subr.bf16.mxu0 %v18606_v18  ;;  %9828 = vmatpush1.bf16.msra.mxu1 %v18707_v12  ;;  %v20646_v18 = vld [vmem:[#allocation37_spill] sm:$0xff]  ;;  %v20659_v12 = vld [vmem:[#allocation75_spill] sm:$0xff]  ;;  %20700 = vst [vmem:[#allocation47_spill] sm:$0xff] %v19159_v55 }
 0xbfa   :  { %9829 = vmatprep.subr.bf16.mxu1 %v18714_v19  ;;  %v20661_v19 = vld [vmem:[#allocation78_spill] sm:$0xff] }
 0xbfc   :  { %9109 = vmatpush1.bf16.msra.mxu0 %v18614_v11  ;;  %v20647_v11 = vld [vmem:[#allocation38_spill] sm:$0xff] }
 0xbfd   :  { %9110 = vmatprep.subr.bf16.mxu0 %v18617_v40  ;;  %9830 = vmatpush1.bf16.msra.mxu1 %v18722_v16  ;;  %v20644_v16 = vld [vmem:[#allocation35_spill] sm:$0xff] }
 0xbfe   :  { %9831 = vmatprep.subr.bf16.mxu1 %v18727_v15  ;;  %v20648_v40 = vld [vmem:[#allocation39_spill] sm:$0xff]  ;;  %v20658_v15 = vld [vmem:[#allocation76_spill] sm:$0xff] }
 0xc00   :  { %9111 = vmatpush1.bf16.msra.mxu0 %v18620_v63  ;;  %v20649_v63 = vld [vmem:[#allocation27_spill] sm:$0xff] }
 0xc01   :  { %9112 = vmatprep.subr.bf16.mxu0 %v18623_v7  ;;  %9832 = vmatpush1.bf16.msra.mxu1 %v18734_v6  ;;  %v20641_v6 = vld [vmem:[#allocation32_spill] sm:$0xff] }
 0xc02   :  { %9833 = vmatprep.subr.bf16.mxu1 %v18739_v52  ;;  %v20650_v7 = vld [vmem:[#allocation28_spill] sm:$0xff]  ;;  %v20660_v52 = vld [vmem:[#allocation77_spill] sm:$0xff] }
 0xc04   :  { %9113 = vmatpush1.bf16.msra.mxu0 %v18626_v51  ;;  %v20651_v51 = vld [vmem:[#allocation29_spill] sm:$0xff] }
 0xc05   :  { %9114 = vmatprep.subr.bf16.mxu0 %v18629_v62  ;;  %9834 = vmatpush1.bf16.msra.mxu1 %v18746_v49  ;;  %v20645_v49 = vld [vmem:[#allocation36_spill] sm:$0xff]  ;;  %v20652_v62 = vld [vmem:[#allocation30_spill] sm:$0xff] }
 0xc08   :  { %9115 = vmatpush1.bf16.msra.mxu0 %v18632_v37  ;;  %v20653_v37 = vld [vmem:[#allocation31_spill] sm:$0xff] }
 0xc09   :  { %9116 = vmatprep.subr.bf16.mxu0 %v18635_v27  ;;  %v20654_v27 = vld [vmem:[#allocation23_spill] sm:$0xff] }
 0xc0c   :  { %9117 = vmatpush1.bf16.msra.mxu0 %v18638_v29  ;;  %v20655_v29 = vld [vmem:[#allocation72_spill] sm:$0xff] }
 0xc0d   :  { %9118 = vmatprep.subr.bf16.mxu0 %v18641_v20  ;;  %v20656_v20 = vld [vmem:[#allocation73_spill] sm:$0xff] }
 0xc10   :  { %9119 = vmatpush1.bf16.msra.mxu0 %v18644_v43  ;;  %v20657_v43 = vld [vmem:[#allocation74_spill] sm:$0xff] }
 0xc11   :  { %9120 = vmatprep.subr.bf16.mxu0 %v20640_v50  ;;  %v19018_v50 = vld [vmem:[#allocation9 + $0x274] ss:$24 sps:$4 sm:$0xff]  }
 0xc14   :  { %9121 = vmatpush1.bf16.msra.mxu0 %v20641_v6  ;;  %v19021_v6 = vld [vmem:[#allocation9 + $0x270] ss:$24 sps:$4 sm:$0xff]  }
 0xc15   :  { %9122 = vmatprep.subr.bf16.mxu0 %v20642_v35  ;;  %v19024_v35 = vld [vmem:[#allocation9 + $0x2a4] ss:$24 sps:$4 sm:$0xff]  }
 0xc18   :  { %9123 = vmatpush1.bf16.msra.mxu0 %v20643_v8  ;;  %v19027_v8 = vld [vmem:[#allocation9 + $0x2a0] ss:$24 sps:$4 sm:$0xff]  }
 0xc19   :  { %9124 = vmatprep.subr.bf16.mxu0 %v20644_v16  ;;  %v19030_v16 = vld [vmem:[#allocation9 + $0x2d4] ss:$24 sps:$4 sm:$0xff]  }
 0xc1c   :  { %9125 = vmatpush1.bf16.msra.mxu0 %v20645_v49  ;;  %v19033_v49 = vld [vmem:[#allocation9 + $0x2d0] ss:$24 sps:$4 sm:$0xff]  }
 0xc1d   :  { %9126 = vmatprep.subr.bf16.mxu0 %v20646_v18  ;;  %v19037_v18 = vld [vmem:[#allocation9 + $0x14] ss:$24 sps:$4 sm:$0xff]  }
 0xc20   :  { %9127 = vmatpush1.bf16.msra.mxu0 %v20647_v11 }
 0xc21   :  { %9128 = vmatprep.subr.bf16.mxu0 %v20648_v40 }
 0xc24   :  { %9129 = vmatpush1.bf16.msra.mxu0 %v20649_v63 }
 0xc25   :  { %9130 = vmatprep.subr.bf16.mxu0 %v20650_v7 }
 0xc28   :  { %9131 = vmatpush1.bf16.msra.mxu0 %v20651_v51 }
 0xc29   :  { %9132 = vmatprep.subr.bf16.mxu0 %v20652_v62 }
 0xc2c   :  { %9133 = vmatpush1.bf16.msra.mxu0 %v20653_v37 }
 0xc2d   :  { %9134 = vmatprep.subr.bf16.mxu0 %v20654_v27 }
 0xc30   :  { %9135 = vmatpush1.bf16.msra.mxu0 %v20655_v29  ;;  %v20677_v29 = vld [vmem:[#allocation66_spill] sm:$0xff] }
 0xc31   :  { %9136 = vmatprep.subr.bf16.mxu0 %v20656_v20 }
 0xc34   :  { %9137 = vmatpush1.bf16.msra.mxu0 %v20657_v43  ;;  %v20678_v43 = vld [vmem:[#allocation67_spill] sm:$0xff] }
 0xc35   :  { %9870 = vmatprep.subr.bf16.mxu0 %v20658_v15 }
 0xc37   :  { %9139 = vmatmul.mubr.bf16.vlgmr.msra.gmra.mrb[112].mxu0 %v18887_v59  ;;  %v19156_v59 = vld [vmem:[#allocation9 + $0x250] ss:$24 sps:$4 sm:$0xff]  }
 0xc38   :  { %9871 = vmatpush1.bf16.msra.mxu0 %v20659_v12  ;;  %20699 = vst [vmem:[#allocation46_spill] sm:$0xff] %v19156_v59 }
 0xc39   :  { %9872 = vmatprep.subr.bf16.mxu0 %v20660_v52 }
 0xc3c   :  { %9873 = vmatpush1.bf16.msra.mxu0 %v20661_v19 }
 0xc3d   :  { %9874 = vmatprep.subr.bf16.mxu0 %v20662_v32 }
 0xc40   :  { %9875 = vmatpush1.bf16.msra.mxu0 %v20663_v42 }
 0xc41   :  { %9876 = vmatprep.subr.bf16.mxu0 %v20664_v28 }
 0xc44   :  { %9877 = vmatpush1.bf16.msra.mxu0 %v20665_v60  ;;  %v20679_v60 = vld [vmem:[#allocation109_spill] sm:$0xff] }
 0xc45   :  { %9878 = vmatprep.subr.bf16.mxu0 %v18748_v0  ;;  %v20667_v0 = vld [vmem:[#allocation85_spill] sm:$0xff] }
 0xc48   :  { %9879 = vmatpush1.bf16.msra.mxu0 %v18752_v34  ;;  %v20668_v34 = vld [vmem:[#allocation84_spill] sm:$0xff] }
 0xc49   :  { %9880 = vmatprep.subr.bf16.mxu0 %v18756_v22  ;;  %v20666_v22 = vld [vmem:[#allocation83_spill] sm:$0xff] }
 0xc4c   :  { %9881 = vmatpush1.bf16.msra.mxu0 %v18760_v46  ;;  %v18960_v46 = vld [vmem:[#allocation9 + $0xf4] ss:$24 sps:$4 sm:$0xff]  }
 0xc4d   :  { %9882 = vmatprep.subr.bf16.mxu0 %v18764_v10  ;;  %v18956_v10 = vld [vmem:[#allocation9 + $0xc0] ss:$24 sps:$4 sm:$0xff]  }
 0xc50   :  { %9883 = vmatpush1.bf16.msra.mxu0 %v18768_v21  ;;  %v18958_v21 = vld [vmem:[#allocation9 + $0xc4] ss:$24 sps:$4 sm:$0xff]  }
 0xc51   :  { %9884 = vmatprep.subr.bf16.mxu0 %v18772_v5  ;;  %9835 = vmatprep.subr.bf16.mxu1 %v18958_v21  ;;  %v20669_v5 = vld [vmem:[#allocation86_spill] sm:$0xff] }
 0xc52   :  { %9836 = vmatpush1.bf16.msra.mxu1 %v18956_v10 }
 0xc53   :  { %9837 = vmatprep.subr.bf16.mxu1 %v18960_v46 }
 0xc54   :  { %9885 = vmatpush1.bf16.msra.mxu0 %v18776_v39  ;;  %v18966_v39 = vld [vmem:[#allocation9 + $0xf0] ss:$24 sps:$4 sm:$0xff]  }
 0xc55   :  { %9886 = vmatprep.subr.bf16.mxu0 %v18780_v38  ;;  %v18969_v38 = vld [vmem:[#allocation9 + $0x124] ss:$24 sps:$4 sm:$0xff]  }
 0xc56   :  { %9838 = vmatpush1.bf16.msra.mxu1 %v18966_v39 }
 0xc57   :  { %9839 = vmatprep.subr.bf16.mxu1 %v18969_v38 }
 0xc58   :  { %9887 = vmatpush1.bf16.msra.mxu0 %v18784_v36  ;;  %v20670_v36 = vld [vmem:[#allocation87_spill] sm:$0xff] }
 0xc59   :  { %9888 = vmatprep.subr.bf16.mxu0 %v18788_v30  ;;  %v20671_v30 = vld [vmem:[#allocation88_spill] sm:$0xff] }
 0xc5c   :  { %9889 = vmatpush1.bf16.msra.mxu0 %v18792_v25  ;;  %v18974_v25 = vld [vmem:[#allocation9 + $0x120] ss:$24 sps:$4 sm:$0xff]  }
 0xc5d   :  { %9890 = vmatprep.subr.bf16.mxu0 %v18800_v24  ;;  %v18977_v24 = vld [vmem:[#allocation9 + $0x154] ss:$24 sps:$4 sm:$0xff]   ;;  %9840 = vmatpush1.bf16.msra.mxu1 %v18974_v25 }
 0xc5e   :  { %9841 = vmatprep.subr.bf16.mxu1 %v18977_v24 }
 0xc60   :  { %9891 = vmatpush1.bf16.msra.mxu0 %v20666_v22 }
 0xc61   :  { %9892 = vmatprep.subr.bf16.mxu0 %v20667_v0  ;;  %9842 = vmatpush1.bf16.msra.mxu1 %v18982_v61  ;;  %v20680_v0 = vld [vmem:[#allocation110_spill] sm:$0xff] }
 0xc62   :  { %9843 = vmatprep.subr.bf16.mxu1 %v18985_v17 }
 0xc64   :  { %9893 = vmatpush1.bf16.msra.mxu0 %v20668_v34 }
 0xc65   :  { %9894 = vmatprep.subr.bf16.mxu0 %v20669_v5  ;;  %9844 = vmatpush1.bf16.msra.mxu1 %v18990_v23 }
 0xc66   :  { %9845 = vmatprep.subr.bf16.mxu1 %v18993_v3 }
 0xc68   :  { %9895 = vmatpush1.bf16.msra.mxu0 %v20670_v36 }
 0xc69   :  { %9896 = vmatprep.subr.bf16.mxu0 %v20671_v30  ;;  %9846 = vmatpush1.bf16.msra.mxu1 %v18997_v31 }
 0xc6a   :  { %9847 = vmatprep.subr.bf16.mxu1 %v19001_v41 }
 0xc6c   :  { %9897 = vmatpush1.bf16.msra.mxu0 %v20672_v4 }
 0xc6d   :  { %9898 = vmatprep.subr.bf16.mxu0 %v20673_v14  ;;  %9848 = vmatpush1.bf16.msra.mxu1 %v19003_v33 }
 0xc6e   :  { %9849 = vmatprep.subr.bf16.mxu1 %v19007_v26 }
 0xc70   :  { %9899 = vmatpush1.bf16.msra.mxu0 %v20674_v47 }
 0xc71   :  { %9900 = vmatprep.subr.bf16.mxu0 %v20675_v44  ;;  %9850 = vmatpush1.bf16.msra.mxu1 %v19009_v9 }
 0xc72   :  { %9851 = vmatprep.subr.bf16.mxu1 %v19012_v58 }
 0xc74   :  { %9901 = vmatpush1.bf16.msra.mxu0 %v20676_v2 }
 0xc75   :  { %9852 = vmatpush1.bf16.msra.mxu1 %v19015_v1 }
 0xc76   :  { %9853 = vmatprep.subr.bf16.mxu1 %v19018_v50 }
 0xc79   :  { %9854 = vmatpush1.bf16.msra.mxu1 %v19021_v6 }
 0xc7a   :  { %9855 = vmatprep.subr.bf16.mxu1 %v19024_v35 }
 0xc7d   :  { %9856 = vmatpush1.bf16.msra.mxu1 %v19027_v8 }
 0xc7e   :  { %9857 = vmatprep.subr.bf16.mxu1 %v19030_v16 }
 0xc81   :  { %9858 = vmatpush1.bf16.msra.mxu1 %v19033_v49 }
 0xc82   :  { %9913 = vmatprep.subr.bf16.mxu1 %v19037_v18 }
 0xcca   :  { %v9054_v11 = vpop.f32.mrb[32].mxu1  ;;  %v9097_v40 = vpop.f32.mrb[80].mxu0 }
 0xccb   :  { %v9056_v63 = vpop.f32.mrb[33].mxu1  ;;  %v9099_v7 = vpop.f32.mrb[81].mxu0  ;;  %v14079_v20 = vadd.f32 %v20677_v29, %v9054_v11  ;;  %v14179_v22 = vadd.f32 %v20679_v60, %v9097_v40 }
 0xccc   :  { %v9058_v51 = vpop.f32.mrb[34].mxu1  ;;  %v9101_v62 = vpop.f32.mrb[82].mxu0  ;;  %v14081_v15 = vadd.f32 %v20678_v43, %v9056_v63  ;;  %v14181_v34 = vadd.f32 %v20680_v0, %v9099_v7 }
 0xccd   :  { %v9060_v37 = vpop.f32.mrb[35].mxu1  ;;  %v9103_v27 = vpop.f32.mrb[83].mxu0  ;;  %v14083_v12 = vadd.f32 %v20677_v29, %v9058_v51  ;;  %v13662_v19 = vmul.f32 -1.442695, %v14079_v20  ;;  %v14183_v5 = vadd.f32 %v20679_v60, %v9101_v62  ;;  %v13666_v30 = vmul.f32 -1.442695, %v14179_v22 }
 0xcce   :  { %v14085_v52 = vadd.f32 %v20678_v43, %v9060_v37  ;;  %v13663_v32 = vmul.f32 -1.442695, %v14081_v15  ;;  %v14185_v36 = vadd.f32 %v20680_v0, %v9103_v27  ;;  %v13667_v4 = vmul.f32 -1.442695, %v14181_v34 }
 0xccf   :  { %v13664_v42 = vmul.f32 -1.442695, %v14083_v12  ;;  %15826 = vpow2.f32 %v13662_v19  ;;  %v13668_v14 = vmul.f32 -1.442695, %v14183_v5 }
 0xcd0   :  { %v13665_v28 = vmul.f32 -1.442695, %v14085_v52  ;;  %15828 = vpow2.f32 %v13663_v32  ;;  %v13669_v44 = vmul.f32 -1.442695, %v14185_v36 }
 0xcd1   :  { %15830 = vpow2.f32 %v13664_v42  ;;  %v20681_v42 = vld [vmem:[#allocation68_spill] sm:$0xff] }
 0xcd2   :  { %15832 = vpow2.f32 %v13665_v28 }
 0xcd3   :  { %15834 = vpow2.f32 %v13666_v30 }
 0xcd4   :  { %15836 = vpow2.f32 %v13667_v4 }
 0xcd5   :  { %15838 = vpow2.f32 %v13668_v14  ;;  %v20682_v14 = vld [vmem:[#allocation48_spill] sm:$0xff] }
 0xcd6   :  { %15840 = vpow2.f32 %v13669_v44 }
 0xcd9   :  { %v15827_v47 = vpop.eup %15826 }
 0xcda   :  { %v15829_v2 = vpop.eup %15828  ;;  %v9165_v51 = vadd.f32 1.0, %v15827_v47  ;;  %v1756_v47 = vadd.f32 %v20682_v14, %v17101_v13 }
 0xcdb   :  { %v15831_v11 = vpop.eup %15830  ;;  %v9166_v40 = vadd.f32 1.0, %v15829_v2 }
 0xcdc   :  { %v15833_v63 = vpop.eup %15832  ;;  %v9167_v37 = vadd.f32 1.0, %v15831_v11  ;;  %15842 = vrcp.f32 %v9165_v51  ;;  %v20683_v51 = vld [vmem:[#allocation49_spill] sm:$0xff] }
 0xcdd   :  { %v9168_v7 = vadd.f32 1.0, %v15833_v63  ;;  %15844 = vrcp.f32 %v9166_v40  ;;  %v15835_v62 = vpop.eup %15834  ;;  %v1758_v40 = vadd.f32 %v20683_v51, %v17106_v57 }
 0xcde   :  { %15846 = vrcp.f32 %v9167_v37  ;;  %v15837_v27 = vpop.eup %15836  ;;  %v9193_v12 = vadd.f32 1.0, %v15835_v62 }
 0xcdf   :  { %15848 = vrcp.f32 %v9168_v7  ;;  %v15839_v20 = vpop.eup %15838  ;;  %v9194_v52 = vadd.f32 1.0, %v15837_v27  ;;  %v20684_v27 = vld [vmem:[#allocation50_spill] sm:$0xff] }
 0xce0   :  { %v15841_v15 = vpop.eup %15840  ;;  %v9195_v32 = vadd.f32 1.0, %v15839_v20  ;;  %15850 = vrcp.f32 %v9193_v12  ;;  %v1760_v20 = vadd.f32 %v20684_v27, %v17101_v13  ;;  %v20685_v12 = vld [vmem:[#allocation51_spill] sm:$0xff] }
 0xce1   :  { %v9196_v5 = vadd.f32 1.0, %v15841_v15  ;;  %15852 = vrcp.f32 %v9194_v52 }
 0xce2   :  { %15854 = vrcp.f32 %v9195_v32 }
 0xce3   :  { %15856 = vrcp.f32 %v9196_v5 }
 0xce6   :  { %v15843_v34 = vpop.eup %15842 }
 0xce7   :  { %v15845_v4 = vpop.eup %15844 }
 0xce8   :  { %v15847_v63 = vpop.eup %15846 }
 0xce9   :  { %v15849_v62 = vpop.eup %15848 }
 0xd0a   :  { %v9140_v19 = vpop.f32.mrb[112].mxu0 }
 0xd0b   :  { %v9141_v28 = vadd.f32 %v9140_v19, %v20681_v42  ;;  %v9142_v22 = vpop.f32.mrb[113].mxu0 }
 0xd0c   :  { %v9143_v36 = vadd.f32 %v9142_v22, %v20360_v48  ;;  %v9144_v30 = vpop.f32.mrb[114].mxu0 }
 0xd0d   :  { %v9205_v44 = vmul.f32 %v15843_v34, %v9141_v28  ;;  %v9145_v2 = vadd.f32 %v9144_v30, %v20681_v42  ;;  %v9146_v11 = vpop.f32.mrb[115].mxu0  ;;  %v1762_v28 = vadd.f32 %v20685_v12, %v17106_v57 }
 0xd0e   :  { %v9206_v37 = vmul.f32 %v15845_v4, %v9143_v36  ;;  %v9147_v7 = vadd.f32 %v9146_v11, %v20360_v48  ;;  %v15851_v36 = vpop.eup %15850 }
 0xd0f   :  { %v9209_v15 = vadd.f32 %v9205_v44, %v1756_v47  ;;  %v9207_v19 = vmul.f32 %v15847_v63, %v9145_v2  ;;  %v15853_v4 = vpop.eup %15852  ;;  %v9217_v51 = vsub.f32 1.0, %v15851_v36  ;;  %v9225_v5 = vmul.f32 %v15851_v36, %v18872_v54  ;;  %v19093_v36 = vld [vmem:[#allocation9 + $0x74] ss:$24 sps:$4 sm:$0xff]  }
 0xd10   :  { %v9210_v22 = vadd.f32 %v9206_v37, %v1758_v40  ;;  %v9208_v34 = vmul.f32 %v15849_v62, %v9147_v7  ;;  %v15855_v14 = vpop.eup %15854  ;;  %v9218_v47 = vsub.f32 1.0, %v15853_v4  ;;  %v9226_v62 = vmul.f32 %v15853_v4, %v18875_v56  ;;  %v19076_v56 = vld [vmem:[#allocation9 + $0x10] ss:$24 sps:$4 sm:$0xff]  }
 0xd11   :  { %15858 = vtanh.f32 %v9209_v15  ;;  %v9211_v30 = vadd.f32 %v9207_v19, %v1760_v20  ;;  %v15857_v11 = vpop.eup %15856  ;;  %v9219_v2 = vsub.f32 1.0, %v15855_v14  ;;  %v9227_v15 = vmul.f32 %v15855_v14, %v18877_v45  ;;  %v19096_v4 = vld [vmem:[#allocation9 + $0x70] ss:$24 sps:$4 sm:$0xff]   ;;  %v19099_v14 = vld [vmem:[#allocation9 + $0xa4] ss:$24 sps:$4 sm:$0xff]  }
 0xd12   :  { %15860 = vtanh.f32 %v9210_v22  ;;  %v9212_v52 = vadd.f32 %v9208_v34, %v1762_v28  ;;  %v9220_v37 = vsub.f32 1.0, %v15857_v11  ;;  %v9228_v28 = vmul.f32 %v15857_v11, %v18879_v53  ;;  %v19090_v53 = vld [vmem:[#allocation9 + $0x40] ss:$24 sps:$4 sm:$0xff]  }
 0xd13   :  { %15862 = vtanh.f32 %v9211_v30  ;;  %v19102_v11 = vld [vmem:[#allocation9 + $0xa0] ss:$24 sps:$4 sm:$0xff]  }
 0xd14   :  { %15864 = vtanh.f32 %v9212_v52  ;;  %v19082_v52 = vld [vmem:[#allocation9 + $0x44] ss:$24 sps:$4 sm:$0xff]  }
 0xd1b   :  { %v15859_v32 = vpop.eup %15858 }
 0xd1c   :  { %v15861_v44 = vpop.eup %15860  ;;  %v9221_v63 = vmul.f32 %v15859_v32, %v9217_v51  ;;  %v19105_v51 = vld [vmem:[#allocation9 + $0xd4] ss:$24 sps:$4 sm:$0xff]   ;;  %v19108_v32 = vld [vmem:[#allocation9 + $0xd0] ss:$24 sps:$4 sm:$0xff]  }
 0xd1d   :  { %v15863_v40 = vpop.eup %15862  ;;  %v9222_v7 = vmul.f32 %v15861_v44, %v9218_v47  ;;  %v19111_v47 = vld [vmem:[#allocation9 + $0x104] ss:$24 sps:$4 sm:$0xff]   ;;  %v19114_v44 = vld [vmem:[#allocation9 + $0x100] ss:$24 sps:$4 sm:$0xff]  }
 0xd1e   :  { %v15865_v27 = vpop.eup %15864  ;;  %v9223_v20 = vmul.f32 %v15863_v40, %v9219_v2  ;;  %v19063_v19 = vadd.f32 %v9225_v5, %v9221_v63  ;;  %v19117_v2 = vld [vmem:[#allocation9 + $0x134] ss:$24 sps:$4 sm:$0xff]   ;;  %v19120_v63 = vld [vmem:[#allocation9 + $0x130] ss:$24 sps:$4 sm:$0xff]   ;;  %v19123_v5 = vld [vmem:[#allocation9 + $0x164] ss:$24 sps:$4 sm:$0xff]  }
 0xd1f   :  { %v9224_v12 = vmul.f32 %v15865_v27, %v9220_v37  ;;  %v19066_v22 = vadd.f32 %v9226_v62, %v9222_v7  ;;  %20688 = vst [vmem:[#allocation98_spill] sm:$0xff] %v19123_v5  ;;  %v19126_v40 = vld [vmem:[#allocation9 + $0x160] ss:$24 sps:$4 sm:$0xff]   ;;  %v19129_v37 = vld [vmem:[#allocation9 + $0x194] ss:$24 sps:$4 sm:$0xff]  }
 0xd20   :  { %v19068_v34 = vadd.f32 %v9227_v15, %v9223_v20  ;;  %20689 = vst [vmem:[#allocation99_spill] sm:$0xff] %v19126_v40  ;;  %20690 = vst [vmem:[#allocation100_spill] sm:$0xff] %v19129_v37  ;;  %v19132_v7 = vld [vmem:[#allocation9 + $0x190] ss:$24 sps:$4 sm:$0xff]   ;;  %v19135_v62 = vld [vmem:[#allocation9 + $0x1c4] ss:$24 sps:$4 sm:$0xff]  }
 0xd21   :  { %v19070_v30 = vadd.f32 %v9228_v28, %v9224_v12  ;;  %20691 = vst [vmem:[#allocation101_spill] sm:$0xff] %v19132_v7  ;;  %20692 = vst [vmem:[#allocation102_spill] sm:$0xff] %v19135_v62  ;;  %v19138_v27 = vld [vmem:[#allocation9 + $0x1c0] ss:$24 sps:$4 sm:$0xff]   ;;  %v19141_v20 = vld [vmem:[#allocation9 + $0x1f4] ss:$24 sps:$4 sm:$0xff]  }
 0xd22   :  { %v19080_v45 = vpack.c.bf16 %v19068_v34, %v19063_v19  ;;  %20693 = vst [vmem:[#allocation40_spill] sm:$0xff] %v19138_v27  ;;  %20694 = vst [vmem:[#allocation41_spill] sm:$0xff] %v19141_v20  ;;  %v19144_v15 = vld [vmem:[#allocation9 + $0x1f0] ss:$24 sps:$4 sm:$0xff]   ;;  %v19147_v12 = vld [vmem:[#allocation9 + $0x224] ss:$24 sps:$4 sm:$0xff]  }
 0xd23   :  { %v19074_v54 = vpack.c.bf16 %v19070_v30, %v19066_v22  ;;  %20695 = vst [vmem:[#allocation42_spill] sm:$0xff] %v19144_v15  ;;  %20696 = vst [vmem:[#allocation43_spill] sm:$0xff] %v19147_v12  ;;  %v19150_v28 = vld [vmem:[#allocation9 + $0x220] ss:$24 sps:$4 sm:$0xff]  }
 0xd24   :  { %20687 = vst [vmem:[#allocation97_spill] sm:$0xff] %v19080_v45  ;;  %20697 = vst [vmem:[#allocation44_spill] sm:$0xff] %v19150_v28 }
 0xd25   :  { %20686 = vst [vmem:[#allocation96_spill] sm:$0xff] %v19074_v54  ;;  %9859 = vmatprep.mubr.bf16.mxu1 %v19074_v54  ;;  %9902 = vmatprep.mubr.bf16.mxu0 %v19074_v54 }
 0xd26   :  { %9860 = vmatmul.mubr.bf16.vlgmr.msra.gmra.mrb[36].mxu1 %v19080_v45  ;;  %9903 = vmatmul.mubr.bf16.vlgmr.msra.gmra.mrb[84].mxu0 %v19080_v45 }
 0xd27   :  { %9914 = vmatpush1.bf16.msra.mxu1 %v19076_v56  ;;  %9945 = vmatprep.mubr.bf16.mxu1 %v19074_v54  ;;  %v19153_v54 = vld [vmem:[#allocation9 + $0x254] ss:$24 sps:$4 sm:$0xff]  }
 0xd28   :  { %9915 = vmatprep.subr.bf16.mxu1 %v19082_v52  ;;  %20698 = vst [vmem:[#allocation45_spill] sm:$0xff] %v19153_v54 }
 0xd2b   :  { %9916 = vmatpush1.bf16.msra.mxu1 %v19090_v53 }
 0xd2c   :  { %9917 = vmatprep.subr.bf16.mxu1 %v19093_v36 }
 0xd2f   :  { %9918 = vmatpush1.bf16.msra.mxu1 %v19096_v4 }
 0xd30   :  { %9919 = vmatprep.subr.bf16.mxu1 %v19099_v14 }
 0xd33   :  { %9920 = vmatpush1.bf16.msra.mxu1 %v19102_v11 }
 0xd34   :  { %9921 = vmatprep.subr.bf16.mxu1 %v19105_v51 }
 0xd37   :  { %9922 = vmatpush1.bf16.msra.mxu1 %v19108_v32 }
 0xd38   :  { %9923 = vmatprep.subr.bf16.mxu1 %v19111_v47 }
 0xd3b   :  { %9924 = vmatpush1.bf16.msra.mxu1 %v19114_v44 }
 0xd3c   :  { %9925 = vmatprep.subr.bf16.mxu1 %v19117_v2 }
 0xd3f   :  { %9926 = vmatpush1.bf16.msra.mxu1 %v19120_v63 }
 0xd40   :  { %9927 = vmatprep.subr.bf16.mxu1 %v19123_v5  ;;  %v19240_v5 = vld [vmem:[#allocation9 + $0x12c] ss:$24 sps:$4 sm:$0xff]  }
 0xd43   :  { %9928 = vmatpush1.bf16.msra.mxu1 %v19126_v40  ;;  %v19224_v40 = vld [vmem:[#allocation9 + $0xcc] ss:$24 sps:$4 sm:$0xff]  }
 0xd44   :  { %9929 = vmatprep.subr.bf16.mxu1 %v19129_v37  ;;  %v19218_v37 = vld [vmem:[#allocation9 + $0x98] ss:$24 sps:$4 sm:$0xff]  }
 0xd45   :  { %20713 = vst [vmem:[#allocation30_spill] sm:$0xff] %v19218_v37 }
 0xd47   :  { %9930 = vmatpush1.bf16.msra.mxu1 %v19132_v7  ;;  %v19212_v7 = vld [vmem:[#allocation9 + $0x9c] ss:$24 sps:$4 sm:$0xff]  }
 0xd48   :  { %9931 = vmatprep.subr.bf16.mxu1 %v19135_v62  ;;  %v19203_v62 = vld [vmem:[#allocation9 + $0x64] ss:$24 sps:$4 sm:$0xff]   ;;  %20712 = vst [vmem:[#allocation29_spill] sm:$0xff] %v19212_v7 }
 0xd4b   :  { %9932 = vmatpush1.bf16.msra.mxu1 %v19138_v27  ;;  %v19185_v27 = vld [vmem:[#allocation9 + $0x4] ss:$24 sps:$4 sm:$0xff]  }
 0xd4c   :  { %9933 = vmatprep.subr.bf16.mxu1 %v19141_v20  ;;  %v19162_v20 = vld [vmem:[#allocation9 + $0x280] ss:$24 sps:$4 sm:$0xff]  }
 0xd4d   :  { %20701 = vst [vmem:[#allocation107_spill] sm:$0xff] %v19162_v20 }
 0xd4f   :  { %9934 = vmatpush1.bf16.msra.mxu1 %v19144_v15  ;;  %v19165_v15 = vld [vmem:[#allocation9 + $0x2b4] ss:$24 sps:$4 sm:$0xff]  }
 0xd50   :  { %9935 = vmatprep.subr.bf16.mxu1 %v19147_v12  ;;  %20702 = vst [vmem:[#allocation32_spill] sm:$0xff] %v19165_v15  ;;  %v19168_v12 = vld [vmem:[#allocation9 + $0x2b0] ss:$24 sps:$4 sm:$0xff]  }
 0xd51   :  { %20703 = vst [vmem:[#allocation33_spill] sm:$0xff] %v19168_v12 }
 0xd53   :  { %9936 = vmatpush1.bf16.msra.mxu1 %v19150_v28  ;;  %v19171_v28 = vld [vmem:[#allocation9 + $0x2e4] ss:$24 sps:$4 sm:$0xff]  }
 0xd54   :  { %9937 = vmatprep.subr.bf16.mxu1 %v19153_v54  ;;  %20704 = vst [vmem:[#allocation34_spill] sm:$0xff] %v19171_v28  ;;  %v19174_v54 = vld [vmem:[#allocation9 + $0x2e0] ss:$24 sps:$4 sm:$0xff]  }
 0xd55   :  { %20705 = vst [vmem:[#allocation35_spill] sm:$0xff] %v19174_v54 }
 0xd57   :  { %9938 = vmatpush1.bf16.msra.mxu1 %v19156_v59  ;;  %v19181_v59 = vld [vmem:[#allocation9 + $0xc] ss:$24 sps:$4 sm:$0xff]  }
 0xd58   :  { %9939 = vmatprep.subr.bf16.mxu1 %v19159_v55  ;;  %v19179_v55 = vld [vmem:[#allocation9 + $0x8] ss:$24 sps:$4 sm:$0xff]   ;;  %20707 = vst [vmem:[#allocation37_spill] sm:$0xff] %v19181_v59  ;;  %10677 = vmatprep.subr.bf16.mxu0 %v19181_v59 }
 0xd59   :  { %20706 = vst [vmem:[#allocation36_spill] sm:$0xff] %v19179_v55  ;;  %10678 = vmatpush1.bf16.msra.mxu0 %v19179_v55  ;;  %v19206_v59 = vld [vmem:[#allocation9 + $0x68] ss:$24 sps:$4 sm:$0xff]  }
 0xd5a   :  { %20711 = vst [vmem:[#allocation28_spill] sm:$0xff] %v19206_v59  ;;  %v19210_v55 = vld [vmem:[#allocation9 + $0x60] ss:$24 sps:$4 sm:$0xff]  }
 0xd5b   :  { %9940 = vmatpush1.bf16.msra.mxu1 %v19162_v20  ;;  %v19183_v20 = vld [vmem:[#allocation9] ss:$24 sps:$4 sm:$0xff]  }
 0xd5c   :  { %9941 = vmatprep.subr.bf16.mxu1 %v19165_v15  ;;  %v19187_v15 = vld [vmem:[#allocation9 + $0x3c] ss:$24 sps:$4 sm:$0xff]  }
 0xd5d   :  { %20708 = vst [vmem:[#allocation38_spill] sm:$0xff] %v19187_v15  ;;  %10679 = vmatprep.subr.bf16.mxu0 %v19187_v15  ;;  %v19215_v15 = vld [vmem:[#allocation9 + $0x94] ss:$24 sps:$4 sm:$0xff]  }
 0xd5f   :  { %9942 = vmatpush1.bf16.msra.mxu1 %v19168_v12  ;;  %v19190_v12 = vld [vmem:[#allocation9 + $0x34] ss:$24 sps:$4 sm:$0xff]  }
 0xd60   :  { %9943 = vmatprep.subr.bf16.mxu1 %v19171_v28  ;;  %v19200_v28 = vld [vmem:[#allocation9 + $0x6c] ss:$24 sps:$4 sm:$0xff]  }
 0xd61   :  { %20710 = vst [vmem:[#allocation27_spill] sm:$0xff] %v19200_v28 }
 0xd63   :  { %9944 = vmatpush1.bf16.msra.mxu1 %v19174_v54  ;;  %v19194_v54 = vld [vmem:[#allocation9 + $0x38] ss:$24 sps:$4 sm:$0xff]  }
 0xd64   :  { %10634 = vmatprep.subr.bf16.mxu1 %v19185_v27  ;;  %20709 = vst [vmem:[#allocation39_spill] sm:$0xff] %v19194_v54  ;;  %10680 = vmatpush1.bf16.msra.mxu0 %v19194_v54  ;;  %v19222_v54 = vld [vmem:[#allocation9 + $0x90] ss:$24 sps:$4 sm:$0xff]  }
 0xd65   :  { %10681 = vmatprep.subr.bf16.mxu0 %v19200_v28  ;;  %v19228_v28 = vld [vmem:[#allocation9 + $0xc8] ss:$24 sps:$4 sm:$0xff]  }
 0xd66   :  { %9946 = vmatmul.mubr.bf16.vlgmr.msra.gmra.mrb[116].mxu1 %v19080_v45  ;;  %v19198_v45 = vld [vmem:[#allocation9 + $0x30] ss:$24 sps:$4 sm:$0xff]  }
 0xd67   :  { %10635 = vmatpush1.bf16.msra.mxu1 %v19183_v20 }
 0xd68   :  { %10636 = vmatprep.subr.bf16.mxu1 %v19190_v12  ;;  %10682 = vmatpush1.bf16.msra.mxu0 %v19206_v59  ;;  %v19232_v59 = vld [vmem:[#allocation9 + $0xfc] ss:$24 sps:$4 sm:$0xff]  }
 0xd69   :  { %10683 = vmatprep.subr.bf16.mxu0 %v19212_v7  ;;  %v19236_v7 = vld [vmem:[#allocation9 + $0xf8] ss:$24 sps:$4 sm:$0xff]  }
 0xd6b   :  { %10637 = vmatpush1.bf16.msra.mxu1 %v19198_v45 }
 0xd6c   :  { %10638 = vmatprep.subr.bf16.mxu1 %v19203_v62  ;;  %10684 = vmatpush1.bf16.msra.mxu0 %v19218_v37  ;;  %v19244_v37 = vld [vmem:[#allocation9 + $0x128] ss:$24 sps:$4 sm:$0xff]  }
 0xd6d   :  { %10685 = vmatprep.subr.bf16.mxu0 %v19224_v40 }
 0xd6f   :  { %10639 = vmatpush1.bf16.msra.mxu1 %v19210_v55 }
 0xd70   :  { %10640 = vmatprep.subr.bf16.mxu1 %v19215_v15  ;;  %10686 = vmatpush1.bf16.msra.mxu0 %v19228_v28 }
 0xd71   :  { %10687 = vmatprep.subr.bf16.mxu0 %v19232_v59 }
 0xd73   :  { %10641 = vmatpush1.bf16.msra.mxu1 %v19222_v54 }
 0xd74   :  { %10642 = vmatprep.subr.bf16.mxu1 %v18958_v21  ;;  %10688 = vmatpush1.bf16.msra.mxu0 %v19236_v7  ;;  %v19248_v21 = vld [vmem:[#allocation9 + $0x15c] ss:$24 sps:$4 sm:$0xff]  }
 0xd75   :  { %10689 = vmatprep.subr.bf16.mxu0 %v19240_v5 }
 0xd77   :  { %10643 = vmatpush1.bf16.msra.mxu1 %v18956_v10  ;;  %v19252_v10 = vld [vmem:[#allocation9 + $0x158] ss:$24 sps:$4 sm:$0xff]  }
 0xd78   :  { %10644 = vmatprep.subr.bf16.mxu1 %v18960_v46  ;;  %10690 = vmatpush1.bf16.msra.mxu0 %v19244_v37  ;;  %v19256_v46 = vld [vmem:[#allocation9 + $0x18c] ss:$24 sps:$4 sm:$0xff]  }
 0xd79   :  { %10691 = vmatprep.subr.bf16.mxu0 %v19248_v21 }
 0xd7b   :  { %10645 = vmatpush1.bf16.msra.mxu1 %v18966_v39  ;;  %v19260_v39 = vld [vmem:[#allocation9 + $0x188] ss:$24 sps:$4 sm:$0xff]  }
 0xd7c   :  { %10646 = vmatprep.subr.bf16.mxu1 %v18969_v38  ;;  %10692 = vmatpush1.bf16.msra.mxu0 %v19252_v10  ;;  %v19264_v38 = vld [vmem:[#allocation9 + $0x1bc] ss:$24 sps:$4 sm:$0xff]  }
 0xd7d   :  { %10693 = vmatprep.subr.bf16.mxu0 %v19256_v46 }
 0xd7f   :  { %10647 = vmatpush1.bf16.msra.mxu1 %v18974_v25  ;;  %v19268_v25 = vld [vmem:[#allocation9 + $0x1b8] ss:$24 sps:$4 sm:$0xff]  }
 0xd80   :  { %10648 = vmatprep.subr.bf16.mxu1 %v18977_v24  ;;  %10694 = vmatpush1.bf16.msra.mxu0 %v19260_v39  ;;  %v19276_v24 = vld [vmem:[#allocation9 + $0x1ec] ss:$24 sps:$4 sm:$0xff]  }
 0xd81   :  { %10695 = vmatprep.subr.bf16.mxu0 %v19264_v38 }
 0xd83   :  { %10649 = vmatpush1.bf16.msra.mxu1 %v18982_v61  ;;  %v19278_v61 = vld [vmem:[#allocation9 + $0x1e8] ss:$24 sps:$4 sm:$0xff]  }
 0xd84   :  { %10650 = vmatprep.subr.bf16.mxu1 %v18985_v17  ;;  %10696 = vmatpush1.bf16.msra.mxu0 %v19268_v25  ;;  %20714 = vst [vmem:[#allocation31_spill] sm:$0xff] %v19278_v61  ;;  %v19284_v17 = vld [vmem:[#allocation9 + $0x21c] ss:$24 sps:$4 sm:$0xff]  }
 0xd85   :  { %10697 = vmatprep.subr.bf16.mxu0 %v19276_v24  ;;  %20715 = vst [vmem:[#allocation23_spill] sm:$0xff] %v19284_v17 }
 0xd87   :  { %10651 = vmatpush1.bf16.msra.mxu1 %v18990_v23  ;;  %v19286_v23 = vld [vmem:[#allocation9 + $0x218] ss:$24 sps:$4 sm:$0xff]  }
 0xd88   :  { %10652 = vmatprep.subr.bf16.mxu1 %v18993_v3  ;;  %10698 = vmatpush1.bf16.msra.mxu0 %v19278_v61  ;;  %20716 = vst [vmem:[#allocation72_spill] sm:$0xff] %v19286_v23  ;;  %v19290_v3 = vld [vmem:[#allocation9 + $0x24c] ss:$24 sps:$4 sm:$0xff]  }
 0xd89   :  { %10699 = vmatprep.subr.bf16.mxu0 %v19284_v17  ;;  %20717 = vst [vmem:[#allocation73_spill] sm:$0xff] %v19290_v3 }
 0xd8b   :  { %10653 = vmatpush1.bf16.msra.mxu1 %v18997_v31  ;;  %v19294_v31 = vld [vmem:[#allocation9 + $0x248] ss:$24 sps:$4 sm:$0xff]  }
 0xd8c   :  { %10654 = vmatprep.subr.bf16.mxu1 %v19001_v41  ;;  %10700 = vmatpush1.bf16.msra.mxu0 %v19286_v23  ;;  %20718 = vst [vmem:[#allocation74_spill] sm:$0xff] %v19294_v31  ;;  %v19297_v41 = vld [vmem:[#allocation9 + $0x27c] ss:$24 sps:$4 sm:$0xff]  }
 0xd8d   :  { %10701 = vmatprep.subr.bf16.mxu0 %v19290_v3  ;;  %20719 = vst [vmem:[#allocation76_spill] sm:$0xff] %v19297_v41 }
 0xd8f   :  { %10655 = vmatpush1.bf16.msra.mxu1 %v19003_v33  ;;  %v19302_v33 = vld [vmem:[#allocation9 + $0x278] ss:$24 sps:$4 sm:$0xff]  }
 0xd90   :  { %10656 = vmatprep.subr.bf16.mxu1 %v19007_v26  ;;  %10702 = vmatpush1.bf16.msra.mxu0 %v19294_v31  ;;  %20720 = vst [vmem:[#allocation75_spill] sm:$0xff] %v19302_v33  ;;  %v19305_v26 = vld [vmem:[#allocation9 + $0x2ac] ss:$24 sps:$4 sm:$0xff]  }
 0xd91   :  { %10703 = vmatprep.subr.bf16.mxu0 %v19297_v41  ;;  %20721 = vst [vmem:[#allocation77_spill] sm:$0xff] %v19305_v26 }
 0xd93   :  { %10657 = vmatpush1.bf16.msra.mxu1 %v19009_v9  ;;  %v19310_v9 = vld [vmem:[#allocation9 + $0x2a8] ss:$24 sps:$4 sm:$0xff]  }
 0xd94   :  { %10658 = vmatprep.subr.bf16.mxu1 %v19012_v58  ;;  %10704 = vmatpush1.bf16.msra.mxu0 %v19302_v33  ;;  %20722 = vst [vmem:[#allocation78_spill] sm:$0xff] %v19310_v9  ;;  %v19313_v58 = vld [vmem:[#allocation9 + $0x2dc] ss:$24 sps:$4 sm:$0xff]  }
 0xd95   :  { %10705 = vmatprep.subr.bf16.mxu0 %v19305_v26  ;;  %20723 = vst [vmem:[#allocation79_spill] sm:$0xff] %v19313_v58 }
 0xd97   :  { %10659 = vmatpush1.bf16.msra.mxu1 %v19015_v1  ;;  %v19318_v1 = vld [vmem:[#allocation9 + $0x2d8] ss:$24 sps:$4 sm:$0xff]  }
 0xd98   :  { %10660 = vmatprep.subr.bf16.mxu1 %v19018_v50  ;;  %10706 = vmatpush1.bf16.msra.mxu0 %v19310_v9  ;;  %20724 = vst [vmem:[#allocation80_spill] sm:$0xff] %v19318_v1 }
 0xd99   :  { %10707 = vmatprep.subr.bf16.mxu0 %v19313_v58 }
 0xd9b   :  { %10661 = vmatpush1.bf16.msra.mxu1 %v19021_v6 }
 0xd9c   :  { %10662 = vmatprep.subr.bf16.mxu1 %v19024_v35  ;;  %10708 = vmatpush1.bf16.msra.mxu0 %v19318_v1 }
 0xd9d   :  { %10720 = vmatprep.subr.bf16.mxu0 %v19037_v18 }
 0xd9f   :  { %10663 = vmatpush1.bf16.msra.mxu1 %v19027_v8 }
 0xda0   :  { %10664 = vmatprep.subr.bf16.mxu1 %v19030_v16 }
 0xda3   :  { %10665 = vmatpush1.bf16.msra.mxu1 %v19033_v49 }
 0xda4   :  { %11441 = vmatprep.subr.bf16.mxu1 %v19185_v27 }
 0xdf9   :  { %v9861_v50 = vpop.f32.mrb[36].mxu1  ;;  %v9904_v6 = vpop.f32.mrb[84].mxu0 }
 0xdfa   :  { %v9863_v35 = vpop.f32.mrb[37].mxu1  ;;  %v9906_v8 = vpop.f32.mrb[85].mxu0  ;;  %v14087_v41 = vadd.f32 %v20677_v29, %v9861_v50  ;;  %v14187_v23 = vadd.f32 %v20679_v60, %v9904_v6 }
 0xdfb   :  { %v9865_v26 = vpop.f32.mrb[38].mxu1  ;;  %v9908_v16 = vpop.f32.mrb[86].mxu0  ;;  %v14089_v58 = vadd.f32 %v20678_v43, %v9863_v35  ;;  %v14189_v17 = vadd.f32 %v20680_v0, %v9906_v8 }
 0xdfc   :  { %v9867_v33 = vpop.f32.mrb[39].mxu1  ;;  %v9910_v9 = vpop.f32.mrb[87].mxu0  ;;  %v14091_v49 = vadd.f32 %v20677_v29, %v9865_v26  ;;  %v13766_v31 = vmul.f32 -1.442695, %v14087_v41  ;;  %v14191_v50 = vadd.f32 %v20679_v60, %v9908_v16  ;;  %v13770_v61 = vmul.f32 -1.442695, %v14187_v23 }
 0xdfd   :  { %v14093_v27 = vadd.f32 %v20678_v43, %v9867_v33  ;;  %v13767_v1 = vmul.f32 -1.442695, %v14089_v58  ;;  %v14193_v35 = vadd.f32 %v20680_v0, %v9910_v9  ;;  %v13771_v26 = vmul.f32 -1.442695, %v14189_v17 }
 0xdfe   :  { %v13768_v3 = vmul.f32 -1.442695, %v14091_v49  ;;  %15866 = vpow2.f32 %v13766_v31  ;;  %v13772_v29 = vmul.f32 -1.442695, %v14191_v50 }
 0xdff   :  { %v13769_v18 = vmul.f32 -1.442695, %v14093_v27  ;;  %15868 = vpow2.f32 %v13767_v1  ;;  %v13773_v41 = vmul.f32 -1.442695, %v14193_v35 }
 0xe00   :  { %15870 = vpow2.f32 %v13768_v3 }
 0xe01   :  { %15872 = vpow2.f32 %v13769_v18 }
 0xe02   :  { %15874 = vpow2.f32 %v13770_v61 }
 0xe03   :  { %15876 = vpow2.f32 %v13771_v26 }
 0xe04   :  { %15878 = vpow2.f32 %v13772_v29 }
 0xe05   :  { %15880 = vpow2.f32 %v13773_v41 }
 0xe08   :  { %v15867_v33 = vpop.eup %15866 }
 0xe09   :  { %v15869_v58 = vpop.eup %15868  ;;  %v9972_v3 = vadd.f32 1.0, %v15867_v33 }
 0xe0a   :  { %v15871_v49 = vpop.eup %15870  ;;  %v9973_v1 = vadd.f32 1.0, %v15869_v58 }
 0xe0b   :  { %v15873_v31 = vpop.eup %15872  ;;  %v9974_v6 = vadd.f32 1.0, %v15871_v49  ;;  %15882 = vrcp.f32 %v9972_v3 }
 0xe0c   :  { %v9975_v8 = vadd.f32 1.0, %v15873_v31  ;;  %15884 = vrcp.f32 %v9973_v1  ;;  %v15875_v23 = vpop.eup %15874  ;;  %v20725_v31 = vld [vmem:[#allocation52_spill] sm:$0xff] }
 0xe0d   :  { %15886 = vrcp.f32 %v9974_v6  ;;  %v15877_v17 = vpop.eup %15876  ;;  %v10000_v27 = vadd.f32 1.0, %v15875_v23  ;;  %v1766_v3 = vadd.f32 %v20725_v31, %v17101_v13 }
 0xe0e   :  { %15888 = vrcp.f32 %v9975_v8  ;;  %v15879_v9 = vpop.eup %15878  ;;  %v10001_v18 = vadd.f32 1.0, %v15877_v17  ;;  %v20726_v17 = vld [vmem:[#allocation53_spill] sm:$0xff] }
 0xe0f   :  { %v15881_v16 = vpop.eup %15880  ;;  %v10002_v50 = vadd.f32 1.0, %v15879_v9  ;;  %15890 = vrcp.f32 %v10000_v27  ;;  %v1768_v9 = vadd.f32 %v20726_v17, %v17106_v57  ;;  %v20728_v27 = vld [vmem:[#allocation55_spill] sm:$0xff] }
 0xe10   :  { %v10003_v33 = vadd.f32 1.0, %v15881_v16  ;;  %15892 = vrcp.f32 %v10001_v18 }
 0xe11   :  { %15894 = vrcp.f32 %v10002_v50 }
 0xe12   :  { %15896 = vrcp.f32 %v10003_v33 }
 0xe15   :  { %v15883_v29 = vpop.eup %15882 }
 0xe16   :  { %v15885_v49 = vpop.eup %15884 }
 0xe17   :  { %v15887_v23 = vpop.eup %15886 }
 0xe18   :  { %v15889_v0 = vpop.eup %15888 }
 0xe39   :  { %v9947_v61 = vpop.f32.mrb[116].mxu1 }
 0xe3a   :  { %v9948_v35 = vadd.f32 %v9947_v61, %v20681_v42  ;;  %v9949_v26 = vpop.f32.mrb[117].mxu1 }
 0xe3b   :  { %v9950_v41 = vadd.f32 %v9949_v26, %v20360_v48  ;;  %v9951_v58 = vpop.f32.mrb[118].mxu1  ;;  %v20727_v26 = vld [vmem:[#allocation54_spill] sm:$0xff] }
 0xe3c   :  { %v10012_v1 = vmul.f32 %v15883_v29, %v9948_v35  ;;  %v9952_v6 = vadd.f32 %v9951_v58, %v20681_v42  ;;  %v9953_v8 = vpop.f32.mrb[119].mxu1  ;;  %v1770_v60 = vadd.f32 %v20727_v26, %v17101_v13  ;;  %v1772_v35 = vadd.f32 %v20728_v27, %v17106_v57 }
 0xe3d   :  { %v10013_v61 = vmul.f32 %v15885_v49, %v9950_v41  ;;  %v9954_v16 = vadd.f32 %v9953_v8, %v20360_v48  ;;  %v15891_v41 = vpop.eup %15890 }
 0xe3e   :  { %v10016_v43 = vadd.f32 %v10012_v1, %v1766_v3  ;;  %v10014_v31 = vmul.f32 %v15887_v23, %v9952_v6  ;;  %v15893_v49 = vpop.eup %15892  ;;  %v10024_v26 = vsub.f32 1.0, %v15891_v41  ;;  %v10032_v33 = vmul.f32 %v15891_v41, %v19063_v19  ;;  %v20751_v41 = vld [vmem:[#allocation27_spill] sm:$0xff] }
 0xe3f   :  { %v10017_v29 = vadd.f32 %v10013_v61, %v1768_v9  ;;  %v10015_v58 = vmul.f32 %v15889_v0, %v9954_v16  ;;  %v15895_v8 = vpop.eup %15894  ;;  %v10025_v3 = vsub.f32 1.0, %v15893_v49 }
 0xe40   :  { %15898 = vtanh.f32 %v10016_v43  ;;  %v10018_v42 = vadd.f32 %v10014_v31, %v1770_v60  ;;  %v15897_v17 = vpop.eup %15896  ;;  %v10026_v6 = vsub.f32 1.0, %v15895_v8  ;;  %v10033_v60 = vmul.f32 %v15893_v49, %v19066_v22  ;;  %v20752_v49 = vld [vmem:[#allocation28_spill] sm:$0xff] }
 0xe41   :  { %15900 = vtanh.f32 %v10017_v29  ;;  %v10019_v18 = vadd.f32 %v10015_v58, %v1772_v35  ;;  %v10027_v0 = vsub.f32 1.0, %v15897_v17  ;;  %v10034_v16 = vmul.f32 %v15895_v8, %v19068_v34  ;;  %v20729_v34 = vld [vmem:[#allocation98_spill] sm:$0xff]  ;;  %v20753_v8 = vld [vmem:[#allocation29_spill] sm:$0xff] }
 0xe42   :  { %15902 = vtanh.f32 %v10018_v42  ;;  %v10035_v35 = vmul.f32 %v15897_v17, %v19070_v30  ;;  %v20731_v30 = vld [vmem:[#allocation100_spill] sm:$0xff]  ;;  %v20754_v17 = vld [vmem:[#allocation30_spill] sm:$0xff] }
 0xe43   :  { %15904 = vtanh.f32 %v10019_v18 }
 0xe4a   :  { %v15899_v50 = vpop.eup %15898 }
 0xe4b   :  { %v15901_v1 = vpop.eup %15900  ;;  %v10028_v23 = vmul.f32 %v15899_v50, %v10024_v26  ;;  %v20761_v26 = vld [vmem:[#allocation75_spill] sm:$0xff]  ;;  %v20762_v50 = vld [vmem:[#allocation77_spill] sm:$0xff] }
 0xe4c   :  { %v15903_v9 = vpop.eup %15902  ;;  %v10029_v43 = vmul.f32 %v15901_v1, %v10025_v3  ;;  %v15383_v3 = vld [vmem:[#allocation9 + $0x150] ss:$24 sps:$4 sm:$0xff]   ;;  %v15388_v1 = vld [vmem:[#allocation9 + $0x184] ss:$24 sps:$4 sm:$0xff]  }
 0xe4d   :  { %v15905_v61 = vpop.eup %15904  ;;  %v10030_v42 = vmul.f32 %v15903_v9, %v10026_v6  ;;  %v19348_v31 = vadd.f32 %v10032_v33, %v10028_v23  ;;  %v20763_v6 = vld [vmem:[#allocation78_spill] sm:$0xff]  ;;  %v20764_v23 = vld [vmem:[#allocation79_spill] sm:$0xff] }
 0xe4e   :  { %v10031_v27 = vmul.f32 %v15905_v61, %v10027_v0  ;;  %v19351_v29 = vadd.f32 %v10033_v60, %v10029_v43  ;;  %v15386_v33 = vld [vmem:[#allocation9 + $0x180] ss:$24 sps:$4 sm:$0xff]   ;;  %v15391_v9 = vld [vmem:[#allocation9 + $0x1b4] ss:$24 sps:$4 sm:$0xff]   ;;  %v15389_v43 = vld [vmem:[#allocation9 + $0x1b0] ss:$24 sps:$4 sm:$0xff]  }
 0xe4f   :  { %v19353_v58 = vadd.f32 %v10034_v16, %v10030_v42  ;;  %v20765_v0 = vld [vmem:[#allocation80_spill] sm:$0xff]  ;;  %v15397_v42 = vld [vmem:[#allocation9 + $0x214] ss:$24 sps:$4 sm:$0xff]   ;;  %v15395_v16 = vld [vmem:[#allocation9 + $0x210] ss:$24 sps:$4 sm:$0xff]  }
 0xe50   :  { %v19355_v18 = vadd.f32 %v10035_v35, %v10031_v27  ;;  %v15394_v60 = vld [vmem:[#allocation9 + $0x1e4] ss:$24 sps:$4 sm:$0xff]   ;;  %v15392_v61 = vld [vmem:[#allocation9 + $0x1e0] ss:$24 sps:$4 sm:$0xff]  }
 0xe51   :  { %v19363_v22 = vpack.c.bf16 %v19353_v58, %v19348_v31  ;;  %v15400_v27 = vld [vmem:[#allocation9 + $0x244] ss:$24 sps:$4 sm:$0xff]   ;;  %v15398_v35 = vld [vmem:[#allocation9 + $0x240] ss:$24 sps:$4 sm:$0xff]  }
 0xe52   :  { %v19359_v19 = vpack.c.bf16 %v19355_v18, %v19351_v29 }
 0xe54   :  { %10666 = vmatprep.mubr.bf16.mxu1 %v19359_v19  ;;  %10709 = vmatprep.mubr.bf16.mxu0 %v19359_v19 }
 0xe55   :  { %10667 = vmatmul.mubr.bf16.vlgmr.msra.gmra.mrb[40].mxu1 %v19363_v22  ;;  %10710 = vmatmul.mubr.bf16.vlgmr.msra.gmra.mrb[88].mxu0 %v19363_v22 }
 0xe56   :  { %10721 = vmatpush1.bf16.msra.mxu0 %v19076_v56  ;;  %10752 = vmatprep.mubr.bf16.mxu0 %v19359_v19  ;;  %v20732_v56 = vld [vmem:[#allocation101_spill] sm:$0xff] }
 0xe57   :  { %10722 = vmatprep.subr.bf16.mxu0 %v19082_v52  ;;  %11442 = vmatpush1.bf16.msra.mxu1 %v19183_v20  ;;  %v20735_v52 = vld [vmem:[#allocation41_spill] sm:$0xff]  ;;  %v20748_v20 = vld [vmem:[#allocation36_spill] sm:$0xff] }
 0xe58   :  { %11443 = vmatprep.subr.bf16.mxu1 %v19190_v12  ;;  %v20750_v12 = vld [vmem:[#allocation39_spill] sm:$0xff] }
 0xe5a   :  { %10723 = vmatpush1.bf16.msra.mxu0 %v19090_v53  ;;  %v20736_v53 = vld [vmem:[#allocation42_spill] sm:$0xff] }
 0xe5b   :  { %10724 = vmatprep.subr.bf16.mxu0 %v19093_v36  ;;  %11444 = vmatpush1.bf16.msra.mxu1 %v19198_v45  ;;  %v20733_v45 = vld [vmem:[#allocation102_spill] sm:$0xff]  ;;  %v20737_v36 = vld [vmem:[#allocation43_spill] sm:$0xff] }
 0xe5c   :  { %11445 = vmatprep.subr.bf16.mxu1 %v19203_v62  ;;  %v20747_v62 = vld [vmem:[#allocation37_spill] sm:$0xff] }
 0xe5e   :  { %10725 = vmatpush1.bf16.msra.mxu0 %v19096_v4  ;;  %v20738_v4 = vld [vmem:[#allocation44_spill] sm:$0xff] }
 0xe5f   :  { %10726 = vmatprep.subr.bf16.mxu0 %v19099_v14  ;;  %11446 = vmatpush1.bf16.msra.mxu1 %v19210_v55  ;;  %v20730_v55 = vld [vmem:[#allocation99_spill] sm:$0xff]  ;;  %v20739_v14 = vld [vmem:[#allocation45_spill] sm:$0xff] }
 0xe60   :  { %11447 = vmatprep.subr.bf16.mxu1 %v19215_v15  ;;  %v20749_v15 = vld [vmem:[#allocation38_spill] sm:$0xff] }
 0xe62   :  { %10727 = vmatpush1.bf16.msra.mxu0 %v19102_v11  ;;  %v20740_v11 = vld [vmem:[#allocation46_spill] sm:$0xff] }
 0xe63   :  { %10728 = vmatprep.subr.bf16.mxu0 %v19105_v51  ;;  %11448 = vmatpush1.bf16.msra.mxu1 %v19222_v54  ;;  %v20734_v54 = vld [vmem:[#allocation40_spill] sm:$0xff]  ;;  %v20741_v51 = vld [vmem:[#allocation47_spill] sm:$0xff] }
 0xe66   :  { %10729 = vmatpush1.bf16.msra.mxu0 %v19108_v32  ;;  %v20742_v32 = vld [vmem:[#allocation107_spill] sm:$0xff] }
 0xe67   :  { %10730 = vmatprep.subr.bf16.mxu0 %v19111_v47  ;;  %v20743_v47 = vld [vmem:[#allocation32_spill] sm:$0xff] }
 0xe6a   :  { %10731 = vmatpush1.bf16.msra.mxu0 %v19114_v44  ;;  %v20744_v44 = vld [vmem:[#allocation33_spill] sm:$0xff] }
 0xe6b   :  { %10732 = vmatprep.subr.bf16.mxu0 %v19117_v2  ;;  %v20745_v2 = vld [vmem:[#allocation34_spill] sm:$0xff] }
 0xe6e   :  { %10733 = vmatpush1.bf16.msra.mxu0 %v19120_v63  ;;  %v20746_v63 = vld [vmem:[#allocation35_spill] sm:$0xff] }
 0xe6f   :  { %10734 = vmatprep.subr.bf16.mxu0 %v20729_v34  ;;  %v15403_v34 = vld [vmem:[#allocation9 + $0x274] ss:$24 sps:$4 sm:$0xff]  }
 0xe72   :  { %10735 = vmatpush1.bf16.msra.mxu0 %v20730_v55  ;;  %v15401_v55 = vld [vmem:[#allocation9 + $0x270] ss:$24 sps:$4 sm:$0xff]  }
 0xe73   :  { %10736 = vmatprep.subr.bf16.mxu0 %v20731_v30  ;;  %v15406_v30 = vld [vmem:[#allocation9 + $0x2a4] ss:$24 sps:$4 sm:$0xff]  }
 0xe76   :  { %10737 = vmatpush1.bf16.msra.mxu0 %v20732_v56  ;;  %v15404_v56 = vld [vmem:[#allocation9 + $0x2a0] ss:$24 sps:$4 sm:$0xff]  }
 0xe77   :  { %10738 = vmatprep.subr.bf16.mxu0 %v20733_v45  ;;  %v15409_v45 = vld [vmem:[#allocation9 + $0x2d4] ss:$24 sps:$4 sm:$0xff]  }
 0xe7a   :  { %10739 = vmatpush1.bf16.msra.mxu0 %v20734_v54  ;;  %v15407_v54 = vld [vmem:[#allocation9 + $0x2d0] ss:$24 sps:$4 sm:$0xff]  }
 0xe7b   :  { %10740 = vmatprep.subr.bf16.mxu0 %v20735_v52  ;;  %v15412_v52 = vld [vmem:[#allocation9 + $0x14] ss:$24 sps:$4 sm:$0xff]  }
 0xe7e   :  { %10741 = vmatpush1.bf16.msra.mxu0 %v20736_v53  ;;  %v15415_v53 = vld [vmem:[#allocation10 + $0x4] ss:$8 sps:$4 sm:$0xff]  }
 0xe7f   :  { %10742 = vmatprep.subr.bf16.mxu0 %v20737_v36 }
 0xe82   :  { %10743 = vmatpush1.bf16.msra.mxu0 %v20738_v4 }
 0xe83   :  { %10744 = vmatprep.subr.bf16.mxu0 %v20739_v14 }
 0xe86   :  { %10745 = vmatpush1.bf16.msra.mxu0 %v20740_v11 }
 0xe87   :  { %10746 = vmatprep.subr.bf16.mxu0 %v20741_v51 }
 0xe8a   :  { %10747 = vmatpush1.bf16.msra.mxu0 %v20742_v32 }
 0xe8b   :  { %10748 = vmatprep.subr.bf16.mxu0 %v20743_v47 }
 0xe8e   :  { %10749 = vmatpush1.bf16.msra.mxu0 %v20744_v44 }
 0xe8f   :  { %10750 = vmatprep.subr.bf16.mxu0 %v20745_v2  ;;  %v20766_v2 = vld [vmem:[#allocation66_spill] sm:$0xff] }
 0xe92   :  { %10751 = vmatpush1.bf16.msra.mxu0 %v20746_v63 }
 0xe93   :  { %11484 = vmatprep.subr.bf16.mxu0 %v20747_v62  ;;  %v20767_v62 = vld [vmem:[#allocation67_spill] sm:$0xff] }
 0xe95   :  { %10753 = vmatmul.mubr.bf16.vlgmr.msra.gmra.mrb[116].mxu0 %v19363_v22 }
 0xe96   :  { %11485 = vmatpush1.bf16.msra.mxu0 %v20748_v20 }
 0xe97   :  { %11486 = vmatprep.subr.bf16.mxu0 %v20749_v15 }
 0xe9a   :  { %11487 = vmatpush1.bf16.msra.mxu0 %v20750_v12 }
 0xe9b   :  { %11488 = vmatprep.subr.bf16.mxu0 %v20751_v41 }
 0xe9e   :  { %11489 = vmatpush1.bf16.msra.mxu0 %v20752_v49 }
 0xe9f   :  { %11490 = vmatprep.subr.bf16.mxu0 %v20753_v8 }
 0xea2   :  { %11491 = vmatpush1.bf16.msra.mxu0 %v20754_v17 }
 0xea3   :  { %11492 = vmatprep.subr.bf16.mxu0 %v19224_v40  ;;  %v20756_v40 = vld [vmem:[#allocation23_spill] sm:$0xff] }
 0xea6   :  { %11493 = vmatpush1.bf16.msra.mxu0 %v19228_v28  ;;  %v20757_v28 = vld [vmem:[#allocation72_spill] sm:$0xff] }
 0xea7   :  { %11494 = vmatprep.subr.bf16.mxu0 %v19232_v59  ;;  %v20755_v59 = vld [vmem:[#allocation31_spill] sm:$0xff] }
 0xeaa   :  { %11495 = vmatpush1.bf16.msra.mxu0 %v19236_v7  ;;  %v15379_v7 = vld [vmem:[#allocation9 + $0xf4] ss:$24 sps:$4 sm:$0xff]  }
 0xeab   :  { %11496 = vmatprep.subr.bf16.mxu0 %v19240_v5  ;;  %v15374_v5 = vld [vmem:[#allocation9 + $0xc0] ss:$24 sps:$4 sm:$0xff]  }
 0xeae   :  { %11497 = vmatpush1.bf16.msra.mxu0 %v19244_v37  ;;  %v15376_v37 = vld [vmem:[#allocation9 + $0xc4] ss:$24 sps:$4 sm:$0xff]  }
 0xeaf   :  { %11498 = vmatprep.subr.bf16.mxu0 %v19248_v21  ;;  %11449 = vmatprep.subr.bf16.mxu1 %v15376_v37  ;;  %v20758_v21 = vld [vmem:[#allocation73_spill] sm:$0xff] }
 0xeb0   :  { %11450 = vmatpush1.bf16.msra.mxu1 %v15374_v5  ;;  %v20769_v5 = vld [vmem:[#allocation110_spill] sm:$0xff] }
 0xeb1   :  { %11451 = vmatprep.subr.bf16.mxu1 %v15379_v7 }
 0xeb2   :  { %11499 = vmatpush1.bf16.msra.mxu0 %v19252_v10  ;;  %v15377_v10 = vld [vmem:[#allocation9 + $0xf0] ss:$24 sps:$4 sm:$0xff]  }
 0xeb3   :  { %11500 = vmatprep.subr.bf16.mxu0 %v19256_v46  ;;  %v15382_v46 = vld [vmem:[#allocation9 + $0x124] ss:$24 sps:$4 sm:$0xff]  }
 0xeb4   :  { %11452 = vmatpush1.bf16.msra.mxu1 %v15377_v10 }
 0xeb5   :  { %11453 = vmatprep.subr.bf16.mxu1 %v15382_v46 }
 0xeb6   :  { %11501 = vmatpush1.bf16.msra.mxu0 %v19260_v39  ;;  %v20759_v39 = vld [vmem:[#allocation74_spill] sm:$0xff] }
 0xeb7   :  { %11502 = vmatprep.subr.bf16.mxu0 %v19264_v38  ;;  %v20760_v38 = vld [vmem:[#allocation76_spill] sm:$0xff] }
 0xeba   :  { %11503 = vmatpush1.bf16.msra.mxu0 %v19268_v25  ;;  %v15380_v25 = vld [vmem:[#allocation9 + $0x120] ss:$24 sps:$4 sm:$0xff]  }
 0xebb   :  { %11504 = vmatprep.subr.bf16.mxu0 %v19276_v24  ;;  %v15385_v24 = vld [vmem:[#allocation9 + $0x154] ss:$24 sps:$4 sm:$0xff]   ;;  %11454 = vmatpush1.bf16.msra.mxu1 %v15380_v25 }
 0xebc   :  { %11455 = vmatprep.subr.bf16.mxu1 %v15385_v24 }
 0xebe   :  { %11505 = vmatpush1.bf16.msra.mxu0 %v20755_v59  ;;  %v20768_v59 = vld [vmem:[#allocation109_spill] sm:$0xff] }
 0xebf   :  { %11506 = vmatprep.subr.bf16.mxu0 %v20756_v40  ;;  %11456 = vmatpush1.bf16.msra.mxu1 %v15383_v3 }
 0xec0   :  { %11457 = vmatprep.subr.bf16.mxu1 %v15388_v1 }
 0xec2   :  { %11507 = vmatpush1.bf16.msra.mxu0 %v20757_v28 }
 0xec3   :  { %11508 = vmatprep.subr.bf16.mxu0 %v20758_v21  ;;  %11458 = vmatpush1.bf16.msra.mxu1 %v15386_v33 }
 0xec4   :  { %11459 = vmatprep.subr.bf16.mxu1 %v15391_v9 }
 0xec6   :  { %11509 = vmatpush1.bf16.msra.mxu0 %v20759_v39 }
 0xec7   :  { %11510 = vmatprep.subr.bf16.mxu0 %v20760_v38  ;;  %11460 = vmatpush1.bf16.msra.mxu1 %v15389_v43 }
 0xec8   :  { %11461 = vmatprep.subr.bf16.mxu1 %v15394_v60 }
 0xeca   :  { %11511 = vmatpush1.bf16.msra.mxu0 %v20761_v26 }
 0xecb   :  { %11512 = vmatprep.subr.bf16.mxu0 %v20762_v50  ;;  %11462 = vmatpush1.bf16.msra.mxu1 %v15392_v61 }
 0xecc   :  { %11463 = vmatprep.subr.bf16.mxu1 %v15397_v42 }
 0xece   :  { %11513 = vmatpush1.bf16.msra.mxu0 %v20763_v6 }
 0xecf   :  { %11514 = vmatprep.subr.bf16.mxu0 %v20764_v23  ;;  %11464 = vmatpush1.bf16.msra.mxu1 %v15395_v16  ;;  %v20770_v16 = vld [vmem:[#allocation68_spill] sm:$0xff] }
 0xed0   :  { %11465 = vmatprep.subr.bf16.mxu1 %v15400_v27 }
 0xed2   :  { %11515 = vmatpush1.bf16.msra.mxu0 %v20765_v0 }
 0xed3   :  { %11466 = vmatpush1.bf16.msra.mxu1 %v15398_v35  ;;  %11938 = vmatprep.subr.bf16.mxu0 %v15415_v53 }
 0xed4   :  { %11467 = vmatprep.subr.bf16.mxu1 %v15403_v34 }
 0xed7   :  { %11468 = vmatpush1.bf16.msra.mxu1 %v15401_v55 }
 0xed8   :  { %11469 = vmatprep.subr.bf16.mxu1 %v15406_v30 }
 0xedb   :  { %11470 = vmatpush1.bf16.msra.mxu1 %v15404_v56 }
 0xedc   :  { %11471 = vmatprep.subr.bf16.mxu1 %v15409_v45 }
 0xedf   :  { %11472 = vmatpush1.bf16.msra.mxu1 %v15407_v54  ;;  %v20771_v54 = vld [vmem:[#allocation56_spill] sm:$0xff] }
 0xee0   :  { %11527 = vmatprep.subr.bf16.mxu1 %v15412_v52  ;;  %v1776_v52 = vadd.f32 %v20771_v54, %v17101_v13  ;;  %v15424_v54 = vld [vmem:[#allocation9 + $0x74] ss:$24 sps:$4 sm:$0xff]  }
 0xf28   :  { %v10668_v36 = vpop.f32.mrb[40].mxu1  ;;  %v10711_v4 = vpop.f32.mrb[88].mxu0 }
 0xf29   :  { %v10670_v14 = vpop.f32.mrb[41].mxu1  ;;  %v10713_v11 = vpop.f32.mrb[89].mxu0  ;;  %v14095_v63 = vadd.f32 %v20766_v2, %v10668_v36  ;;  %v14195_v40 = vadd.f32 %v20768_v59, %v10711_v4 }
 0xf2a   :  { %v10672_v51 = vpop.f32.mrb[42].mxu1  ;;  %v10715_v32 = vpop.f32.mrb[90].mxu0  ;;  %v14097_v20 = vadd.f32 %v20767_v62, %v10670_v14  ;;  %v14197_v37 = vadd.f32 %v20769_v5, %v10713_v11  ;;  %v20772_v11 = vld [vmem:[#allocation57_spill] sm:$0xff] }
 0xf2b   :  { %v10674_v47 = vpop.f32.mrb[43].mxu1  ;;  %v10717_v44 = vpop.f32.mrb[91].mxu0  ;;  %v14099_v15 = vadd.f32 %v20766_v2, %v10672_v51  ;;  %v13870_v41 = vmul.f32 -1.442695, %v14095_v63  ;;  %v14199_v7 = vadd.f32 %v20768_v59, %v10715_v32  ;;  %v13874_v21 = vmul.f32 -1.442695, %v14195_v40 }
 0xf2c   :  { %v14101_v12 = vadd.f32 %v20767_v62, %v10674_v47  ;;  %v13871_v49 = vmul.f32 -1.442695, %v14097_v20  ;;  %v14201_v28 = vadd.f32 %v20769_v5, %v10717_v44  ;;  %v13875_v10 = vmul.f32 -1.442695, %v14197_v37  ;;  %v20773_v63 = vld [vmem:[#allocation58_spill] sm:$0xff] }
 0xf2d   :  { %v13872_v8 = vmul.f32 -1.442695, %v14099_v15  ;;  %15906 = vpow2.f32 %v13870_v41  ;;  %v13876_v46 = vmul.f32 -1.442695, %v14199_v7  ;;  %v1778_v51 = vadd.f32 %v20772_v11, %v17106_v57  ;;  %v20774_v41 = vld [vmem:[#allocation59_spill] sm:$0xff] }
 0xf2e   :  { %v13873_v17 = vmul.f32 -1.442695, %v14101_v12  ;;  %15908 = vpow2.f32 %v13871_v49  ;;  %v13877_v38 = vmul.f32 -1.442695, %v14201_v28  ;;  %v1780_v20 = vadd.f32 %v20773_v63, %v17101_v13  ;;  %v15428_v11 = vld [vmem:[#allocation9 + $0xa0] ss:$24 sps:$4 sm:$0xff]  }
 0xf2f   :  { %15910 = vpow2.f32 %v13872_v8  ;;  %v1782_v49 = vadd.f32 %v20774_v41, %v17106_v57  ;;  %v15437_v63 = vld [vmem:[#allocation10 + $0x40] ss:$8 sps:$4 sm:$0xff]   ;;  %v15443_v41 = vld [vmem:[#allocation10 + $0x50] ss:$8 sps:$4 sm:$0xff]  }
 0xf30   :  { %15912 = vpow2.f32 %v13873_v17 }
 0xf31   :  { %15914 = vpow2.f32 %v13874_v21 }
 0xf32   :  { %15916 = vpow2.f32 %v13875_v10 }
 0xf33   :  { %15918 = vpow2.f32 %v13876_v46 }
 0xf34   :  { %15920 = vpow2.f32 %v13877_v38 }
 0xf37   :  { %v15907_v39 = vpop.eup %15906 }
 0xf38   :  { %v15909_v25 = vpop.eup %15908  ;;  %v10779_v50 = vadd.f32 1.0, %v15907_v39 }
 0xf39   :  { %v15911_v24 = vpop.eup %15910  ;;  %v10780_v3 = vadd.f32 1.0, %v15909_v25 }
 0xf3a   :  { %v15913_v26 = vpop.eup %15912  ;;  %v10781_v1 = vadd.f32 1.0, %v15911_v24  ;;  %15922 = vrcp.f32 %v10779_v50 }
 0xf3b   :  { %v10782_v6 = vadd.f32 1.0, %v15913_v26  ;;  %15924 = vrcp.f32 %v10780_v3  ;;  %v15915_v23 = vpop.eup %15914 }
 0xf3c   :  { %15926 = vrcp.f32 %v10781_v1  ;;  %v15917_v33 = vpop.eup %15916  ;;  %v10807_v43 = vadd.f32 1.0, %v15915_v23 }
 0xf3d   :  { %15928 = vrcp.f32 %v10782_v6  ;;  %v15919_v9 = vpop.eup %15918  ;;  %v10808_v60 = vadd.f32 1.0, %v15917_v33 }
 0xf3e   :  { %v15921_v0 = vpop.eup %15920  ;;  %v10809_v42 = vadd.f32 1.0, %v15919_v9  ;;  %15930 = vrcp.f32 %v10807_v43 }
 0xf3f   :  { %v10810_v55 = vadd.f32 1.0, %v15921_v0  ;;  %15932 = vrcp.f32 %v10808_v60 }
 0xf40   :  { %15934 = vrcp.f32 %v10809_v42 }
 0xf41   :  { %15936 = vrcp.f32 %v10810_v55  ;;  %v15421_v55 = vld [vmem:[#allocation10 + $0x14] ss:$8 sps:$4 sm:$0xff]  }
 0xf44   :  { %v15923_v34 = vpop.eup %15922 }
 0xf45   :  { %v15925_v45 = vpop.eup %15924 }
 0xf46   :  { %v15927_v14 = vpop.eup %15926 }
 0xf47   :  { %v15929_v44 = vpop.eup %15928 }
 0xf48   :  { %v15931_v7 = vpop.eup %15930 }
 0xf49   :  { %v15933_v28 = vpop.eup %15932  ;;  %v10831_v46 = vsub.f32 1.0, %v15931_v7  ;;  %v10839_v50 = vmul.f32 %v15931_v7, %v19348_v31  ;;  %v15457_v7 = vld [vmem:[#allocation10 + $0x74] ss:$8 sps:$4 sm:$0xff]  }
 0xf4a   :  { %v15935_v21 = vpop.eup %15934  ;;  %v10832_v38 = vsub.f32 1.0, %v15933_v28  ;;  %v10840_v23 = vmul.f32 %v15933_v28, %v19351_v29  ;;  %v15410_v29 = vld [vmem:[#allocation9 + $0x10] ss:$24 sps:$4 sm:$0xff]   ;;  %v15452_v28 = vld [vmem:[#allocation9 + $0x160] ss:$24 sps:$4 sm:$0xff]  }
 0xf4b   :  { %v15937_v10 = vpop.eup %15936  ;;  %v10833_v24 = vsub.f32 1.0, %v15935_v21  ;;  %v10841_v0 = vmul.f32 %v15935_v21, %v19353_v58  ;;  %v15455_v21 = vld [vmem:[#allocation10 + $0x70] ss:$8 sps:$4 sm:$0xff]  }
 0xf4c   :  { %v10834_v1 = vsub.f32 1.0, %v15937_v10 }
 0xf68   :  { %v10754_v61 = vpop.f32.mrb[116].mxu0 }
 0xf69   :  { %v10755_v27 = vadd.f32 %v10754_v61, %v20770_v16  ;;  %v10756_v35 = vpop.f32.mrb[117].mxu0  ;;  %v10842_v61 = vmul.f32 %v15937_v10, %v19355_v18  ;;  %v15418_v18 = vld [vmem:[#allocation9 + $0x44] ss:$24 sps:$4 sm:$0xff]   ;;  %v15460_v10 = vld [vmem:[#allocation9 + $0x194] ss:$24 sps:$4 sm:$0xff]  }
 0xf6a   :  { %v10757_v30 = vadd.f32 %v10756_v35, %v20360_v48  ;;  %v10758_v56 = vpop.f32.mrb[118].mxu0 }
 0xf6b   :  { %v10819_v53 = vmul.f32 %v15923_v34, %v10755_v27  ;;  %v10759_v36 = vadd.f32 %v10758_v56, %v20770_v16  ;;  %v10760_v4 = vpop.f32.mrb[119].mxu0  ;;  %v15413_v34 = vld [vmem:[#allocation10] ss:$8 sps:$4 sm:$0xff]   ;;  %v15419_v56 = vld [vmem:[#allocation10 + $0x10] ss:$8 sps:$4 sm:$0xff]  }
 0xf6c   :  { %v10820_v32 = vmul.f32 %v15925_v45, %v10757_v30  ;;  %v10761_v47 = vadd.f32 %v10760_v4, %v20360_v48  ;;  %v15416_v30 = vld [vmem:[#allocation9 + $0x40] ss:$24 sps:$4 sm:$0xff]   ;;  %v20775_v45 = vld [vmem:[#allocation70_spill] sm:$0xff]  ;;  %v15430_v4 = vld [vmem:[#allocation9 + $0xa4] ss:$24 sps:$4 sm:$0xff]  }
 0xf6d   :  { %v10823_v15 = vadd.f32 %v10819_v53, %v1776_v52  ;;  %v10821_v12 = vmul.f32 %v15927_v14, %v10759_v36  ;;  %v15427_v52 = vld [vmem:[#allocation10 + $0x24] ss:$8 sps:$4 sm:$0xff]   ;;  %v15422_v53 = vld [vmem:[#allocation9 + $0x70] ss:$24 sps:$4 sm:$0xff]   ;;  %v15433_v14 = vld [vmem:[#allocation10 + $0x34] ss:$8 sps:$4 sm:$0xff]  }
 0xf6e   :  { %v10824_v8 = vadd.f32 %v10820_v32, %v1778_v51  ;;  %v10822_v17 = vmul.f32 %v15929_v44, %v10761_v47  ;;  %v15425_v36 = vld [vmem:[#allocation10 + $0x20] ss:$8 sps:$4 sm:$0xff]   ;;  %v15431_v51 = vld [vmem:[#allocation10 + $0x30] ss:$8 sps:$4 sm:$0xff]   ;;  %v15436_v32 = vld [vmem:[#allocation9 + $0xd4] ss:$24 sps:$4 sm:$0xff]  }
 0xf6f   :  { %15938 = vtanh.f32 %v10823_v15  ;;  %v10825_v40 = vadd.f32 %v10821_v12, %v1780_v20  ;;  %v15439_v47 = vld [vmem:[#allocation10 + $0x44] ss:$8 sps:$4 sm:$0xff]   ;;  %v15434_v44 = vld [vmem:[#allocation9 + $0xd0] ss:$24 sps:$4 sm:$0xff]   ;;  %v15445_v15 = vld [vmem:[#allocation10 + $0x54] ss:$8 sps:$4 sm:$0xff]  }
 0xf70   :  { %15940 = vtanh.f32 %v10824_v8  ;;  %v10826_v37 = vadd.f32 %v10822_v17, %v1782_v49  ;;  %v15442_v20 = vld [vmem:[#allocation9 + $0x104] ss:$24 sps:$4 sm:$0xff]   ;;  %v15440_v12 = vld [vmem:[#allocation9 + $0x100] ss:$24 sps:$4 sm:$0xff]   ;;  %v15448_v49 = vld [vmem:[#allocation9 + $0x134] ss:$24 sps:$4 sm:$0xff]  }
 0xf71   :  { %15942 = vtanh.f32 %v10825_v40  ;;  %v15451_v8 = vld [vmem:[#allocation10 + $0x64] ss:$8 sps:$4 sm:$0xff]   ;;  %v15446_v17 = vld [vmem:[#allocation9 + $0x130] ss:$24 sps:$4 sm:$0xff]  }
 0xf72   :  { %15944 = vtanh.f32 %v10826_v37  ;;  %v15449_v40 = vld [vmem:[#allocation10 + $0x60] ss:$8 sps:$4 sm:$0xff]   ;;  %v15454_v37 = vld [vmem:[#allocation9 + $0x164] ss:$24 sps:$4 sm:$0xff]  }
 0xf79   :  { %v15939_v39 = vpop.eup %15938 }
 0xf7a   :  { %v15941_v25 = vpop.eup %15940  ;;  %v10835_v26 = vmul.f32 %v15939_v39, %v10831_v46  ;;  %v15463_v46 = vld [vmem:[#allocation10 + $0x84] ss:$8 sps:$4 sm:$0xff]   ;;  %v15458_v39 = vld [vmem:[#allocation9 + $0x190] ss:$24 sps:$4 sm:$0xff]  }
 0xf7b   :  { %v15943_v3 = vpop.eup %15942  ;;  %v10836_v6 = vmul.f32 %v15941_v25, %v10832_v38  ;;  %v15461_v38 = vld [vmem:[#allocation10 + $0x80] ss:$8 sps:$4 sm:$0xff]   ;;  %v15466_v25 = vld [vmem:[#allocation9 + $0x1c4] ss:$24 sps:$4 sm:$0xff]  }
 0xf7c   :  { %v15945_v33 = vpop.eup %15944  ;;  %v10837_v9 = vmul.f32 %v15943_v3, %v10833_v24  ;;  %v19464_v43 = vadd.f32 %v10839_v50, %v10835_v26  ;;  %v15469_v24 = vld [vmem:[#allocation10 + $0x94] ss:$8 sps:$4 sm:$0xff]   ;;  %v15464_v26 = vld [vmem:[#allocation9 + $0x1c0] ss:$24 sps:$4 sm:$0xff]  }
 0xf7d   :  { %v10838_v60 = vmul.f32 %v15945_v33, %v10834_v1  ;;  %v19467_v42 = vadd.f32 %v10840_v23, %v10836_v6  ;;  %v15467_v50 = vld [vmem:[#allocation10 + $0x90] ss:$8 sps:$4 sm:$0xff]   ;;  %v15472_v3 = vld [vmem:[#allocation9 + $0x1f4] ss:$24 sps:$4 sm:$0xff]   ;;  %v15473_v23 = vld [vmem:[#allocation10 + $0xa0] ss:$8 sps:$4 sm:$0xff]  }
 0xf7e   :  { %v19469_v27 = vadd.f32 %v10841_v0, %v10837_v9  ;;  %v15475_v1 = vld [vmem:[#allocation10 + $0xa4] ss:$8 sps:$4 sm:$0xff]   ;;  %v15470_v6 = vld [vmem:[#allocation9 + $0x1f0] ss:$24 sps:$4 sm:$0xff]   ;;  %v15481_v9 = vld [vmem:[#allocation10 + $0xb4] ss:$8 sps:$4 sm:$0xff]  }
 0xf7f   :  { %v19471_v35 = vadd.f32 %v10842_v61, %v10838_v60  ;;  %v15478_v33 = vld [vmem:[#allocation9 + $0x224] ss:$24 sps:$4 sm:$0xff]   ;;  %v15476_v0 = vld [vmem:[#allocation9 + $0x220] ss:$24 sps:$4 sm:$0xff]   ;;  %v15484_v61 = vld [vmem:[#allocation9 + $0x254] ss:$24 sps:$4 sm:$0xff]  }
 0xf80   :  { %v19479_v58 = vpack.c.bf16 %v19469_v27, %v19464_v43  ;;  %v15479_v60 = vld [vmem:[#allocation10 + $0xb0] ss:$8 sps:$4 sm:$0xff]  }
 0xf81   :  { %v19475_v31 = vpack.c.bf16 %v19471_v35, %v19467_v42 }
 0xf83   :  { %11473 = vmatprep.mubr.bf16.mxu1 %v19475_v31  ;;  %11516 = vmatprep.mubr.bf16.mxu0 %v19475_v31 }
 0xf84   :  { %11474 = vmatmul.mubr.bf16.vlgmr.msra.gmra.mrb[44].mxu1 %v19479_v58  ;;  %11517 = vmatmul.mubr.bf16.vlgmr.msra.gmra.mrb[92].mxu0 %v19479_v58 }
 0xf85   :  { %11528 = vmatpush1.bf16.msra.mxu1 %v15410_v29  ;;  %11939 = vmatpush1.bf16.msra.mxu0 %v15413_v34  ;;  %v15487_v29 = vld [vmem:[#allocation10 + $0xc4] ss:$8 sps:$4 sm:$0xff]   ;;  %v15482_v34 = vld [vmem:[#allocation9 + $0x250] ss:$24 sps:$4 sm:$0xff]  }
 0xf86   :  { %11559 = vmatprep.mubr.bf16.mxu1 %v19475_v31  ;;  %11970 = vmatprep.mubr.bf16.mxu0 %v20775_v45  ;;  %v15491_v45 = vld [vmem:[#allocation10 + $0xd0] ss:$8 sps:$4 sm:$0xff]  }
 0xf87   :  { %11529 = vmatprep.subr.bf16.mxu1 %v15418_v18  ;;  %11940 = vmatprep.subr.bf16.mxu0 %v15421_v55  ;;  %v15485_v18 = vld [vmem:[#allocation10 + $0xc0] ss:$8 sps:$4 sm:$0xff]   ;;  %v15490_v55 = vld [vmem:[#allocation9 + $0x284] ss:$24 sps:$4 sm:$0xff]  }
 0xf89   :  { %11530 = vmatpush1.bf16.msra.mxu1 %v15416_v30  ;;  %11941 = vmatpush1.bf16.msra.mxu0 %v15419_v56  ;;  %v15493_v30 = vld [vmem:[#allocation10 + $0xd4] ss:$8 sps:$4 sm:$0xff]   ;;  %v15488_v56 = vld [vmem:[#allocation9 + $0x280] ss:$24 sps:$4 sm:$0xff]  }
 0xf8a   :  { %11531 = vmatprep.subr.bf16.mxu1 %v15424_v54  ;;  %11942 = vmatprep.subr.bf16.mxu0 %v15427_v52  ;;  %v15496_v54 = vld [vmem:[#allocation9 + $0x2b4] ss:$24 sps:$4 sm:$0xff]  }
 0xf8b   :  { %v15499_v52 = vld [vmem:[#allocation10 + $0xe4] ss:$8 sps:$4 sm:$0xff]  }
 0xf8d   :  { %11532 = vmatpush1.bf16.msra.mxu1 %v15422_v53  ;;  %11943 = vmatpush1.bf16.msra.mxu0 %v15425_v36  ;;  %v15494_v53 = vld [vmem:[#allocation9 + $0x2b0] ss:$24 sps:$4 sm:$0xff]  }
 0xf8e   :  { %11533 = vmatprep.subr.bf16.mxu1 %v15430_v4  ;;  %11944 = vmatprep.subr.bf16.mxu0 %v15433_v14  ;;  %v15497_v36 = vld [vmem:[#allocation10 + $0xe0] ss:$8 sps:$4 sm:$0xff]   ;;  %v15502_v4 = vld [vmem:[#allocation9 + $0x2e4] ss:$24 sps:$4 sm:$0xff]  }
 0xf8f   :  { %v15505_v14 = vld [vmem:[#allocation10 + $0xf4] ss:$8 sps:$4 sm:$0xff]  }
 0xf91   :  { %11534 = vmatpush1.bf16.msra.mxu1 %v15428_v11  ;;  %11945 = vmatpush1.bf16.msra.mxu0 %v15431_v51  ;;  %v15500_v11 = vld [vmem:[#allocation9 + $0x2e0] ss:$24 sps:$4 sm:$0xff]  }
 0xf92   :  { %11535 = vmatprep.subr.bf16.mxu1 %v15436_v32  ;;  %11946 = vmatprep.subr.bf16.mxu0 %v15439_v47  ;;  %v15503_v51 = vld [vmem:[#allocation10 + $0xf0] ss:$8 sps:$4 sm:$0xff]   ;;  %v20777_v47 = vld [vmem:[#allocation69_spill] sm:$0xff] }
 0xf93   :  { %v20776_v32 = vld [vmem:[#allocation71_spill] sm:$0xff] }
 0xf95   :  { %11536 = vmatpush1.bf16.msra.mxu1 %v15434_v44  ;;  %11947 = vmatpush1.bf16.msra.mxu0 %v15437_v63  ;;  %v20778_v44 = vld [vmem:[#allocation20_spill] sm:$0xff]  ;;  %v20779_v63 = vld [vmem:[#allocation21_spill] sm:$0xff] }
 0xf96   :  { %11537 = vmatprep.subr.bf16.mxu1 %v15442_v20  ;;  %11948 = vmatprep.subr.bf16.mxu0 %v15445_v15  ;;  %v20780_v20 = vld [vmem:[#allocation22_spill] sm:$0xff]  ;;  %v20781_v15 = vld [vmem:[#allocation108_spill] sm:$0xff] }
 0xf99   :  { %11538 = vmatpush1.bf16.msra.mxu1 %v15440_v12  ;;  %11949 = vmatpush1.bf16.msra.mxu0 %v15443_v41  ;;  %v20782_v12 = vld [vmem:[#allocation24_spill] sm:$0xff]  ;;  %v20783_v41 = vld [vmem:[#allocation25_spill] sm:$0xff] }
 0xf9a   :  { %11539 = vmatprep.subr.bf16.mxu1 %v15448_v49  ;;  %11950 = vmatprep.subr.bf16.mxu0 %v15451_v8  ;;  %v20784_v49 = vld [vmem:[#allocation26_spill] sm:$0xff]  ;;  %v20785_v8 = vld [vmem:[#allocation103_spill] sm:$0xff] }
 0xf9d   :  { %11540 = vmatpush1.bf16.msra.mxu1 %v15446_v17  ;;  %11951 = vmatpush1.bf16.msra.mxu0 %v15449_v40  ;;  %v20786_v17 = vld [vmem:[#allocation104_spill] sm:$0xff]  ;;  %v20787_v40 = vld [vmem:[#allocation105_spill] sm:$0xff] }
 0xf9e   :  { %11541 = vmatprep.subr.bf16.mxu1 %v15454_v37  ;;  %11952 = vmatprep.subr.bf16.mxu0 %v15457_v7  ;;  %v20788_v37 = vld [vmem:[#allocation106_spill] sm:$0xff] }
 0xf9f   :  { %v20789_v7 = vld [vmem:[#allocation94_spill] sm:$0xff] }
 0xfa1   :  { %11542 = vmatpush1.bf16.msra.mxu1 %v15452_v28  ;;  %11953 = vmatpush1.bf16.msra.mxu0 %v15455_v21  ;;  %v20790_v28 = vld [vmem:[#allocation95_spill] sm:$0xff]  ;;  %v20791_v21 = vld [vmem:[#allocation96_spill] sm:$0xff] }
 0xfa2   :  { %11543 = vmatprep.subr.bf16.mxu1 %v15460_v10  ;;  %11954 = vmatprep.subr.bf16.mxu0 %v15463_v46  ;;  %v20792_v10 = vld [vmem:[#allocation97_spill] sm:$0xff] }
 0xfa5   :  { %11544 = vmatpush1.bf16.msra.mxu1 %v15458_v39  ;;  %11955 = vmatpush1.bf16.msra.mxu0 %v15461_v38 }
 0xfa6   :  { %11545 = vmatprep.subr.bf16.mxu1 %v15466_v25  ;;  %11956 = vmatprep.subr.bf16.mxu0 %v15469_v24 }
 0xfa9   :  { %11546 = vmatpush1.bf16.msra.mxu1 %v15464_v26  ;;  %11957 = vmatpush1.bf16.msra.mxu0 %v15467_v50 }
 0xfaa   :  { %11547 = vmatprep.subr.bf16.mxu1 %v15472_v3  ;;  %11958 = vmatprep.subr.bf16.mxu0 %v15475_v1 }
 0xfad   :  { %11548 = vmatpush1.bf16.msra.mxu1 %v15470_v6  ;;  %11959 = vmatpush1.bf16.msra.mxu0 %v15473_v23 }
 0xfae   :  { %11549 = vmatprep.subr.bf16.mxu1 %v15478_v33  ;;  %11960 = vmatprep.subr.bf16.mxu0 %v15481_v9 }
 0xfb1   :  { %11550 = vmatpush1.bf16.msra.mxu1 %v15476_v0  ;;  %11961 = vmatpush1.bf16.msra.mxu0 %v15479_v60 }
 0xfb2   :  { %11551 = vmatprep.subr.bf16.mxu1 %v15484_v61  ;;  %11962 = vmatprep.subr.bf16.mxu0 %v15487_v29 }
 0xfb5   :  { %11552 = vmatpush1.bf16.msra.mxu1 %v15482_v34  ;;  %11963 = vmatpush1.bf16.msra.mxu0 %v15485_v18 }
 0xfb6   :  { %11553 = vmatprep.subr.bf16.mxu1 %v15490_v55  ;;  %11964 = vmatprep.subr.bf16.mxu0 %v15493_v30 }
 0xfb9   :  { %11554 = vmatpush1.bf16.msra.mxu1 %v15488_v56  ;;  %11965 = vmatpush1.bf16.msra.mxu0 %v15491_v45 }
 0xfba   :  { %11555 = vmatprep.subr.bf16.mxu1 %v15496_v54  ;;  %11966 = vmatprep.subr.bf16.mxu0 %v15499_v52 }
 0xfbd   :  { %11556 = vmatpush1.bf16.msra.mxu1 %v15494_v53  ;;  %11967 = vmatpush1.bf16.msra.mxu0 %v15497_v36 }
 0xfbe   :  { %11557 = vmatprep.subr.bf16.mxu1 %v15502_v4  ;;  %11968 = vmatprep.subr.bf16.mxu0 %v15505_v14  ;;  %v20793_v4 = vld [vmem:[#allocation60_spill] sm:$0xff] }
 0xfc1   :  { %11558 = vmatpush1.bf16.msra.mxu1 %v15500_v11  ;;  %11969 = vmatpush1.bf16.msra.mxu0 %v15503_v51  ;;  %v20794_v51 = vld [vmem:[#allocation61_spill] sm:$0xff] }
 0xfc4   :  { %11560 = vmatmul.mubr.bf16.vlgmr.msra.gmra.mrb[120].mxu1 %v19479_v58  ;;  %11971 = vmatmul.mubr.bf16.vlgmr.msra.gmra.mrb[120].mxu0 %v20776_v32 }
 0xfc5   :  { %11980 = vmatprep.mubr.bf16.mxu0 %v20777_v47 }
 0xfcc   :  { %11981 = vmatmul.mubr.bf16.gmra.mrb[124].mxu0 %v20778_v44 }
 0xfcd   :  { %11990 = vmatprep.mubr.bf16.mxu0 %v20779_v63 }
 0xfd4   :  { %11991 = vmatmul.mubr.bf16.gmra.mrb[128].mxu0 %v20780_v20  ;;  %v20795_v20 = vld [vmem:[#allocation62_spill] sm:$0xff] }
 0xfd5   :  { %12000 = vmatprep.mubr.bf16.mxu0 %v20781_v15  ;;  %v1786_v15 = vadd.f32 %v20795_v20, %v17101_v13 }
 0xfdc   :  { %12001 = vmatmul.mubr.bf16.gmra.mrb[132].mxu0 %v20782_v12  ;;  %v20796_v12 = vld [vmem:[#allocation63_spill] sm:$0xff] }
 0xfdd   :  { %12010 = vmatprep.mubr.bf16.mxu0 %v20783_v41  ;;  %v1788_v41 = vadd.f32 %v20796_v12, %v17106_v57 }
 0xfe4   :  { %12011 = vmatmul.mubr.bf16.gmra.mrb[136].mxu0 %v20784_v49 }
 0xfe5   :  { %12020 = vmatprep.mubr.bf16.mxu0 %v20785_v8 }
 0xfec   :  { %12021 = vmatmul.mubr.bf16.gmra.mrb[140].mxu0 %v20786_v17  ;;  %v20797_v17 = vld [vmem:[#allocation64_spill] sm:$0xff] }
 0xfed   :  { %12030 = vmatprep.mubr.bf16.mxu0 %v20787_v40  ;;  %v1790_v40 = vadd.f32 %v20797_v17, %v17101_v13 }
 0xff4   :  { %12031 = vmatmul.mubr.bf16.gmra.mrb[144].mxu0 %v20788_v37 }
 0xff5   :  { %12040 = vmatprep.mubr.bf16.mxu0 %v20789_v7 }
 0xffc   :  { %12041 = vmatmul.mubr.bf16.gmra.mrb[148].mxu0 %v20790_v28 }
 0xffd   :  { %12050 = vmatprep.mubr.bf16.mxu0 %v20791_v21 }
0x1004   :  { %12051 = vmatmul.mubr.bf16.gmra.mrb[152].mxu0 %v20792_v10 }
0x1005   :  { %12060 = vmatprep.mubr.bf16.mxu0 %v19359_v19 }
0x100c   :  { %12061 = vmatmul.mubr.bf16.gmra.mrb[156].mxu0 %v19363_v22 }
0x100d   :  { %12070 = vmatprep.mubr.bf16.mxu0 %v19475_v31 }
0x1014   :  { %12071 = vmatmul.mubr.bf16.gmra.mrb[160].mxu0 %v19479_v58 }
0x1057   :  { %v11475_v46 = vpop.f32.mrb[44].mxu1  ;;  %v11518_v39 = vpop.f32.mrb[92].mxu0 }
0x1058   :  { %v11477_v38 = vpop.f32.mrb[45].mxu1  ;;  %v11520_v25 = vpop.f32.mrb[93].mxu0  ;;  %v14103_v1 = vadd.f32 %v20766_v2, %v11475_v46  ;;  %v14203_v9 = vadd.f32 %v20768_v59, %v11518_v39 }
0x1059   :  { %v11479_v24 = vpop.f32.mrb[46].mxu1  ;;  %v11522_v26 = vpop.f32.mrb[94].mxu0  ;;  %v14105_v6 = vadd.f32 %v20767_v62, %v11477_v38  ;;  %v14205_v0 = vadd.f32 %v20769_v5, %v11520_v25 }
0x105a   :  { %v11481_v50 = vpop.f32.mrb[47].mxu1  ;;  %v11524_v3 = vpop.f32.mrb[95].mxu0  ;;  %v14107_v19 = vadd.f32 %v20766_v2, %v11479_v24  ;;  %v13974_v23 = vmul.f32 -1.442695, %v14103_v1  ;;  %v14207_v60 = vadd.f32 %v20768_v59, %v11522_v26  ;;  %v13978_v61 = vmul.f32 -1.442695, %v14203_v9 }
0x105b   :  { %v14109_v22 = vadd.f32 %v20767_v62, %v11481_v50  ;;  %v13975_v31 = vmul.f32 -1.442695, %v14105_v6  ;;  %v14209_v29 = vadd.f32 %v20769_v5, %v11524_v3  ;;  %v13979_v2 = vmul.f32 -1.442695, %v14205_v0  ;;  %v11766_v59 = vld [vmem:[%s20012_s8] sm:$0x3] }
0x105c   :  { %v13976_v33 = vmul.f32 -1.442695, %v14107_v19  ;;  %15946 = vpow2.f32 %v13974_v23  ;;  %v13980_v34 = vmul.f32 -1.442695, %v14207_v60  ;;  %v19521_v14 = vrot.slane %v11766_v59, %v20793_v4  ;;  %v20798_v0 = vld [vmem:[#allocation65_spill] sm:$0xff]  ;;  %s16282_s8 = smov [#allocation13]  }
0x105d   :  { %v13977_v58 = vmul.f32 -1.442695, %v14109_v22  ;;  %15948 = vpow2.f32 %v13975_v31  ;;  %v13981_v18 = vmul.f32 -1.442695, %v14209_v29  ;;  %v19524_v32 = vrot.slane %v11766_v59, %v20794_v51  ;;  %s12540_s13 = sshll.u32 %s16282_s8, 4  ;;  %s12541_s13 = int_to_ptr.vmem [resolvable:$true] %s12540_s13 }
0x105e   :  { %15950 = vpow2.f32 %v13976_v33  ;;  %v1792_v60 = vadd.f32 %v20798_v0, %v17106_v57  ;;  %s16218_s2 = scalar_lea.vmem %s12541_s13, 512  ;;  %p16223_p5 = scmp.lt.s32.totalorder %s12541_s13, %s12541_s13 }
0x105f   :  { %15952 = vpow2.f32 %v13977_v58  ;;  %p16219_p4 = scmp.ne.s32.totalorder %s12541_s13, %s16218_s2  ;;  %p16224_p6 = scmp.lt.s32.totalorder %s16218_s2, %s16218_s2 }
0x1060   :  { %15954 = vpow2.f32 %v13978_v61 }
0x1061   :  { %15956 = vpow2.f32 %v13979_v2  ;;  %p16225_p7 = por %p16224_p6, %p16223_p5 }
0x1062   :  { %15958 = vpow2.f32 %v13980_v34 }
0x1063   :  { %15960 = vpow2.f32 %v13981_v18  ;;  %p16226_p8 = pnand %p16225_p7, %p16219_p4 }
0x1066   :  { %v15947_v62 = vpop.eup %15946 }
0x1067   :  { %v15949_v55 = vpop.eup %15948  ;;  %v11586_v45 = vadd.f32 1.0, %v15947_v62 }
0x1068   :  { %v15951_v30 = vpop.eup %15950  ;;  %v11587_v54 = vadd.f32 1.0, %v15949_v55 }
0x1069   :  { %v15953_v56 = vpop.eup %15952  ;;  %v11588_v52 = vadd.f32 1.0, %v15951_v30  ;;  %15962 = vrcp.f32 %v11586_v45 }
0x106a   :  { %v11589_v53 = vadd.f32 1.0, %v15953_v56  ;;  %15964 = vrcp.f32 %v11587_v54  ;;  %v15955_v5 = vpop.eup %15954 }
0x106b   :  { %15966 = vrcp.f32 %v11588_v52  ;;  %v15957_v36 = vpop.eup %15956  ;;  %v11614_v47 = vadd.f32 1.0, %v15955_v5 }
0x106c   :  { %15968 = vrcp.f32 %v11589_v53  ;;  %v15959_v11 = vpop.eup %15958  ;;  %v11615_v63 = vadd.f32 1.0, %v15957_v36 }
0x106d   :  { %v15961_v44 = vpop.eup %15960  ;;  %v11616_v37 = vadd.f32 1.0, %v15959_v11  ;;  %15970 = vrcp.f32 %v11614_v47 }
0x106e   :  { %v11617_v39 = vadd.f32 1.0, %v15961_v44  ;;  %15972 = vrcp.f32 %v11615_v63 }
0x106f   :  { %15974 = vrcp.f32 %v11616_v37 }
0x1070   :  { %15976 = vrcp.f32 %v11617_v39 }
0x1073   :  { %v15963_v46 = vpop.eup %15962 }
0x1074   :  { %v15965_v50 = vpop.eup %15964 }
0x1075   :  { %v15967_v22 = vpop.eup %15966 }
0x1076   :  { %v15969_v9 = vpop.eup %15968 }
0x1077   :  { %v15971_v54 = vpop.eup %15970 }
0x1078   :  { %v15973_v5 = vpop.eup %15972  ;;  %v11638_v47 = vsub.f32 1.0, %v15971_v54  ;;  %v11646_v12 = vmul.f32 %v15971_v54, %v19464_v43 }
0x1079   :  { %v15975_v36 = vpop.eup %15974  ;;  %v11647_v17 = vmul.f32 %v15973_v5, %v19467_v42 }
0x107a   :  { %v15977_v4 = vpop.eup %15976 }
0x1097   :  { %v11561_v49 = vpop.f32.mrb[120].mxu1  ;;  %v11972_v8 = vpop.f32.mrb[120].mxu0 }
0x1098   :  { %v11562_v7 = vadd.f32 %v11561_v49, %v20770_v16  ;;  %v19534_v28 = vadd.f32 %v11972_v8, %v19521_v14  ;;  %v11563_v21 = vpop.f32.mrb[121].mxu1  ;;  %v11974_v10 = vpop.f32.mrb[121].mxu0 }
0x1099   :  { %v11564_v38 = vadd.f32 %v11563_v21, %v20360_v48  ;;  %v19538_v25 = vadd.f32 %v11974_v10, %v19524_v32  ;;  %v11565_v24 = vpop.f32.mrb[122].mxu1  ;;  %v11976_v26 = vpop.f32.mrb[122].mxu0 }
0x109a   :  { %v11626_v13 = vmul.f32 %v15963_v46, %v11562_v7  ;;  %v11566_v3 = vadd.f32 %v11565_v24, %v20770_v16  ;;  %v19542_v1 = vadd.f32 %v11976_v26, %v19521_v14  ;;  %v11567_v6 = vpop.f32.mrb[123].mxu1  ;;  %v11978_v19 = vpop.f32.mrb[123].mxu0  ;;  %v11641_v46 = vsub.f32 1.0, %v15977_v4 }
0x109b   :  { %v11627_v23 = vmul.f32 %v15965_v50, %v11564_v38  ;;  %v11568_v31 = vadd.f32 %v11567_v6, %v20360_v48  ;;  %v19546_v33 = vadd.f32 %v11978_v19, %v19524_v32  ;;  %v12091_v58 = vmax.f32 %v19534_v28, %v19538_v25 }
0x109c   :  { %v11630_v16 = vadd.f32 %v11626_v13, %v1786_v15  ;;  %v11628_v61 = vmul.f32 %v15967_v22, %v11566_v3  ;;  %v11639_v15 = vsub.f32 1.0, %v15973_v5  ;;  %v11648_v38 = vmul.f32 %v15975_v36, %v19469_v27 }
0x109d   :  { %v11631_v29 = vadd.f32 %v11627_v23, %v1788_v41  ;;  %v11629_v2 = vmul.f32 %v15969_v9, %v11568_v31  ;;  %12092 = vmax.xlane.f32.xlu0 %v12091_v58  ;;  %v12094_v48 = vmax.f32 %v19542_v1, %v19546_v33  ;;  %v11649_v3 = vmul.f32 %v15977_v4, %v19471_v35 }
0x109e   :  { %15978 = vtanh.f32 %v11630_v16  ;;  %v11632_v34 = vadd.f32 %v11628_v61, %v1790_v40  ;;  %v11640_v40 = vsub.f32 1.0, %v15975_v36 }
0x109f   :  { %15980 = vtanh.f32 %v11631_v29  ;;  %v11633_v62 = vadd.f32 %v11629_v2, %v1792_v60  ;;  %v11982_v18 = vpop.f32.mrb[124].mxu0  ;;  %12095 = vmax.xlane.f32.xlu1 %v12094_v48 }
0x10a0   :  { %15982 = vtanh.f32 %v11632_v34  ;;  %v19555_v55 = vadd.f32 %v11982_v18, %v19521_v14  ;;  %v11984_v57 = vpop.f32.mrb[125].mxu0 }
0x10a1   :  { %15984 = vtanh.f32 %v11633_v62  ;;  %v19558_v30 = vadd.f32 %v11984_v57, %v19524_v32  ;;  %v11986_v56 = vpop.f32.mrb[126].mxu0 }
0x10a2   :  { %v11988_v45 = vpop.f32.mrb[127].mxu0  ;;  %v19561_v52 = vadd.f32 %v11986_v56, %v19521_v14 }
0x10a3   :  { %v19564_v53 = vadd.f32 %v11988_v45, %v19524_v32  ;;  %v12097_v59 = vmax.f32 %v19555_v55, %v19558_v30 }
0x10a5   :  { %12098 = vmax.xlane.f32.xlu0 %v12097_v59  ;;  %v12100_v51 = vmax.f32 %v19561_v52, %v19564_v53 }
0x10a7   :  { %v11992_v11 = vpop.f32.mrb[128].mxu0 }
0x10a8   :  { %v15979_v44 = vpop.eup %15978  ;;  %v19571_v63 = vadd.f32 %v11992_v11, %v19521_v14  ;;  %v11994_v20 = vpop.f32.mrb[129].mxu0 }
0x10a9   :  { %v15981_v41 = vpop.eup %15980  ;;  %v19575_v49 = vadd.f32 %v11994_v20, %v19524_v32  ;;  %v11996_v8 = vpop.f32.mrb[130].mxu0  ;;  %12101 = vmax.xlane.f32.xlu0 %v12100_v51  ;;  %v11642_v37 = vmul.f32 %v15979_v44, %v11638_v47 }
0x10aa   :  { %v15983_v7 = vpop.eup %15982  ;;  %v19579_v21 = vadd.f32 %v11996_v8, %v19521_v14  ;;  %v11998_v10 = vpop.f32.mrb[131].mxu0  ;;  %v11643_v39 = vmul.f32 %v15981_v41, %v11639_v15 }
0x10ab   :  { %v15985_v43 = vpop.eup %15984  ;;  %v19583_v24 = vadd.f32 %v11998_v10, %v19524_v32  ;;  %v12103_v26 = vmax.f32 %v19571_v63, %v19575_v49  ;;  %v11644_v50 = vmul.f32 %v15983_v7, %v11640_v40  ;;  %v11650_v42 = vadd.f32 %v11646_v12, %v11642_v37 }
0x10ac   :  { %v11645_v13 = vmul.f32 %v15985_v43, %v11641_v46  ;;  %v11651_v6 = vadd.f32 %v11647_v17, %v11643_v39 }
0x10ad   :  { %12104 = vmax.xlane.f32.xlu1 %v12103_v26  ;;  %v12106_v19 = vmax.f32 %v19579_v21, %v19583_v24  ;;  %v11652_v22 = vadd.f32 %v11648_v38, %v11644_v50  ;;  %11658 = vst [vmem:[#allocation13] sm:$0xff] %v11650_v42 }
0x10ae   :  { %v11653_v27 = vadd.f32 %v11649_v3, %v11645_v13  ;;  %11659 = vst [vmem:[#allocation13 + $0x8] sm:$0xff] %v11651_v6 }
0x10af   :  { %v12002_v23 = vpop.f32.mrb[132].mxu0  ;;  %12107 = vmax.xlane.f32.xlu0 %v12106_v19  ;;  %11660 = vst [vmem:[#allocation13 + $0x10] sm:$0xff] %v11652_v22  ;;  %v11732_v31 = vpack.c.bf16 %v11652_v22, %v11650_v42 }
0x10b0   :  { %v19591_v58 = vadd.f32 %v12002_v23, %v19521_v14  ;;  %v12004_v9 = vpop.f32.mrb[133].mxu0  ;;  %11661 = vst [vmem:[#allocation13 + $0x18] sm:$0xff] %v11653_v27  ;;  %v11733_v0 = vpack.c.bf16 %v11653_v27, %v11651_v6 }
0x10b1   :  { %v19594_v35 = vadd.f32 %v12004_v9, %v19524_v32  ;;  %v12006_v60 = vpop.f32.mrb[134].mxu0 }
0x10b2   :  { %v19597_v16 = vadd.f32 %v12006_v60, %v19521_v14  ;;  %v12008_v61 = vpop.f32.mrb[135].mxu0  ;;  %12080 = vmatprep.mubr.bf16.mxu0 %v11733_v0 }
0x10b3   :  { %v19600_v29 = vadd.f32 %v12008_v61, %v19524_v32  ;;  %12081 = vmatmul.mubr.bf16.gmra.mrb[164].mxu0 %v11732_v31  ;;  %v12109_v2 = vmax.f32 %v19591_v58, %v19594_v35 }
0x10b5   :  { %12110 = vmax.xlane.f32.xlu1 %v12109_v2  ;;  %v12112_v48 = vmax.f32 %v19597_v16, %v19600_v29 }
0x10b7   :  { %v12012_v34 = vpop.f32.mrb[136].mxu0  ;;  %12113 = vmax.xlane.f32.xlu0 %v12112_v48 }
0x10b8   :  { %v19607_v62 = vadd.f32 %v12012_v34, %v19521_v14  ;;  %v12014_v18 = vpop.f32.mrb[137].mxu0 }
0x10b9   :  { %v19610_v57 = vadd.f32 %v12014_v18, %v19524_v32  ;;  %v12016_v56 = vpop.f32.mrb[138].mxu0 }
0x10ba   :  { %v19613_v45 = vadd.f32 %v12016_v56, %v19521_v14  ;;  %v12018_v54 = vpop.f32.mrb[139].mxu0 }
0x10bb   :  { %v19616_v59 = vadd.f32 %v12018_v54, %v19524_v32  ;;  %v12115_v5 = vmax.f32 %v19607_v62, %v19610_v57 }
0x10bd   :  { %12116 = vmax.xlane.f32.xlu1 %v12115_v5  ;;  %v12118_v36 = vmax.f32 %v19613_v45, %v19616_v59 }
0x10bf   :  { %v12022_v4 = vpop.f32.mrb[140].mxu0  ;;  %12119 = vmax.xlane.f32.xlu0 %v12118_v36 }
0x10c0   :  { %v19623_v11 = vadd.f32 %v12022_v4, %v19521_v14  ;;  %v12024_v51 = vpop.f32.mrb[141].mxu0 }
0x10c1   :  { %v19626_v47 = vadd.f32 %v12024_v51, %v19524_v32  ;;  %v12026_v44 = vpop.f32.mrb[142].mxu0 }
0x10c2   :  { %v19629_v20 = vadd.f32 %v12026_v44, %v19521_v14  ;;  %v12028_v15 = vpop.f32.mrb[143].mxu0 }
0x10c3   :  { %v19632_v12 = vadd.f32 %v12028_v15, %v19524_v32  ;;  %v12121_v41 = vmax.f32 %v19623_v11, %v19626_v47 }
0x10c5   :  { %12122 = vmax.xlane.f32.xlu1 %v12121_v41  ;;  %v12124_v8 = vmax.f32 %v19629_v20, %v19632_v12 }
0x10c7   :  { %v12032_v17 = vpop.f32.mrb[144].mxu0  ;;  %12125 = vmax.xlane.f32.xlu0 %v12124_v8 }
0x10c8   :  { %v19639_v40 = vadd.f32 %v12032_v17, %v19521_v14  ;;  %v12034_v37 = vpop.f32.mrb[145].mxu0 }
0x10c9   :  { %v19642_v7 = vadd.f32 %v12034_v37, %v19524_v32  ;;  %v12036_v10 = vpop.f32.mrb[146].mxu0 }
0x10ca   :  { %v19645_v46 = vadd.f32 %v12036_v10, %v19521_v14  ;;  %v12038_v39 = vpop.f32.mrb[147].mxu0 }
0x10cb   :  { %v19648_v38 = vadd.f32 %v12038_v39, %v19524_v32  ;;  %v12127_v43 = vmax.f32 %v19639_v40, %v19642_v7 }
0x10cd   :  { %12128 = vmax.xlane.f32.xlu1 %v12127_v43  ;;  %v12130_v26 = vmax.f32 %v19645_v46, %v19648_v38 }
0x10cf   :  { %v12042_v50 = vpop.f32.mrb[148].mxu0  ;;  %12131 = vmax.xlane.f32.xlu0 %v12130_v26 }
0x10d0   :  { %v19655_v42 = vadd.f32 %v12042_v50, %v19521_v14  ;;  %v12044_v13 = vpop.f32.mrb[149].mxu0 }
0x10d1   :  { %v19658_v3 = vadd.f32 %v12044_v13, %v19524_v32  ;;  %v12046_v6 = vpop.f32.mrb[150].mxu0 }
0x10d2   :  { %v19661_v19 = vadd.f32 %v12046_v6, %v19521_v14  ;;  %v12048_v22 = vpop.f32.mrb[151].mxu0 }
0x10d3   :  { %v19664_v27 = vadd.f32 %v12048_v22, %v19524_v32  ;;  %v12133_v23 = vmax.f32 %v19655_v42, %v19658_v3 }
0x10d5   :  { %12134 = vmax.xlane.f32.xlu1 %v12133_v23  ;;  %v12136_v31 = vmax.f32 %v19661_v19, %v19664_v27 }
0x10d7   :  { %v12052_v9 = vpop.f32.mrb[152].mxu0  ;;  %12137 = vmax.xlane.f32.xlu0 %v12136_v31 }
0x10d8   :  { %v19671_v0 = vadd.f32 %v12052_v9, %v19521_v14  ;;  %v12054_v60 = vpop.f32.mrb[153].mxu0 }
0x10d9   :  { %v19674_v61 = vadd.f32 %v12054_v60, %v19524_v32  ;;  %v12056_v2 = vpop.f32.mrb[154].mxu0 }
0x10da   :  { %v19677_v48 = vadd.f32 %v12056_v2, %v19521_v14  ;;  %v12058_v34 = vpop.f32.mrb[155].mxu0 }
0x10db   :  { %v19680_v18 = vadd.f32 %v12058_v34, %v19524_v32  ;;  %v12139_v56 = vmax.f32 %v19671_v0, %v19674_v61 }
0x10dd   :  { %12140 = vmax.xlane.f32.xlu1 %v12139_v56  ;;  %v12142_v54 = vmax.f32 %v19677_v48, %v19680_v18 }
0x10df   :  { %v12062_v5 = vpop.f32.mrb[156].mxu0  ;;  %12143 = vmax.xlane.f32.xlu0 %v12142_v54 }
0x10e0   :  { %v19687_v36 = vadd.f32 %v12062_v5, %v19521_v14  ;;  %v12064_v4 = vpop.f32.mrb[157].mxu0 }
0x10e1   :  { %v19690_v51 = vadd.f32 %v12064_v4, %v19524_v32  ;;  %v12066_v44 = vpop.f32.mrb[158].mxu0 }
0x10e2   :  { %v19693_v15 = vadd.f32 %v12066_v44, %v19521_v14  ;;  %v12068_v41 = vpop.f32.mrb[159].mxu0 }
0x10e3   :  { %v19696_v8 = vadd.f32 %v12068_v41, %v19524_v32  ;;  %v12145_v17 = vmax.f32 %v19687_v36, %v19690_v51 }
0x10e5   :  { %12146 = vmax.xlane.f32.xlu1 %v12145_v17  ;;  %v12148_v37 = vmax.f32 %v19693_v15, %v19696_v8 }
0x10e7   :  { %v12072_v10 = vpop.f32.mrb[160].mxu0  ;;  %12149 = vmax.xlane.f32.xlu0 %v12148_v37 }
0x10e8   :  { %v19703_v39 = vadd.f32 %v12072_v10, %v19521_v14  ;;  %v12074_v43 = vpop.f32.mrb[161].mxu0 }
0x10e9   :  { %v19706_v26 = vadd.f32 %v12074_v43, %v19524_v32  ;;  %v12076_v50 = vpop.f32.mrb[162].mxu0 }
0x10ea   :  { %v19709_v13 = vadd.f32 %v12076_v50, %v19521_v14  ;;  %v12078_v6 = vpop.f32.mrb[163].mxu0 }
0x10eb   :  { %v19712_v22 = vadd.f32 %v12078_v6, %v19524_v32  ;;  %v12151_v23 = vmax.f32 %v19703_v39, %v19706_v26 }
0x10ed   :  { %12152 = vmax.xlane.f32.xlu1 %v12151_v23  ;;  %v12154_v31 = vmax.f32 %v19709_v13, %v19712_v22 }
0x10ef   :  { %12155 = vmax.xlane.f32.xlu0 %v12154_v31 }
0x112a   :  { %v12093_v9 = vpop.xlane.xlu0 %12092 }
0x112b   :  { %v19719_v34 = vsub.f32 %v19534_v28, %v12093_v9  ;;  %v19722_v56 = vsub.f32 %v19538_v25, %v12093_v9 }
0x112c   :  { %v12096_v2 = vpop.xlane.xlu1 %12095 }
0x112d   :  { %v19725_v54 = vsub.f32 %v19542_v1, %v12096_v2  ;;  %v19728_v5 = vsub.f32 %v19546_v33, %v12096_v2  ;;  %v12211_v44 = vmul.f32 1.442695, %v19719_v34  ;;  %v12213_v17 = vmul.f32 1.442695, %v19722_v56 }
0x112f   :  { %v12215_v25 = vmul.f32 1.442695, %v19725_v54  ;;  %v12217_v33 = vmul.f32 1.442695, %v19728_v5  ;;  %15986 = vpow2.f32 %v12211_v44 }
0x1130   :  { %15988 = vpow2.f32 %v12213_v17 }
0x1131   :  { %15990 = vpow2.f32 %v12215_v25 }
0x1132   :  { %v12099_v60 = vpop.xlane.xlu0 %12098  ;;  %15992 = vpow2.f32 %v12217_v33 }
0x1133   :  { %v19732_v41 = vsub.f32 %v19555_v55, %v12099_v60  ;;  %v19736_v28 = vsub.f32 %v19558_v30, %v12099_v60 }
0x1135   :  { %v12219_v55 = vmul.f32 1.442695, %v19732_v41  ;;  %v12221_v30 = vmul.f32 1.442695, %v19736_v28 }
0x1136   :  { %v12102_v4 = vpop.xlane.xlu0 %12101 }
0x1137   :  { %v19740_v1 = vsub.f32 %v19561_v52, %v12102_v4  ;;  %v19744_v10 = vsub.f32 %v19564_v53, %v12102_v4  ;;  %15994 = vpow2.f32 %v12219_v55 }
0x1138   :  { %15996 = vpow2.f32 %v12221_v30 }
0x1139   :  { %v12223_v52 = vmul.f32 1.442695, %v19740_v1  ;;  %v12225_v31 = vmul.f32 1.442695, %v19744_v10 }
0x113a   :  { %v12105_v37 = vpop.xlane.xlu1 %12104 }
0x113b   :  { %v19748_v50 = vsub.f32 %v19571_v63, %v12105_v37  ;;  %v19752_v6 = vsub.f32 %v19575_v49, %v12105_v37  ;;  %15998 = vpow2.f32 %v12223_v52  ;;  %v15987_v52 = vpop.eup %15986 }
0x113c   :  { %v12108_v43 = vpop.xlane.xlu0 %12107  ;;  %16000 = vpow2.f32 %v12225_v31 }
0x113d   :  { %v19756_v23 = vsub.f32 %v19579_v21, %v12108_v43  ;;  %v12227_v63 = vmul.f32 1.442695, %v19748_v50  ;;  %v19761_v9 = vsub.f32 %v19583_v24, %v12108_v43  ;;  %v12229_v49 = vmul.f32 1.442695, %v19752_v6 }
0x113f   :  { %v12231_v21 = vmul.f32 1.442695, %v19756_v23  ;;  %16002 = vpow2.f32 %v12227_v63  ;;  %v12233_v37 = vmul.f32 1.442695, %v19761_v9 }
0x1140   :  { %16004 = vpow2.f32 %v12229_v49  ;;  %v15989_v49 = vpop.eup %15988 }
0x1141   :  { %16006 = vpow2.f32 %v12231_v21 }
0x1142   :  { %v12111_v53 = vpop.xlane.xlu1 %12110  ;;  %16008 = vpow2.f32 %v12233_v37 }
0x1143   :  { %v19765_v2 = vsub.f32 %v19591_v58, %v12111_v53  ;;  %v19769_v4 = vsub.f32 %v19594_v35, %v12111_v53 }
0x1144   :  { %v12114_v60 = vpop.xlane.xlu0 %12113 }
0x1145   :  { %20799 = vst [vmem:[#allocation81_spill] sm:$0xff] %v19765_v2  ;;  %20800 = vst [vmem:[#allocation82_spill] sm:$0xff] %v19769_v4  ;;  %v19772_v17 = vsub.f32 %v19597_v16, %v12114_v60  ;;  %v19776_v25 = vsub.f32 %v19600_v29, %v12114_v60  ;;  %v12235_v35 = vmul.f32 1.442695, %v19765_v2  ;;  %v12237_v29 = vmul.f32 1.442695, %v19769_v4  ;;  %v15991_v4 = vpop.eup %15990 }
0x1147   :  { %20801 = vst [vmem:[#allocation83_spill] sm:$0xff] %v19772_v17  ;;  %20802 = vst [vmem:[#allocation85_spill] sm:$0xff] %v19776_v25  ;;  %16010 = vpow2.f32 %v12235_v35 }
0x1148   :  { %16012 = vpow2.f32 %v12237_v29 }
0x114a   :  { %v12117_v44 = vpop.xlane.xlu1 %12116 }
0x114b   :  { %v19783_v55 = vsub.f32 %v19607_v62, %v12117_v44  ;;  %v19790_v53 = vsub.f32 %v19610_v57, %v12117_v44  ;;  %v12239_v62 = vmul.f32 1.442695, %v19772_v17  ;;  %v12241_v57 = vmul.f32 1.442695, %v19776_v25 }
0x114c   :  { %v12120_v58 = vpop.xlane.xlu0 %12119 }
0x114d   :  { %20803 = vst [vmem:[#allocation84_spill] sm:$0xff] %v19783_v55  ;;  %20804 = vst [vmem:[#allocation86_spill] sm:$0xff] %v19790_v53  ;;  %v12243_v17 = vmul.f32 1.442695, %v19783_v55  ;;  %v12245_v37 = vmul.f32 1.442695, %v19790_v53  ;;  %16014 = vpow2.f32 %v12239_v62 }
0x114e   :  { %16016 = vpow2.f32 %v12241_v57 }
0x114f   :  { %16018 = vpow2.f32 %v12243_v17 }
0x1150   :  { %16020 = vpow2.f32 %v12245_v37 }
0x1152   :  { %v12123_v31 = vpop.xlane.xlu1 %12122 }
0x1153   :  { %v19816_v25 = vsub.f32 %v19626_v47, %v12123_v31 }
0x1154   :  { %v12126_v44 = vpop.xlane.xlu0 %12125 }
0x1155   :  { %v19820_v55 = vsub.f32 %v19629_v20, %v12126_v44  ;;  %v19824_v29 = vsub.f32 %v19632_v12, %v12126_v44 }
0x1157   :  { %v12255_v44 = vmul.f32 1.442695, %v19820_v55 }
0x115c   :  { %v12132_v53 = vpop.xlane.xlu0 %12131 }
0x115d   :  { %v19836_v17 = vsub.f32 %v19645_v46, %v12132_v53 }
0x1164   :  { %v12138_v37 = vpop.xlane.xlu0 %12137 }
0x1186   :  { %v12082_v24 = vpop.f32.mrb[164].mxu0 }
0x1187   :  { %v19779_v33 = vadd.f32 %v12082_v24, %v19521_v14  ;;  %v12084_v43 = vpop.f32.mrb[165].mxu0  ;;  %v19797_v24 = vsub.f32 %v19613_v45, %v12120_v58  ;;  %v19810_v45 = vsub.f32 %v19623_v11, %v12123_v31  ;;  %v12307_v11 = vadd.f32 %v15989_v49, %v15987_v52 }
0x1188   :  { %v19786_v16 = vadd.f32 %v12084_v43, %v19524_v32  ;;  %v12086_v30 = vpop.f32.mrb[166].mxu0  ;;  %v12253_v52 = vmul.f32 1.442695, %v19816_v25 }
0x1189   :  { %v19793_v63 = vadd.f32 %v12086_v30, %v19521_v14  ;;  %v12088_v60 = vpop.f32.mrb[167].mxu0  ;;  %20805 = vst [vmem:[#allocation87_spill] sm:$0xff] %v19797_v24  ;;  %v19806_v14 = vsub.f32 %v19616_v59, %v12120_v58  ;;  %v15993_v30 = vpop.eup %15992  ;;  %v12247_v35 = vmul.f32 1.442695, %v19797_v24  ;;  %v12251_v31 = vmul.f32 1.442695, %v19810_v45 }
0x118a   :  { %v19800_v43 = vadd.f32 %v12088_v60, %v19524_v32  ;;  %v12157_v21 = vmax.f32 %v19779_v33, %v19786_v16  ;;  %v15995_v60 = vpop.eup %15994  ;;  %v12129_v59 = vpop.xlane.xlu1 %12128  ;;  %v12310_v20 = vadd.f32 %v15993_v30, %v15991_v4  ;;  %v12257_v4 = vmul.f32 1.442695, %v19824_v29 }
0x118b   :  { %v15997_v58 = vpop.eup %15996  ;;  %v12249_v2 = vmul.f32 1.442695, %v19806_v14  ;;  %v19828_v62 = vsub.f32 %v19639_v40, %v12129_v59  ;;  %v19832_v49 = vsub.f32 %v19642_v7, %v12129_v59  ;;  %16022 = vpow2.f32 %v12247_v35 }
0x118c   :  { %12158 = vmax.xlane.f32.xlu1 %v12157_v21  ;;  %v12160_v32 = vmax.f32 %v19793_v63, %v19800_v43  ;;  %v15999_v21 = vpop.eup %15998  ;;  %v12313_v40 = vadd.f32 %v15997_v58, %v15995_v60  ;;  %v19840_v30 = vsub.f32 %v19648_v38, %v12132_v53  ;;  %v12263_v38 = vmul.f32 1.442695, %v19836_v17 }
0x118d   :  { %v16001_v47 = vpop.eup %16000  ;;  %16024 = vpow2.f32 %v12249_v2  ;;  %v12259_v7 = vmul.f32 1.442695, %v19828_v62  ;;  %v12261_v60 = vmul.f32 1.442695, %v19832_v49  ;;  %v19852_v53 = vsub.f32 %v19661_v19, %v12138_v37 }
0x118e   :  { %12161 = vmax.xlane.f32.xlu0 %v12160_v32  ;;  %v16003_v24 = vpop.eup %16002  ;;  %v12135_v57 = vpop.xlane.xlu1 %12134  ;;  %16026 = vpow2.f32 %v12251_v31  ;;  %v12316_v35 = vadd.f32 %v16001_v47, %v15999_v21  ;;  %v12265_v21 = vmul.f32 1.442695, %v19840_v30  ;;  %v19856_v47 = vsub.f32 %v19664_v27, %v12138_v37 }
0x118f   :  { %v16005_v12 = vpop.eup %16004  ;;  %v19844_v59 = vsub.f32 %v19655_v42, %v12135_v57  ;;  %16028 = vpow2.f32 %v12253_v52  ;;  %v19848_v2 = vsub.f32 %v19658_v3, %v12135_v57 }
0x1190   :  { %12308 = vadd.xlane.f32.xlu1 %v12307_v11  ;;  %v16007_v32 = vpop.eup %16006  ;;  %16030 = vpow2.f32 %v12255_v44  ;;  %v12319_v42 = vadd.f32 %v16005_v12, %v16003_v24 }
0x1191   :  { %v16009_v46 = vpop.eup %16008  ;;  %16032 = vpow2.f32 %v12257_v4  ;;  %v12267_v52 = vmul.f32 1.442695, %v19844_v59  ;;  %v12269_v24 = vmul.f32 1.442695, %v19848_v2  ;;  %v12271_v4 = vmul.f32 1.442695, %v19852_v53 }
0x1192   :  { %12311 = vadd.xlane.f32.xlu0 %v12310_v20  ;;  %v12141_v58 = vpop.xlane.xlu1 %12140  ;;  %v16011_v11 = vpop.eup %16010  ;;  %16034 = vpow2.f32 %v12259_v7  ;;  %v12322_v19 = vadd.f32 %v16009_v46, %v16007_v32  ;;  %v12273_v32 = vmul.f32 1.442695, %v19856_v47 }
0x1193   :  { %v16013_v31 = vpop.eup %16012  ;;  %v12144_v20 = vpop.xlane.xlu0 %12143  ;;  %v19860_v57 = vsub.f32 %v19671_v0, %v12141_v58  ;;  %16036 = vpow2.f32 %v12261_v60  ;;  %v19864_v12 = vsub.f32 %v19674_v61, %v12141_v58 }
0x1194   :  { %12314 = vadd.xlane.f32.xlu1 %v12313_v40  ;;  %v16015_v3 = vpop.eup %16014  ;;  %16038 = vpow2.f32 %v12263_v38  ;;  %v19868_v37 = vsub.f32 %v19677_v48, %v12144_v20  ;;  %v12325_v0 = vadd.f32 %v16013_v31, %v16011_v11 }
0x1195   :  { %v16017_v44 = vpop.eup %16016  ;;  %16040 = vpow2.f32 %v12265_v21  ;;  %v12275_v60 = vmul.f32 1.442695, %v19860_v57  ;;  %v12277_v11 = vmul.f32 1.442695, %v19864_v12 }
0x1196   :  { %12317 = vadd.xlane.f32.xlu0 %v12316_v35  ;;  %v12147_v40 = vpop.xlane.xlu1 %12146  ;;  %v16019_v27 = vpop.eup %16018  ;;  %v19872_v35 = vsub.f32 %v19680_v18, %v12144_v20  ;;  %16042 = vpow2.f32 %v12267_v52  ;;  %v12328_v48 = vadd.f32 %v16017_v44, %v16015_v3  ;;  %v12279_v21 = vmul.f32 1.442695, %v19868_v37 }
0x1197   :  { %v16021_v7 = vpop.eup %16020  ;;  %v12150_v46 = vpop.xlane.xlu0 %12149  ;;  %v19876_v58 = vsub.f32 %v19687_v36, %v12147_v40  ;;  %16044 = vpow2.f32 %v12269_v24 }
0x1198   :  { %12320 = vadd.xlane.f32.xlu1 %v12319_v42  ;;  %v16023_v61 = vpop.eup %16022  ;;  %v19880_v42 = vsub.f32 %v19690_v51, %v12147_v40  ;;  %16046 = vpow2.f32 %v12271_v4  ;;  %v19884_v20 = vsub.f32 %v19693_v15, %v12150_v46  ;;  %v12331_v36 = vadd.f32 %v16021_v7, %v16019_v27 }
0x1199   :  { %v16025_v38 = vpop.eup %16024  ;;  %16048 = vpow2.f32 %v12273_v32  ;;  %v12281_v3 = vmul.f32 1.442695, %v19872_v35  ;;  %v12283_v24 = vmul.f32 1.442695, %v19876_v58 }
0x119a   :  { %12323 = vadd.xlane.f32.xlu0 %v12322_v19  ;;  %v12153_v31 = vpop.xlane.xlu1 %12152  ;;  %v16027_v18 = vpop.eup %16026  ;;  %v19888_v19 = vsub.f32 %v19696_v8, %v12150_v46  ;;  %16050 = vpow2.f32 %v12275_v60  ;;  %v12334_v15 = vadd.f32 %v16025_v38, %v16023_v61  ;;  %v12285_v27 = vmul.f32 1.442695, %v19880_v42 }
0x119b   :  { %v16029_v52 = vpop.eup %16028  ;;  %v12156_v44 = vpop.xlane.xlu0 %12155  ;;  %v19892_v40 = vsub.f32 %v19703_v39, %v12153_v31  ;;  %16052 = vpow2.f32 %v12277_v11  ;;  %v12287_v8 = vmul.f32 1.442695, %v19884_v20 }
0x119c   :  { %12326 = vadd.xlane.f32.xlu1 %v12325_v0  ;;  %v16031_v51 = vpop.eup %16030  ;;  %v19896_v0 = vsub.f32 %v19706_v26, %v12153_v31  ;;  %16054 = vpow2.f32 %v12279_v21  ;;  %v19900_v32 = vsub.f32 %v19709_v13, %v12156_v44  ;;  %v12337_v46 = vadd.f32 %v16029_v52, %v16027_v18 }
0x119d   :  { %v16033_v4 = vpop.eup %16032  ;;  %16056 = vpow2.f32 %v12281_v3  ;;  %v12289_v61 = vmul.f32 1.442695, %v19888_v19  ;;  %v19904_v60 = vsub.f32 %v19712_v22, %v12156_v44  ;;  %v12291_v26 = vmul.f32 1.442695, %v19892_v40 }
0x119e   :  { %12329 = vadd.xlane.f32.xlu0 %v12328_v48  ;;  %v16035_v7 = vpop.eup %16034  ;;  %16058 = vpow2.f32 %v12283_v24  ;;  %v12340_v38 = vadd.f32 %v16033_v4, %v16031_v51  ;;  %v12293_v13 = vmul.f32 1.442695, %v19896_v0  ;;  %v12295_v18 = vmul.f32 1.442695, %v19900_v32 }
0x119f   :  { %v16037_v39 = vpop.eup %16036  ;;  %16060 = vpow2.f32 %v12285_v27  ;;  %v12297_v22 = vmul.f32 1.442695, %v19904_v60 }
0x11a0   :  { %12332 = vadd.xlane.f32.xlu1 %v12331_v36  ;;  %v16039_v48 = vpop.eup %16038  ;;  %16062 = vpow2.f32 %v12287_v8  ;;  %v12343_v21 = vadd.f32 %v16037_v39, %v16035_v7 }
0x11a1   :  { %v16041_v11 = vpop.eup %16040  ;;  %16064 = vpow2.f32 %v12289_v61 }
0x11a2   :  { %12335 = vadd.xlane.f32.xlu0 %v12334_v15  ;;  %v16043_v31 = vpop.eup %16042  ;;  %16066 = vpow2.f32 %v12291_v26  ;;  %v12346_v3 = vadd.f32 %v16041_v11, %v16039_v48 }
0x11a3   :  { %v16045_v36 = vpop.eup %16044  ;;  %16068 = vpow2.f32 %v12293_v13 }
0x11a4   :  { %12338 = vadd.xlane.f32.xlu1 %v12337_v46  ;;  %v16047_v52 = vpop.eup %16046  ;;  %16070 = vpow2.f32 %v12295_v18  ;;  %v12349_v24 = vadd.f32 %v16045_v36, %v16043_v31 }
0x11a5   :  { %v16049_v44 = vpop.eup %16048  ;;  %16072 = vpow2.f32 %v12297_v22 }
0x11a6   :  { %12341 = vadd.xlane.f32.xlu0 %v12340_v38  ;;  %v16051_v51 = vpop.eup %16050  ;;  %v12352_v27 = vadd.f32 %v16049_v44, %v16047_v52 }
0x11a7   :  { %v16053_v15 = vpop.eup %16052 }
0x11a8   :  { %12344 = vadd.xlane.f32.xlu1 %v12343_v21  ;;  %v16055_v4 = vpop.eup %16054  ;;  %v12355_v46 = vadd.f32 %v16053_v15, %v16051_v51 }
0x11a9   :  { %v16057_v7 = vpop.eup %16056 }
0x11aa   :  { %12347 = vadd.xlane.f32.xlu0 %v12346_v3  ;;  %v16059_v8 = vpop.eup %16058  ;;  %v12358_v26 = vadd.f32 %v16057_v7, %v16055_v4 }
0x11ab   :  { %v16061_v39 = vpop.eup %16060 }
0x11ac   :  { %12350 = vadd.xlane.f32.xlu1 %v12349_v24  ;;  %v16063_v61 = vpop.eup %16062  ;;  %v12361_v11 = vadd.f32 %v16061_v39, %v16059_v8 }
0x11ad   :  { %v16065_v48 = vpop.eup %16064 }
0x11ae   :  { %12353 = vadd.xlane.f32.xlu0 %v12352_v27  ;;  %v16067_v38 = vpop.eup %16066  ;;  %v12364_v31 = vadd.f32 %v16065_v48, %v16063_v61 }
0x11af   :  { %v16069_v13 = vpop.eup %16068 }
0x11b0   :  { %12356 = vadd.xlane.f32.xlu1 %v12355_v46  ;;  %v16071_v18 = vpop.eup %16070  ;;  %v12367_v36 = vadd.f32 %v16069_v13, %v16067_v38 }
0x11b1   :  { %v16073_v21 = vpop.eup %16072 }
0x11b2   :  { %12359 = vadd.xlane.f32.xlu0 %v12358_v26  ;;  %v12370_v22 = vadd.f32 %v16073_v21, %v16071_v18 }
0x11b4   :  { %12362 = vadd.xlane.f32.xlu1 %v12361_v11 }
0x11b6   :  { %12365 = vadd.xlane.f32.xlu0 %v12364_v31 }
0x11b8   :  { %12368 = vadd.xlane.f32.xlu1 %v12367_v36 }
0x11ba   :  { %12371 = vadd.xlane.f32.xlu0 %v12370_v22 }
0x1219   :  { %v12159_v52 = vpop.xlane.xlu1 %12158 }
0x121a   :  { %v19911_v3 = vsub.f32 %v19779_v33, %v12159_v52  ;;  %v19914_v44 = vsub.f32 %v19786_v16, %v12159_v52 }
0x121b   :  { %v12162_v51 = vpop.xlane.xlu0 %12161 }
0x121c   :  { %v12299_v24 = vmul.f32 1.442695, %v19911_v3  ;;  %v12301_v15 = vmul.f32 1.442695, %v19914_v44  ;;  %v19919_v4 = vsub.f32 %v19793_v63, %v12162_v51  ;;  %v19922_v27 = vsub.f32 %v19800_v43, %v12162_v51 }
0x121d   :  { %v12309_v7 = vpop.xlane.xlu1 %12308 }
0x121e   :  { %16074 = vpow2.f32 %v12299_v24  ;;  %v12303_v8 = vmul.f32 1.442695, %v19919_v4  ;;  %v12305_v33 = vmul.f32 1.442695, %v19922_v27 }
0x121f   :  { %16076 = vpow2.f32 %v12301_v15  ;;  %v12312_v16 = vpop.xlane.xlu0 %12311 }
0x1220   :  { %16078 = vpow2.f32 %v12303_v8 }
0x1221   :  { %16080 = vpow2.f32 %v12305_v33  ;;  %v12315_v46 = vpop.xlane.xlu1 %12314 }
0x1222   :  { %16082 = vlog2.f32 %v12309_v7 }
0x1223   :  { %16084 = vlog2.f32 %v12312_v16  ;;  %v12318_v39 = vpop.xlane.xlu0 %12317 }
0x1224   :  { %16086 = vlog2.f32 %v12315_v46 }
0x1225   :  { %16088 = vlog2.f32 %v12318_v39  ;;  %v12321_v63 = vpop.xlane.xlu1 %12320 }
0x1226   :  { %16090 = vlog2.f32 %v12321_v63 }
0x1227   :  { %v12324_v43 = vpop.xlane.xlu0 %12323 }
0x1228   :  { %v16075_v61 = vpop.eup %16074  ;;  %16092 = vlog2.f32 %v12324_v43 }
0x1229   :  { %v16077_v26 = vpop.eup %16076  ;;  %v12327_v48 = vpop.xlane.xlu1 %12326 }
0x122a   :  { %v16079_v38 = vpop.eup %16078  ;;  %16094 = vlog2.f32 %v12327_v48  ;;  %v12373_v11 = vadd.f32 %v16077_v26, %v16075_v61 }
0x122b   :  { %v16081_v13 = vpop.eup %16080  ;;  %v12330_v18 = vpop.xlane.xlu0 %12329 }
0x122c   :  { %v16083_v31 = vpop.eup %16082  ;;  %16096 = vlog2.f32 %v12330_v18  ;;  %12374 = vadd.xlane.f32.xlu1 %v12373_v11  ;;  %v12376_v21 = vadd.f32 %v16081_v13, %v16079_v38 }
0x122d   :  { %v16085_v36 = vpop.eup %16084  ;;  %v12380_v22 = vmul.f32 0.6931472, %v16083_v31  ;;  %v12333_v52 = vpop.xlane.xlu1 %12332 }
0x122e   :  { %v16087_v51 = vpop.eup %16086  ;;  %v12382_v24 = vmul.f32 0.6931472, %v16085_v36  ;;  %12377 = vadd.xlane.f32.xlu0 %v12376_v21  ;;  %16098 = vlog2.f32 %v12333_v52  ;;  %v20807_v36 = vld [vmem:[#allocation82_spill] sm:$0xff] }
0x122f   :  { %v16089_v15 = vpop.eup %16088  ;;  %v12427_v7 = vsub.f32 %v19719_v34, %v12380_v22  ;;  %v12428_v8 = vsub.f32 %v19722_v56, %v12380_v22  ;;  %v12384_v33 = vmul.f32 0.6931472, %v16087_v51  ;;  %v12336_v16 = vpop.xlane.xlu0 %12335 }
0x1230   :  { %v16091_v46 = vpop.eup %16090  ;;  %v12429_v39 = vsub.f32 %v19725_v54, %v12382_v24  ;;  %v12430_v63 = vsub.f32 %v19728_v5, %v12382_v24  ;;  %v12386_v43 = vmul.f32 0.6931472, %v16089_v15  ;;  %16100 = vlog2.f32 %v12336_v16  ;;  %v20808_v15 = vld [vmem:[#allocation83_spill] sm:$0xff] }
0x1231   :  { %12475 = vst [vmem:[#allocation12] sm:$0xff] %v12427_v7  ;;  %12476 = vst [vmem:[#allocation12 + $0x8] sm:$0xff] %v12428_v8  ;;  %v12431_v61 = vsub.f32 %v19732_v41, %v12384_v33  ;;  %v12432_v26 = vsub.f32 %v19736_v28, %v12384_v33  ;;  %v12388_v48 = vmul.f32 0.6931472, %v16091_v46  ;;  %v12339_v38 = vpop.xlane.xlu1 %12338  ;;  %v20809_v7 = vld [vmem:[#allocation85_spill] sm:$0xff]  ;;  %v20810_v46 = vld [vmem:[#allocation84_spill] sm:$0xff] }
0x1232   :  { %v16093_v34 = vpop.eup %16092  ;;  %12477 = vst [vmem:[#allocation12 + $0x10] sm:$0xff] %v12429_v39  ;;  %12478 = vst [vmem:[#allocation12 + $0x18] sm:$0xff] %v12430_v63  ;;  %v12433_v56 = vsub.f32 %v19740_v1, %v12386_v43  ;;  %v12434_v11 = vsub.f32 %v19744_v10, %v12386_v43  ;;  %16102 = vlog2.f32 %v12339_v38  ;;  %v20811_v63 = vld [vmem:[#allocation86_spill] sm:$0xff]  ;;  %v20812_v38 = vld [vmem:[#allocation87_spill] sm:$0xff] }
0x1233   :  { %12479 = vst [vmem:[#allocation12 + $0x20] sm:$0xff] %v12431_v61  ;;  %12480 = vst [vmem:[#allocation12 + $0x28] sm:$0xff] %v12432_v26  ;;  %v12435_v54 = vsub.f32 %v19748_v50, %v12388_v48  ;;  %v12436_v5 = vsub.f32 %v19752_v6, %v12388_v48  ;;  %v12390_v13 = vmul.f32 0.6931472, %v16093_v34  ;;  %v12342_v41 = vpop.xlane.xlu0 %12341  ;;  %v20806_v50 = vld [vmem:[#allocation81_spill] sm:$0xff] }
0x1234   :  { %v16095_v18 = vpop.eup %16094  ;;  %12481 = vst [vmem:[#allocation12 + $0x30] sm:$0xff] %v12433_v56  ;;  %12482 = vst [vmem:[#allocation12 + $0x38] sm:$0xff] %v12434_v11  ;;  %16104 = vlog2.f32 %v12342_v41 }
0x1235   :  { %12483 = vst [vmem:[#allocation12 + $0x40] sm:$0xff] %v12435_v54  ;;  %12484 = vst [vmem:[#allocation12 + $0x48] sm:$0xff] %v12436_v5  ;;  %v12437_v28 = vsub.f32 %v19756_v23, %v12390_v13  ;;  %v12438_v1 = vsub.f32 %v19761_v9, %v12390_v13  ;;  %v12392_v10 = vmul.f32 0.6931472, %v16095_v18  ;;  %v12345_v31 = vpop.xlane.xlu1 %12344 }
0x1236   :  { %v16097_v21 = vpop.eup %16096  ;;  %16106 = vlog2.f32 %v12345_v31 }
0x1237   :  { %12485 = vst [vmem:[#allocation12 + $0x50] sm:$0xff] %v12437_v28  ;;  %12486 = vst [vmem:[#allocation12 + $0x58] sm:$0xff] %v12438_v1  ;;  %v12439_v6 = vsub.f32 %v20806_v50, %v12392_v10  ;;  %v12440_v22 = vsub.f32 %v20807_v36, %v12392_v10  ;;  %v12394_v52 = vmul.f32 0.6931472, %v16097_v21  ;;  %v12348_v51 = vpop.xlane.xlu0 %12347 }
0x1238   :  { %v16099_v24 = vpop.eup %16098  ;;  %16108 = vlog2.f32 %v12348_v51 }
0x1239   :  { %12487 = vst [vmem:[#allocation12 + $0x60] sm:$0xff] %v12439_v6  ;;  %12488 = vst [vmem:[#allocation12 + $0x68] sm:$0xff] %v12440_v22  ;;  %v12441_v23 = vsub.f32 %v20808_v15, %v12394_v52  ;;  %v12442_v9 = vsub.f32 %v20809_v7, %v12394_v52  ;;  %v12396_v8 = vmul.f32 0.6931472, %v16099_v24  ;;  %v12351_v33 = vpop.xlane.xlu1 %12350 }
0x123a   :  { %v16101_v16 = vpop.eup %16100  ;;  %16110 = vlog2.f32 %v12351_v33 }
0x123b   :  { %12489 = vst [vmem:[#allocation12 + $0x70] sm:$0xff] %v12441_v23  ;;  %12490 = vst [vmem:[#allocation12 + $0x78] sm:$0xff] %v12442_v9  ;;  %v12443_v39 = vsub.f32 %v20810_v46, %v12396_v8  ;;  %v12444_v43 = vsub.f32 %v20811_v63, %v12396_v8  ;;  %v12398_v61 = vmul.f32 0.6931472, %v16101_v16  ;;  %v12354_v26 = vpop.xlane.xlu0 %12353 }
0x123c   :  { %v16103_v48 = vpop.eup %16102  ;;  %16112 = vlog2.f32 %v12354_v26 }
0x123d   :  { %12491 = vst [vmem:[#allocation12 + $0x80] sm:$0xff] %v12443_v39  ;;  %12492 = vst [vmem:[#allocation12 + $0x88] sm:$0xff] %v12444_v43  ;;  %v12445_v34 = vsub.f32 %v20812_v38, %v12398_v61  ;;  %v12446_v56 = vsub.f32 %v19806_v14, %v12398_v61  ;;  %v12400_v11 = vmul.f32 0.6931472, %v16103_v48  ;;  %v12357_v54 = vpop.xlane.xlu1 %12356 }
0x123e   :  { %v16105_v5 = vpop.eup %16104  ;;  %16114 = vlog2.f32 %v12357_v54 }
0x123f   :  { %12493 = vst [vmem:[#allocation12 + $0x90] sm:$0xff] %v12445_v34  ;;  %12494 = vst [vmem:[#allocation12 + $0x98] sm:$0xff] %v12446_v56  ;;  %v12447_v13 = vsub.f32 %v19810_v45, %v12400_v11  ;;  %v12448_v41 = vsub.f32 %v19816_v25, %v12400_v11  ;;  %v12402_v18 = vmul.f32 0.6931472, %v16105_v5  ;;  %v12360_v28 = vpop.xlane.xlu0 %12359 }
0x1240   :  { %v16107_v1 = vpop.eup %16106  ;;  %16116 = vlog2.f32 %v12360_v28 }
0x1241   :  { %12495 = vst [vmem:[#allocation12 + $0xa0] sm:$0xff] %v12447_v13  ;;  %12496 = vst [vmem:[#allocation12 + $0xa8] sm:$0xff] %v12448_v41  ;;  %v12449_v10 = vsub.f32 %v19820_v55, %v12402_v18  ;;  %v12450_v14 = vsub.f32 %v19824_v29, %v12402_v18  ;;  %v12404_v31 = vmul.f32 0.6931472, %v16107_v1  ;;  %v12363_v21 = vpop.xlane.xlu1 %12362 }
0x1242   :  { %v16109_v50 = vpop.eup %16108  ;;  %16118 = vlog2.f32 %v12363_v21 }
0x1243   :  { %12497 = vst [vmem:[#allocation12 + $0xb0] sm:$0xff] %v12449_v10  ;;  %12498 = vst [vmem:[#allocation12 + $0xb8] sm:$0xff] %v12450_v14  ;;  %v12451_v45 = vsub.f32 %v19828_v62, %v12404_v31  ;;  %v12452_v25 = vsub.f32 %v19832_v49, %v12404_v31  ;;  %v12406_v6 = vmul.f32 0.6931472, %v16109_v50  ;;  %v12366_v36 = vpop.xlane.xlu0 %12365 }
0x1244   :  { %v16111_v22 = vpop.eup %16110  ;;  %16120 = vlog2.f32 %v12366_v36 }
0x1245   :  { %12499 = vst [vmem:[#allocation12 + $0xc0] sm:$0xff] %v12451_v45  ;;  %12500 = vst [vmem:[#allocation12 + $0xc8] sm:$0xff] %v12452_v25  ;;  %v12453_v55 = vsub.f32 %v19836_v17, %v12406_v6  ;;  %v12454_v29 = vsub.f32 %v19840_v30, %v12406_v6  ;;  %v12408_v52 = vmul.f32 0.6931472, %v16111_v22  ;;  %v12369_v51 = vpop.xlane.xlu1 %12368 }
0x1246   :  { %v16113_v24 = vpop.eup %16112  ;;  %16122 = vlog2.f32 %v12369_v51 }
0x1247   :  { %12501 = vst [vmem:[#allocation12 + $0xd0] sm:$0xff] %v12453_v55  ;;  %12502 = vst [vmem:[#allocation12 + $0xd8] sm:$0xff] %v12454_v29  ;;  %v12455_v62 = vsub.f32 %v19844_v59, %v12408_v52  ;;  %v12456_v49 = vsub.f32 %v19848_v2, %v12408_v52  ;;  %v12410_v15 = vmul.f32 0.6931472, %v16113_v24  ;;  %v12372_v23 = vpop.xlane.xlu0 %12371 }
0x1248   :  { %v16115_v7 = vpop.eup %16114  ;;  %16124 = vlog2.f32 %v12372_v23 }
0x1249   :  { %12503 = vst [vmem:[#allocation12 + $0xe0] sm:$0xff] %v12455_v62  ;;  %12504 = vst [vmem:[#allocation12 + $0xe8] sm:$0xff] %v12456_v49  ;;  %v12457_v17 = vsub.f32 %v19852_v53, %v12410_v15  ;;  %v12458_v30 = vsub.f32 %v19856_v47, %v12410_v15  ;;  %v12412_v9 = vmul.f32 0.6931472, %v16115_v7 }
0x124a   :  { %v16117_v8 = vpop.eup %16116 }
0x124b   :  { %12505 = vst [vmem:[#allocation12 + $0xf0] sm:$0xff] %v12457_v17  ;;  %12506 = vst [vmem:[#allocation12 + $0xf8] sm:$0xff] %v12458_v30  ;;  %v12459_v33 = vsub.f32 %v19860_v57, %v12412_v9  ;;  %v12460_v59 = vsub.f32 %v19864_v12, %v12412_v9  ;;  %v12414_v16 = vmul.f32 0.6931472, %v16117_v8 }
0x124c   :  { %v16119_v2 = vpop.eup %16118 }
0x124d   :  { %12507 = vst [vmem:[#allocation12 + $0x100] sm:$0xff] %v12459_v33  ;;  %12508 = vst [vmem:[#allocation12 + $0x108] sm:$0xff] %v12460_v59  ;;  %v12461_v46 = vsub.f32 %v19868_v37, %v12414_v16  ;;  %v12462_v39 = vsub.f32 %v19872_v35, %v12414_v16  ;;  %v12416_v63 = vmul.f32 0.6931472, %v16119_v2 }
0x124e   :  { %v16121_v53 = vpop.eup %16120 }
0x124f   :  { %12509 = vst [vmem:[#allocation12 + $0x110] sm:$0xff] %v12461_v46  ;;  %12510 = vst [vmem:[#allocation12 + $0x118] sm:$0xff] %v12462_v39  ;;  %v12463_v47 = vsub.f32 %v19876_v58, %v12416_v63  ;;  %v12464_v57 = vsub.f32 %v19880_v42, %v12416_v63  ;;  %v12418_v43 = vmul.f32 0.6931472, %v16121_v53 }
0x1250   :  { %v16123_v12 = vpop.eup %16122 }
0x1251   :  { %16229 = shalt.err (!%p16226_p8)
}
0x1252   :  { %s16230_s16 = scalar_lea.hbm %s20014_s10, 512 }
0x1253   :  { %p16231_p9 = scmp.ne.s32.totalorder %s20014_s10, %s16230_s16  ;;  %p16234_p10 = scmp.lt.u32.totalorder %s16230_s16, %s20014_s10 }
0x1255   :  { %p16236_p11 = pnand %p16234_p10, %p16231_p9 }
0x1257   :  { %16239 = shalt.err (!%p16236_p11)
}
0x1258   :  { %s16283_s22 = smov 256   ;;  %s16284_s26 = smov 16   ;;  %12511 = vst [vmem:[#allocation12 + $0x120] sm:$0xff] %v12463_v47  ;;  %12512 = vst [vmem:[#allocation12 + $0x128] sm:$0xff] %v12464_v57  ;;  %v12465_v37 = vsub.f32 %v19884_v20, %v12418_v43  ;;  %v12466_v35 = vsub.f32 %v19888_v19, %v12418_v43  ;;  %v12420_v58 = vmul.f32 0.6931472, %v16123_v12  ;;  %v16125_v42 = vpop.eup %16124 }
0x1259   :  { %12546 = dma.vmem_to_hbm [thread:$0]  %s12541_s13, 512, %s20014_s10, [#allocation14], %s16283_s22, %s16283_s22, %s16284_s26   ;;  %v12422_v48 = vmul.f32 0.6931472, %v16125_v42 }
0x125a   :  { %12513 = vst [vmem:[#allocation12 + $0x130] sm:$0xff] %v12465_v37  ;;  %12514 = vst [vmem:[#allocation12 + $0x138] sm:$0xff] %v12466_v35  ;;  %v12467_v61 = vsub.f32 %v19892_v40, %v12420_v58  ;;  %v12468_v26 = vsub.f32 %v19896_v0, %v12420_v58  ;;  %s16285_s10 = smov [#allocation12]  }
0x125b   :  { %v12469_v38 = vsub.f32 %v19900_v32, %v12422_v48  ;;  %v12470_v34 = vsub.f32 %v19904_v60, %v12422_v48  ;;  %s12528_s23 = sshll.u32 %s16285_s10, 4  ;;  %s12529_s23 = int_to_ptr.vmem [resolvable:$true] %s12528_s23 }
0x125c   :  { %12515 = vst [vmem:[#allocation12 + $0x140] sm:$0xff] %v12467_v61  ;;  %12516 = vst [vmem:[#allocation12 + $0x148] sm:$0xff] %v12468_v26  ;;  %s16240_s0 = scalar_lea.vmem %s12529_s23, 6144  ;;  %p16245_p13 = scmp.lt.s32.totalorder %s12529_s23, %s12529_s23 }
0x125d   :  { %12517 = vst [vmem:[#allocation12 + $0x150] sm:$0xff] %v12469_v38  ;;  %12518 = vst [vmem:[#allocation12 + $0x158] sm:$0xff] %v12470_v34  ;;  %p16241_p12 = scmp.ne.s32.totalorder %s12529_s23, %s16240_s0  ;;  %p16246_p0 = scmp.lt.s32.totalorder %s16240_s0, %s16240_s0 }
0x125f   :  { %p16247_p1 = por %p16246_p0, %p16245_p13 }
0x1261   :  { %p16248_p2 = pnand %p16247_p1, %p16241_p12 }
0x12b9   :  { %v12375_v20 = vpop.xlane.xlu1 %12374 }
0x12ba   :  { %16126 = vlog2.f32 %v12375_v20 }
0x12bb   :  { %v12378_v19 = vpop.xlane.xlu0 %12377 }
0x12bc   :  { %16128 = vlog2.f32 %v12378_v19 }
0x12c4   :  { %v16127_v56 = vpop.eup %16126 }
0x12c5   :  { %v12424_v11 = vmul.f32 0.6931472, %v16127_v56 }
0x12c6   :  { %v16129_v54 = vpop.eup %16128 }
0x12c7   :  { %v12471_v40 = vsub.f32 %v19911_v3, %v12424_v11  ;;  %v12472_v0 = vsub.f32 %v19914_v44, %v12424_v11  ;;  %v12426_v5 = vmul.f32 0.6931472, %v16129_v54 }
0x12c9   :  { %12519 = vst [vmem:[#allocation12 + $0x160] sm:$0xff] %v12471_v40  ;;  %12520 = vst [vmem:[#allocation12 + $0x168] sm:$0xff] %v12472_v0  ;;  %v12473_v32 = vsub.f32 %v19919_v4, %v12426_v5  ;;  %v12474_v60 = vsub.f32 %v19922_v27, %v12426_v5 }
0x12cb   :  { %12521 = vst [vmem:[#allocation12 + $0x170] sm:$0xff] %v12473_v32  ;;  %12522 = vst [vmem:[#allocation12 + $0x178] sm:$0xff] %v12474_v60 }
0x12cc   :  { %16251 = shalt.err (!%p16248_p2)
}
0x12cd   :  { %s16252_s29 = scalar_lea.hbm %s20013_s9, 6144 }
0x12ce   :  { %p16253_p3 = scmp.ne.s32.totalorder %s20013_s9, %s16252_s29  ;;  %p16256_p4 = scmp.lt.u32.totalorder %s16252_s29, %s20013_s9 }
0x12d0   :  { %p16258_p5 = pnand %p16256_p4, %p16253_p3 }
0x12d2   :  { %16261 = shalt.err (!%p16258_p5)
}
0x12d3   :  { %12534 = dma.vmem_to_hbm [thread:$0]  %s12529_s23, 6144, %s20013_s9, [#allocation6], %s16283_s22, %s16283_s22, %s16284_s26  }
0x12d4   :  { %16268 = dma.done.wait [#allocation6], 6144  }
0x12d5   :  { %16269 = vsyncadd [#allocation6], 4294961152 }
0x12d6   :  { %16270 = dma.done.wait [#allocation14], 512  }
0x12d7   :  { %16271 = vsyncadd [#allocation14], 4294966784 }
0x12d8   :  { %12553 = vsyncpa [#allocation5], 1 }
0x12d9   :  { %12554 = vsyncpa [#allocation8], 1 }
0x12da   :  { %12555 = vsyncpa [#allocation11], 1 }
0x12db   :  { %12556 = vsyncpa [#allocation6], 1 }
0x12dc   :  { %12557 = vsyncpa [#allocation14], 1 }

</bundles_post_ra>
